<compile_context>
chip_gen: v7x
topology: tpu7x:2x2x1
jax: 0.10.0
libtpu: 0.0.40
codegen_flags: <defaults>
</compile_context>

<pallas_src>
import numpy as np

import jax
import jax.numpy as jnp
from jax.experimental import pallas as pl
from jax.experimental.pallas import tpu as pltpu


IMG_SIZE = 16
LATENT_DIM = 32
CHANNELS = 3
INIT_SIZE = IMG_SIZE // 4   # 4
C128 = 128                  # main channel width (lane-dense)
N_SP = INIT_SIZE * INIT_SIZE  # 16 spatial positions after the Linear


# ------------------------------ fused kernel -------------------------------

def _generator_kernel(z_ref, w1_ref, b1_ref, g1_ref, be1_ref,
                      u1_ref, wc1_ref, bc1_ref, g2_ref, be2_ref,
                      u2_ref, wc2_ref, bc2_ref, g3_ref, be3_ref,
                      wc3_ref, bc3_ref,
                      o_ref,
                      x0_ref, pad1_ref, pad2_ref, pad3_ref):
    B = z_ref.shape[0]
    f32 = jnp.float32
    bf16 = jnp.bfloat16

    def batchnorm(x, g_ref, b_ref, eps, slope=None):
        # Training-mode BatchNorm2d on 2-D (rows, C): batch stats per channel,
        # biased variance (divide by N).  Optional fused LeakyReLU.
        mean = jnp.mean(x, axis=0, keepdims=True)
        var = jnp.mean((x - mean) ** 2, axis=0, keepdims=True)
        y = (x - mean) * jax.lax.rsqrt(var + eps) * g_ref[...] + b_ref[...]
        if slope is not None:
            y = jnp.where(y >= 0, y, slope * y)
        return y

    def conv3x3(x2d, pad_ref, H, W, w_ref, b_ref):
        # x2d: (B*H*W, Cin), rows ordered (b, h, w).  3x3 conv, stride 1,
        # padding 1, expressed as a single long-K (9*Cin) MXU matmul on an
        # im2col block assembled from 9 shifted views of a zero-padded VMEM
        # scratch image.  Interior is stored at column offset 8 so the store
        # is sublane-aligned; tap reads at offsets 7/8/9 are cheap shifts.
        Cin = x2d.shape[-1]
        pad_ref[...] = jnp.zeros(pad_ref.shape, f32)
        pad_ref[:, 1:H + 1, 8:8 + W, :] = x2d.reshape(B, H, W, Cin)
        taps = []
        for ky in range(3):
            for kx in range(3):
                t = pad_ref[:, ky:ky + H, 7 + kx:7 + kx + W, :]
                taps.append(t.reshape(B * H * W, Cin).astype(bf16))
        patches = jnp.concatenate(taps, axis=-1)              # (B*H*W, 9*Cin)
        return (jnp.dot(patches, w_ref[...], preferred_element_type=f32)
                + b_ref[...])

    # ---- l1: Linear(latent, 128*4*4); weight columns pre-permuted so that
    #      lane index = s*128 + c (s = spatial position, c = channel). --------
    lin = (jnp.dot(z_ref[...].astype(bf16), w1_ref[...],
                   preferred_element_type=f32) + b1_ref[...])   # (B, 16*128)
    # Scatter the 16 spatial lane-groups into rows: x0[(s, b), c].
    for s in range(N_SP):
        x0_ref[s * B:(s + 1) * B, :] = lin[:, s * C128:(s + 1) * C128]

    # ---- BatchNorm2d(128, eps=1e-5) ----------------------------------------
    x0 = batchnorm(x0_ref[...], g1_ref, be1_ref, 1e-5)          # (16B, 128)

    # ---- Upsample x2 (4->8) -> Conv(128->128) -> BN(eps=0.8) -> LeakyReLU ---
    x1 = jnp.dot(u1_ref[...], x0, preferred_element_type=f32)   # (64B, 128)
    h1 = conv3x3(x1, pad1_ref, 8, 8, wc1_ref, bc1_ref)
    h1 = batchnorm(h1, g2_ref, be2_ref, 0.8, slope=0.2)

    # ---- Upsample x2 (8->16) -> Conv(128->64, lane-padded) -> BN -> LeakyReLU
    x2 = jnp.dot(u2_ref[...], h1, preferred_element_type=f32)   # (256B, 128)
    h2 = conv3x3(x2, pad2_ref, 16, 16, wc2_ref, bc2_ref)        # cols 64.. = 0
    h2 = batchnorm(h2, g3_ref, be3_ref, 0.8, slope=0.2)         # zeros stay 0

    # ---- Conv(64->3, lane-padded to 128) -> Tanh ----------------------------
    h3 = conv3x3(h2, pad3_ref, 16, 16, wc3_ref, bc3_ref)
    o_ref[...] = jnp.tanh(h3)                                   # (256B, 128)


# --------------------------- parameter packing ------------------------------

def init_params(key):
    """PyTorch-layout parameters (same layout/semantics as the reference)."""
    ks = jax.random.split(key, 8)
    s = 0.05
    return {
        # l1: Linear(latent_dim, 128 * init_size**2); columns = c*16 + (h*4+w)
        "l1_w": jax.random.normal(ks[0], (LATENT_DIM, C128 * N_SP),
                                  jnp.float32) * s,
        "l1_b": jax.random.normal(ks[1], (C128 * N_SP,), jnp.float32) * s,
        # BatchNorm2d(128), eps=1e-5
        "bn1_g": jnp.ones((C128,), jnp.float32),
        "bn1_b": jnp.zeros((C128,), jnp.float32),
        # Conv2d(128,128,3,p=1), HWIO
        "c1_w": jax.random.normal(ks[2], (3, 3, C128, C128), jnp.float32) * s,
        "c1_b": jax.random.normal(ks[3], (C128,), jnp.float32) * s,
        # BatchNorm2d(128, 0.8) -> eps=0.8
        "bn2_g": jnp.ones((C128,), jnp.float32),
        "bn2_b": jnp.zeros((C128,), jnp.float32),
        # Conv2d(128,64,3,p=1)
        "c2_w": jax.random.normal(ks[4], (3, 3, C128, 64), jnp.float32) * s,
        "c2_b": jax.random.normal(ks[5], (64,), jnp.float32) * s,
        # BatchNorm2d(64, 0.8) -> eps=0.8
        "bn3_g": jnp.ones((64,), jnp.float32),
        "bn3_b": jnp.zeros((64,), jnp.float32),
        # Conv2d(64, channels, 3, p=1)
        "c3_w": jax.random.normal(ks[6], (3, 3, 64, CHANNELS), jnp.float32) * s,
        "c3_b": jax.random.normal(ks[7], (CHANNELS,), jnp.float32) * s,
    }


def _nearest_upsample_matrix(B, H, W, src_sb_order=False):
    """0/1 row-gather matrix implementing nearest x2 upsampling.

    Dest rows are ordered (b, i, j) over the (2H, 2W) grid.  Source rows are
    ordered (b, h, w) by default, or (s=h*W+w, b) if src_sb_order=True.
    Built with numpy at trace time -> baked in as a constant.
    """
    Ho, Wo = 2 * H, 2 * W
    m = np.zeros((B * Ho * Wo, B * H * W), np.float32)
    r = np.arange(B * Ho * Wo)
    b = r // (Ho * Wo)
    rem = r % (Ho * Wo)
    i, j = rem // Wo, rem % Wo
    s = (i // 2) * W + (j // 2)
    src = s * B + b if src_sb_order else b * H * W + s
    m[r, src] = 1.0
    return m


def _pack_params(p):
    """Repack PyTorch-layout params into the fused kernel's layouts."""
    bf16 = jnp.bfloat16
    # Linear: permute output columns from (c*16 + s) to (s*128 + c) so the
    # linear output splits directly into NHWC lane groups (no transposes).
    w1 = p["l1_w"].reshape(LATENT_DIM, C128, N_SP).transpose(0, 2, 1)
    w1 = w1.reshape(LATENT_DIM, C128 * N_SP).astype(bf16)
    b1 = p["l1_b"].reshape(C128, N_SP).T.reshape(1, C128 * N_SP)
    # Conv weights in im2col layout (9*Cin, Cout), lane-padded to 128 outputs.
    wc1 = p["c1_w"].reshape(9 * C128, C128).astype(bf16)
    wc2 = jnp.pad(p["c2_w"].reshape(9 * C128, 64),
                  ((0, 0), (0, C128 - 64))).astype(bf16)
    w3 = jnp.pad(p["c3_w"],
                 ((0, 0), (0, 0), (0, C128 - 64), (0, C128 - CHANNELS)))
    wc3 = w3.reshape(9 * C128, C128).astype(bf16)
    return {
        "w1": w1, "b1": b1,
        "g1": p["bn1_g"].reshape(1, C128), "be1": p["bn1_b"].reshape(1, C128),
        "wc1": wc1, "bc1": p["c1_b"].reshape(1, C128),
        "g2": p["bn2_g"].reshape(1, C128), "be2": p["bn2_b"].reshape(1, C128),
        "wc2": wc2, "bc2": jnp.pad(p["c2_b"], (0, C128 - 64)).reshape(1, C128),
        "g3": jnp.pad(p["bn3_g"], (0, C128 - 64),
                      constant_values=1.0).reshape(1, C128),
        "be3": jnp.pad(p["bn3_b"], (0, C128 - 64)).reshape(1, C128),
        "wc3": wc3,
        "bc3": jnp.pad(p["c3_b"], (0, C128 - CHANNELS)).reshape(1, C128),
    }


# ------------------------------- Generator ----------------------------------

def generator_forward(z, params):
    B = z.shape[0]
    pk = _pack_params(params)
    u1 = jnp.asarray(
        _nearest_upsample_matrix(B, INIT_SIZE, INIT_SIZE, src_sb_order=True))
    u2 = jnp.asarray(_nearest_upsample_matrix(B, 2 * INIT_SIZE, 2 * INIT_SIZE))
    n_out = B * IMG_SIZE * IMG_SIZE

    args = (z, pk["w1"], pk["b1"], pk["g1"], pk["be1"],
            u1, pk["wc1"], pk["bc1"], pk["g2"], pk["be2"],
            u2, pk["wc2"], pk["bc2"], pk["g3"], pk["be3"],
            pk["wc3"], pk["bc3"])

    out = pl.pallas_call(
        _generator_kernel,
        out_shape=jax.ShapeDtypeStruct((n_out, C128), jnp.float32),
        in_specs=[pl.BlockSpec(a.shape) for a in args],
        out_specs=pl.BlockSpec((n_out, C128)),
        scratch_shapes=[
            pltpu.VMEM((N_SP * B, C128), jnp.float32),                  # x0
            pltpu.VMEM((B, 2 * INIT_SIZE + 2, 2 * INIT_SIZE + 9, C128),
                       jnp.float32),                                    # pad 8x8
            pltpu.VMEM((B, IMG_SIZE + 2, IMG_SIZE + 9, C128),
                       jnp.float32),                                    # pad 16x16
            pltpu.VMEM((B, IMG_SIZE + 2, IMG_SIZE + 9, C128),
                       jnp.float32),                                    # pad 16x16
        ],
        compiler_params=pltpu.CompilerParams(
            vmem_limit_bytes=32 * 1024 * 1024),
    )(*args)

    # Lane-dense (B*H*W, 128) output -> slice real channels -> NCHW.
    img = out[:, :CHANNELS].reshape(B, IMG_SIZE, IMG_SIZE, CHANNELS)
    return jnp.transpose(img, (0, 3, 1, 2))


if __name__ == "__main__":
    key = jax.random.PRNGKey(0)
    pkey, zkey = jax.random.split(key)
    params = init_params(pkey)

    B = 2
    z = jax.random.normal(zkey, (B, LATENT_DIM), jnp.float32)

    img = jax.jit(generator_forward)(z, params)
    img = jax.block_until_ready(img)

    assert img.shape == (B, CHANNELS, IMG_SIZE, IMG_SIZE), img.shape
    assert bool(jnp.all(jnp.isfinite(img)))
    assert bool(jnp.all(jnp.abs(img) <= 1.0))  # tanh output range
    print("KERNEL_OK")
</pallas_src>

<mosaic_0001>
module attributes {stable_mosaic.version = 11 : i64} {
  func.func @_generator_kernel(%arg0: memref<2x32xf32, #tpu.memory_space<vmem>>, %arg1: memref<32x2048xbf16, #tpu.memory_space<vmem>>, %arg2: memref<1x2048xf32, #tpu.memory_space<vmem>>, %arg3: memref<1x128xf32, #tpu.memory_space<vmem>>, %arg4: memref<1x128xf32, #tpu.memory_space<vmem>>, %arg5: memref<128x32xf32, #tpu.memory_space<vmem>>, %arg6: memref<1152x128xbf16, #tpu.memory_space<vmem>>, %arg7: memref<1x128xf32, #tpu.memory_space<vmem>>, %arg8: memref<1x128xf32, #tpu.memory_space<vmem>>, %arg9: memref<1x128xf32, #tpu.memory_space<vmem>>, %arg10: memref<512x128xf32, #tpu.memory_space<vmem>>, %arg11: memref<1152x128xbf16, #tpu.memory_space<vmem>>, %arg12: memref<1x128xf32, #tpu.memory_space<vmem>>, %arg13: memref<1x128xf32, #tpu.memory_space<vmem>>, %arg14: memref<1x128xf32, #tpu.memory_space<vmem>>, %arg15: memref<1152x128xbf16, #tpu.memory_space<vmem>>, %arg16: memref<1x128xf32, #tpu.memory_space<vmem>>, %arg17: memref<512x128xf32, #tpu.memory_space<vmem>>, %arg18: memref<32x128xf32, #tpu.memory_space<vmem>>, %arg19: memref<2x10x17x128xf32, #tpu.memory_space<vmem>>, %arg20: memref<2x18x25x128xf32, #tpu.memory_space<vmem>>, %arg21: memref<2x18x25x128xf32, #tpu.memory_space<vmem>>) attributes {dimension_semantics = [], scalar_prefetch = 0 : i64, scratch_operands = 4 : i64, tpu.core_type = #tpu.core_type<tc>} {
    %c0 = arith.constant 0 : index
    %c0_0 = arith.constant 0 : index
    %0 = vector.load %arg0[%c0, %c0_0] : memref<2x32xf32, #tpu.memory_space<vmem>>, vector<2x32xf32>
    %1 = arith.truncf %0 : vector<2x32xf32> to vector<2x32xbf16>
    %c0_1 = arith.constant 0 : index
    %c0_2 = arith.constant 0 : index
    %2 = vector.load %arg1[%c0_1, %c0_2] : memref<32x2048xbf16, #tpu.memory_space<vmem>>, vector<32x2048xbf16>
    %cst = arith.constant dense<0.000000e+00> : vector<2x2048xf32>
    %3 = tpu.matmul %1, %2, %cst {dimension_numbers = #tpu.dot_dimension_numbers<[1], [0], [0], [1], [0, 0, 1, 1], [], []>} : vector<2x32xbf16>, vector<32x2048xbf16>, vector<2x2048xf32> -> vector<2x2048xf32>
    %c0_3 = arith.constant 0 : index
    %c0_4 = arith.constant 0 : index
    %4 = vector.load %arg2[%c0_3, %c0_4] : memref<1x2048xf32, #tpu.memory_space<vmem>>, vector<1x2048xf32>
    %5 = vector.broadcast %4 : vector<1x2048xf32> to vector<2x2048xf32>
    %6 = arith.addf %3, %5 : vector<2x2048xf32>
    %7 = vector.extract_strided_slice %6 {offsets = [0, 0], sizes = [2, 128], strides = [1, 1]} : vector<2x2048xf32> to vector<2x128xf32>
    %c0_5 = arith.constant 0 : index
    %c0_6 = arith.constant 0 : index
    %8 = vector.load %arg18[%c0_5, %c0_6] : memref<32x128xf32, #tpu.memory_space<vmem>>, vector<2x128xf32>
    tpu.vector_store %arg18[%c0_5, %c0_6], %7 {strides = array<i32>} : memref<32x128xf32, #tpu.memory_space<vmem>>, vector<2x128xf32>,
    %9 = vector.extract_strided_slice %6 {offsets = [0, 128], sizes = [2, 128], strides = [1, 1]} : vector<2x2048xf32> to vector<2x128xf32>
    %c2 = arith.constant 2 : index
    %c0_7 = arith.constant 0 : index
    %10 = vector.load %arg18[%c2, %c0_7] : memref<32x128xf32, #tpu.memory_space<vmem>>, vector<2x128xf32>
    tpu.vector_store %arg18[%c2, %c0_7], %9 {strides = array<i32>} : memref<32x128xf32, #tpu.memory_space<vmem>>, vector<2x128xf32>,
    %11 = vector.extract_strided_slice %6 {offsets = [0, 256], sizes = [2, 128], strides = [1, 1]} : vector<2x2048xf32> to vector<2x128xf32>
    %c4 = arith.constant 4 : index
    %c0_8 = arith.constant 0 : index
    %12 = vector.load %arg18[%c4, %c0_8] : memref<32x128xf32, #tpu.memory_space<vmem>>, vector<2x128xf32>
    tpu.vector_store %arg18[%c4, %c0_8], %11 {strides = array<i32>} : memref<32x128xf32, #tpu.memory_space<vmem>>, vector<2x128xf32>,
    %13 = vector.extract_strided_slice %6 {offsets = [0, 384], sizes = [2, 128], strides = [1, 1]} : vector<2x2048xf32> to vector<2x128xf32>
    %c6 = arith.constant 6 : index
    %c0_9 = arith.constant 0 : index
    %14 = vector.load %arg18[%c6, %c0_9] : memref<32x128xf32, #tpu.memory_space<vmem>>, vector<2x128xf32>
    tpu.vector_store %arg18[%c6, %c0_9], %13 {strides = array<i32>} : memref<32x128xf32, #tpu.memory_space<vmem>>, vector<2x128xf32>,
    %15 = vector.extract_strided_slice %6 {offsets = [0, 512], sizes = [2, 128], strides = [1, 1]} : vector<2x2048xf32> to vector<2x128xf32>
    %c8 = arith.constant 8 : index
    %c0_10 = arith.constant 0 : index
    %16 = vector.load %arg18[%c8, %c0_10] : memref<32x128xf32, #tpu.memory_space<vmem>>, vector<2x128xf32>
    tpu.vector_store %arg18[%c8, %c0_10], %15 {strides = array<i32>} : memref<32x128xf32, #tpu.memory_space<vmem>>, vector<2x128xf32>,
    %17 = vector.extract_strided_slice %6 {offsets = [0, 640], sizes = [2, 128], strides = [1, 1]} : vector<2x2048xf32> to vector<2x128xf32>
    %c10 = arith.constant 10 : index
    %c0_11 = arith.constant 0 : index
    %18 = vector.load %arg18[%c10, %c0_11] : memref<32x128xf32, #tpu.memory_space<vmem>>, vector<2x128xf32>
    tpu.vector_store %arg18[%c10, %c0_11], %17 {strides = array<i32>} : memref<32x128xf32, #tpu.memory_space<vmem>>, vector<2x128xf32>,
    %19 = vector.extract_strided_slice %6 {offsets = [0, 768], sizes = [2, 128], strides = [1, 1]} : vector<2x2048xf32> to vector<2x128xf32>
    %c12 = arith.constant 12 : index
    %c0_12 = arith.constant 0 : index
    %20 = vector.load %arg18[%c12, %c0_12] : memref<32x128xf32, #tpu.memory_space<vmem>>, vector<2x128xf32>
    tpu.vector_store %arg18[%c12, %c0_12], %19 {strides = array<i32>} : memref<32x128xf32, #tpu.memory_space<vmem>>, vector<2x128xf32>,
    %21 = vector.extract_strided_slice %6 {offsets = [0, 896], sizes = [2, 128], strides = [1, 1]} : vector<2x2048xf32> to vector<2x128xf32>
    %c14 = arith.constant 14 : index
    %c0_13 = arith.constant 0 : index
    %22 = vector.load %arg18[%c14, %c0_13] : memref<32x128xf32, #tpu.memory_space<vmem>>, vector<2x128xf32>
    tpu.vector_store %arg18[%c14, %c0_13], %21 {strides = array<i32>} : memref<32x128xf32, #tpu.memory_space<vmem>>, vector<2x128xf32>,
    %23 = vector.extract_strided_slice %6 {offsets = [0, 1024], sizes = [2, 128], strides = [1, 1]} : vector<2x2048xf32> to vector<2x128xf32>
    %c16 = arith.constant 16 : index
    %c0_14 = arith.constant 0 : index
    %24 = vector.load %arg18[%c16, %c0_14] : memref<32x128xf32, #tpu.memory_space<vmem>>, vector<2x128xf32>
    tpu.vector_store %arg18[%c16, %c0_14], %23 {strides = array<i32>} : memref<32x128xf32, #tpu.memory_space<vmem>>, vector<2x128xf32>,
    %25 = vector.extract_strided_slice %6 {offsets = [0, 1152], sizes = [2, 128], strides = [1, 1]} : vector<2x2048xf32> to vector<2x128xf32>
    %c18 = arith.constant 18 : index
    %c0_15 = arith.constant 0 : index
    %26 = vector.load %arg18[%c18, %c0_15] : memref<32x128xf32, #tpu.memory_space<vmem>>, vector<2x128xf32>
    tpu.vector_store %arg18[%c18, %c0_15], %25 {strides = array<i32>} : memref<32x128xf32, #tpu.memory_space<vmem>>, vector<2x128xf32>,
    %27 = vector.extract_strided_slice %6 {offsets = [0, 1280], sizes = [2, 128], strides = [1, 1]} : vector<2x2048xf32> to vector<2x128xf32>
    %c20 = arith.constant 20 : index
    %c0_16 = arith.constant 0 : index
    %28 = vector.load %arg18[%c20, %c0_16] : memref<32x128xf32, #tpu.memory_space<vmem>>, vector<2x128xf32>
    tpu.vector_store %arg18[%c20, %c0_16], %27 {strides = array<i32>} : memref<32x128xf32, #tpu.memory_space<vmem>>, vector<2x128xf32>,
    %29 = vector.extract_strided_slice %6 {offsets = [0, 1408], sizes = [2, 128], strides = [1, 1]} : vector<2x2048xf32> to vector<2x128xf32>
    %c22 = arith.constant 22 : index
    %c0_17 = arith.constant 0 : index
    %30 = vector.load %arg18[%c22, %c0_17] : memref<32x128xf32, #tpu.memory_space<vmem>>, vector<2x128xf32>
    tpu.vector_store %arg18[%c22, %c0_17], %29 {strides = array<i32>} : memref<32x128xf32, #tpu.memory_space<vmem>>, vector<2x128xf32>,
    %31 = vector.extract_strided_slice %6 {offsets = [0, 1536], sizes = [2, 128], strides = [1, 1]} : vector<2x2048xf32> to vector<2x128xf32>
    %c24 = arith.constant 24 : index
    %c0_18 = arith.constant 0 : index
    %32 = vector.load %arg18[%c24, %c0_18] : memref<32x128xf32, #tpu.memory_space<vmem>>, vector<2x128xf32>
    tpu.vector_store %arg18[%c24, %c0_18], %31 {strides = array<i32>} : memref<32x128xf32, #tpu.memory_space<vmem>>, vector<2x128xf32>,
    %33 = vector.extract_strided_slice %6 {offsets = [0, 1664], sizes = [2, 128], strides = [1, 1]} : vector<2x2048xf32> to vector<2x128xf32>
    %c26 = arith.constant 26 : index
    %c0_19 = arith.constant 0 : index
    %34 = vector.load %arg18[%c26, %c0_19] : memref<32x128xf32, #tpu.memory_space<vmem>>, vector<2x128xf32>
    tpu.vector_store %arg18[%c26, %c0_19], %33 {strides = array<i32>} : memref<32x128xf32, #tpu.memory_space<vmem>>, vector<2x128xf32>,
    %35 = vector.extract_strided_slice %6 {offsets = [0, 1792], sizes = [2, 128], strides = [1, 1]} : vector<2x2048xf32> to vector<2x128xf32>
    %c28 = arith.constant 28 : index
    %c0_20 = arith.constant 0 : index
    %36 = vector.load %arg18[%c28, %c0_20] : memref<32x128xf32, #tpu.memory_space<vmem>>, vector<2x128xf32>
    tpu.vector_store %arg18[%c28, %c0_20], %35 {strides = array<i32>} : memref<32x128xf32, #tpu.memory_space<vmem>>, vector<2x128xf32>,
    %37 = vector.extract_strided_slice %6 {offsets = [0, 1920], sizes = [2, 128], strides = [1, 1]} : vector<2x2048xf32> to vector<2x128xf32>
    %c30 = arith.constant 30 : index
    %c0_21 = arith.constant 0 : index
    %38 = vector.load %arg18[%c30, %c0_21] : memref<32x128xf32, #tpu.memory_space<vmem>>, vector<2x128xf32>
    tpu.vector_store %arg18[%c30, %c0_21], %37 {strides = array<i32>} : memref<32x128xf32, #tpu.memory_space<vmem>>, vector<2x128xf32>,
    %c0_22 = arith.constant 0 : index
    %c0_23 = arith.constant 0 : index
    %39 = vector.load %arg18[%c0_22, %c0_23] : memref<32x128xf32, #tpu.memory_space<vmem>>, vector<32x128xf32>
    %cst_24 = arith.constant dense<0.000000e+00> : vector<128xf32>
    %40 = vector.multi_reduction <add>, %39, %cst_24 [0] : vector<32x128xf32> to vector<128xf32>
    %41 = vector.shape_cast %40 : vector<128xf32> to vector<1x128xf32>
    %cst_25 = arith.constant 3.200000e+01 : f32
    %42 = vector.broadcast %cst_25 : f32 to vector<1x128xf32>
    %43 = arith.divf %41, %42 : vector<1x128xf32>
    %44 = vector.broadcast %43 : vector<1x128xf32> to vector<32x128xf32>
    %45 = arith.subf %39, %44 : vector<32x128xf32>
    %46 = arith.mulf %45, %45 : vector<32x128xf32>
    %cst_26 = arith.constant dense<0.000000e+00> : vector<128xf32>
    %47 = vector.multi_reduction <add>, %46, %cst_26 [0] : vector<32x128xf32> to vector<128xf32>
    %48 = vector.shape_cast %47 : vector<128xf32> to vector<1x128xf32>
    %cst_27 = arith.constant 3.200000e+01 : f32
    %49 = vector.broadcast %cst_27 : f32 to vector<1x128xf32>
    %50 = arith.divf %48, %49 : vector<1x128xf32>
    %51 = vector.broadcast %43 : vector<1x128xf32> to vector<32x128xf32>
    %52 = arith.subf %39, %51 : vector<32x128xf32>
    %cst_28 = arith.constant 9.99999974E-6 : f32
    %53 = vector.broadcast %cst_28 : f32 to vector<1x128xf32>
    %54 = arith.addf %50, %53 : vector<1x128xf32>
    %55 = math.rsqrt %54 : vector<1x128xf32>
    %56 = vector.broadcast %55 : vector<1x128xf32> to vector<32x128xf32>
    %57 = arith.mulf %52, %56 : vector<32x128xf32>
    %c0_29 = arith.constant 0 : index
    %c0_30 = arith.constant 0 : index
    %58 = vector.load %arg3[%c0_29, %c0_30] : memref<1x128xf32, #tpu.memory_space<vmem>>, vector<1x128xf32>
    %59 = vector.broadcast %58 : vector<1x128xf32> to vector<32x128xf32>
    %60 = arith.mulf %57, %59 : vector<32x128xf32>
    %c0_31 = arith.constant 0 : index
    %c0_32 = arith.constant 0 : index
    %61 = vector.load %arg4[%c0_31, %c0_32] : memref<1x128xf32, #tpu.memory_space<vmem>>, vector<1x128xf32>
    %62 = vector.broadcast %61 : vector<1x128xf32> to vector<32x128xf32>
    %63 = arith.addf %60, %62 : vector<32x128xf32>
    %c0_33 = arith.constant 0 : index
    %c0_34 = arith.constant 0 : index
    %64 = vector.load %arg5[%c0_33, %c0_34] : memref<128x32xf32, #tpu.memory_space<vmem>>, vector<128x32xf32>
    %cst_35 = arith.constant dense<0.000000e+00> : vector<128x128xf32>
    %65 = tpu.matmul %64, %63, %cst_35 {dimension_numbers = #tpu.dot_dimension_numbers<[1], [0], [0], [1], [0, 0, 1, 1], [], []>} : vector<128x32xf32>, vector<32x128xf32>, vector<128x128xf32> -> vector<128x128xf32>
    %cst_36 = arith.constant 0.000000e+00 : f32
    %66 = vector.broadcast %cst_36 : f32 to vector<2x10x17x128xf32>
    %c0_37 = arith.constant 0 : index
    %c0_38 = arith.constant 0 : index
    %c0_39 = arith.constant 0 : index
    %c0_40 = arith.constant 0 : index
    %67 = vector.load %arg19[%c0_37, %c0_38, %c0_39, %c0_40] : memref<2x10x17x128xf32, #tpu.memory_space<vmem>>, vector<2x10x17x128xf32>
    tpu.vector_store %arg19[%c0_37, %c0_38, %c0_39, %c0_40], %66 {strides = array<i32>} : memref<2x10x17x128xf32, #tpu.memory_space<vmem>>, vector<2x10x17x128xf32>,
    %68 = vector.shape_cast %65 : vector<128x128xf32> to vector<2x8x8x128xf32>
    %c0_41 = arith.constant 0 : index
    %c1 = arith.constant 1 : index
    %c8_42 = arith.constant 8 : index
    %c0_43 = arith.constant 0 : index
    %69 = vector.load %arg19[%c0_41, %c1, %c8_42, %c0_43] : memref<2x10x17x128xf32, #tpu.memory_space<vmem>>, vector<2x8x8x128xf32>
    tpu.vector_store %arg19[%c0_41, %c1, %c8_42, %c0_43], %68 {strides = array<i32>} : memref<2x10x17x128xf32, #tpu.memory_space<vmem>>, vector<2x8x8x128xf32>,
    %c0_44 = arith.constant 0 : index
    %c0_45 = arith.constant 0 : index
    %c7 = arith.constant 7 : index
    %c0_46 = arith.constant 0 : index
    %70 = vector.load %arg19[%c0_44, %c0_45, %c7, %c0_46] : memref<2x10x17x128xf32, #tpu.memory_space<vmem>>, vector<2x8x8x128xf32>
    %71 = vector.shape_cast %70 : vector<2x8x8x128xf32> to vector<128x128xf32>
    %72 = arith.truncf %71 : vector<128x128xf32> to vector<128x128xbf16>
    %c0_47 = arith.constant 0 : index
    %c0_48 = arith.constant 0 : index
    %c8_49 = arith.constant 8 : index
    %c0_50 = arith.constant 0 : index
    %73 = vector.load %arg19[%c0_47, %c0_48, %c8_49, %c0_50] : memref<2x10x17x128xf32, #tpu.memory_space<vmem>>, vector<2x8x8x128xf32>
    %74 = vector.shape_cast %73 : vector<2x8x8x128xf32> to vector<128x128xf32>
    %75 = arith.truncf %74 : vector<128x128xf32> to vector<128x128xbf16>
    %c0_51 = arith.constant 0 : index
    %c0_52 = arith.constant 0 : index
    %c9 = arith.constant 9 : index
    %c0_53 = arith.constant 0 : index
    %76 = vector.load %arg19[%c0_51, %c0_52, %c9, %c0_53] : memref<2x10x17x128xf32, #tpu.memory_space<vmem>>, vector<2x8x8x128xf32>
    %77 = vector.shape_cast %76 : vector<2x8x8x128xf32> to vector<128x128xf32>
    %78 = arith.truncf %77 : vector<128x128xf32> to vector<128x128xbf16>
    %c0_54 = arith.constant 0 : index
    %c1_55 = arith.constant 1 : index
    %c7_56 = arith.constant 7 : index
    %c0_57 = arith.constant 0 : index
    %79 = vector.load %arg19[%c0_54, %c1_55, %c7_56, %c0_57] : memref<2x10x17x128xf32, #tpu.memory_space<vmem>>, vector<2x8x8x128xf32>
    %80 = vector.shape_cast %79 : vector<2x8x8x128xf32> to vector<128x128xf32>
    %81 = arith.truncf %80 : vector<128x128xf32> to vector<128x128xbf16>
    %c0_58 = arith.constant 0 : index
    %c1_59 = arith.constant 1 : index
    %c8_60 = arith.constant 8 : index
    %c0_61 = arith.constant 0 : index
    %82 = vector.load %arg19[%c0_58, %c1_59, %c8_60, %c0_61] : memref<2x10x17x128xf32, #tpu.memory_space<vmem>>, vector<2x8x8x128xf32>
    %83 = vector.shape_cast %82 : vector<2x8x8x128xf32> to vector<128x128xf32>
    %84 = arith.truncf %83 : vector<128x128xf32> to vector<128x128xbf16>
    %c0_62 = arith.constant 0 : index
    %c1_63 = arith.constant 1 : index
    %c9_64 = arith.constant 9 : index
    %c0_65 = arith.constant 0 : index
    %85 = vector.load %arg19[%c0_62, %c1_63, %c9_64, %c0_65] : memref<2x10x17x128xf32, #tpu.memory_space<vmem>>, vector<2x8x8x128xf32>
    %86 = vector.shape_cast %85 : vector<2x8x8x128xf32> to vector<128x128xf32>
    %87 = arith.truncf %86 : vector<128x128xf32> to vector<128x128xbf16>
    %c0_66 = arith.constant 0 : index
    %c2_67 = arith.constant 2 : index
    %c7_68 = arith.constant 7 : index
    %c0_69 = arith.constant 0 : index
    %88 = vector.load %arg19[%c0_66, %c2_67, %c7_68, %c0_69] : memref<2x10x17x128xf32, #tpu.memory_space<vmem>>, vector<2x8x8x128xf32>
    %89 = vector.shape_cast %88 : vector<2x8x8x128xf32> to vector<128x128xf32>
    %90 = arith.truncf %89 : vector<128x128xf32> to vector<128x128xbf16>
    %c0_70 = arith.constant 0 : index
    %c2_71 = arith.constant 2 : index
    %c8_72 = arith.constant 8 : index
    %c0_73 = arith.constant 0 : index
    %91 = vector.load %arg19[%c0_70, %c2_71, %c8_72, %c0_73] : memref<2x10x17x128xf32, #tpu.memory_space<vmem>>, vector<2x8x8x128xf32>
    %92 = vector.shape_cast %91 : vector<2x8x8x128xf32> to vector<128x128xf32>
    %93 = arith.truncf %92 : vector<128x128xf32> to vector<128x128xbf16>
    %c0_74 = arith.constant 0 : index
    %c2_75 = arith.constant 2 : index
    %c9_76 = arith.constant 9 : index
    %c0_77 = arith.constant 0 : index
    %94 = vector.load %arg19[%c0_74, %c2_75, %c9_76, %c0_77] : memref<2x10x17x128xf32, #tpu.memory_space<vmem>>, vector<2x8x8x128xf32>
    %95 = vector.shape_cast %94 : vector<2x8x8x128xf32> to vector<128x128xf32>
    %96 = arith.truncf %95 : vector<128x128xf32> to vector<128x128xbf16>
    %97 = tpu.concatenate %72, %75, %78, %81, %84, %87, %90, %93, %96 in 1 : vector<128x128xbf16>, vector<128x128xbf16>, vector<128x128xbf16>, vector<128x128xbf16>, vector<128x128xbf16>, vector<128x128xbf16>, vector<128x128xbf16>, vector<128x128xbf16>, vector<128x128xbf16> -> vector<128x1152xbf16>
    %c0_78 = arith.constant 0 : index
    %c0_79 = arith.constant 0 : index
    %98 = vector.load %arg6[%c0_78, %c0_79] : memref<1152x128xbf16, #tpu.memory_space<vmem>>, vector<1152x128xbf16>
    %cst_80 = arith.constant dense<0.000000e+00> : vector<128x128xf32>
    %99 = tpu.matmul %97, %98, %cst_80 {dimension_numbers = #tpu.dot_dimension_numbers<[1], [0], [0], [1], [0, 0, 1, 1], [], []>} : vector<128x1152xbf16>, vector<1152x128xbf16>, vector<128x128xf32> -> vector<128x128xf32>
    %c0_81 = arith.constant 0 : index
    %c0_82 = arith.constant 0 : index
    %100 = vector.load %arg7[%c0_81, %c0_82] : memref<1x128xf32, #tpu.memory_space<vmem>>, vector<1x128xf32>
    %101 = vector.broadcast %100 : vector<1x128xf32> to vector<128x128xf32>
    %102 = arith.addf %99, %101 : vector<128x128xf32>
    %cst_83 = arith.constant dense<0.000000e+00> : vector<128xf32>
    %103 = vector.multi_reduction <add>, %102, %cst_83 [0] : vector<128x128xf32> to vector<128xf32>
    %104 = vector.shape_cast %103 : vector<128xf32> to vector<1x128xf32>
    %cst_84 = arith.constant 1.280000e+02 : f32
    %105 = vector.broadcast %cst_84 : f32 to vector<1x128xf32>
    %106 = arith.divf %104, %105 : vector<1x128xf32>
    %107 = vector.broadcast %106 : vector<1x128xf32> to vector<128x128xf32>
    %108 = arith.subf %102, %107 : vector<128x128xf32>
    %109 = arith.mulf %108, %108 : vector<128x128xf32>
    %cst_85 = arith.constant dense<0.000000e+00> : vector<128xf32>
    %110 = vector.multi_reduction <add>, %109, %cst_85 [0] : vector<128x128xf32> to vector<128xf32>
    %111 = vector.shape_cast %110 : vector<128xf32> to vector<1x128xf32>
    %cst_86 = arith.constant 1.280000e+02 : f32
    %112 = vector.broadcast %cst_86 : f32 to vector<1x128xf32>
    %113 = arith.divf %111, %112 : vector<1x128xf32>
    %114 = vector.broadcast %106 : vector<1x128xf32> to vector<128x128xf32>
    %115 = arith.subf %102, %114 : vector<128x128xf32>
    %cst_87 = arith.constant 8.000000e-01 : f32
    %116 = vector.broadcast %cst_87 : f32 to vector<1x128xf32>
    %117 = arith.addf %113, %116 : vector<1x128xf32>
    %118 = math.rsqrt %117 : vector<1x128xf32>
    %119 = vector.broadcast %118 : vector<1x128xf32> to vector<128x128xf32>
    %120 = arith.mulf %115, %119 : vector<128x128xf32>
    %c0_88 = arith.constant 0 : index
    %c0_89 = arith.constant 0 : index
    %121 = vector.load %arg8[%c0_88, %c0_89] : memref<1x128xf32, #tpu.memory_space<vmem>>, vector<1x128xf32>
    %122 = vector.broadcast %121 : vector<1x128xf32> to vector<128x128xf32>
    %123 = arith.mulf %120, %122 : vector<128x128xf32>
    %c0_90 = arith.constant 0 : index
    %c0_91 = arith.constant 0 : index
    %124 = vector.load %arg9[%c0_90, %c0_91] : memref<1x128xf32, #tpu.memory_space<vmem>>, vector<1x128xf32>
    %125 = vector.broadcast %124 : vector<1x128xf32> to vector<128x128xf32>
    %126 = arith.addf %123, %125 : vector<128x128xf32>
    %cst_92 = arith.constant 0.000000e+00 : f32
    %127 = vector.broadcast %cst_92 : f32 to vector<128x128xf32>
    %128 = arith.cmpf oge, %126, %127 : vector<128x128xf32>
    %cst_93 = arith.constant 2.000000e-01 : f32
    %129 = vector.broadcast %cst_93 : f32 to vector<128x128xf32>
    %130 = arith.mulf %129, %126 : vector<128x128xf32>
    %131 = arith.select %128, %126, %130 : vector<128x128xi1>, vector<128x128xf32>
    %c0_94 = arith.constant 0 : index
    %c0_95 = arith.constant 0 : index
    %132 = vector.load %arg10[%c0_94, %c0_95] : memref<512x128xf32, #tpu.memory_space<vmem>>, vector<512x128xf32>
    %cst_96 = arith.constant dense<0.000000e+00> : vector<512x128xf32>
    %133 = tpu.matmul %132, %131, %cst_96 {dimension_numbers = #tpu.dot_dimension_numbers<[1], [0], [0], [1], [0, 0, 1, 1], [], []>} : vector<512x128xf32>, vector<128x128xf32>, vector<512x128xf32> -> vector<512x128xf32>
    %cst_97 = arith.constant 0.000000e+00 : f32
    %134 = vector.broadcast %cst_97 : f32 to vector<2x18x25x128xf32>
    %c0_98 = arith.constant 0 : index
    %c0_99 = arith.constant 0 : index
    %c0_100 = arith.constant 0 : index
    %c0_101 = arith.constant 0 : index
    %135 = vector.load %arg20[%c0_98, %c0_99, %c0_100, %c0_101] : memref<2x18x25x128xf32, #tpu.memory_space<vmem>>, vector<2x18x25x128xf32>
    tpu.vector_store %arg20[%c0_98, %c0_99, %c0_100, %c0_101], %134 {strides = array<i32>} : memref<2x18x25x128xf32, #tpu.memory_space<vmem>>, vector<2x18x25x128xf32>,
    %136 = vector.shape_cast %133 : vector<512x128xf32> to vector<2x16x16x128xf32>
    %c0_102 = arith.constant 0 : index
    %c1_103 = arith.constant 1 : index
    %c8_104 = arith.constant 8 : index
    %c0_105 = arith.constant 0 : index
    %137 = vector.load %arg20[%c0_102, %c1_103, %c8_104, %c0_105] : memref<2x18x25x128xf32, #tpu.memory_space<vmem>>, vector<2x16x16x128xf32>
    tpu.vector_store %arg20[%c0_102, %c1_103, %c8_104, %c0_105], %136 {strides = array<i32>} : memref<2x18x25x128xf32, #tpu.memory_space<vmem>>, vector<2x16x16x128xf32>,
    %c0_106 = arith.constant 0 : index
    %c0_107 = arith.constant 0 : index
    %c7_108 = arith.constant 7 : index
    %c0_109 = arith.constant 0 : index
    %138 = vector.load %arg20[%c0_106, %c0_107, %c7_108, %c0_109] : memref<2x18x25x128xf32, #tpu.memory_space<vmem>>, vector<2x16x16x128xf32>
    %139 = vector.shape_cast %138 : vector<2x16x16x128xf32> to vector<512x128xf32>
    %140 = arith.truncf %139 : vector<512x128xf32> to vector<512x128xbf16>
    %c0_110 = arith.constant 0 : index
    %c0_111 = arith.constant 0 : index
    %c8_112 = arith.constant 8 : index
    %c0_113 = arith.constant 0 : index
    %141 = vector.load %arg20[%c0_110, %c0_111, %c8_112, %c0_113] : memref<2x18x25x128xf32, #tpu.memory_space<vmem>>, vector<2x16x16x128xf32>
    %142 = vector.shape_cast %141 : vector<2x16x16x128xf32> to vector<512x128xf32>
    %143 = arith.truncf %142 : vector<512x128xf32> to vector<512x128xbf16>
    %c0_114 = arith.constant 0 : index
    %c0_115 = arith.constant 0 : index
    %c9_116 = arith.constant 9 : index
    %c0_117 = arith.constant 0 : index
    %144 = vector.load %arg20[%c0_114, %c0_115, %c9_116, %c0_117] : memref<2x18x25x128xf32, #tpu.memory_space<vmem>>, vector<2x16x16x128xf32>
    %145 = vector.shape_cast %144 : vector<2x16x16x128xf32> to vector<512x128xf32>
    %146 = arith.truncf %145 : vector<512x128xf32> to vector<512x128xbf16>
    %c0_118 = arith.constant 0 : index
    %c1_119 = arith.constant 1 : index
    %c7_120 = arith.constant 7 : index
    %c0_121 = arith.constant 0 : index
    %147 = vector.load %arg20[%c0_118, %c1_119, %c7_120, %c0_121] : memref<2x18x25x128xf32, #tpu.memory_space<vmem>>, vector<2x16x16x128xf32>
    %148 = vector.shape_cast %147 : vector<2x16x16x128xf32> to vector<512x128xf32>
    %149 = arith.truncf %148 : vector<512x128xf32> to vector<512x128xbf16>
    %c0_122 = arith.constant 0 : index
    %c1_123 = arith.constant 1 : index
    %c8_124 = arith.constant 8 : index
    %c0_125 = arith.constant 0 : index
    %150 = vector.load %arg20[%c0_122, %c1_123, %c8_124, %c0_125] : memref<2x18x25x128xf32, #tpu.memory_space<vmem>>, vector<2x16x16x128xf32>
    %151 = vector.shape_cast %150 : vector<2x16x16x128xf32> to vector<512x128xf32>
    %152 = arith.truncf %151 : vector<512x128xf32> to vector<512x128xbf16>
    %c0_126 = arith.constant 0 : index
    %c1_127 = arith.constant 1 : index
    %c9_128 = arith.constant 9 : index
    %c0_129 = arith.constant 0 : index
    %153 = vector.load %arg20[%c0_126, %c1_127, %c9_128, %c0_129] : memref<2x18x25x128xf32, #tpu.memory_space<vmem>>, vector<2x16x16x128xf32>
    %154 = vector.shape_cast %153 : vector<2x16x16x128xf32> to vector<512x128xf32>
    %155 = arith.truncf %154 : vector<512x128xf32> to vector<512x128xbf16>
    %c0_130 = arith.constant 0 : index
    %c2_131 = arith.constant 2 : index
    %c7_132 = arith.constant 7 : index
    %c0_133 = arith.constant 0 : index
    %156 = vector.load %arg20[%c0_130, %c2_131, %c7_132, %c0_133] : memref<2x18x25x128xf32, #tpu.memory_space<vmem>>, vector<2x16x16x128xf32>
    %157 = vector.shape_cast %156 : vector<2x16x16x128xf32> to vector<512x128xf32>
    %158 = arith.truncf %157 : vector<512x128xf32> to vector<512x128xbf16>
    %c0_134 = arith.constant 0 : index
    %c2_135 = arith.constant 2 : index
    %c8_136 = arith.constant 8 : index
    %c0_137 = arith.constant 0 : index
    %159 = vector.load %arg20[%c0_134, %c2_135, %c8_136, %c0_137] : memref<2x18x25x128xf32, #tpu.memory_space<vmem>>, vector<2x16x16x128xf32>
    %160 = vector.shape_cast %159 : vector<2x16x16x128xf32> to vector<512x128xf32>
    %161 = arith.truncf %160 : vector<512x128xf32> to vector<512x128xbf16>
    %c0_138 = arith.constant 0 : index
    %c2_139 = arith.constant 2 : index
    %c9_140 = arith.constant 9 : index
    %c0_141 = arith.constant 0 : index
    %162 = vector.load %arg20[%c0_138, %c2_139, %c9_140, %c0_141] : memref<2x18x25x128xf32, #tpu.memory_space<vmem>>, vector<2x16x16x128xf32>
    %163 = vector.shape_cast %162 : vector<2x16x16x128xf32> to vector<512x128xf32>
    %164 = arith.truncf %163 : vector<512x128xf32> to vector<512x128xbf16>
    %165 = tpu.concatenate %140, %143, %146, %149, %152, %155, %158, %161, %164 in 1 : vector<512x128xbf16>, vector<512x128xbf16>, vector<512x128xbf16>, vector<512x128xbf16>, vector<512x128xbf16>, vector<512x128xbf16>, vector<512x128xbf16>, vector<512x128xbf16>, vector<512x128xbf16> -> vector<512x1152xbf16>
    %c0_142 = arith.constant 0 : index
    %c0_143 = arith.constant 0 : index
    %166 = vector.load %arg11[%c0_142, %c0_143] : memref<1152x128xbf16, #tpu.memory_space<vmem>>, vector<1152x128xbf16>
    %cst_144 = arith.constant dense<0.000000e+00> : vector<512x128xf32>
    %167 = tpu.matmul %165, %166, %cst_144 {dimension_numbers = #tpu.dot_dimension_numbers<[1], [0], [0], [1], [0, 0, 1, 1], [], []>} : vector<512x1152xbf16>, vector<1152x128xbf16>, vector<512x128xf32> -> vector<512x128xf32>
    %c0_145 = arith.constant 0 : index
    %c0_146 = arith.constant 0 : index
    %168 = vector.load %arg12[%c0_145, %c0_146] : memref<1x128xf32, #tpu.memory_space<vmem>>, vector<1x128xf32>
    %169 = vector.broadcast %168 : vector<1x128xf32> to vector<512x128xf32>
    %170 = arith.addf %167, %169 : vector<512x128xf32>
    %cst_147 = arith.constant dense<0.000000e+00> : vector<128xf32>
    %171 = vector.multi_reduction <add>, %170, %cst_147 [0] : vector<512x128xf32> to vector<128xf32>
    %172 = vector.shape_cast %171 : vector<128xf32> to vector<1x128xf32>
    %cst_148 = arith.constant 5.120000e+02 : f32
    %173 = vector.broadcast %cst_148 : f32 to vector<1x128xf32>
    %174 = arith.divf %172, %173 : vector<1x128xf32>
    %175 = vector.broadcast %174 : vector<1x128xf32> to vector<512x128xf32>
    %176 = arith.subf %170, %175 : vector<512x128xf32>
    %177 = arith.mulf %176, %176 : vector<512x128xf32>
    %cst_149 = arith.constant dense<0.000000e+00> : vector<128xf32>
    %178 = vector.multi_reduction <add>, %177, %cst_149 [0] : vector<512x128xf32> to vector<128xf32>
    %179 = vector.shape_cast %178 : vector<128xf32> to vector<1x128xf32>
    %cst_150 = arith.constant 5.120000e+02 : f32
    %180 = vector.broadcast %cst_150 : f32 to vector<1x128xf32>
    %181 = arith.divf %179, %180 : vector<1x128xf32>
    %182 = vector.broadcast %174 : vector<1x128xf32> to vector<512x128xf32>
    %183 = arith.subf %170, %182 : vector<512x128xf32>
    %cst_151 = arith.constant 8.000000e-01 : f32
    %184 = vector.broadcast %cst_151 : f32 to vector<1x128xf32>
    %185 = arith.addf %181, %184 : vector<1x128xf32>
    %186 = math.rsqrt %185 : vector<1x128xf32>
    %187 = vector.broadcast %186 : vector<1x128xf32> to vector<512x128xf32>
    %188 = arith.mulf %183, %187 : vector<512x128xf32>
    %c0_152 = arith.constant 0 : index
    %c0_153 = arith.constant 0 : index
    %189 = vector.load %arg13[%c0_152, %c0_153] : memref<1x128xf32, #tpu.memory_space<vmem>>, vector<1x128xf32>
    %190 = vector.broadcast %189 : vector<1x128xf32> to vector<512x128xf32>
    %191 = arith.mulf %188, %190 : vector<512x128xf32>
    %c0_154 = arith.constant 0 : index
    %c0_155 = arith.constant 0 : index
    %192 = vector.load %arg14[%c0_154, %c0_155] : memref<1x128xf32, #tpu.memory_space<vmem>>, vector<1x128xf32>
    %193 = vector.broadcast %192 : vector<1x128xf32> to vector<512x128xf32>
    %194 = arith.addf %191, %193 : vector<512x128xf32>
    %cst_156 = arith.constant 0.000000e+00 : f32
    %195 = vector.broadcast %cst_156 : f32 to vector<512x128xf32>
    %196 = arith.cmpf oge, %194, %195 : vector<512x128xf32>
    %cst_157 = arith.constant 2.000000e-01 : f32
    %197 = vector.broadcast %cst_157 : f32 to vector<512x128xf32>
    %198 = arith.mulf %197, %194 : vector<512x128xf32>
    %199 = arith.select %196, %194, %198 : vector<512x128xi1>, vector<512x128xf32>
    %cst_158 = arith.constant 0.000000e+00 : f32
    %200 = vector.broadcast %cst_158 : f32 to vector<2x18x25x128xf32>
    %c0_159 = arith.constant 0 : index
    %c0_160 = arith.constant 0 : index
    %c0_161 = arith.constant 0 : index
    %c0_162 = arith.constant 0 : index
    %201 = vector.load %arg21[%c0_159, %c0_160, %c0_161, %c0_162] : memref<2x18x25x128xf32, #tpu.memory_space<vmem>>, vector<2x18x25x128xf32>
    tpu.vector_store %arg21[%c0_159, %c0_160, %c0_161, %c0_162], %200 {strides = array<i32>} : memref<2x18x25x128xf32, #tpu.memory_space<vmem>>, vector<2x18x25x128xf32>,
    %202 = vector.shape_cast %199 : vector<512x128xf32> to vector<2x16x16x128xf32>
    %c0_163 = arith.constant 0 : index
    %c1_164 = arith.constant 1 : index
    %c8_165 = arith.constant 8 : index
    %c0_166 = arith.constant 0 : index
    %203 = vector.load %arg21[%c0_163, %c1_164, %c8_165, %c0_166] : memref<2x18x25x128xf32, #tpu.memory_space<vmem>>, vector<2x16x16x128xf32>
    tpu.vector_store %arg21[%c0_163, %c1_164, %c8_165, %c0_166], %202 {strides = array<i32>} : memref<2x18x25x128xf32, #tpu.memory_space<vmem>>, vector<2x16x16x128xf32>,
    %c0_167 = arith.constant 0 : index
    %c0_168 = arith.constant 0 : index
    %c7_169 = arith.constant 7 : index
    %c0_170 = arith.constant 0 : index
    %204 = vector.load %arg21[%c0_167, %c0_168, %c7_169, %c0_170] : memref<2x18x25x128xf32, #tpu.memory_space<vmem>>, vector<2x16x16x128xf32>
    %205 = vector.shape_cast %204 : vector<2x16x16x128xf32> to vector<512x128xf32>
    %206 = arith.truncf %205 : vector<512x128xf32> to vector<512x128xbf16>
    %c0_171 = arith.constant 0 : index
    %c0_172 = arith.constant 0 : index
    %c8_173 = arith.constant 8 : index
    %c0_174 = arith.constant 0 : index
    %207 = vector.load %arg21[%c0_171, %c0_172, %c8_173, %c0_174] : memref<2x18x25x128xf32, #tpu.memory_space<vmem>>, vector<2x16x16x128xf32>
    %208 = vector.shape_cast %207 : vector<2x16x16x128xf32> to vector<512x128xf32>
    %209 = arith.truncf %208 : vector<512x128xf32> to vector<512x128xbf16>
    %c0_175 = arith.constant 0 : index
    %c0_176 = arith.constant 0 : index
    %c9_177 = arith.constant 9 : index
    %c0_178 = arith.constant 0 : index
    %210 = vector.load %arg21[%c0_175, %c0_176, %c9_177, %c0_178] : memref<2x18x25x128xf32, #tpu.memory_space<vmem>>, vector<2x16x16x128xf32>
    %211 = vector.shape_cast %210 : vector<2x16x16x128xf32> to vector<512x128xf32>
    %212 = arith.truncf %211 : vector<512x128xf32> to vector<512x128xbf16>
    %c0_179 = arith.constant 0 : index
    %c1_180 = arith.constant 1 : index
    %c7_181 = arith.constant 7 : index
    %c0_182 = arith.constant 0 : index
    %213 = vector.load %arg21[%c0_179, %c1_180, %c7_181, %c0_182] : memref<2x18x25x128xf32, #tpu.memory_space<vmem>>, vector<2x16x16x128xf32>
    %214 = vector.shape_cast %213 : vector<2x16x16x128xf32> to vector<512x128xf32>
    %215 = arith.truncf %214 : vector<512x128xf32> to vector<512x128xbf16>
    %c0_183 = arith.constant 0 : index
    %c1_184 = arith.constant 1 : index
    %c8_185 = arith.constant 8 : index
    %c0_186 = arith.constant 0 : index
    %216 = vector.load %arg21[%c0_183, %c1_184, %c8_185, %c0_186] : memref<2x18x25x128xf32, #tpu.memory_space<vmem>>, vector<2x16x16x128xf32>
    %217 = vector.shape_cast %216 : vector<2x16x16x128xf32> to vector<512x128xf32>
    %218 = arith.truncf %217 : vector<512x128xf32> to vector<512x128xbf16>
    %c0_187 = arith.constant 0 : index
    %c1_188 = arith.constant 1 : index
    %c9_189 = arith.constant 9 : index
    %c0_190 = arith.constant 0 : index
    %219 = vector.load %arg21[%c0_187, %c1_188, %c9_189, %c0_190] : memref<2x18x25x128xf32, #tpu.memory_space<vmem>>, vector<2x16x16x128xf32>
    %220 = vector.shape_cast %219 : vector<2x16x16x128xf32> to vector<512x128xf32>
    %221 = arith.truncf %220 : vector<512x128xf32> to vector<512x128xbf16>
    %c0_191 = arith.constant 0 : index
    %c2_192 = arith.constant 2 : index
    %c7_193 = arith.constant 7 : index
    %c0_194 = arith.constant 0 : index
    %222 = vector.load %arg21[%c0_191, %c2_192, %c7_193, %c0_194] : memref<2x18x25x128xf32, #tpu.memory_space<vmem>>, vector<2x16x16x128xf32>
    %223 = vector.shape_cast %222 : vector<2x16x16x128xf32> to vector<512x128xf32>
    %224 = arith.truncf %223 : vector<512x128xf32> to vector<512x128xbf16>
    %c0_195 = arith.constant 0 : index
    %c2_196 = arith.constant 2 : index
    %c8_197 = arith.constant 8 : index
    %c0_198 = arith.constant 0 : index
    %225 = vector.load %arg21[%c0_195, %c2_196, %c8_197, %c0_198] : memref<2x18x25x128xf32, #tpu.memory_space<vmem>>, vector<2x16x16x128xf32>
    %226 = vector.shape_cast %225 : vector<2x16x16x128xf32> to vector<512x128xf32>
    %227 = arith.truncf %226 : vector<512x128xf32> to vector<512x128xbf16>
    %c0_199 = arith.constant 0 : index
    %c2_200 = arith.constant 2 : index
    %c9_201 = arith.constant 9 : index
    %c0_202 = arith.constant 0 : index
    %228 = vector.load %arg21[%c0_199, %c2_200, %c9_201, %c0_202] : memref<2x18x25x128xf32, #tpu.memory_space<vmem>>, vector<2x16x16x128xf32>
    %229 = vector.shape_cast %228 : vector<2x16x16x128xf32> to vector<512x128xf32>
    %230 = arith.truncf %229 : vector<512x128xf32> to vector<512x128xbf16>
    %231 = tpu.concatenate %206, %209, %212, %215, %218, %221, %224, %227, %230 in 1 : vector<512x128xbf16>, vector<512x128xbf16>, vector<512x128xbf16>, vector<512x128xbf16>, vector<512x128xbf16>, vector<512x128xbf16>, vector<512x128xbf16>, vector<512x128xbf16>, vector<512x128xbf16> -> vector<512x1152xbf16>
    %c0_203 = arith.constant 0 : index
    %c0_204 = arith.constant 0 : index
    %232 = vector.load %arg15[%c0_203, %c0_204] : memref<1152x128xbf16, #tpu.memory_space<vmem>>, vector<1152x128xbf16>
    %cst_205 = arith.constant dense<0.000000e+00> : vector<512x128xf32>
    %233 = tpu.matmul %231, %232, %cst_205 {dimension_numbers = #tpu.dot_dimension_numbers<[1], [0], [0], [1], [0, 0, 1, 1], [], []>} : vector<512x1152xbf16>, vector<1152x128xbf16>, vector<512x128xf32> -> vector<512x128xf32>
    %c0_206 = arith.constant 0 : index
    %c0_207 = arith.constant 0 : index
    %234 = vector.load %arg16[%c0_206, %c0_207] : memref<1x128xf32, #tpu.memory_space<vmem>>, vector<1x128xf32>
    %235 = vector.broadcast %234 : vector<1x128xf32> to vector<512x128xf32>
    %236 = arith.addf %233, %235 : vector<512x128xf32>
    %237 = math.tanh %236 : vector<512x128xf32>
    %c0_208 = arith.constant 0 : index
    %c0_209 = arith.constant 0 : index
    %238 = vector.load %arg17[%c0_208, %c0_209] : memref<512x128xf32, #tpu.memory_space<vmem>>, vector<512x128xf32>
    tpu.vector_store %arg17[%c0_208, %c0_209], %237 {strides = array<i32>} : memref<512x128xf32, #tpu.memory_space<vmem>>, vector<512x128xf32>,
    return
  }
}

</mosaic_0001>

<bundles_post_ra>
// kernel: generator_forward.1
= control target key start
LH: loop header
LB: loop body
LE: loop exit
PB: predicated region body
PF: predicated region fallthrough
CT: control target
= control target key end

     0   :  { %v17765_v3 = vmov 0   ;;  %vm335_vm0 = vcmask 261120   ;;  %s17744_s1 = inlined_call_operand.vmem [shape: bf16[32,2048], index: 1, kind: input, shape index: {}]   ;;  %s17745_s0 = inlined_call_operand.vmem [shape: f32[2,32], index: 0, kind: input, shape index: {}]   ;;  %s17746_s5 = inlined_call_operand.vmem [shape: f32[128,32], index: 5, kind: input, shape index: {}]   ;;  %s17747_s2 = inlined_call_operand.vmem [shape: f32[1,2048], index: 2, kind: input, shape index: {}]   ;;  %s17748_s6 = inlined_call_operand.vmem [shape: bf16[1152,128], index: 6, kind: input, shape index: {}]   ;;  %s17749_s3 = inlined_call_operand.vmem [shape: f32[1,128], index: 3, kind: input, shape index: {}]   ;;  %s17750_s4 = inlined_call_operand.vmem [shape: f32[1,128], index: 4, kind: input, shape index: {}]   ;;  %s17751_s7 = inlined_call_operand.vmem [shape: f32[1,128], index: 7, kind: input, shape index: {}]   ;;  %s17752_s10 = inlined_call_operand.vmem [shape: f32[512,128], index: 10, kind: input, shape index: {}]   ;;  %s17753_s11 = inlined_call_operand.vmem [shape: bf16[1152,128], index: 11, kind: input, shape index: {}]   ;;  %s17754_s8 = inlined_call_operand.vmem [shape: f32[1,128], index: 8, kind: input, shape index: {}]   ;;  %s17755_s9 = inlined_call_operand.vmem [shape: f32[1,128], index: 9, kind: input, shape index: {}]   ;;  %s17756_s12 = inlined_call_operand.vmem [shape: f32[1,128], index: 12, kind: input, shape index: {}]   ;;  %s17757_s15 = inlined_call_operand.vmem [shape: bf16[1152,128], index: 15, kind: input, shape index: {}]   ;;  %s17758_s13 = inlined_call_operand.vmem [shape: f32[1,128], index: 13, kind: input, shape index: {}]   ;;  %s17759_s14 = inlined_call_operand.vmem [shape: f32[1,128], index: 14, kind: input, shape index: {}]   ;;  %s17760_s16 = inlined_call_operand.vmem [shape: f32[1,128], index: 16, kind: input, shape index: {}]   ;;  %s17761_s17 = inlined_call_operand.vmem [shape: f32[512,128], index: 17, kind: output, shape index: {}]  }
   0x1   :  { %17871 = sst [smem:[#allocation57_spill]] %s17744_s1  ;;  %371 = vmatprep.mubr.bf16.mxu0 %v17765_v3  ;;  %412 = vmatprep.mubr.bf16.mxu1 %v17765_v3 }
   0x2   :  { %17872 = sst [smem:[#allocation58_spill]] %s17745_s0  ;;  %s17873_s26 = sld [smem:[#allocation57_spill]] }
   0x3   :  { %s17874_s20 = sld [smem:[#allocation58_spill]] }
   0x8   :  { %v59_v0 = vld [vmem:[%s17873_s26] sm:$0xff]  ;;  %v60_v2 = vld [vmem:[%s17873_s26 + $0x8] sm:$0xff]  ;;  %v61_v15 = vld [vmem:[%s17873_s26 + $0x10] sm:$0xff] }
   0x9   :  { %v67_v1 = vld [vmem:[%s17873_s26 + $0x40] sm:$0xff]  ;;  %v68_v5 = vld [vmem:[%s17873_s26 + $0x48] sm:$0xff]  ;;  %v69_v16 = vld [vmem:[%s17873_s26 + $0x50] sm:$0xff] }
   0xa   :  { %v9959_v4 = vcombine.high %v59_v0, %v67_v1  ;;  %v9958_v6 = vcombine.low %v59_v0, %v67_v1  ;;  %v75_v7 = vld [vmem:[%s17873_s26 + $0x80] sm:$0xff]  ;;  %v9961_v9 = vcombine.high %v60_v2, %v68_v5  ;;  %v9960_v10 = vcombine.low %v60_v2, %v68_v5  ;;  %v76_v12 = vld [vmem:[%s17873_s26 + $0x88] sm:$0xff]  ;;  %v62_v17 = vld [vmem:[%s17873_s26 + $0x18] sm:$0xff] }
   0xb   :  { %v83_v8 = vld [vmem:[%s17873_s26 + $0xc0] sm:$0xff]  ;;  %v84_v13 = vld [vmem:[%s17873_s26 + $0xc8] sm:$0xff]  ;;  %v70_v20 = vld [vmem:[%s17873_s26 + $0x58] sm:$0xff]  ;;  %v9963_v22 = vcombine.high %v61_v15, %v69_v16  ;;  %v9962_v29 = vcombine.low %v61_v15, %v69_v16  ;;  %v95_v5 = vlaneseq }
   0xc   :  { %v9975_v11 = vcombine.high %v75_v7, %v83_v8  ;;  %339 = vmatprep.subr.bf16.mxu0 %v9959_v4  ;;  %v9977_v14 = vcombine.high %v76_v12, %v84_v13  ;;  %380 = vmatprep.subr.bf16.mxu1 %v9961_v9  ;;  %v9974_v18 = vcombine.low %v75_v7, %v83_v8  ;;  %v57_v19 = vld [vmem:[%s17874_s20] sm:$0x3]  ;;  %v77_v24 = vld [vmem:[%s17873_s26 + $0x90] sm:$0xff]  ;;  %v78_v27 = vld [vmem:[%s17873_s26 + $0x98] sm:$0xff] }
   0xd   :  { %340 = vmatpush1.bf16.msra.mxu0 %v9958_v6  ;;  %381 = vmatpush1.bf16.msra.mxu1 %v9960_v10  ;;  %v9976_v21 = vcombine.low %v76_v12, %v84_v13  ;;  %v9965_v23 = vcombine.high %v62_v17, %v70_v20  ;;  %v85_v25 = vld [vmem:[%s17873_s26 + $0xd0] sm:$0xff]  ;;  %v12490_v26 = vpack.c.bf16 %v57_v19, %v57_v19  ;;  %v86_v28 = vld [vmem:[%s17873_s26 + $0xd8] sm:$0xff]  ;;  %v63_v33 = vld [vmem:[%s17873_s26 + $0x20] sm:$0xff]  ;;  %v12572_v6 = vshrl.u32 %v95_v5, 7 }
   0xe   :  { %341 = vmatprep.subr.bf16.mxu0 %v9975_v11  ;;  %382 = vmatprep.subr.bf16.mxu1 %v9977_v14  ;;  %v9964_v30 = vcombine.low %v62_v17, %v70_v20  ;;  %v9979_v31 = vcombine.high %v77_v24, %v85_v25  ;;  %v9981_v32 = vcombine.high %v78_v27, %v86_v28  ;;  %v71_v34 = vld [vmem:[%s17873_s26 + $0x60] sm:$0xff]  ;;  %v64_v35 = vld [vmem:[%s17873_s26 + $0x28] sm:$0xff]  ;;  %v65_v49 = vld [vmem:[%s17873_s26 + $0x30] sm:$0xff] }
   0xf   :  { %v72_v36 = vld [vmem:[%s17873_s26 + $0x68] sm:$0xff]  ;;  %v9978_v37 = vcombine.low %v77_v24, %v85_v25  ;;  %v9980_v38 = vcombine.low %v78_v27, %v86_v28  ;;  %v9967_v39 = vcombine.high %v63_v33, %v71_v34  ;;  %v79_v41 = vld [vmem:[%s17873_s26 + $0xa0] sm:$0xff]  ;;  %v9966_v45 = vcombine.low %v63_v33, %v71_v34  ;;  %v73_v50 = vld [vmem:[%s17873_s26 + $0x70] sm:$0xff] }
  0x10   :  { %v9969_v40 = vcombine.high %v64_v35, %v72_v36  ;;  %v87_v42 = vld [vmem:[%s17873_s26 + $0xe0] sm:$0xff]  ;;  %v80_v43 = vld [vmem:[%s17873_s26 + $0xa8] sm:$0xff]  ;;  %v9968_v46 = vcombine.low %v64_v35, %v72_v36  ;;  %v66_v51 = vld [vmem:[%s17873_s26 + $0x38] sm:$0xff]  ;;  %v9971_v55 = vcombine.high %v65_v49, %v73_v50  ;;  %v9970_v61 = vcombine.low %v65_v49, %v73_v50 }
  0x11   :  { %342 = vmatpush1.bf16.msra.mxu0 %v9974_v18  ;;  %383 = vmatpush1.bf16.msra.mxu1 %v9976_v21  ;;  %v88_v44 = vld [vmem:[%s17873_s26 + $0xe8] sm:$0xff]  ;;  %v9983_v47 = vcombine.high %v79_v41, %v87_v42  ;;  %v74_v52 = vld [vmem:[%s17873_s26 + $0x78] sm:$0xff]  ;;  %v9982_v53 = vcombine.low %v79_v41, %v87_v42  ;;  %v81_v57 = vld [vmem:[%s17873_s26 + $0xb0] sm:$0xff]  ;;  %v97_v7 = vsub.s32 0, %v12572_v6  ;;  %v105_v9 = vsub.s32 2, %v12572_v6 }
  0x12   :  { %421 = vmatprep.subr.bf16.mxu0 %v9963_v22  ;;  %462 = vmatprep.subr.bf16.mxu1 %v9965_v23  ;;  %v9985_v48 = vcombine.high %v80_v43, %v88_v44  ;;  %v9984_v54 = vcombine.low %v80_v43, %v88_v44  ;;  %v9973_v56 = vcombine.high %v66_v51, %v74_v52  ;;  %v89_v58 = vld [vmem:[%s17873_s26 + $0xf0] sm:$0xff]  ;;  %v82_v59 = vld [vmem:[%s17873_s26 + $0xb8] sm:$0xff]  ;;  %v744_v4 = vld [vmem:[%s17746_s5] sm:$0xff]  ;;  %v101_v10 = vsub.s32 1, %v12572_v6 }
  0x13   :  { %v90_v60 = vld [vmem:[%s17873_s26 + $0xf8] sm:$0xff]  ;;  %v9972_v62 = vcombine.low %v66_v51, %v74_v52  ;;  %v9987_v63 = vcombine.high %v81_v57, %v89_v58  ;;  %v9986_v1 = vcombine.low %v81_v57, %v89_v58  ;;  %v91_v8 = vld [vmem:[%s17747_s2] sm:$0xff]  ;;  %v109_v11 = vsub.s32 3, %v12572_v6  ;;  %v12001_v51 = vld [vmem:[%s17748_s6 + $0x48] sm:$0xff]  }
  0x14   :  { %9990 = vmatmul.mubr.msk.bf16.vlgmr.msra.gmra.mrb[0].mxu0 %vm335_vm0, %v12490_v26  ;;  %9991 = vmatmul.mubr.msk.bf16.vlgmr.msra.gmra.mrb[0].mxu1 %vm335_vm0, %v12490_v26  ;;  %v9989_v0 = vcombine.high %v82_v59, %v90_v60  ;;  %v9988_v2 = vcombine.low %v82_v59, %v90_v60  ;;  %v98_v12 = vrot.slane %v91_v8, %v97_v7  ;;  %v113_v20 = vsub.s32 4, %v12572_v6  ;;  %v11997_v36 = vld [vmem:[%s17748_s6 + $0x40] sm:$0xff]   ;;  %v12005_v58 = vld [vmem:[%s17748_s6 + $0x50] sm:$0xff]  }
  0x15   :  { %422 = vmatpush1.bf16.msra.mxu0 %v9962_v29  ;;  %463 = vmatpush1.bf16.msra.mxu1 %v9964_v30  ;;  %v106_v13 = vrot.slane %v91_v8, %v105_v9  ;;  %v102_v14 = vrot.slane %v91_v8, %v101_v10  ;;  %v110_v15 = vrot.slane %v91_v8, %v109_v11  ;;  %v121_v25 = vsub.s32 6, %v12572_v6 }
  0x16   :  { %423 = vmatprep.subr.bf16.mxu0 %v9979_v31  ;;  %464 = vmatprep.subr.bf16.mxu1 %v9981_v32  ;;  %v125_v30 = vsub.s32 7, %v12572_v6  ;;  %v114_v32 = vrot.slane %v91_v8, %v113_v20 }
  0x17   :  { %453 = vmatprep.mubr.bf16.mxu0 %v17765_v3  ;;  %494 = vmatprep.mubr.bf16.mxu1 %v17765_v3  ;;  %v122_v33 = vrot.slane %v91_v8, %v121_v25 }
  0x18   :  { %v126_v35 = vrot.slane %v91_v8, %v125_v30 }
  0x19   :  { %424 = vmatpush1.bf16.msra.mxu0 %v9978_v37  ;;  %465 = vmatpush1.bf16.msra.mxu1 %v9980_v38 }
  0x1a   :  { %503 = vmatprep.subr.bf16.mxu0 %v9967_v39  ;;  %544 = vmatprep.subr.bf16.mxu1 %v9969_v40 }
  0x1c   :  { %9992 = vmatmul.mubr.msk.bf16.vlgmr.msra.gmra.mrb[4].mxu0 %vm335_vm0, %v12490_v26  ;;  %9993 = vmatmul.mubr.msk.bf16.vlgmr.msra.gmra.mrb[4].mxu1 %vm335_vm0, %v12490_v26 }
  0x1d   :  { %504 = vmatpush1.bf16.msra.mxu0 %v9966_v45  ;;  %545 = vmatpush1.bf16.msra.mxu1 %v9968_v46  ;;  %v92_v45 = vld [vmem:[%s17747_s2 + $0x8] sm:$0xff]  ;;  %v11999_v46 = vld [vmem:[%s17748_s6] sm:$0xff]  }
  0x1e   :  { %505 = vmatprep.subr.bf16.mxu0 %v9983_v47  ;;  %546 = vmatprep.subr.bf16.mxu1 %v9985_v48  ;;  %v130_v52 = vrot.slane %v92_v45, %v97_v7 }
  0x1f   :  { %535 = vmatprep.mubr.bf16.mxu0 %v17765_v3  ;;  %576 = vmatprep.mubr.bf16.mxu1 %v17765_v3 }
  0x21   :  { %506 = vmatpush1.bf16.msra.mxu0 %v9982_v53  ;;  %547 = vmatpush1.bf16.msra.mxu1 %v9984_v54  ;;  %v138_v53 = vrot.slane %v92_v45, %v105_v9  ;;  %v134_v54 = vrot.slane %v92_v45, %v101_v10  ;;  %v146_v9 = vrot.slane %v92_v45, %v113_v20  ;;  %v12009_v10 = vld [vmem:[%s17748_s6 + $0x58] sm:$0xff]  }
  0x22   :  { %585 = vmatprep.subr.bf16.mxu0 %v9971_v55  ;;  %626 = vmatprep.subr.bf16.mxu1 %v9973_v56  ;;  %v12003_v55 = vld [vmem:[%s17748_s6 + $0x8] sm:$0xff]   ;;  %v142_v56 = vrot.slane %v92_v45, %v109_v11  ;;  %v154_v11 = vrot.slane %v92_v45, %v121_v25 }
  0x24   :  { %9994 = vmatmul.mubr.msk.bf16.vlgmr.msra.gmra.mrb[8].mxu0 %vm335_vm0, %v12490_v26  ;;  %9995 = vmatmul.mubr.msk.bf16.vlgmr.msra.gmra.mrb[8].mxu1 %vm335_vm0, %v12490_v26 }
  0x25   :  { %586 = vmatpush1.bf16.msra.mxu0 %v9970_v61  ;;  %627 = vmatpush1.bf16.msra.mxu1 %v9972_v62 }
  0x26   :  { %587 = vmatprep.subr.bf16.mxu0 %v9987_v63  ;;  %628 = vmatprep.subr.bf16.mxu1 %v9989_v0 }
  0x27   :  { %617 = vmatprep.mubr.bf16.mxu0 %v17765_v3  ;;  %658 = vmatprep.mubr.bf16.mxu1 %v17765_v3 }
  0x29   :  { %588 = vmatpush1.bf16.msra.mxu0 %v9986_v1  ;;  %629 = vmatpush1.bf16.msra.mxu1 %v9988_v2  ;;  %v12007_v2 = vld [vmem:[%s17748_s6 + $0x10] sm:$0xff]  }
  0x2a   :  { %10259 = vmatprep.subr.bf16.mxu1 %v11997_v36 }
  0x2c   :  { %9996 = vmatmul.mubr.msk.bf16.vlgmr.msra.gmra.mrb[12].mxu0 %vm335_vm0, %v12490_v26  ;;  %9997 = vmatmul.mubr.msk.bf16.vlgmr.msra.gmra.mrb[12].mxu1 %vm335_vm0, %v12490_v26  ;;  %v117_v26 = vsub.s32 5, %v12572_v6 }
  0x2d   :  { %10699 = vmatprep.mubr.msk.f32.mxu0 %vm335_vm0, %v744_v4  ;;  %10260 = vmatpush3.bf16.msra.mxu1 %v11999_v46 }
  0x2e   :  { %v118_v34 = vrot.slane %v91_v8, %v117_v26  ;;  %10261 = vmatprep.subr.bf16.mxu1 %v12001_v51 }
  0x31   :  { %10262 = vmatpush3.bf16.msra.mxu1 %v12003_v55 }
  0x32   :  { %10263 = vmatprep.subr.bf16.mxu1 %v12005_v58 }
  0x35   :  { %10264 = vmatpush3.bf16.msra.mxu1 %v12007_v2 }
  0x36   :  { %10265 = vmatprep.subr.bf16.mxu1 %v12009_v10 }
  0xe7   :  { %v373_v16 = vpop.f32.mrb[0].mxu0  ;;  %v414_v18 = vpop.f32.mrb[0].mxu1 }
  0xe8   :  { %v374_v17 = vadd.f32 %v373_v16, %v98_v12  ;;  %v375_v19 = vpop.f32.mrb[1].mxu0  ;;  %v415_v21 = vadd.f32 %v414_v18, %v106_v13  ;;  %v416_v23 = vpop.f32.mrb[1].mxu1  ;;  %v150_v12 = vrot.slane %v92_v45, %v117_v26  ;;  %v158_v13 = vrot.slane %v92_v45, %v125_v30 }
  0xe9   :  { %v376_v22 = vadd.f32 %v375_v19, %v102_v14  ;;  %v377_v24 = vpop.f32.mrb[2].mxu0  ;;  %v417_v27 = vadd.f32 %v416_v23, %v110_v15  ;;  %v418_v28 = vpop.f32.mrb[2].mxu1  ;;  %v12011_v14 = vld [vmem:[%s17748_s6 + $0x18] sm:$0xff]   ;;  %v12013_v23 = vld [vmem:[%s17748_s6 + $0x60] sm:$0xff]  }
  0xea   :  { %667 = vst [vmem:[#allocation2] sm:$0x3] %v374_v17  ;;  %v378_v29 = vpop.f32.mrb[3].mxu0  ;;  %669 = vst [vmem:[#allocation2 + $0x4] sm:$0x3] %v415_v21  ;;  %v419_v31 = vpop.f32.mrb[3].mxu1  ;;  %10266 = vmatpush3.bf16.msra.mxu1 %v12011_v14 }
  0xeb   :  { %668 = vst [vmem:[#allocation2 + $0x2] sm:$0x3] %v376_v22  ;;  %670 = vst [vmem:[#allocation2 + $0x6] sm:$0x3] %v417_v27  ;;  %10267 = vmatprep.subr.bf16.mxu1 %v12013_v23  ;;  %v12015_v27 = vld [vmem:[%s17748_s6 + $0x20] sm:$0xff]  }
  0xec   :  { %v748_v23 = vld [vmem:[%s17746_s5 + $0x20] sm:$0xff] }
  0xee   :  { %10268 = vmatpush3.bf16.msra.mxu1 %v12015_v27  ;;  %v12700_v27 = vld [vmem:[%s17748_s6 + $0xd8] sm:$0xff]  }
  0xef   :  { %v455_v37 = vpop.f32.mrb[4].mxu0  ;;  %v496_v39 = vpop.f32.mrb[4].mxu1 }
  0xf0   :  { %v456_v38 = vadd.f32 %v455_v37, %v114_v32  ;;  %v457_v40 = vpop.f32.mrb[5].mxu0  ;;  %v497_v41 = vadd.f32 %v496_v39, %v122_v33  ;;  %v498_v43 = vpop.f32.mrb[5].mxu1 }
  0xf1   :  { %v458_v42 = vadd.f32 %v457_v40, %v118_v34  ;;  %v459_v44 = vpop.f32.mrb[6].mxu0  ;;  %v499_v47 = vadd.f32 %v498_v43, %v126_v35  ;;  %v500_v48 = vpop.f32.mrb[6].mxu1 }
  0xf2   :  { %671 = vst [vmem:[#allocation2 + $0x8] sm:$0x3] %v456_v38  ;;  %v460_v49 = vpop.f32.mrb[7].mxu0  ;;  %673 = vst [vmem:[#allocation2 + $0xc] sm:$0x3] %v497_v41  ;;  %v501_v50 = vpop.f32.mrb[7].mxu1 }
  0xf3   :  { %672 = vst [vmem:[#allocation2 + $0xa] sm:$0x3] %v458_v42  ;;  %674 = vst [vmem:[#allocation2 + $0xe] sm:$0x3] %v499_v47  ;;  %v683_v29 = vld [vmem:[#allocation2] sm:$0xff] }
  0xf7   :  { %v537_v57 = vpop.f32.mrb[8].mxu0  ;;  %v578_v60 = vpop.f32.mrb[8].mxu1 }
  0xf8   :  { %v538_v59 = vadd.f32 %v537_v57, %v130_v52  ;;  %v539_v61 = vpop.f32.mrb[9].mxu0  ;;  %v579_v62 = vadd.f32 %v578_v60, %v138_v53  ;;  %v580_v0 = vpop.f32.mrb[9].mxu1 }
  0xf9   :  { %v540_v63 = vadd.f32 %v539_v61, %v134_v54  ;;  %v541_v1 = vpop.f32.mrb[10].mxu0  ;;  %v581_v4 = vadd.f32 %v580_v0, %v142_v56  ;;  %v582_v5 = vpop.f32.mrb[10].mxu1 }
  0xfa   :  { %675 = vst [vmem:[#allocation2 + $0x10] sm:$0x3] %v538_v59  ;;  %v542_v7 = vpop.f32.mrb[11].mxu0  ;;  %677 = vst [vmem:[#allocation2 + $0x14] sm:$0x3] %v579_v62  ;;  %v583_v8 = vpop.f32.mrb[11].mxu1 }
  0xfb   :  { %676 = vst [vmem:[#allocation2 + $0x12] sm:$0x3] %v540_v63  ;;  %678 = vst [vmem:[#allocation2 + $0x16] sm:$0x3] %v581_v4  ;;  %v684_v28 = vld [vmem:[#allocation2 + $0x8] sm:$0xff] }
  0xfc   :  { %v687_v31 = vadd.f32 %v684_v28, %v683_v29  ;;  %v9998_v62 = vld [vmem:[%s17749_s3] ss:$0 sm:$0xff] }
  0xfd   :  { %v9999_v4 = vld [vmem:[%s17750_s4] ss:$0 sm:$0xff] }
  0xff   :  { %v619_v15 = vpop.f32.mrb[12].mxu0  ;;  %v660_v17 = vpop.f32.mrb[12].mxu1 }
 0x100   :  { %v620_v16 = vadd.f32 %v619_v15, %v146_v9  ;;  %v621_v18 = vpop.f32.mrb[13].mxu0  ;;  %v661_v19 = vadd.f32 %v660_v17, %v154_v11  ;;  %v662_v21 = vpop.f32.mrb[13].mxu1  ;;  %v745_v17 = vld [vmem:[%s17746_s5 + $0x8] sm:$0xff] }
 0x101   :  { %v622_v20 = vadd.f32 %v621_v18, %v150_v12  ;;  %v623_v22 = vpop.f32.mrb[14].mxu0  ;;  %v663_v6 = vadd.f32 %v662_v21, %v158_v13  ;;  %v664_v24 = vpop.f32.mrb[14].mxu1  ;;  %v12651_v18 = vld [vmem:[%s17748_s6 + $0x80] sm:$0xff]   ;;  %v747_v21 = vld [vmem:[%s17746_s5 + $0x18] sm:$0xff] }
 0x102   :  { %679 = vst [vmem:[#allocation2 + $0x18] sm:$0x3] %v620_v16  ;;  %v624_v25 = vpop.f32.mrb[15].mxu0  ;;  %681 = vst [vmem:[#allocation2 + $0x1c] sm:$0x3] %v661_v19  ;;  %v665_v26 = vpop.f32.mrb[15].mxu1 }
 0x103   :  { %680 = vst [vmem:[#allocation2 + $0x1a] sm:$0x3] %v622_v20  ;;  %682 = vst [vmem:[#allocation2 + $0x1e] sm:$0x3] %v663_v6  ;;  %v685_v30 = vld [vmem:[#allocation2 + $0x10] sm:$0xff]  ;;  %v12643_v16 = vld [vmem:[%s17748_s6 + $0xc0] sm:$0xff]  }
 0x104   :  { %v688_v32 = vadd.f32 %v687_v31, %v685_v30  ;;  %v746_v19 = vld [vmem:[%s17746_s5 + $0x10] sm:$0xff]  ;;  %v12660_v20 = vld [vmem:[%s17748_s6 + $0xc8] sm:$0xff]   ;;  %v12720_v31 = vld [vmem:[%s17748_s6 + $0xe0] sm:$0xff]  }
 0x105   :  { %v12671_v22 = vld [vmem:[%s17748_s6 + $0x88] sm:$0xff]   ;;  %v12680_v6 = vld [vmem:[%s17748_s6 + $0xd0] sm:$0xff]  }
 0x106   :  { %v749_v24 = vld [vmem:[%s17746_s5 + $0x28] sm:$0xff]  ;;  %v12691_v25 = vld [vmem:[%s17748_s6 + $0x90] sm:$0xff]  }
 0x107   :  { %v750_v26 = vld [vmem:[%s17746_s5 + $0x30] sm:$0xff] }
 0x10a   :  { %v686_v33 = vld [vmem:[#allocation2 + $0x18] sm:$0xff] }
 0x10b   :  { %v689_v34 = vadd.f32 %v688_v32, %v686_v33  ;;  %v753_v32 = vld [vmem:[%s17746_s5 + $0x48] sm:$0xff] }
 0x10d   :  { %v690_v35 = vrot.slane %v689_v34, 4 }
 0x10f   :  { %v691_v36 = vadd.f32 %v690_v35, %v689_v34  ;;  %v754_v34 = vld [vmem:[%s17746_s5 + $0x50] sm:$0xff]  ;;  %v755_v35 = vld [vmem:[%s17746_s5 + $0x58] sm:$0xff] }
 0x111   :  { %v692_v37 = vrot.slane %v691_v36, 2 }
 0x113   :  { %v693_v38 = vadd.f32 %v692_v37, %v691_v36  ;;  %v756_v36 = vld [vmem:[%s17746_s5 + $0x60] sm:$0xff]  ;;  %v757_v37 = vld [vmem:[%s17746_s5 + $0x68] sm:$0xff] }
 0x115   :  { %v694_v39 = vrot.slane %v693_v38, 1 }
 0x117   :  { %v695_v40 = vadd.f32 %v694_v39, %v693_v38  ;;  %v758_v38 = vld [vmem:[%s17746_s5 + $0x70] sm:$0xff]  ;;  %v759_v39 = vld [vmem:[%s17746_s5 + $0x78] sm:$0xff] }
 0x119   :  { %v697_v41 = vmul.f32 0.03125, %v695_v40  ;;  %v12017_v40 = vld [vmem:[%s17748_s6 + $0x68] sm:$0xff]  }
 0x11a   :  { %10269 = vmatprep.subr.bf16.mxu1 %v12017_v40 }
 0x11b   :  { %v698_v42 = vsub.f32 %v683_v29, %v697_v41  ;;  %v699_v43 = vsub.f32 %v684_v28, %v697_v41  ;;  %v700_v44 = vsub.f32 %v685_v30, %v697_v41  ;;  %v701_v45 = vsub.f32 %v686_v33, %v697_v41  ;;  %v751_v28 = vld [vmem:[%s17746_s5 + $0x38] sm:$0xff]  ;;  %v752_v30 = vld [vmem:[%s17746_s5 + $0x40] sm:$0xff]  ;;  %v12766_v41 = vld [vmem:[%s17748_s6 + $0xe8] sm:$0xff]  }
 0x11c   :  { %v12711_v29 = vld [vmem:[%s17748_s6 + $0x98] sm:$0xff]   ;;  %v12731_v33 = vld [vmem:[%s17748_s6 + $0xa0] sm:$0xff]  }
 0x11d   :  { %v702_v46 = vmul.f32 %v698_v42, %v698_v42  ;;  %v703_v47 = vmul.f32 %v699_v43, %v699_v43  ;;  %v704_v48 = vmul.f32 %v700_v44, %v700_v44  ;;  %v705_v50 = vmul.f32 %v701_v45, %v701_v45 }
 0x11f   :  { %v706_v49 = vadd.f32 %v703_v47, %v702_v46  ;;  %v12991_v46 = vld [vmem:[%s17748_s6 + $0xf0] sm:$0xff]  }
 0x120   :  { %v12023_v47 = vld [vmem:[%s17748_s6 + $0x30] sm:$0xff]  }
 0x121   :  { %v707_v51 = vadd.f32 %v706_v49, %v704_v48  ;;  %v12999_v48 = vld [vmem:[%s17748_s6 + $0xb0] sm:$0xff]   ;;  %v12025_v49 = vld [vmem:[%s17748_s6 + $0x78] sm:$0xff]  }
 0x123   :  { %v708_v52 = vadd.f32 %v707_v51, %v705_v50  ;;  %v13009_v50 = vld [vmem:[%s17748_s6 + $0xf8] sm:$0xff]  }
 0x124   :  { %v12027_v51 = vld [vmem:[%s17748_s6 + $0x38] sm:$0xff]  }
 0x125   :  { %v709_v53 = vrot.slane %v708_v52, 4 }
 0x127   :  { %v710_v54 = vadd.f32 %v709_v53, %v708_v52  ;;  %v13017_v52 = vld [vmem:[%s17748_s6 + $0xb8] sm:$0xff]   ;;  %v12029_v53 = vld [vmem:[%s17748_s6 + $0x1c0] sm:$0xff]  }
 0x129   :  { %v711_v55 = vrot.slane %v710_v54, 2 }
 0x12b   :  { %v712_v56 = vadd.f32 %v711_v55, %v710_v54 }
 0x12d   :  { %v713_v57 = vrot.slane %v712_v56, 1 }
 0x12f   :  { %v714_v58 = vadd.f32 %v713_v57, %v712_v56 }
 0x131   :  { %v715_v59 = vmul.f32 0.03125, %v714_v58 }
 0x133   :  { %v716_v60 = vadd.f32 1e-05, %v715_v59 }
 0x135   :  { %12213 = vrsqrt.f32 %v716_v60 }
 0x13f   :  { %v12214_v61 = vpop.eup %12213 }
 0x140   :  { %v718_v63 = vmul.f32 %v12214_v61, %v698_v42  ;;  %v719_v0 = vmul.f32 %v12214_v61, %v699_v43  ;;  %v720_v1 = vmul.f32 %v12214_v61, %v700_v44  ;;  %v721_v2 = vmul.f32 %v12214_v61, %v701_v45  ;;  %v12771_v42 = vld [vmem:[%s17748_s6 + $0x28] sm:$0xff]   ;;  %v12021_v45 = vld [vmem:[%s17748_s6 + $0x70] sm:$0xff]  }
 0x141   :  { %v12776_v43 = vld [vmem:[%s17748_s6 + $0xa8] sm:$0xff]   ;;  %v12352_v44 = vmov 0.0   ;;  %10270 = vmatpush3.bf16.msra.mxu1 %v12771_v42 }
 0x142   :  { %v729_v5 = vmul.f32 %v9998_v62, %v718_v63  ;;  %v730_v7 = vmul.f32 %v9998_v62, %v719_v0  ;;  %v731_v8 = vmul.f32 %v9998_v62, %v720_v1  ;;  %v732_v9 = vmul.f32 %v9998_v62, %v721_v2  ;;  %953 = vst [vmem:[#allocation3] sm:$0xff] %v12352_v44 }
 0x143   :  { %954 = vst [vmem:[#allocation3 + $0x8] sm:$0xff] %v12352_v44  ;;  %955 = vst [vmem:[#allocation3 + $0x10] sm:$0x1] %v12352_v44  ;;  %10271 = vmatprep.subr.bf16.mxu1 %v12021_v45  ;;  %v12034_v45 = vld [vmem:[%s17748_s6 + $0x190] sm:$0xff]  }
 0x144   :  { %v740_v10 = vadd.f32 %v9999_v4, %v729_v5  ;;  %v741_v11 = vadd.f32 %v9999_v4, %v730_v7  ;;  %v742_v12 = vadd.f32 %v9999_v4, %v731_v8  ;;  %v743_v13 = vadd.f32 %v9999_v4, %v732_v9  ;;  %956 = vst [vmem:[#allocation3 + $0x18] sm:$0xff] %v12352_v44 }
 0x145   :  { %958 = vst [vmem:[#allocation3 + $0x28] sm:$0x1] %v12352_v44  ;;  %959 = vst [vmem:[#allocation3 + $0x30] sm:$0xff] %v12352_v44  ;;  %10272 = vmatpush3.bf16.msra.mxu1 %v12023_v47 }
 0x146   :  { %v11043_v14 = vpack.c.bf16 %v741_v11, %v740_v10  ;;  %v11047_v15 = vpack.c.bf16 %v743_v13, %v742_v12  ;;  %961 = vst [vmem:[#allocation3 + $0x40] sm:$0x1] %v12352_v44  ;;  %962 = vst [vmem:[#allocation3 + $0x48] sm:$0xff] %v12352_v44  ;;  %10273 = vmatprep.subr.bf16.mxu1 %v12025_v49  ;;  %v12030_v12 = vld [vmem:[%s17748_s6 + $0x180] sm:$0xff]  }
 0x147   :  { %964 = vst [vmem:[#allocation3 + $0x58] sm:$0x1] %v12352_v44  ;;  %965 = vst [vmem:[#allocation3 + $0x60] sm:$0xff] %v12352_v44 }
 0x148   :  { %11044 = vmatprep.subr.bf16.mxu0 %v11043_v14  ;;  %967 = vst [vmem:[#allocation3 + $0x70] sm:$0x1] %v12352_v44  ;;  %968 = vst [vmem:[#allocation3 + $0x78] sm:$0xff] %v12352_v44 }
 0x149   :  { %11046 = vmatpush3.bf16.msra.mxu0 %v11043_v14  ;;  %970 = vst [vmem:[#allocation3 + $0x88] sm:$0x1] %v12352_v44  ;;  %971 = vst [vmem:[#allocation3 + $0x90] sm:$0xff] %v12352_v44  ;;  %10274 = vmatpush3.bf16.msra.mxu1 %v12027_v51  ;;  %v12031_v14 = vld [vmem:[%s17748_s6 + $0x1c8] sm:$0xff]   ;;  %v12035_v51 = vld [vmem:[%s17748_s6 + $0x1d8] sm:$0xff]  }
 0x14a   :  { %11048 = vmatprep.subr.bf16.mxu0 %v11047_v15  ;;  %973 = vst [vmem:[#allocation3 + $0xa0] sm:$0x1] %v12352_v44  ;;  %974 = vst [vmem:[#allocation3 + $0xa8] sm:$0xff] %v12352_v44  ;;  %11083 = vmatprep.subr.bf16.mxu1 %v12643_v16  ;;  %v1030_v61 = vld [vmem:[#allocation3 + $0x7] sm:$0xff] }
 0x14b   :  { %976 = vst [vmem:[#allocation3 + $0xb8] sm:$0x1] %v12352_v44  ;;  %977 = vst [vmem:[#allocation3 + $0xc0] sm:$0xff] %v12352_v44  ;;  %v1078_v62 = vld [vmem:[#allocation3 + $0x9] sm:$0xff] }
 0x14c   :  { %979 = vst [vmem:[#allocation3 + $0xd0] sm:$0x1] %v12352_v44  ;;  %980 = vst [vmem:[#allocation3 + $0xd8] sm:$0xff] %v12352_v44 }
 0x14d   :  { %11050 = vmatpush3.bf16.msra.mxu0 %v11047_v15  ;;  %981 = vst [vmem:[#allocation3 + $0xe0] sm:$0xff] %v12352_v44  ;;  %982 = vst [vmem:[#allocation3 + $0xe8] sm:$0x1] %v12352_v44 }
 0x14e   :  { %10323 = vmatprep.subr.bf16.mxu0 %v12643_v16  ;;  %983 = vst [vmem:[#allocation3 + $0xf0] sm:$0xff] %v12352_v44  ;;  %984 = vst [vmem:[#allocation3 + $0xf8] sm:$0xff] %v12352_v44 }
 0x14f   :  { %985 = vst [vmem:[#allocation3 + $0x100] sm:$0x1] %v12352_v44  ;;  %986 = vst [vmem:[#allocation3 + $0x108] sm:$0xff] %v12352_v44 }
 0x150   :  { %10700 = vmatmul.mubr.msk.f32.vlgmr.msra.gmra.mrb[16].mxu0 %vm335_vm0, %v745_v17  ;;  %988 = vst [vmem:[#allocation3 + $0x118] sm:$0x1] %v12352_v44  ;;  %989 = vst [vmem:[#allocation3 + $0x120] sm:$0xff] %v12352_v44 }
 0x151   :  { %10702 = vmatprep.mubr.msk.f32.mxu0 %vm335_vm0, %v746_v19  ;;  %10324 = vmatpush3.bf16.msra.mxu0 %v12651_v18  ;;  %991 = vst [vmem:[#allocation3 + $0x130] sm:$0x1] %v12352_v44  ;;  %992 = vst [vmem:[#allocation3 + $0x138] sm:$0xff] %v12352_v44 }
 0x152   :  { %10325 = vmatprep.subr.bf16.mxu0 %v12660_v20  ;;  %994 = vst [vmem:[#allocation3 + $0x148] sm:$0x1] %v12352_v44  ;;  %995 = vst [vmem:[#allocation3 + $0x150] sm:$0xff] %v12352_v44 }
 0x153   :  { %997 = vst [vmem:[#allocation3 + $0x160] sm:$0x1] %v12352_v44  ;;  %998 = vst [vmem:[#allocation3 + $0x168] sm:$0xff] %v12352_v44 }
 0x154   :  { %10703 = vmatmul.mubr.msk.f32.gmra.mrb[18].mxu0 %vm335_vm0, %v747_v21  ;;  %1000 = vst [vmem:[#allocation3 + $0x178] sm:$0x1] %v12352_v44  ;;  %1001 = vst [vmem:[#allocation3 + $0x180] sm:$0xff] %v12352_v44 }
 0x155   :  { %10705 = vmatprep.mubr.msk.f32.mxu0 %vm335_vm0, %v748_v23  ;;  %10326 = vmatpush3.bf16.msra.mxu0 %v12671_v22  ;;  %1003 = vst [vmem:[#allocation3 + $0x190] sm:$0x1] %v12352_v44  ;;  %1004 = vst [vmem:[#allocation3 + $0x198] sm:$0xff] %v12352_v44 }
 0x156   :  { %10327 = vmatprep.subr.bf16.mxu0 %v12680_v6  ;;  %1006 = vst [vmem:[#allocation3 + $0x1a8] sm:$0x1] %v12352_v44  ;;  %1007 = vst [vmem:[#allocation3 + $0x1b0] sm:$0xff] %v12352_v44 }
 0x157   :  { %1009 = vst [vmem:[#allocation3 + $0x1c0] sm:$0x1] %v12352_v44  ;;  %1010 = vst [vmem:[#allocation3 + $0x1c8] sm:$0xff] %v12352_v44 }
 0x158   :  { %10706 = vmatmul.mubr.msk.f32.gmra.mrb[20].mxu0 %vm335_vm0, %v749_v24  ;;  %1011 = vst [vmem:[#allocation3 + $0x1d0] sm:$0xff] %v12352_v44  ;;  %1012 = vst [vmem:[#allocation3 + $0x1d8] sm:$0x1] %v12352_v44 }
 0x159   :  { %10708 = vmatprep.mubr.msk.f32.mxu0 %vm335_vm0, %v750_v26  ;;  %10328 = vmatpush3.bf16.msra.mxu0 %v12691_v25  ;;  %2953 = vst [vmem:[#allocation4] sm:$0xff] %v12352_v44  ;;  %2954 = vst [vmem:[#allocation4 + $0x8] sm:$0xff] %v12352_v44  ;;  %v12032_v26 = vld [vmem:[%s17748_s6 + $0x188] sm:$0xff]  }
 0x15a   :  { %10329 = vmatprep.subr.bf16.mxu0 %v12700_v27  ;;  %2955 = vst [vmem:[#allocation4 + $0x10] sm:$0xff] %v12352_v44  ;;  %2956 = vst [vmem:[#allocation4 + $0x18] sm:$0x1] %v12352_v44 }
 0x15b   :  { %2957 = vst [vmem:[#allocation4 + $0x20] sm:$0xff] %v12352_v44  ;;  %2960 = vst [vmem:[#allocation4 + $0x38] sm:$0x1] %v12352_v44 }
 0x15c   :  { %10709 = vmatmul.mubr.msk.f32.gmra.mrb[22].mxu0 %vm335_vm0, %v751_v28  ;;  %2961 = vst [vmem:[#allocation4 + $0x40] sm:$0xff] %v12352_v44  ;;  %2964 = vst [vmem:[#allocation4 + $0x58] sm:$0x1] %v12352_v44 }
 0x15d   :  { %10711 = vmatprep.mubr.msk.f32.mxu0 %vm335_vm0, %v752_v30  ;;  %10330 = vmatpush3.bf16.msra.mxu0 %v12711_v29  ;;  %2965 = vst [vmem:[#allocation4 + $0x60] sm:$0xff] %v12352_v44  ;;  %2968 = vst [vmem:[#allocation4 + $0x78] sm:$0x1] %v12352_v44 }
 0x15e   :  { %10331 = vmatprep.subr.bf16.mxu0 %v12720_v31  ;;  %2969 = vst [vmem:[#allocation4 + $0x80] sm:$0xff] %v12352_v44  ;;  %2972 = vst [vmem:[#allocation4 + $0x98] sm:$0x1] %v12352_v44 }
 0x15f   :  { %2973 = vst [vmem:[#allocation4 + $0xa0] sm:$0xff] %v12352_v44  ;;  %2976 = vst [vmem:[#allocation4 + $0xb8] sm:$0x1] %v12352_v44 }
 0x160   :  { %10712 = vmatmul.mubr.msk.f32.gmra.mrb[24].mxu0 %vm335_vm0, %v753_v32  ;;  %2977 = vst [vmem:[#allocation4 + $0xc0] sm:$0xff] %v12352_v44  ;;  %2980 = vst [vmem:[#allocation4 + $0xd8] sm:$0x1] %v12352_v44 }
 0x161   :  { %10714 = vmatprep.mubr.msk.f32.mxu0 %vm335_vm0, %v754_v34  ;;  %10332 = vmatpush3.bf16.msra.mxu0 %v12731_v33  ;;  %2981 = vst [vmem:[#allocation4 + $0xe0] sm:$0xff] %v12352_v44  ;;  %2984 = vst [vmem:[#allocation4 + $0xf8] sm:$0x1] %v12352_v44  ;;  %v12033_v34 = vld [vmem:[%s17748_s6 + $0x1d0] sm:$0xff]  }
 0x162   :  { %2985 = vst [vmem:[#allocation4 + $0x100] sm:$0xff] %v12352_v44  ;;  %2988 = vst [vmem:[#allocation4 + $0x118] sm:$0x1] %v12352_v44  ;;  %10333 = vmatprep.subr.bf16.mxu0 %v12766_v41 }
 0x163   :  { %2989 = vst [vmem:[#allocation4 + $0x120] sm:$0xff] %v12352_v44  ;;  %2992 = vst [vmem:[#allocation4 + $0x138] sm:$0x1] %v12352_v44 }
 0x164   :  { %10715 = vmatmul.mubr.msk.f32.gmra.mrb[26].mxu0 %vm335_vm0, %v755_v35  ;;  %2993 = vst [vmem:[#allocation4 + $0x140] sm:$0xff] %v12352_v44  ;;  %2996 = vst [vmem:[#allocation4 + $0x158] sm:$0x1] %v12352_v44 }
 0x165   :  { %10717 = vmatprep.mubr.msk.f32.mxu0 %vm335_vm0, %v756_v36  ;;  %2997 = vst [vmem:[#allocation4 + $0x160] sm:$0xff] %v12352_v44  ;;  %3000 = vst [vmem:[#allocation4 + $0x178] sm:$0x1] %v12352_v44  ;;  %10334 = vmatpush3.bf16.msra.mxu0 %v12776_v43 }
 0x166   :  { %3001 = vst [vmem:[#allocation4 + $0x180] sm:$0xff] %v12352_v44  ;;  %3004 = vst [vmem:[#allocation4 + $0x198] sm:$0x1] %v12352_v44  ;;  %10335 = vmatprep.subr.bf16.mxu0 %v12991_v46 }
 0x167   :  { %3005 = vst [vmem:[#allocation4 + $0x1a0] sm:$0xff] %v12352_v44  ;;  %3008 = vst [vmem:[#allocation4 + $0x1b8] sm:$0x1] %v12352_v44 }
 0x168   :  { %10718 = vmatmul.mubr.msk.f32.gmra.mrb[28].mxu0 %vm335_vm0, %v757_v37  ;;  %3009 = vst [vmem:[#allocation4 + $0x1c0] sm:$0xff] %v12352_v44  ;;  %3012 = vst [vmem:[#allocation4 + $0x1d8] sm:$0x1] %v12352_v44 }
 0x169   :  { %10720 = vmatprep.mubr.msk.f32.mxu0 %vm335_vm0, %v758_v38  ;;  %3013 = vst [vmem:[#allocation4 + $0x1e0] sm:$0xff] %v12352_v44  ;;  %3016 = vst [vmem:[#allocation4 + $0x1f8] sm:$0x1] %v12352_v44  ;;  %10336 = vmatpush3.bf16.msra.mxu0 %v12999_v48 }
 0x16a   :  { %3017 = vst [vmem:[#allocation4 + $0x200] sm:$0xff] %v12352_v44  ;;  %3020 = vst [vmem:[#allocation4 + $0x218] sm:$0x1] %v12352_v44  ;;  %10337 = vmatprep.subr.bf16.mxu0 %v13009_v50 }
 0x16b   :  { %3021 = vst [vmem:[#allocation4 + $0x220] sm:$0xff] %v12352_v44  ;;  %3022 = vst [vmem:[#allocation4 + $0x228] sm:$0xff] %v12352_v44 }
 0x16c   :  { %10721 = vmatmul.mubr.msk.f32.gmra.mrb[30].mxu0 %vm335_vm0, %v759_v39  ;;  %3023 = vst [vmem:[#allocation4 + $0x230] sm:$0xff] %v12352_v44  ;;  %3024 = vst [vmem:[#allocation4 + $0x238] sm:$0x1] %v12352_v44 }
 0x16d   :  { %3025 = vst [vmem:[#allocation4 + $0x240] sm:$0xff] %v12352_v44  ;;  %3026 = vst [vmem:[#allocation4 + $0x248] sm:$0xff] %v12352_v44  ;;  %10338 = vmatpush3.bf16.msra.mxu0 %v13017_v52 }
 0x16e   :  { %3027 = vst [vmem:[#allocation4 + $0x250] sm:$0xff] %v12352_v44  ;;  %3028 = vst [vmem:[#allocation4 + $0x258] sm:$0x1] %v12352_v44  ;;  %10451 = vmatprep.subr.bf16.mxu0 %v12029_v53 }
 0x16f   :  { %3029 = vst [vmem:[#allocation4 + $0x260] sm:$0xff] %v12352_v44  ;;  %3032 = vst [vmem:[#allocation4 + $0x278] sm:$0x1] %v12352_v44 }
 0x170   :  { %3033 = vst [vmem:[#allocation4 + $0x280] sm:$0xff] %v12352_v44  ;;  %3036 = vst [vmem:[#allocation4 + $0x298] sm:$0x1] %v12352_v44 }
 0x171   :  { %3037 = vst [vmem:[#allocation4 + $0x2a0] sm:$0xff] %v12352_v44  ;;  %3040 = vst [vmem:[#allocation4 + $0x2b8] sm:$0x1] %v12352_v44 }
 0x172   :  { %3041 = vst [vmem:[#allocation4 + $0x2c0] sm:$0xff] %v12352_v44  ;;  %3044 = vst [vmem:[#allocation4 + $0x2d8] sm:$0x1] %v12352_v44 }
 0x173   :  { %3045 = vst [vmem:[#allocation4 + $0x2e0] sm:$0xff] %v12352_v44  ;;  %3048 = vst [vmem:[#allocation4 + $0x2f8] sm:$0x1] %v12352_v44 }
 0x174   :  { %3049 = vst [vmem:[#allocation4 + $0x300] sm:$0xff] %v12352_v44  ;;  %3052 = vst [vmem:[#allocation4 + $0x318] sm:$0x1] %v12352_v44 }
 0x175   :  { %3053 = vst [vmem:[#allocation4 + $0x320] sm:$0xff] %v12352_v44  ;;  %3056 = vst [vmem:[#allocation4 + $0x338] sm:$0x1] %v12352_v44 }
 0x176   :  { %3057 = vst [vmem:[#allocation4 + $0x340] sm:$0xff] %v12352_v44  ;;  %3060 = vst [vmem:[#allocation4 + $0x358] sm:$0x1] %v12352_v44 }
 0x177   :  { %3061 = vst [vmem:[#allocation4 + $0x360] sm:$0xff] %v12352_v44  ;;  %3064 = vst [vmem:[#allocation4 + $0x378] sm:$0x1] %v12352_v44 }
 0x178   :  { %3065 = vst [vmem:[#allocation4 + $0x380] sm:$0xff] %v12352_v44  ;;  %3068 = vst [vmem:[#allocation4 + $0x398] sm:$0x1] %v12352_v44 }
 0x179   :  { %3069 = vst [vmem:[#allocation4 + $0x3a0] sm:$0xff] %v12352_v44  ;;  %3072 = vst [vmem:[#allocation4 + $0x3b8] sm:$0x1] %v12352_v44 }
 0x17a   :  { %3073 = vst [vmem:[#allocation4 + $0x3c0] sm:$0xff] %v12352_v44  ;;  %3076 = vst [vmem:[#allocation4 + $0x3d8] sm:$0x1] %v12352_v44 }
 0x17b   :  { %3077 = vst [vmem:[#allocation4 + $0x3e0] sm:$0xff] %v12352_v44  ;;  %3080 = vst [vmem:[#allocation4 + $0x3f8] sm:$0x1] %v12352_v44 }
 0x17c   :  { %3081 = vst [vmem:[#allocation4 + $0x400] sm:$0xff] %v12352_v44  ;;  %3084 = vst [vmem:[#allocation4 + $0x418] sm:$0x1] %v12352_v44 }
 0x17d   :  { %3085 = vst [vmem:[#allocation4 + $0x420] sm:$0xff] %v12352_v44  ;;  %3088 = vst [vmem:[#allocation4 + $0x438] sm:$0x1] %v12352_v44 }
 0x17e   :  { %3089 = vst [vmem:[#allocation4 + $0x440] sm:$0xff] %v12352_v44  ;;  %3092 = vst [vmem:[#allocation4 + $0x458] sm:$0x1] %v12352_v44 }
 0x17f   :  { %3093 = vst [vmem:[#allocation4 + $0x460] sm:$0xff] %v12352_v44  ;;  %3094 = vst [vmem:[#allocation4 + $0x468] sm:$0xff] %v12352_v44 }
 0x180   :  { %3095 = vst [vmem:[#allocation4 + $0x470] sm:$0xff] %v12352_v44  ;;  %3096 = vst [vmem:[#allocation4 + $0x478] sm:$0x1] %v12352_v44 }
 0x181   :  { %6724 = vst [vmem:[#allocation5] sm:$0xff] %v12352_v44  ;;  %6725 = vst [vmem:[#allocation5 + $0x8] sm:$0xff] %v12352_v44 }
 0x182   :  { %6726 = vst [vmem:[#allocation5 + $0x10] sm:$0xff] %v12352_v44  ;;  %6727 = vst [vmem:[#allocation5 + $0x18] sm:$0x1] %v12352_v44 }
 0x183   :  { %6728 = vst [vmem:[#allocation5 + $0x20] sm:$0xff] %v12352_v44  ;;  %6731 = vst [vmem:[#allocation5 + $0x38] sm:$0x1] %v12352_v44 }
 0x184   :  { %6732 = vst [vmem:[#allocation5 + $0x40] sm:$0xff] %v12352_v44  ;;  %6735 = vst [vmem:[#allocation5 + $0x58] sm:$0x1] %v12352_v44 }
 0x185   :  { %6736 = vst [vmem:[#allocation5 + $0x60] sm:$0xff] %v12352_v44  ;;  %6739 = vst [vmem:[#allocation5 + $0x78] sm:$0x1] %v12352_v44 }
 0x186   :  { %6740 = vst [vmem:[#allocation5 + $0x80] sm:$0xff] %v12352_v44  ;;  %6743 = vst [vmem:[#allocation5 + $0x98] sm:$0x1] %v12352_v44 }
 0x187   :  { %6744 = vst [vmem:[#allocation5 + $0xa0] sm:$0xff] %v12352_v44  ;;  %6747 = vst [vmem:[#allocation5 + $0xb8] sm:$0x1] %v12352_v44 }
 0x188   :  { %6748 = vst [vmem:[#allocation5 + $0xc0] sm:$0xff] %v12352_v44  ;;  %6751 = vst [vmem:[#allocation5 + $0xd8] sm:$0x1] %v12352_v44 }
 0x189   :  { %6752 = vst [vmem:[#allocation5 + $0xe0] sm:$0xff] %v12352_v44  ;;  %6755 = vst [vmem:[#allocation5 + $0xf8] sm:$0x1] %v12352_v44 }
 0x18a   :  { %6756 = vst [vmem:[#allocation5 + $0x100] sm:$0xff] %v12352_v44  ;;  %6759 = vst [vmem:[#allocation5 + $0x118] sm:$0x1] %v12352_v44 }
 0x18b   :  { %6760 = vst [vmem:[#allocation5 + $0x120] sm:$0xff] %v12352_v44  ;;  %6763 = vst [vmem:[#allocation5 + $0x138] sm:$0x1] %v12352_v44 }
 0x18c   :  { %6764 = vst [vmem:[#allocation5 + $0x140] sm:$0xff] %v12352_v44  ;;  %6767 = vst [vmem:[#allocation5 + $0x158] sm:$0x1] %v12352_v44 }
 0x18d   :  { %6768 = vst [vmem:[#allocation5 + $0x160] sm:$0xff] %v12352_v44  ;;  %6771 = vst [vmem:[#allocation5 + $0x178] sm:$0x1] %v12352_v44 }
 0x18e   :  { %6772 = vst [vmem:[#allocation5 + $0x180] sm:$0xff] %v12352_v44  ;;  %6775 = vst [vmem:[#allocation5 + $0x198] sm:$0x1] %v12352_v44 }
 0x18f   :  { %6776 = vst [vmem:[#allocation5 + $0x1a0] sm:$0xff] %v12352_v44  ;;  %6779 = vst [vmem:[#allocation5 + $0x1b8] sm:$0x1] %v12352_v44 }
 0x190   :  { %6780 = vst [vmem:[#allocation5 + $0x1c0] sm:$0xff] %v12352_v44  ;;  %6783 = vst [vmem:[#allocation5 + $0x1d8] sm:$0x1] %v12352_v44 }
 0x191   :  { %6784 = vst [vmem:[#allocation5 + $0x1e0] sm:$0xff] %v12352_v44  ;;  %6787 = vst [vmem:[#allocation5 + $0x1f8] sm:$0x1] %v12352_v44 }
 0x192   :  { %6788 = vst [vmem:[#allocation5 + $0x200] sm:$0xff] %v12352_v44  ;;  %6791 = vst [vmem:[#allocation5 + $0x218] sm:$0x1] %v12352_v44 }
 0x193   :  { %6792 = vst [vmem:[#allocation5 + $0x220] sm:$0xff] %v12352_v44  ;;  %6793 = vst [vmem:[#allocation5 + $0x228] sm:$0xff] %v12352_v44 }
 0x194   :  { %6794 = vst [vmem:[#allocation5 + $0x230] sm:$0xff] %v12352_v44  ;;  %6795 = vst [vmem:[#allocation5 + $0x238] sm:$0x1] %v12352_v44 }
 0x195   :  { %6796 = vst [vmem:[#allocation5 + $0x240] sm:$0xff] %v12352_v44  ;;  %6797 = vst [vmem:[#allocation5 + $0x248] sm:$0xff] %v12352_v44 }
 0x196   :  { %6798 = vst [vmem:[#allocation5 + $0x250] sm:$0xff] %v12352_v44  ;;  %6799 = vst [vmem:[#allocation5 + $0x258] sm:$0x1] %v12352_v44 }
 0x197   :  { %6800 = vst [vmem:[#allocation5 + $0x260] sm:$0xff] %v12352_v44  ;;  %6803 = vst [vmem:[#allocation5 + $0x278] sm:$0x1] %v12352_v44 }
 0x198   :  { %6804 = vst [vmem:[#allocation5 + $0x280] sm:$0xff] %v12352_v44  ;;  %6807 = vst [vmem:[#allocation5 + $0x298] sm:$0x1] %v12352_v44 }
 0x199   :  { %6808 = vst [vmem:[#allocation5 + $0x2a0] sm:$0xff] %v12352_v44  ;;  %6811 = vst [vmem:[#allocation5 + $0x2b8] sm:$0x1] %v12352_v44 }
 0x19a   :  { %6812 = vst [vmem:[#allocation5 + $0x2c0] sm:$0xff] %v12352_v44  ;;  %6815 = vst [vmem:[#allocation5 + $0x2d8] sm:$0x1] %v12352_v44 }
 0x19b   :  { %6816 = vst [vmem:[#allocation5 + $0x2e0] sm:$0xff] %v12352_v44  ;;  %6819 = vst [vmem:[#allocation5 + $0x2f8] sm:$0x1] %v12352_v44 }
 0x19c   :  { %6820 = vst [vmem:[#allocation5 + $0x300] sm:$0xff] %v12352_v44  ;;  %6823 = vst [vmem:[#allocation5 + $0x318] sm:$0x1] %v12352_v44 }
 0x19d   :  { %6824 = vst [vmem:[#allocation5 + $0x320] sm:$0xff] %v12352_v44  ;;  %6827 = vst [vmem:[#allocation5 + $0x338] sm:$0x1] %v12352_v44 }
 0x19e   :  { %6828 = vst [vmem:[#allocation5 + $0x340] sm:$0xff] %v12352_v44  ;;  %6831 = vst [vmem:[#allocation5 + $0x358] sm:$0x1] %v12352_v44 }
 0x19f   :  { %6832 = vst [vmem:[#allocation5 + $0x360] sm:$0xff] %v12352_v44  ;;  %6835 = vst [vmem:[#allocation5 + $0x378] sm:$0x1] %v12352_v44 }
 0x1a0   :  { %6836 = vst [vmem:[#allocation5 + $0x380] sm:$0xff] %v12352_v44  ;;  %6839 = vst [vmem:[#allocation5 + $0x398] sm:$0x1] %v12352_v44 }
 0x1a1   :  { %6840 = vst [vmem:[#allocation5 + $0x3a0] sm:$0xff] %v12352_v44  ;;  %6843 = vst [vmem:[#allocation5 + $0x3b8] sm:$0x1] %v12352_v44 }
 0x1a2   :  { %6844 = vst [vmem:[#allocation5 + $0x3c0] sm:$0xff] %v12352_v44  ;;  %6847 = vst [vmem:[#allocation5 + $0x3d8] sm:$0x1] %v12352_v44 }
 0x1a3   :  { %6848 = vst [vmem:[#allocation5 + $0x3e0] sm:$0xff] %v12352_v44  ;;  %6851 = vst [vmem:[#allocation5 + $0x3f8] sm:$0x1] %v12352_v44 }
 0x1a4   :  { %6852 = vst [vmem:[#allocation5 + $0x400] sm:$0xff] %v12352_v44  ;;  %6855 = vst [vmem:[#allocation5 + $0x418] sm:$0x1] %v12352_v44 }
 0x1a5   :  { %6856 = vst [vmem:[#allocation5 + $0x420] sm:$0xff] %v12352_v44  ;;  %6859 = vst [vmem:[#allocation5 + $0x438] sm:$0x1] %v12352_v44 }
 0x1a6   :  { %6860 = vst [vmem:[#allocation5 + $0x440] sm:$0xff] %v12352_v44  ;;  %6863 = vst [vmem:[#allocation5 + $0x458] sm:$0x1] %v12352_v44 }
 0x1a7   :  { %6864 = vst [vmem:[#allocation5 + $0x460] sm:$0xff] %v12352_v44  ;;  %6865 = vst [vmem:[#allocation5 + $0x468] sm:$0xff] %v12352_v44 }
 0x1a8   :  { %6866 = vst [vmem:[#allocation5 + $0x470] sm:$0xff] %v12352_v44  ;;  %6867 = vst [vmem:[#allocation5 + $0x478] sm:$0x1] %v12352_v44 }
 0x223   :  { %v10701_v54 = vpop.f32.mrb[16].mxu0 }
 0x224   :  { %1015 = vst [vmem:[#allocation3 + $0x38] sm:$0xff] %v10701_v54  ;;  %v13025_v55 = vpop.f32.mrb[17].mxu0 }
 0x225   :  { %1014 = vst [vmem:[#allocation3 + $0x20] sm:$0xff] %v13025_v55  ;;  %v1070_v56 = vpack.c.bf16 %v13025_v55, %v12352_v44 }
 0x227   :  { %v13030_v57 = vpop.f32.mrb[18].mxu0  ;;  %1862 = vmatprep.mubr.bf16.mxu1 %v1070_v56 }
 0x228   :  { %1017 = vst [vmem:[#allocation3 + $0x68] sm:$0xff] %v13030_v57  ;;  %v13033_v58 = vpop.f32.mrb[19].mxu0 }
 0x229   :  { %1016 = vst [vmem:[#allocation3 + $0x50] sm:$0xff] %v13033_v58  ;;  %v1071_v59 = vpack.c.bf16 %v13033_v58, %v10701_v54  ;;  %v1143_v60 = vpack.c.bf16 %v13030_v57, %v13033_v58 }
 0x22b   :  { %v13039_v63 = vpop.f32.mrb[20].mxu0  ;;  %v1103_v0 = vld [vmem:[#allocation3 + $0x37] sm:$0xff] }
 0x22c   :  { %v13041_v1 = vld [vmem:[#allocation3 + $0x39] sm:$0xff]  ;;  %1019 = vst [vmem:[#allocation3 + $0x98] sm:$0xff] %v13039_v63  ;;  %v13046_v4 = vpop.f32.mrb[21].mxu0  ;;  %v13048_v7 = vld [vmem:[#allocation3 + $0x21] sm:$0xff] }
 0x22d   :  { %v13043_v2 = vld [vmem:[#allocation3 + $0x38] sm:$0xff]  ;;  %1018 = vst [vmem:[#allocation3 + $0x80] sm:$0xff] %v13046_v4  ;;  %v1094_v11 = vpack.c.bf16 %v13048_v7, %v1078_v62  ;;  %v13059_v13 = vpack.c.bf16 %v13046_v4, %v13030_v57  ;;  %v1166_v15 = vpack.c.bf16 %v13041_v1, %v13048_v7  ;;  %v1144_v16 = vpack.c.bf16 %v13039_v63, %v13046_v4 }
 0x22e   :  { %v1102_v5 = vld [vmem:[#allocation3 + $0x1f] sm:$0xff]  ;;  %v1142_v8 = vpack.c.bf16 %v13043_v2, %v13025_v55 }
 0x22f   :  { %v1118_v9 = vpack.c.bf16 %v1103_v0, %v1102_v5  ;;  %v1046_v10 = vpack.c.bf16 %v1102_v5, %v1030_v61  ;;  %v13068_v17 = vpop.f32.mrb[22].mxu0  ;;  %v1105_v19 = vld [vmem:[#allocation3 + $0x67] sm:$0xff]  ;;  %v12064_v7 = vld [vmem:[%s17748_s6 + $0x218] sm:$0xff]  }
 0x230   :  { %v13070_v21 = vld [vmem:[#allocation3 + $0x69] sm:$0xff]  ;;  %1021 = vst [vmem:[#allocation3 + $0xc8] sm:$0xff] %v13068_v17  ;;  %v13073_v23 = vpop.f32.mrb[23].mxu0  ;;  %v13079_v30 = vld [vmem:[#allocation3 + $0x51] sm:$0xff]  ;;  %v12065_v55 = vld [vmem:[%s17748_s6 + $0x220] sm:$0xff]  }
 0x231   :  { %1959 = vmatprep.mubr.bf16.mxu0 %v1118_v9  ;;  %1863 = vmatmul.mubr.bf16.vlgmr.msra.gmra.mrb[16].mxu1 %v1046_v10  ;;  %v1104_v24 = vld [vmem:[#allocation3 + $0x4f] sm:$0xff]  ;;  %1020 = vst [vmem:[#allocation3 + $0xb0] sm:$0xff] %v13073_v23  ;;  %v13083_v32 = vpack.c.bf16 %v13073_v23, %v13039_v63  ;;  %v1167_v35 = vpack.c.bf16 %v13070_v21, %v13079_v30 }
 0x232   :  { %1960 = vmatmul.mubr.bf16.vlgmr.msra.gmra.mrb[32].mxu0 %v1094_v11  ;;  %1870 = vmatprep.mubr.bf16.mxu1 %v1071_v59  ;;  %v1119_v28 = vpack.c.bf16 %v1105_v19, %v1104_v24  ;;  %v1145_v36 = vpack.c.bf16 %v13068_v17, %v13073_v23 }
 0x233   :  { %10452 = vmatpush3.bf16.msra.mxu0 %v12030_v12  ;;  %11091 = vmatpush3.bf16.msra.mxu1 %v12651_v18  ;;  %v13093_v37 = vld [vmem:[#allocation3 + $0x97] sm:$0xff]  ;;  %v13095_v38 = vpop.f32.mrb[24].mxu0  ;;  %v13103_v18 = vpack.c.bf16 %v1104_v24, %v1103_v0  ;;  %v12038_v12 = vld [vmem:[%s17748_s6 + $0x1a0] sm:$0xff]  }
 0x234   :  { %10453 = vmatprep.subr.bf16.mxu0 %v12031_v14  ;;  %1967 = vmatprep.mubr.bf16.mxu0 %v1119_v28  ;;  %v13097_v39 = vld [vmem:[#allocation3 + $0x99] sm:$0xff]  ;;  %1023 = vst [vmem:[#allocation3 + $0x128] sm:$0xff] %v13095_v38  ;;  %v13101_v42 = vpop.f32.mrb[25].mxu0  ;;  %v13109_v49 = vld [vmem:[#allocation3 + $0x81] sm:$0xff] }
 0x235   :  { %11084 = vmatprep.subr.bf16.mxu1 %v12660_v20  ;;  %v1106_v40 = vld [vmem:[#allocation3 + $0x7f] sm:$0xff]  ;;  %1022 = vst [vmem:[#allocation3 + $0x110] sm:$0xff] %v13101_v42  ;;  %v13114_v20 = vpack.c.bf16 %v13079_v30, %v13041_v1  ;;  %v1168_v53 = vpack.c.bf16 %v13097_v39, %v13109_v49  ;;  %v1146_v54 = vpack.c.bf16 %v13095_v38, %v13101_v42  ;;  %v12063_v1 = vld [vmem:[%s17748_s6 + $0x210] sm:$0xff]  }
 0x236   :  { %v1120_v47 = vpack.c.bf16 %v13093_v37, %v1106_v40  ;;  %v1048_v11 = vpack.c.bf16 %v1106_v40, %v1105_v19  ;;  %v12039_v19 = vld [vmem:[%s17748_s6 + $0x1e8] sm:$0xff]   ;;  %v1238_v30 = vld [vmem:[#allocation3 + $0x1d1] sm:$0xff] }
 0x237   :  { %10454 = vmatpush3.bf16.msra.mxu0 %v12032_v26  ;;  %11092 = vmatpush3.bf16.msra.mxu1 %v12671_v22  ;;  %v13125_v56 = vpop.f32.mrb[26].mxu0  ;;  %v12036_v22 = vld [vmem:[%s17748_s6 + $0x198] sm:$0xff]   ;;  %v13140_v61 = vld [vmem:[#allocation3 + $0xc7] sm:$0xff] }
 0x238   :  { %10455 = vmatprep.subr.bf16.mxu0 %v12033_v34  ;;  %11085 = vmatprep.subr.bf16.mxu1 %v12680_v6  ;;  %1025 = vst [vmem:[#allocation3 + $0x158] sm:$0xff] %v13125_v56  ;;  %v13131_v59 = vpop.f32.mrb[27].mxu0  ;;  %v12037_v6 = vld [vmem:[%s17748_s6 + $0x1e0] sm:$0xff]   ;;  %v1108_v9 = vld [vmem:[#allocation3 + $0xaf] sm:$0xff] }
 0x239   :  { %1871 = vmatmul.mubr.bf16.gmra.mrb[20].mxu1 %v13103_v18  ;;  %1024 = vst [vmem:[#allocation3 + $0x140] sm:$0xff] %v13131_v59  ;;  %v13144_v62 = vpack.c.bf16 %v13131_v59, %v13095_v38  ;;  %v1147_v0 = vpack.c.bf16 %v13125_v56, %v13131_v59 }
 0x23a   :  { %1968 = vmatmul.mubr.bf16.gmra.mrb[36].mxu0 %v13114_v20  ;;  %1878 = vmatprep.mubr.bf16.mxu1 %v13059_v13 }
 0x23b   :  { %10456 = vmatpush3.bf16.msra.mxu0 %v12034_v45  ;;  %1975 = vmatprep.mubr.bf16.mxu0 %v1120_v47  ;;  %v13149_v5 = vpop.f32.mrb[28].mxu0  ;;  %v13196_v45 = vld [vmem:[#allocation3 + $0xb1] sm:$0xff]  ;;  %v1049_v47 = vpack.c.bf16 %v1108_v9, %v13093_v37 }
 0x23c   :  { %10457 = vmatprep.subr.bf16.mxu0 %v12035_v51  ;;  %11093 = vmatpush3.bf16.msra.mxu1 %v12691_v25  ;;  %1027 = vst [vmem:[#allocation3 + $0x188] sm:$0xff] %v13149_v5  ;;  %v13153_v10 = vpop.f32.mrb[29].mxu0  ;;  %v1121_v25 = vpack.c.bf16 %v13140_v61, %v1108_v9  ;;  %v12042_v51 = vld [vmem:[%s17748_s6 + $0x1b0] sm:$0xff]  }
 0x23d   :  { %11086 = vmatprep.subr.bf16.mxu1 %v12700_v27  ;;  %1026 = vst [vmem:[#allocation3 + $0x170] sm:$0xff] %v13153_v10  ;;  %v13162_v14 = vpack.c.bf16 %v13153_v10, %v13125_v56  ;;  %v13166_v27 = vpack.c.bf16 %v13109_v49, %v13070_v21  ;;  %v1148_v24 = vpack.c.bf16 %v13149_v5, %v13153_v10  ;;  %v1038_v37 = vld [vmem:[#allocation3 + $0xf7] sm:$0xff]  ;;  %v1039_v9 = vld [vmem:[#allocation3 + $0x10f] sm:$0xff]  ;;  %v1230_v21 = vld [vmem:[#allocation3 + $0xe1] sm:$0xff] }
 0x23f   :  { %10458 = vmatpush3.bf16.msra.mxu0 %v12036_v22  ;;  %v13174_v26 = vpop.f32.mrb[30].mxu0  ;;  %v13205_v22 = vpack.c.bf16 %v13196_v45, %v13097_v39  ;;  %v13382_v39 = vld [vmem:[%s17751_s7] ss:$0 sm:$0xff] }
 0x240   :  { %10459 = vmatprep.subr.bf16.mxu0 %v12037_v6  ;;  %11094 = vmatpush3.bf16.msra.mxu1 %v12711_v29  ;;  %1029 = vst [vmem:[#allocation3 + $0x1b8] sm:$0xff] %v13174_v26  ;;  %v13180_v28 = vpop.f32.mrb[31].mxu0  ;;  %v12040_v29 = vld [vmem:[%s17748_s6 + $0x1a8] sm:$0xff]   ;;  %v1074_v6 = vpack.c.bf16 %v13101_v42, %v12352_v44 }
 0x241   :  { %1879 = vmatmul.mubr.bf16.gmra.mrb[24].mxu1 %v1048_v11  ;;  %11087 = vmatprep.subr.bf16.mxu1 %v12720_v31  ;;  %1028 = vst [vmem:[#allocation3 + $0x1a0] sm:$0xff] %v13180_v28  ;;  %v13188_v34 = vpack.c.bf16 %v13180_v28, %v13149_v5  ;;  %v12041_v31 = vld [vmem:[%s17748_s6 + $0x1f0] sm:$0xff]   ;;  %v1149_v40 = vpack.c.bf16 %v13174_v26, %v13180_v28 }
 0x242   :  { %1976 = vmatmul.mubr.bf16.gmra.mrb[40].mxu0 %v13166_v27  ;;  %1886 = vmatprep.mubr.bf16.mxu1 %v13083_v32 }
 0x243   :  { %10460 = vmatpush3.bf16.msra.mxu0 %v12038_v12  ;;  %1983 = vmatprep.mubr.bf16.mxu0 %v1121_v25  ;;  %v12044_v12 = vld [vmem:[%s17748_s6 + $0x1b8] sm:$0xff]   ;;  %v1040_v25 = vld [vmem:[#allocation3 + $0x127] sm:$0xff] }
 0x244   :  { %10461 = vmatprep.subr.bf16.mxu0 %v12039_v19  ;;  %11095 = vmatpush3.bf16.msra.mxu1 %v12731_v33  ;;  %v12043_v33 = vld [vmem:[%s17748_s6 + $0x1f8] sm:$0xff]  }
 0x245   :  { %11088 = vmatprep.subr.bf16.mxu1 %v12766_v41  ;;  %v1215_v41 = vpack.c.bf16 %v13033_v58, %v13043_v2  ;;  %v1157_v2 = vld [vmem:[#allocation3 + $0xc9] sm:$0xff] }
 0x246   :  { %v1169_v57 = vpack.c.bf16 %v1157_v2, %v13196_v45  ;;  %v12067_v58 = vld [vmem:[%s17748_s6 + $0x230] sm:$0xff]   ;;  %v1242_v23 = vpack.c.bf16 %v1230_v21, %v1157_v2 }
 0x247   :  { %10462 = vmatpush3.bf16.msra.mxu0 %v12040_v29  ;;  %v1043_v29 = vld [vmem:[#allocation3 + $0x16f] sm:$0xff] }
 0x248   :  { %10463 = vmatprep.subr.bf16.mxu0 %v12041_v31  ;;  %11096 = vmatpush3.bf16.msra.mxu1 %v12776_v43  ;;  %v1050_v43 = vpack.c.bf16 %v1039_v9, %v1038_v37  ;;  %v1045_v31 = vld [vmem:[#allocation3 + $0x19f] sm:$0xff] }
 0x249   :  { %1887 = vmatmul.mubr.bf16.gmra.mrb[28].mxu1 %v1049_v47  ;;  %11089 = vmatprep.subr.bf16.mxu1 %v12991_v46  ;;  %v12045_v46 = vld [vmem:[%s17748_s6 + $0x140] sm:$0xff]  }
 0x24a   :  { %1984 = vmatmul.mubr.bf16.gmra.mrb[44].mxu0 %v13205_v22  ;;  %1894 = vmatprep.mubr.bf16.mxu1 %v1074_v6  ;;  %v1122_v6 = vpack.c.bf16 %v1040_v25, %v1039_v9  ;;  %v12046_v37 = vld [vmem:[%s17748_s6 + $0x100] sm:$0xff]   ;;  %v13249_v9 = vld [vmem:[#allocation3 + $0x129] sm:$0xff] }
 0x24b   :  { %10464 = vmatpush3.bf16.msra.mxu0 %v12042_v51  ;;  %2153 = vmatprep.mubr.bf16.mxu0 %v1215_v41  ;;  %v1182_v51 = vld [vmem:[#allocation3 + $0xdf] sm:$0xff]  ;;  %v13236_v41 = vld [vmem:[#allocation3 + $0x111] sm:$0xff] }
 0x24c   :  { %10465 = vmatprep.subr.bf16.mxu0 %v12043_v33  ;;  %11097 = vmatpush3.bf16.msra.mxu1 %v12999_v48  ;;  %v1041_v48 = vld [vmem:[#allocation3 + $0x13f] sm:$0xff] }
 0x24d   :  { %11090 = vmatprep.subr.bf16.mxu1 %v13009_v50  ;;  %v1051_v19 = vpack.c.bf16 %v1041_v48, %v1040_v25  ;;  %v1042_v50 = vld [vmem:[#allocation3 + $0x157] sm:$0xff] }
 0x24f   :  { %10466 = vmatpush3.bf16.msra.mxu0 %v12044_v12  ;;  %v1123_v12 = vpack.c.bf16 %v1042_v50, %v1041_v48 }
 0x250   :  { %11098 = vmatpush3.bf16.msra.mxu1 %v13017_v52  ;;  %v1052_v52 = vpack.c.bf16 %v1043_v29, %v1042_v50  ;;  %v12052_v50 = vld [vmem:[%s17748_s6 + $0x118] sm:$0xff]  }
 0x251   :  { %1895 = vmatmul.mubr.bf16.gmra.mrb[32].mxu1 %v1050_v43  ;;  %10387 = vmatprep.subr.bf16.mxu1 %v12045_v46  ;;  %v13251_v43 = vld [vmem:[#allocation3 + $0x141] sm:$0xff]  ;;  %v12049_v46 = vld [vmem:[%s17748_s6 + $0x150] sm:$0xff]  }
 0x252   :  { %2154 = vmatmul.mubr.bf16.vlgmr.msra.gmra.mrb[48].mxu0 %v13103_v18  ;;  %1902 = vmatprep.mubr.bf16.mxu1 %v13144_v62  ;;  %v1218_v18 = vpack.c.bf16 %v12352_v44, %v13068_v17  ;;  %v13258_v25 = vpack.c.bf16 %v13251_v43, %v13249_v9 }
 0x253   :  { %2161 = vmatprep.mubr.bf16.mxu0 %v13059_v13  ;;  %v1044_v13 = vld [vmem:[#allocation3 + $0x187] sm:$0xff] }
 0x254   :  { %v1053_v33 = vpack.c.bf16 %v1045_v31, %v1044_v13  ;;  %v1124_v48 = vpack.c.bf16 %v1044_v13, %v1043_v29  ;;  %v12053_v29 = vld [vmem:[%s17748_s6 + $0x160] sm:$0xff]   ;;  %v1117_v13 = vld [vmem:[#allocation3 + $0x1b7] sm:$0xff] }
 0x259   :  { %1903 = vmatmul.mubr.bf16.gmra.mrb[36].mxu1 %v1051_v19 }
 0x25a   :  { %2162 = vmatmul.mubr.bf16.gmra.mrb[52].mxu0 %v1048_v11  ;;  %1910 = vmatprep.mubr.bf16.mxu1 %v13162_v14  ;;  %v1194_v11 = vpack.c.bf16 %v1182_v51, %v13140_v61  ;;  %v12047_v61 = vld [vmem:[%s17748_s6 + $0x148] sm:$0xff]   ;;  %v13273_v51 = vld [vmem:[#allocation3 + $0x171] sm:$0xff] }
 0x25b   :  { %2169 = vmatprep.mubr.bf16.mxu0 %v13083_v32  ;;  %v1086_v32 = vld [vmem:[#allocation3 + $0xf9] sm:$0xff] }
 0x261   :  { %1911 = vmatmul.mubr.bf16.gmra.mrb[40].mxu1 %v1052_v52 }
 0x262   :  { %2170 = vmatmul.mubr.bf16.gmra.mrb[56].mxu0 %v1049_v47  ;;  %1918 = vmatprep.mubr.bf16.mxu1 %v13188_v34  ;;  %v1098_v47 = vpack.c.bf16 %v13236_v41, %v1086_v32  ;;  %v1222_v32 = vpack.c.bf16 %v12352_v44, %v13174_v26  ;;  %v12058_v44 = vld [vmem:[%s17748_s6 + $0x130] sm:$0xff]  }
 0x263   :  { %2177 = vmatprep.mubr.bf16.mxu0 %v1218_v18  ;;  %v13271_v18 = vld [vmem:[#allocation3 + $0x159] sm:$0xff] }
 0x264   :  { %v1171_v63 = vpack.c.bf16 %v13271_v18, %v13251_v43 }
 0x269   :  { %1919 = vmatmul.mubr.bf16.gmra.mrb[44].mxu1 %v1053_v33 }
 0x26a   :  { %2178 = vmatmul.mubr.bf16.gmra.mrb[60].mxu0 %v1194_v11  ;;  %1991 = vmatprep.mubr.bf16.mxu1 %v1122_v6  ;;  %v1125_v11 = vpack.c.bf16 %v1117_v13, %v1045_v31  ;;  %v12055_v6 = vld [vmem:[%s17748_s6 + $0x168] sm:$0xff]  }
 0x26b   :  { %2185 = vmatprep.mubr.bf16.mxu0 %v13144_v62  ;;  %v12048_v62 = vld [vmem:[%s17748_s6 + $0x108] sm:$0xff]  }
 0x26c   :  { %v1093_v31 = vld [vmem:[#allocation3 + $0x1a1] sm:$0xff] }
 0x271   :  { %1992 = vmatmul.mubr.bf16.vlgmr.msra.gmra.mrb[48].mxu1 %v1098_v47  ;;  %v12056_v47 = vld [vmem:[%s17748_s6 + $0x128] sm:$0xff]  }
 0x272   :  { %2186 = vmatmul.mubr.bf16.gmra.mrb[64].mxu0 %v1051_v19  ;;  %1999 = vmatprep.mubr.bf16.mxu1 %v1123_v12  ;;  %v12051_v19 = vld [vmem:[%s17748_s6 + $0x158] sm:$0xff]   ;;  %v12057_v12 = vld [vmem:[%s17748_s6 + $0x170] sm:$0xff]  }
 0x273   :  { %10388 = vmatpush3.bf16.msra.mxu1 %v12046_v37  ;;  %2193 = vmatprep.mubr.bf16.mxu0 %v13162_v14  ;;  %v12050_v14 = vld [vmem:[%s17748_s6 + $0x110] sm:$0xff]  }
 0x274   :  { %10389 = vmatprep.subr.bf16.mxu1 %v12047_v61  ;;  %v1092_v37 = vld [vmem:[#allocation3 + $0x189] sm:$0xff] }
 0x275   :  { %v1190_v61 = vld [vmem:[#allocation3 + $0x1cf] sm:$0xff]  ;;  %v1172_v4 = vpack.c.bf16 %v1092_v37, %v13273_v51 }
 0x277   :  { %10390 = vmatpush3.bf16.msra.mxu1 %v12048_v62  ;;  %v13297_v62 = vpack.c.bf16 %v1093_v31, %v1092_v37 }
 0x278   :  { %10391 = vmatprep.subr.bf16.mxu1 %v12049_v46  ;;  %v12059_v46 = vld [vmem:[%s17748_s6 + $0x178] sm:$0xff]  }
 0x279   :  { %2000 = vmatmul.mubr.bf16.gmra.mrb[52].mxu1 %v13258_v25 }
 0x27a   :  { %2194 = vmatmul.mubr.bf16.gmra.mrb[68].mxu0 %v1052_v52  ;;  %2007 = vmatprep.mubr.bf16.mxu1 %v1124_v48  ;;  %v13280_v52 = vpack.c.bf16 %v13273_v51, %v13271_v18  ;;  %v12061_v48 = vld [vmem:[%s17748_s6 + $0x200] sm:$0xff]  }
 0x27b   :  { %10392 = vmatpush3.bf16.msra.mxu1 %v12050_v14  ;;  %2201 = vmatprep.mubr.bf16.mxu0 %v13188_v34  ;;  %v12054_v34 = vld [vmem:[%s17748_s6 + $0x120] sm:$0xff]   ;;  %v12060_v14 = vld [vmem:[%s17748_s6 + $0x138] sm:$0xff]  }
 0x27c   :  { %10393 = vmatprep.subr.bf16.mxu1 %v12051_v19  ;;  %v12062_v19 = vld [vmem:[%s17748_s6 + $0x208] sm:$0xff]  }
 0x27f   :  { %10394 = vmatpush3.bf16.msra.mxu1 %v12052_v50 }
 0x280   :  { %10395 = vmatprep.subr.bf16.mxu1 %v12053_v29 }
 0x281   :  { %2008 = vmatmul.mubr.bf16.gmra.mrb[56].mxu1 %v13280_v52 }
 0x282   :  { %2202 = vmatmul.mubr.bf16.gmra.mrb[72].mxu0 %v1053_v33  ;;  %2015 = vmatprep.mubr.bf16.mxu1 %v1125_v11  ;;  %v1198_v33 = vpack.c.bf16 %v1190_v61, %v1117_v13 }
 0x283   :  { %10396 = vmatpush3.bf16.msra.mxu1 %v12054_v34  ;;  %2209 = vmatprep.mubr.bf16.mxu0 %v1222_v32 }
 0x284   :  { %10397 = vmatprep.subr.bf16.mxu1 %v12055_v6 }
 0x287   :  { %10398 = vmatpush3.bf16.msra.mxu1 %v12056_v47 }
 0x288   :  { %10399 = vmatprep.subr.bf16.mxu1 %v12057_v12 }
 0x289   :  { %2016 = vmatmul.mubr.bf16.gmra.mrb[60].mxu1 %v13297_v62 }
 0x28a   :  { %2210 = vmatmul.mubr.bf16.gmra.mrb[76].mxu0 %v1198_v33  ;;  %2056 = vmatprep.mubr.bf16.mxu1 %v1166_v15  ;;  %v1170_v15 = vpack.c.bf16 %v13249_v9, %v13236_v41 }
 0x28b   :  { %10400 = vmatpush3.bf16.msra.mxu1 %v12058_v44 }
 0x28c   :  { %10401 = vmatprep.subr.bf16.mxu1 %v12059_v46 }
 0x28f   :  { %10402 = vmatpush3.bf16.msra.mxu1 %v12060_v14 }
 0x290   :  { %10723 = vmatprep.subr.bf16.mxu1 %v12061_v48 }
 0x292   :  { %2057 = vmatmul.mubr.bf16.vlgmr.msra.gmra.mrb[64].mxu1 %v1142_v8  ;;  %v12066_v8 = vld [vmem:[%s17748_s6 + $0x228] sm:$0xff]  }
 0x293   :  { %2064 = vmatprep.mubr.bf16.mxu1 %v1167_v35  ;;  %10724 = vmatpush3.bf16.msra.mxu1 %v12061_v48 }
 0x294   :  { %10725 = vmatprep.subr.bf16.mxu1 %v12062_v19 }
 0x297   :  { %10726 = vmatpush3.bf16.msra.mxu1 %v12062_v19 }
 0x298   :  { %10727 = vmatprep.subr.bf16.mxu1 %v12063_v1 }
 0x29a   :  { %2065 = vmatmul.mubr.bf16.gmra.mrb[68].mxu1 %v1143_v60  ;;  %v12068_v60 = vld [vmem:[%s17748_s6 + $0x238] sm:$0xff]  }
 0x29b   :  { %2072 = vmatprep.mubr.bf16.mxu1 %v1168_v53  ;;  %10728 = vmatpush3.bf16.msra.mxu1 %v12063_v1 }
 0x29c   :  { %10729 = vmatprep.subr.bf16.mxu1 %v12064_v7 }
 0x29f   :  { %10730 = vmatpush3.bf16.msra.mxu1 %v12064_v7 }
 0x2a0   :  { %10731 = vmatprep.subr.bf16.mxu1 %v12065_v55 }
 0x2a2   :  { %2073 = vmatmul.mubr.bf16.gmra.mrb[72].mxu1 %v1144_v16  ;;  %v1165_v16 = vld [vmem:[#allocation3 + $0x1b9] sm:$0xff] }
 0x2a3   :  { %2080 = vmatprep.mubr.bf16.mxu1 %v1169_v57  ;;  %10732 = vmatpush3.bf16.msra.mxu1 %v12065_v55  ;;  %v1173_v17 = vpack.c.bf16 %v1165_v16, %v1093_v31  ;;  %v1246_v35 = vpack.c.bf16 %v1238_v30, %v1165_v16 }
 0x2a4   :  { %10733 = vmatprep.subr.bf16.mxu1 %v12066_v8 }
 0x2a7   :  { %10734 = vmatpush3.bf16.msra.mxu1 %v12066_v8 }
 0x2a8   :  { %10735 = vmatprep.subr.bf16.mxu1 %v12067_v58 }
 0x2aa   :  { %2081 = vmatmul.mubr.bf16.gmra.mrb[76].mxu1 %v1145_v36 }
 0x2ab   :  { %2088 = vmatprep.mubr.bf16.mxu1 %v1170_v15  ;;  %10736 = vmatpush3.bf16.msra.mxu1 %v12067_v58 }
 0x2ac   :  { %10737 = vmatprep.subr.bf16.mxu1 %v12068_v60 }
 0x2af   :  { %10738 = vmatpush3.bf16.msra.mxu1 %v12068_v60 }
 0x2b0   :  { %4610 = vmatprep.subr.bf16.mxu1 %v17765_v3 }
 0x2b2   :  { %2089 = vmatmul.mubr.bf16.gmra.mrb[80].mxu1 %v1146_v54 }
 0x2b3   :  { %2096 = vmatprep.mubr.bf16.mxu1 %v1171_v63 }
 0x2ba   :  { %2097 = vmatmul.mubr.bf16.gmra.mrb[84].mxu1 %v1147_v0 }
 0x2bb   :  { %2104 = vmatprep.mubr.bf16.mxu1 %v1172_v4 }
 0x2c2   :  { %2105 = vmatmul.mubr.bf16.gmra.mrb[88].mxu1 %v1148_v24 }
 0x2c3   :  { %2112 = vmatprep.mubr.bf16.mxu1 %v1173_v17 }
 0x2ca   :  { %2113 = vmatmul.mubr.bf16.gmra.mrb[92].mxu1 %v1149_v40 }
 0x2cb   :  { %10739 = vmatprep.mubr.bf16.mxu1 %v13114_v20 }
 0x2d2   :  { %10740 = vmatmul.mubr.bf16.vlgmr.msra.gmra.mrb[96].mxu1 %v13166_v27 }
 0x2d3   :  { %10743 = vmatprep.mubr.bf16.mxu1 %v13205_v22 }
 0x2da   :  { %10744 = vmatmul.mubr.bf16.gmra.mrb[100].mxu1 %v1242_v23 }
 0x2db   :  { %10747 = vmatprep.mubr.bf16.mxu1 %v13258_v25 }
 0x2e2   :  { %10748 = vmatmul.mubr.bf16.gmra.mrb[104].mxu1 %v13280_v52 }
 0x2e3   :  { %10751 = vmatprep.mubr.bf16.mxu1 %v13297_v62 }
 0x2ea   :  { %10752 = vmatmul.mubr.bf16.gmra.mrb[108].mxu1 %v1246_v35 }
 0x304   :  { %v10275_v36 = vpop.f32.mrb[16].mxu1 }
 0x305   :  { %v10339_v38 = vpop.f32.mrb[32].mxu0  ;;  %v10276_v42 = vpop.f32.mrb[17].mxu1 }
 0x306   :  { %v10277_v49 = vadd.f32 %v10276_v42, %v10275_v36  ;;  %v10340_v20 = vpop.f32.mrb[33].mxu0  ;;  %v10278_v53 = vpop.f32.mrb[18].mxu1 }
 0x307   :  { %v10342_v54 = vpop.f32.mrb[34].mxu0  ;;  %v10279_v56 = vpop.f32.mrb[19].mxu1  ;;  %v10341_v59 = vadd.f32 %v10340_v20, %v10339_v38 }
 0x308   :  { %v1865_v0 = vadd.f32 %v10277_v49, %v13382_v39  ;;  %v10280_v5 = vadd.f32 %v10279_v56, %v10278_v53  ;;  %v10343_v10 = vpop.f32.mrb[35].mxu0 }
 0x309   :  { %v10344_v27 = vadd.f32 %v10343_v10, %v10342_v54 }
 0x30a   :  { %v1868_v24 = vadd.f32 %v10280_v5, %v13382_v39  ;;  %v13386_v26 = vadd.f32 %v10341_v59, %v1865_v0 }
 0x30c   :  { %v10281_v28 = vpop.f32.mrb[20].mxu1  ;;  %v13388_v40 = vadd.f32 %v10344_v27, %v1868_v24 }
 0x30d   :  { %v10345_v45 = vpop.f32.mrb[36].mxu0  ;;  %v10282_v22 = vpop.f32.mrb[21].mxu1 }
 0x30e   :  { %v10283_v41 = vadd.f32 %v10282_v22, %v10281_v28  ;;  %v10346_v9 = vpop.f32.mrb[37].mxu0  ;;  %v10284_v43 = vpop.f32.mrb[22].mxu1 }
 0x30f   :  { %v10348_v25 = vpop.f32.mrb[38].mxu0  ;;  %v10285_v50 = vpop.f32.mrb[23].mxu1  ;;  %v10347_v18 = vadd.f32 %v10346_v9, %v10345_v45 }
 0x310   :  { %v1873_v51 = vadd.f32 %v10283_v41, %v13382_v39  ;;  %v10286_v29 = vadd.f32 %v10285_v50, %v10284_v43  ;;  %v10349_v13 = vpop.f32.mrb[39].mxu0 }
 0x311   :  { %v10350_v52 = vadd.f32 %v10349_v13, %v10348_v25 }
 0x312   :  { %v1876_v34 = vadd.f32 %v10286_v29, %v13382_v39  ;;  %v13392_v11 = vadd.f32 %v10347_v18, %v1873_v51 }
 0x314   :  { %v10287_v6 = vpop.f32.mrb[24].mxu1  ;;  %v13394_v32 = vadd.f32 %v10350_v52, %v1876_v34 }
 0x315   :  { %v10351_v47 = vpop.f32.mrb[40].mxu0  ;;  %v10288_v37 = vpop.f32.mrb[25].mxu1 }
 0x316   :  { %v10289_v31 = vadd.f32 %v10288_v37, %v10287_v6  ;;  %v10352_v12 = vpop.f32.mrb[41].mxu0  ;;  %v10290_v61 = vpop.f32.mrb[26].mxu1 }
 0x317   :  { %v10354_v62 = vpop.f32.mrb[42].mxu0  ;;  %v10291_v44 = vpop.f32.mrb[27].mxu1  ;;  %v10353_v33 = vadd.f32 %v10352_v12, %v10351_v47 }
 0x318   :  { %v1881_v46 = vadd.f32 %v10289_v31, %v13382_v39  ;;  %v10292_v14 = vadd.f32 %v10291_v44, %v10290_v61  ;;  %v10355_v48 = vpop.f32.mrb[43].mxu0 }
 0x319   :  { %v10356_v19 = vadd.f32 %v10355_v48, %v10354_v62 }
 0x31a   :  { %v1884_v1 = vadd.f32 %v10292_v14, %v13382_v39  ;;  %v13398_v7 = vadd.f32 %v10353_v33, %v1881_v46 }
 0x31c   :  { %v10293_v55 = vpop.f32.mrb[28].mxu1  ;;  %v13400_v2 = vadd.f32 %v10356_v19, %v1884_v1 }
 0x31d   :  { %v10357_v8 = vpop.f32.mrb[44].mxu0  ;;  %v10294_v57 = vpop.f32.mrb[29].mxu1 }
 0x31e   :  { %v10295_v58 = vadd.f32 %v10294_v57, %v10293_v55  ;;  %v10358_v60 = vpop.f32.mrb[45].mxu0  ;;  %v10296_v15 = vpop.f32.mrb[30].mxu1 }
 0x31f   :  { %v10360_v63 = vpop.f32.mrb[46].mxu0  ;;  %v10297_v4 = vpop.f32.mrb[31].mxu1  ;;  %v10359_v16 = vadd.f32 %v10358_v60, %v10357_v8 }
 0x320   :  { %v1889_v17 = vadd.f32 %v10295_v58, %v13382_v39  ;;  %v10298_v21 = vadd.f32 %v10297_v4, %v10296_v15  ;;  %v10361_v23 = vpop.f32.mrb[47].mxu0 }
 0x321   :  { %v10362_v30 = vadd.f32 %v10361_v23, %v10360_v63 }
 0x322   :  { %v1892_v35 = vadd.f32 %v10298_v21, %v13382_v39  ;;  %v13404_v36 = vadd.f32 %v10359_v16, %v1889_v17 }
 0x324   :  { %v10299_v38 = vpop.f32.mrb[32].mxu1  ;;  %v13406_v42 = vadd.f32 %v10362_v30, %v1892_v35 }
 0x325   :  { %v10467_v49 = vpop.f32.mrb[48].mxu0  ;;  %v10300_v20 = vpop.f32.mrb[33].mxu1 }
 0x326   :  { %v10301_v53 = vadd.f32 %v10300_v20, %v10299_v38  ;;  %v10468_v54 = vpop.f32.mrb[49].mxu0  ;;  %v10302_v56 = vpop.f32.mrb[34].mxu1 }
 0x327   :  { %v10470_v59 = vpop.f32.mrb[50].mxu0  ;;  %v10303_v0 = vpop.f32.mrb[35].mxu1  ;;  %v13408_v5 = vadd.f32 %v10468_v54, %v10467_v49 }
 0x328   :  { %v10304_v10 = vadd.f32 %v10303_v0, %v10302_v56  ;;  %v10471_v27 = vpop.f32.mrb[51].mxu0  ;;  %v1897_v23 = vadd.f32 %v10301_v53, %v13382_v39 }
 0x329   :  { %v13410_v24 = vadd.f32 %v10471_v27, %v10470_v59 }
 0x32a   :  { %v1900_v59 = vadd.f32 %v10304_v10, %v13382_v39 }
 0x32c   :  { %v10305_v28 = vpop.f32.mrb[36].mxu1 }
 0x32d   :  { %v10473_v45 = vpop.f32.mrb[52].mxu0  ;;  %v10306_v22 = vpop.f32.mrb[37].mxu1 }
 0x32e   :  { %v10307_v41 = vadd.f32 %v10306_v22, %v10305_v28  ;;  %v10474_v9 = vpop.f32.mrb[53].mxu0  ;;  %v10308_v43 = vpop.f32.mrb[38].mxu1 }
 0x32f   :  { %v10476_v25 = vpop.f32.mrb[54].mxu0  ;;  %v10309_v50 = vpop.f32.mrb[39].mxu1  ;;  %v13412_v18 = vadd.f32 %v10474_v9, %v10473_v45 }
 0x330   :  { %v10310_v51 = vadd.f32 %v10309_v50, %v10308_v43  ;;  %v10477_v29 = vpop.f32.mrb[55].mxu0  ;;  %v1905_v43 = vadd.f32 %v10307_v41, %v13382_v39 }
 0x331   :  { %v13414_v13 = vadd.f32 %v10477_v29, %v10476_v25 }
 0x332   :  { %v1908_v10 = vadd.f32 %v10310_v51, %v13382_v39 }
 0x334   :  { %v10311_v52 = vpop.f32.mrb[40].mxu1 }
 0x335   :  { %v10479_v34 = vpop.f32.mrb[56].mxu0  ;;  %v10312_v6 = vpop.f32.mrb[41].mxu1 }
 0x336   :  { %v10313_v47 = vadd.f32 %v10312_v6, %v10311_v52  ;;  %v10480_v37 = vpop.f32.mrb[57].mxu0  ;;  %v10314_v31 = vpop.f32.mrb[42].mxu1 }
 0x337   :  { %v10482_v12 = vpop.f32.mrb[58].mxu0  ;;  %v10315_v61 = vpop.f32.mrb[43].mxu1  ;;  %v13416_v62 = vadd.f32 %v10480_v37, %v10479_v34 }
 0x338   :  { %v10316_v44 = vadd.f32 %v10315_v61, %v10314_v31  ;;  %v10483_v33 = vpop.f32.mrb[59].mxu0 }
 0x339   :  { %v13418_v46 = vadd.f32 %v10483_v33, %v10482_v12 }
 0x33a   :  { %v1916_v51 = vadd.f32 %v10316_v44, %v13382_v39 }
 0x33c   :  { %v10317_v14 = vpop.f32.mrb[44].mxu1 }
 0x33d   :  { %v10485_v48 = vpop.f32.mrb[60].mxu0  ;;  %v10318_v19 = vpop.f32.mrb[45].mxu1 }
 0x33e   :  { %v10319_v1 = vadd.f32 %v10318_v19, %v10317_v14  ;;  %v10486_v55 = vpop.f32.mrb[61].mxu0  ;;  %v10320_v8 = vpop.f32.mrb[46].mxu1  ;;  %v1913_v19 = vadd.f32 %v10313_v47, %v13382_v39 }
 0x33f   :  { %v10488_v57 = vpop.f32.mrb[62].mxu0  ;;  %v10321_v58 = vpop.f32.mrb[47].mxu1  ;;  %v13420_v60 = vadd.f32 %v10486_v55, %v10485_v48 }
 0x340   :  { %v10322_v15 = vadd.f32 %v10321_v58, %v10320_v8  ;;  %v10489_v63 = vpop.f32.mrb[63].mxu0 }
 0x341   :  { %v13422_v4 = vadd.f32 %v10489_v63, %v10488_v57 }
 0x342   :  { %v1924_v44 = vadd.f32 %v10322_v15, %v13382_v39 }
 0x344   :  { %v10363_v16 = vpop.f32.mrb[48].mxu1 }
 0x345   :  { %v10491_v17 = vpop.f32.mrb[64].mxu0  ;;  %v10364_v21 = vpop.f32.mrb[49].mxu1 }
 0x346   :  { %v10365_v30 = vadd.f32 %v10364_v21, %v10363_v16  ;;  %v10492_v35 = vpop.f32.mrb[65].mxu0  ;;  %v10366_v38 = vpop.f32.mrb[50].mxu1 }
 0x347   :  { %v10494_v49 = vpop.f32.mrb[66].mxu0  ;;  %v10367_v20 = vpop.f32.mrb[51].mxu1  ;;  %v13425_v54 = vadd.f32 %v10492_v35, %v10491_v17 }
 0x348   :  { %v13427_v56 = vadd.f32 %v10365_v30, %v1897_v23  ;;  %v10368_v0 = vadd.f32 %v10367_v20, %v10366_v38  ;;  %v10495_v27 = vpop.f32.mrb[67].mxu0  ;;  %v1921_v20 = vadd.f32 %v10319_v1, %v13382_v39 }
 0x349   :  { %v13430_v28 = vadd.f32 %v10495_v27, %v10494_v49 }
 0x34a   :  { %v13432_v45 = vadd.f32 %v10368_v0, %v1900_v59 }
 0x34c   :  { %v10369_v22 = vpop.f32.mrb[52].mxu1 }
 0x34d   :  { %v10497_v9 = vpop.f32.mrb[68].mxu0  ;;  %v10370_v53 = vpop.f32.mrb[53].mxu1 }
 0x34e   :  { %v10371_v25 = vadd.f32 %v10370_v53, %v10369_v22  ;;  %v10498_v50 = vpop.f32.mrb[69].mxu0  ;;  %v10372_v29 = vpop.f32.mrb[54].mxu1 }
 0x34f   :  { %v10500_v52 = vpop.f32.mrb[70].mxu0  ;;  %v10373_v34 = vpop.f32.mrb[55].mxu1  ;;  %v13435_v6 = vadd.f32 %v10498_v50, %v10497_v9 }
 0x350   :  { %v13437_v37 = vadd.f32 %v10371_v25, %v1905_v43  ;;  %v10374_v31 = vadd.f32 %v10373_v34, %v10372_v29  ;;  %v10501_v12 = vpop.f32.mrb[71].mxu0 }
 0x351   :  { %v13440_v61 = vadd.f32 %v10501_v12, %v10500_v52 }
 0x352   :  { %v13442_v33 = vadd.f32 %v10374_v31, %v1908_v10 }
 0x354   :  { %v10375_v14 = vpop.f32.mrb[56].mxu1 }
 0x355   :  { %v10503_v48 = vpop.f32.mrb[72].mxu0  ;;  %v10376_v41 = vpop.f32.mrb[57].mxu1 }
 0x356   :  { %v10377_v55 = vadd.f32 %v10376_v41, %v10375_v14  ;;  %v10504_v8 = vpop.f32.mrb[73].mxu0  ;;  %v10378_v57 = vpop.f32.mrb[58].mxu1 }
 0x357   :  { %v10506_v58 = vpop.f32.mrb[74].mxu0  ;;  %v10379_v63 = vpop.f32.mrb[59].mxu1  ;;  %v13445_v16 = vadd.f32 %v10504_v8, %v10503_v48 }
 0x358   :  { %v13447_v17 = vadd.f32 %v10377_v55, %v1913_v19  ;;  %v10380_v21 = vadd.f32 %v10379_v63, %v10378_v57  ;;  %v10507_v23 = vpop.f32.mrb[75].mxu0 }
 0x359   :  { %v13450_v30 = vadd.f32 %v10507_v23, %v10506_v58 }
 0x35a   :  { %v13452_v35 = vadd.f32 %v10380_v21, %v1916_v51 }
 0x35c   :  { %v10381_v38 = vpop.f32.mrb[60].mxu1 }
 0x35d   :  { %v10509_v49 = vpop.f32.mrb[76].mxu0  ;;  %v10382_v47 = vpop.f32.mrb[61].mxu1 }
 0x35e   :  { %v10383_v59 = vadd.f32 %v10382_v47, %v10381_v38  ;;  %v10510_v0 = vpop.f32.mrb[77].mxu0  ;;  %v10384_v27 = vpop.f32.mrb[62].mxu1 }
 0x35f   :  { %v10512_v22 = vpop.f32.mrb[78].mxu0  ;;  %v10385_v9 = vpop.f32.mrb[63].mxu1  ;;  %v13455_v53 = vadd.f32 %v10510_v0, %v10509_v49 }
 0x360   :  { %v13457_v43 = vadd.f32 %v10383_v59, %v1921_v20  ;;  %v10386_v25 = vadd.f32 %v10385_v9, %v10384_v27  ;;  %v10513_v50 = vpop.f32.mrb[79].mxu0 }
 0x361   :  { %v13460_v29 = vadd.f32 %v10513_v50, %v10512_v22 }
 0x362   :  { %v13462_v52 = vadd.f32 %v10386_v25, %v1924_v44 }
 0x365   :  { %v10403_v34 = vpop.f32.mrb[64].mxu1 }
 0x366   :  { %v10404_v10 = vpop.f32.mrb[65].mxu1 }
 0x367   :  { %v10405_v1 = vadd.f32 %v10404_v10, %v10403_v34  ;;  %v10406_v31 = vpop.f32.mrb[66].mxu1 }
 0x368   :  { %v10407_v12 = vpop.f32.mrb[67].mxu1 }
 0x369   :  { %v2059_v14 = vadd.f32 %v10405_v1, %v13386_v26  ;;  %v10408_v48 = vadd.f32 %v10407_v12, %v10406_v31 }
 0x36b   :  { %v2062_v41 = vadd.f32 %v10408_v48, %v13388_v40  ;;  %v13467_v19 = vadd.f32 %v13408_v5, %v2059_v14 }
 0x36d   :  { %v10409_v39 = vpop.f32.mrb[68].mxu1  ;;  %v13470_v15 = vadd.f32 %v13410_v24, %v2062_v41 }
 0x36e   :  { %v10410_v55 = vpop.f32.mrb[69].mxu1 }
 0x36f   :  { %v10411_v8 = vadd.f32 %v10410_v55, %v10409_v39  ;;  %v10412_v57 = vpop.f32.mrb[70].mxu1 }
 0x370   :  { %v10413_v58 = vpop.f32.mrb[71].mxu1 }
 0x371   :  { %v2067_v63 = vadd.f32 %v10411_v8, %v13392_v11  ;;  %v10414_v51 = vadd.f32 %v10413_v58, %v10412_v57 }
 0x373   :  { %v2070_v21 = vadd.f32 %v10414_v51, %v13394_v32  ;;  %v13475_v26 = vadd.f32 %v13412_v18, %v2067_v63 }
 0x375   :  { %v10415_v40 = vpop.f32.mrb[72].mxu1  ;;  %v13478_v5 = vadd.f32 %v13414_v13, %v2070_v21 }
 0x376   :  { %v10416_v23 = vpop.f32.mrb[73].mxu1 }
 0x377   :  { %v10417_v38 = vadd.f32 %v10416_v23, %v10415_v40  ;;  %v10418_v24 = vpop.f32.mrb[74].mxu1 }
 0x378   :  { %v10419_v49 = vpop.f32.mrb[75].mxu1 }
 0x379   :  { %v2075_v47 = vadd.f32 %v10417_v38, %v13398_v7  ;;  %v10420_v20 = vadd.f32 %v10419_v49, %v10418_v24 }
 0x37b   :  { %v2078_v59 = vadd.f32 %v10420_v20, %v13400_v2  ;;  %v13483_v11 = vadd.f32 %v13416_v62, %v2075_v47 }
 0x37d   :  { %v10421_v32 = vpop.f32.mrb[76].mxu1  ;;  %v13486_v18 = vadd.f32 %v13418_v46, %v2078_v59 }
 0x37e   :  { %v10422_v0 = vpop.f32.mrb[77].mxu1 }
 0x37f   :  { %v10423_v27 = vadd.f32 %v10422_v0, %v10421_v32  ;;  %v10424_v13 = vpop.f32.mrb[78].mxu1 }
 0x380   :  { %v10425_v22 = vpop.f32.mrb[79].mxu1 }
 0x381   :  { %v2083_v9 = vadd.f32 %v10423_v27, %v13404_v36  ;;  %v10426_v44 = vadd.f32 %v10425_v22, %v10424_v13 }
 0x383   :  { %v2086_v25 = vadd.f32 %v10426_v44, %v13406_v42  ;;  %v2180_v7 = vadd.f32 %v13420_v60, %v2083_v9 }
 0x385   :  { %v10427_v50 = vpop.f32.mrb[80].mxu1  ;;  %v2183_v2 = vadd.f32 %v13422_v4, %v2086_v25 }
 0x386   :  { %v10428_v62 = vpop.f32.mrb[81].mxu1 }
 0x387   :  { %v10429_v34 = vadd.f32 %v10428_v62, %v10427_v50  ;;  %v10430_v10 = vpop.f32.mrb[82].mxu1 }
 0x388   :  { %v10431_v1 = vpop.f32.mrb[83].mxu1 }
 0x389   :  { %v2091_v46 = vadd.f32 %v10429_v34, %v13427_v56  ;;  %v10432_v31 = vadd.f32 %v10431_v1, %v10430_v10 }
 0x38b   :  { %v2094_v12 = vadd.f32 %v10432_v31, %v13432_v45  ;;  %v2188_v14 = vadd.f32 %v13425_v54, %v2091_v46 }
 0x38d   :  { %v10433_v36 = vpop.f32.mrb[84].mxu1  ;;  %v2191_v48 = vadd.f32 %v13430_v28, %v2094_v12 }
 0x38e   :  { %v10434_v42 = vpop.f32.mrb[85].mxu1 }
 0x38f   :  { %v10435_v41 = vadd.f32 %v10434_v42, %v10433_v36  ;;  %v10436_v60 = vpop.f32.mrb[86].mxu1 }
 0x390   :  { %v10437_v39 = vpop.f32.mrb[87].mxu1 }
 0x391   :  { %v2099_v4 = vadd.f32 %v10435_v41, %v13437_v37  ;;  %v10438_v55 = vadd.f32 %v10437_v39, %v10436_v60 }
 0x393   :  { %v2102_v8 = vadd.f32 %v10438_v55, %v13442_v33  ;;  %v2196_v57 = vadd.f32 %v13435_v6, %v2099_v4 }
 0x395   :  { %v10439_v56 = vpop.f32.mrb[88].mxu1  ;;  %v2199_v58 = vadd.f32 %v13440_v61, %v2102_v8 }
 0x396   :  { %v10440_v45 = vpop.f32.mrb[89].mxu1 }
 0x397   :  { %v10441_v63 = vadd.f32 %v10440_v45, %v10439_v56  ;;  %v10442_v54 = vpop.f32.mrb[90].mxu1 }
 0x398   :  { %v10443_v51 = vpop.f32.mrb[91].mxu1 }
 0x399   :  { %v2107_v28 = vadd.f32 %v10441_v63, %v13447_v17  ;;  %v10444_v21 = vadd.f32 %v10443_v51, %v10442_v54 }
 0x39b   :  { %v2110_v40 = vadd.f32 %v10444_v21, %v13452_v35  ;;  %v2204_v23 = vadd.f32 %v13445_v16, %v2107_v28 }
 0x39d   :  { %v10445_v37 = vpop.f32.mrb[92].mxu1  ;;  %v2207_v38 = vadd.f32 %v13450_v30, %v2110_v40 }
 0x39e   :  { %v10446_v33 = vpop.f32.mrb[93].mxu1 }
 0x39f   :  { %v10447_v24 = vadd.f32 %v10446_v33, %v10445_v37  ;;  %v10448_v6 = vpop.f32.mrb[94].mxu1 }
 0x3a0   :  { %v10449_v49 = vpop.f32.mrb[95].mxu1 }
 0x3a1   :  { %v2115_v61 = vadd.f32 %v10447_v24, %v13457_v43  ;;  %v10450_v47 = vadd.f32 %v10449_v49, %v10448_v6 }
 0x3a3   :  { %v2118_v20 = vadd.f32 %v10450_v47, %v13462_v52  ;;  %v2212_v59 = vadd.f32 %v13455_v53, %v2115_v61 }
 0x3a5   :  { %v10741_v17 = vpop.f32.mrb[96].mxu1  ;;  %v2215_v32 = vadd.f32 %v13460_v29, %v2118_v20 }
 0x3a6   :  { %v2261_v35 = vadd.f32 %v10741_v17, %v13475_v26  ;;  %v2252_v16 = vpop.f32.mrb[97].mxu1 }
 0x3a7   :  { %v2253_v0 = vadd.f32 %v2252_v16, %v13467_v19  ;;  %v10742_v30 = vpop.f32.mrb[98].mxu1 }
 0x3a8   :  { %v2264_v27 = vadd.f32 %v10742_v30, %v13478_v5  ;;  %v2255_v13 = vpop.f32.mrb[99].mxu1 }
 0x3a9   :  { %v2256_v22 = vadd.f32 %v2255_v13, %v13470_v15 }
 0x3ab   :  { %v2315_v43 = vadd.f32 %v2256_v22, %v2253_v0 }
 0x3ad   :  { %v2316_v9 = vadd.f32 %v2315_v43, %v2261_v35  ;;  %v10745_v44 = vpop.f32.mrb[100].mxu1 }
 0x3ae   :  { %v2277_v52 = vadd.f32 %v10745_v44, %v2180_v7  ;;  %v2268_v25 = vpop.f32.mrb[101].mxu1 }
 0x3af   :  { %v2269_v53 = vadd.f32 %v2268_v25, %v13483_v11  ;;  %v2317_v50 = vadd.f32 %v2316_v9, %v2264_v27  ;;  %v10746_v29 = vpop.f32.mrb[102].mxu1 }
 0x3b0   :  { %v2280_v62 = vadd.f32 %v10746_v29, %v2183_v2  ;;  %v2271_v26 = vpop.f32.mrb[103].mxu1 }
 0x3b1   :  { %v2318_v34 = vadd.f32 %v2317_v50, %v2269_v53  ;;  %v2272_v19 = vadd.f32 %v2271_v26, %v13486_v18 }
 0x3b3   :  { %v2319_v10 = vadd.f32 %v2318_v34, %v2272_v19 }
 0x3b5   :  { %v2320_v1 = vadd.f32 %v2319_v10, %v2277_v52  ;;  %v10749_v5 = vpop.f32.mrb[104].mxu1 }
 0x3b6   :  { %v2293_v46 = vadd.f32 %v10749_v5, %v2196_v57  ;;  %v2284_v31 = vpop.f32.mrb[105].mxu1 }
 0x3b7   :  { %v2285_v15 = vadd.f32 %v2284_v31, %v2188_v14  ;;  %v2321_v12 = vadd.f32 %v2320_v1, %v2280_v62  ;;  %v10750_v36 = vpop.f32.mrb[106].mxu1  ;;  %v2504_v14 = vld [vmem:[%s17752_s10] sm:$0xff] }
 0x3b8   :  { %v2296_v42 = vadd.f32 %v10750_v36, %v2199_v58  ;;  %v2287_v7 = vpop.f32.mrb[107].mxu1  ;;  %10787 = vmatprep.mubr.f32.mxu0 %v2504_v14 }
 0x3b9   :  { %v2322_v41 = vadd.f32 %v2321_v12, %v2285_v15  ;;  %v2288_v60 = vadd.f32 %v2287_v7, %v2191_v48 }
 0x3bb   :  { %v2323_v11 = vadd.f32 %v2322_v41, %v2288_v60 }
 0x3bd   :  { %v2324_v39 = vadd.f32 %v2323_v11, %v2293_v46  ;;  %v10753_v4 = vpop.f32.mrb[108].mxu1 }
 0x3be   :  { %v2309_v2 = vadd.f32 %v10753_v4, %v2212_v59  ;;  %v2300_v55 = vpop.f32.mrb[109].mxu1 }
 0x3bf   :  { %v2301_v8 = vadd.f32 %v2300_v55, %v2204_v23  ;;  %v2325_v56 = vadd.f32 %v2324_v39, %v2296_v42  ;;  %v10754_v18 = vpop.f32.mrb[110].mxu1 }
 0x3c0   :  { %v2312_v45 = vadd.f32 %v10754_v18, %v2215_v32  ;;  %v2303_v63 = vpop.f32.mrb[111].mxu1 }
 0x3c1   :  { %v2326_v54 = vadd.f32 %v2325_v56, %v2301_v8  ;;  %v2304_v57 = vadd.f32 %v2303_v63, %v2207_v38 }
 0x3c3   :  { %v2327_v58 = vadd.f32 %v2326_v54, %v2304_v57 }
 0x3c5   :  { %v2328_v51 = vadd.f32 %v2327_v58, %v2309_v2 }
 0x3c7   :  { %v2329_v48 = vadd.f32 %v2328_v51, %v2312_v45 }
 0x3c9   :  { %v2330_v28 = vrot.slane %v2329_v48, 4 }
 0x3cb   :  { %v2331_v21 = vadd.f32 %v2330_v28, %v2329_v48  ;;  %v12069_v48 = vld [vmem:[%s17753_s11] sm:$0xff]   ;;  %v12070_v28 = vld [vmem:[%s17753_s11 + $0x8] sm:$0xff]  }
 0x3cc   :  { %4611 = vmatpush1.bf16.msra.mxu1 %v12069_v48 }
 0x3cd   :  { %v2332_v40 = vrot.slane %v2331_v21, 2  ;;  %4612 = vmatprep.subr.bf16.mxu1 %v17765_v3 }
 0x3cf   :  { %v2333_v37 = vadd.f32 %v2332_v40, %v2331_v21  ;;  %v12071_v21 = vld [vmem:[%s17753_s11 + $0x10] sm:$0xff]  }
 0x3d0   :  { %4613 = vmatpush1.bf16.msra.mxu1 %v12070_v28 }
 0x3d1   :  { %v2334_v33 = vrot.slane %v2333_v37, 1  ;;  %4614 = vmatprep.subr.bf16.mxu1 %v17765_v3 }
 0x3d3   :  { %v2335_v23 = vadd.f32 %v2334_v33, %v2333_v37  ;;  %v13592_v37 = vld [vmem:[%s17754_s8] ss:$0 sm:$0xff] }
 0x3d4   :  { %v13597_v33 = vld [vmem:[%s17755_s9] ss:$0 sm:$0xff]  ;;  %4615 = vmatpush1.bf16.msra.mxu1 %v12071_v21  ;;  %v12075_v21 = vld [vmem:[%s17753_s11 + $0x30] sm:$0xff]  }
 0x3d5   :  { %v2337_v24 = vmul.f32 0.0078125, %v2335_v23  ;;  %4616 = vmatprep.subr.bf16.mxu1 %v17765_v3 }
 0x3d7   :  { %v13517_v6 = vsub.f32 %v2253_v0, %v2337_v24  ;;  %v13519_v49 = vsub.f32 %v2256_v22, %v2337_v24  ;;  %v13521_v38 = vsub.f32 %v2261_v35, %v2337_v24  ;;  %v13523_v61 = vsub.f32 %v2264_v27, %v2337_v24 }
 0x3d8   :  { %v13525_v47 = vsub.f32 %v2269_v53, %v2337_v24  ;;  %v13527_v20 = vsub.f32 %v2272_v19, %v2337_v24  ;;  %v13529_v59 = vsub.f32 %v2277_v52, %v2337_v24  ;;  %v13531_v17 = vsub.f32 %v2280_v62, %v2337_v24 }
 0x3d9   :  { %v13533_v32 = vsub.f32 %v2285_v15, %v2337_v24  ;;  %v13535_v16 = vsub.f32 %v2288_v60, %v2337_v24  ;;  %v13537_v0 = vsub.f32 %v2293_v46, %v2337_v24  ;;  %v13539_v30 = vsub.f32 %v2296_v42, %v2337_v24 }
 0x3da   :  { %v13541_v35 = vsub.f32 %v2301_v8, %v2337_v24  ;;  %v2351_v27 = vsub.f32 %v2304_v57, %v2337_v24  ;;  %v13543_v13 = vsub.f32 %v2309_v2, %v2337_v24  ;;  %v13545_v22 = vsub.f32 %v2312_v45, %v2337_v24 }
 0x3db   :  { %v2354_v43 = vmul.f32 %v13517_v6, %v13517_v6  ;;  %v2355_v9 = vmul.f32 %v13519_v49, %v13519_v49  ;;  %v2356_v44 = vmul.f32 %v13521_v38, %v13521_v38  ;;  %v2357_v25 = vmul.f32 %v13523_v61, %v13523_v61 }
 0x3dc   :  { %v2358_v50 = vmul.f32 %v13525_v47, %v13525_v47  ;;  %v2359_v62 = vmul.f32 %v13527_v20, %v13527_v20  ;;  %v2360_v34 = vmul.f32 %v13529_v59, %v13529_v59  ;;  %v2361_v10 = vmul.f32 %v13531_v17, %v13531_v17 }
 0x3dd   :  { %v2370_v52 = vadd.f32 %v2355_v9, %v2354_v43  ;;  %v2362_v5 = vmul.f32 %v13533_v32, %v13533_v32  ;;  %v2363_v31 = vmul.f32 %v13535_v16, %v13535_v16  ;;  %v2364_v12 = vmul.f32 %v13537_v0, %v13537_v0 }
 0x3de   :  { %v2365_v42 = vmul.f32 %v13539_v30, %v13539_v30  ;;  %v2366_v41 = vmul.f32 %v13541_v35, %v13541_v35  ;;  %v2367_v11 = vmul.f32 %v2351_v27, %v2351_v27  ;;  %v2368_v4 = vmul.f32 %v13543_v13, %v13543_v13 }
 0x3df   :  { %v2371_v53 = vadd.f32 %v2370_v52, %v2356_v44  ;;  %v2369_v55 = vmul.f32 %v13545_v22, %v13545_v22  ;;  %v12072_v44 = vld [vmem:[%s17753_s11 + $0x18] sm:$0xff]  }
 0x3e0   :  { %4617 = vmatpush1.bf16.msra.mxu1 %v12072_v44 }
 0x3e1   :  { %v2372_v29 = vadd.f32 %v2371_v53, %v2357_v25  ;;  %4618 = vmatprep.subr.bf16.mxu1 %v17765_v3 }
 0x3e3   :  { %v2373_v26 = vadd.f32 %v2372_v29, %v2358_v50 }
 0x3e5   :  { %v2374_v19 = vadd.f32 %v2373_v26, %v2359_v62 }
 0x3e7   :  { %v2375_v1 = vadd.f32 %v2374_v19, %v2360_v34  ;;  %v12073_v19 = vld [vmem:[%s17753_s11 + $0x20] sm:$0xff]  }
 0x3e8   :  { %4619 = vmatpush1.bf16.msra.mxu1 %v12073_v19 }
 0x3e9   :  { %v2376_v46 = vadd.f32 %v2375_v1, %v2361_v10  ;;  %4620 = vmatprep.subr.bf16.mxu1 %v17765_v3 }
 0x3eb   :  { %v2377_v15 = vadd.f32 %v2376_v46, %v2362_v5 }
 0x3ed   :  { %v2378_v36 = vadd.f32 %v2377_v15, %v2363_v31 }
 0x3ef   :  { %v2379_v7 = vadd.f32 %v2378_v36, %v2364_v12 }
 0x3f1   :  { %v2380_v60 = vadd.f32 %v2379_v7, %v2365_v42 }
 0x3f3   :  { %v2381_v39 = vadd.f32 %v2380_v60, %v2366_v41 }
 0x3f5   :  { %v2382_v2 = vadd.f32 %v2381_v39, %v2367_v11  ;;  %v12074_v39 = vld [vmem:[%s17753_s11 + $0x28] sm:$0xff]  }
 0x3f6   :  { %4621 = vmatpush1.bf16.msra.mxu1 %v12074_v39  ;;  %v2506_v39 = vld [vmem:[%s17752_s10 + $0x10] sm:$0xff] }
 0x3f7   :  { %v2383_v8 = vadd.f32 %v2382_v2, %v2368_v4  ;;  %4622 = vmatprep.subr.bf16.mxu1 %v17765_v3 }
 0x3f9   :  { %v2384_v56 = vadd.f32 %v2383_v8, %v2369_v55 }
 0x3fa   :  { %4623 = vmatpush1.bf16.msra.mxu1 %v12075_v21  ;;  %v2523_v21 = vld [vmem:[%s17752_s10 + $0x98] sm:$0xff] }
 0x3fb   :  { %v2385_v18 = vrot.slane %v2384_v56, 4  ;;  %4624 = vmatprep.subr.bf16.mxu1 %v17765_v3 }
 0x3fd   :  { %v2386_v45 = vadd.f32 %v2385_v18, %v2384_v56 }
 0x3ff   :  { %v2387_v63 = vrot.slane %v2386_v45, 2 }
 0x401   :  { %v2388_v54 = vadd.f32 %v2387_v63, %v2386_v45 }
 0x403   :  { %v2389_v57 = vrot.slane %v2388_v54, 1 }
 0x405   :  { %v2390_v14 = vadd.f32 %v2389_v57, %v2388_v54 }
 0x407   :  { %v2391_v58 = vmul.f32 0.0078125, %v2390_v14 }
 0x409   :  { %v2392_v51 = vadd.f32 0.8, %v2391_v58 }
 0x40b   :  { %12215 = vrsqrt.f32 %v2392_v51 }
 0x415   :  { %v13587_v40 = vpop.eup %12215 }
 0x416   :  { %v2407_v23 = vmul.f32 %v13587_v40, %v2351_v27  ;;  %v2394_v24 = vmul.f32 %v13587_v40, %v13517_v6  ;;  %v2395_v43 = vmul.f32 %v13587_v40, %v13519_v49  ;;  %v2396_v9 = vmul.f32 %v13587_v40, %v13521_v38 }
 0x417   :  { %v2397_v52 = vmul.f32 %v13587_v40, %v13523_v61  ;;  %v2398_v25 = vmul.f32 %v13587_v40, %v13525_v47  ;;  %v2399_v27 = vmul.f32 %v13587_v40, %v13527_v20  ;;  %v2400_v6 = vmul.f32 %v13587_v40, %v13529_v59 }
 0x418   :  { %v2430_v49 = vmul.f32 %v13592_v37, %v2407_v23  ;;  %v2417_v38 = vmul.f32 %v13592_v37, %v2394_v24  ;;  %v2418_v53 = vmul.f32 %v13592_v37, %v2395_v43  ;;  %v2419_v50 = vmul.f32 %v13592_v37, %v2396_v9 }
 0x419   :  { %v2420_v61 = vmul.f32 %v13592_v37, %v2397_v52  ;;  %v2421_v29 = vmul.f32 %v13592_v37, %v2398_v25  ;;  %v2422_v47 = vmul.f32 %v13592_v37, %v2399_v27  ;;  %v2401_v20 = vmul.f32 %v13587_v40, %v13531_v17 }
 0x41a   :  { %v13629_v59 = vadd.f32 %v13597_v33, %v2430_v49  ;;  %v2440_v62 = vadd.f32 %v13597_v33, %v2417_v38  ;;  %v2441_v26 = vadd.f32 %v13597_v33, %v2418_v53  ;;  %v2442_v34 = vadd.f32 %v13597_v33, %v2419_v50 }
 0x41b   :  { %v2443_v10 = vadd.f32 %v13597_v33, %v2420_v61  ;;  %v2444_v1 = vadd.f32 %v13597_v33, %v2421_v29  ;;  %v2445_v17 = vadd.f32 %v13597_v33, %v2422_v47  ;;  %v2423_v5 = vmul.f32 %v13592_v37, %v2400_v6 }
 0x41c   :  { %vm2456_vm1 = vcmp.ge.f32.partialorder %v2440_v62, 0.0  ;;  %vm2457_vm2 = vcmp.ge.f32.partialorder %v2441_v26, 0.0  ;;  %v2472_v46 = vmul.f32 0.2, %v2440_v62  ;;  %v2473_v31 = vmul.f32 0.2, %v2441_v26 }
 0x41d   :  { %vm2458_vm3 = vcmp.ge.f32.partialorder %v2442_v34, 0.0  ;;  %vm2459_vm4 = vcmp.ge.f32.partialorder %v2443_v10, 0.0  ;;  %v2474_v15 = vmul.f32 0.2, %v2442_v34  ;;  %v2475_v12 = vmul.f32 0.2, %v2443_v10 }
 0x41e   :  { %v2488_v36 = vsel %vm2456_vm1, %v2440_v62, %v2472_v46  ;;  %v2489_v42 = vsel %vm2457_vm2, %v2441_v26, %v2473_v31  ;;  %vm2460_vm5 = vcmp.ge.f32.partialorder %v2444_v1, 0.0  ;;  %vm2461_vm6 = vcmp.ge.f32.partialorder %v2445_v17, 0.0  ;;  %v12077_v62 = vld [vmem:[%s17753_s11 + $0x40] sm:$0xff]  }
 0x41f   :  { %v11051_v7 = vpack.c.bf16 %v2489_v42, %v2488_v36  ;;  %v2490_v41 = vsel %vm2458_vm3, %v2442_v34, %v2474_v15  ;;  %v2491_v60 = vsel %vm2459_vm4, %v2443_v10, %v2475_v12  ;;  %v2476_v11 = vmul.f32 0.2, %v2444_v1  ;;  %v12079_v42 = vld [vmem:[%s17753_s11 + $0x50] sm:$0xff]  }
 0x420   :  { %v11055_v4 = vpack.c.bf16 %v2491_v60, %v2490_v41  ;;  %v2477_v2 = vmul.f32 0.2, %v2445_v17  ;;  %v2424_v55 = vmul.f32 %v13592_v37, %v2401_v20  ;;  %v2446_v8 = vadd.f32 %v13597_v33, %v2423_v5  ;;  %v12080_v41 = vld [vmem:[%s17753_s11 + $0x58] sm:$0xff]   ;;  %v12081_v60 = vld [vmem:[%s17753_s11 + $0x60] sm:$0xff]  }
 0x421   :  { %11052 = vmatprep.subr.bf16.mxu0 %v11051_v7  ;;  %v2492_v56 = vsel %vm2460_vm5, %v2444_v1, %v2476_v11  ;;  %v2402_v18 = vmul.f32 %v13587_v40, %v13533_v32  ;;  %v2403_v45 = vmul.f32 %v13587_v40, %v13535_v16  ;;  %v2404_v63 = vmul.f32 %v13587_v40, %v13537_v0  ;;  %v2505_v11 = vld [vmem:[%s17752_s10 + $0x8] sm:$0xff] }
 0x422   :  { %11054 = vmatpush3.bf16.msra.mxu0 %v11051_v7  ;;  %v2493_v54 = vsel %vm2461_vm6, %v2445_v17, %v2477_v2  ;;  %v2447_v57 = vadd.f32 %v13597_v33, %v2424_v55  ;;  %vm2462_vm7 = vcmp.ge.f32.partialorder %v2446_v8, 0.0  ;;  %v2478_v14 = vmul.f32 0.2, %v2446_v8  ;;  %v2507_v2 = vld [vmem:[%s17752_s10 + $0x18] sm:$0xff]  ;;  %v2508_v55 = vld [vmem:[%s17752_s10 + $0x20] sm:$0xff] }
 0x423   :  { %11056 = vmatprep.subr.bf16.mxu0 %v11055_v4  ;;  %v11059_v58 = vpack.c.bf16 %v2493_v54, %v2492_v56  ;;  %v2425_v51 = vmul.f32 %v13592_v37, %v2402_v18  ;;  %v2426_v32 = vmul.f32 %v13592_v37, %v2403_v45  ;;  %v2405_v16 = vmul.f32 %v13587_v40, %v13539_v30  ;;  %v2509_v56 = vld [vmem:[%s17752_s10 + $0x28] sm:$0xff]  ;;  %v2510_v18 = vld [vmem:[%s17752_s10 + $0x30] sm:$0xff]  ;;  %v2511_v45 = vld [vmem:[%s17752_s10 + $0x38] sm:$0xff] }
 0x424   :  { %vm2463_vm8 = vcmp.ge.f32.partialorder %v2447_v57, 0.0  ;;  %v2479_v0 = vmul.f32 0.2, %v2447_v57  ;;  %v2494_v48 = vsel %vm2462_vm7, %v2446_v8, %v2478_v14  ;;  %v2427_v28 = vmul.f32 %v13592_v37, %v2404_v63  ;;  %v12083_v8 = vld [vmem:[%s17753_s11 + $0x70] sm:$0xff]   ;;  %v2512_v63 = vld [vmem:[%s17752_s10 + $0x40] sm:$0xff]  ;;  %v2513_v54 = vld [vmem:[%s17752_s10 + $0x48] sm:$0xff] }
 0x425   :  { %v2448_v23 = vadd.f32 %v13597_v33, %v2425_v51  ;;  %v2449_v24 = vadd.f32 %v13597_v33, %v2426_v32  ;;  %v2428_v43 = vmul.f32 %v13592_v37, %v2405_v16  ;;  %v2406_v9 = vmul.f32 %v13587_v40, %v13541_v35  ;;  %v12076_v35 = vld [vmem:[%s17753_s11 + $0x38] sm:$0xff]   ;;  %v2517_v51 = vld [vmem:[%s17752_s10 + $0x68] sm:$0xff]  ;;  %v2518_v32 = vld [vmem:[%s17752_s10 + $0x70] sm:$0xff] }
 0x426   :  { %11058 = vmatpush3.bf16.msra.mxu0 %v11055_v4  ;;  %v2495_v30 = vsel %vm2463_vm8, %v2447_v57, %v2479_v0  ;;  %v2450_v44 = vadd.f32 %v13597_v33, %v2427_v28  ;;  %v2485_v52 = vmul.f32 0.2, %v13629_v59  ;;  %vm2469_vm12 = vcmp.ge.f32.partialorder %v13629_v59, 0.0  ;;  %4625 = vmatpush1.bf16.msra.mxu1 %v12076_v35  ;;  %v12082_v4 = vld [vmem:[%s17753_s11 + $0x68] sm:$0xff]   ;;  %v2514_v57 = vld [vmem:[%s17752_s10 + $0x50] sm:$0xff]  ;;  %v2515_v14 = vld [vmem:[%s17752_s10 + $0x58] sm:$0xff] }
 0x427   :  { %11060 = vmatprep.subr.bf16.mxu0 %v11059_v58  ;;  %v11063_v25 = vpack.c.bf16 %v2495_v30, %v2494_v48  ;;  %vm2464_vm9 = vcmp.ge.f32.partialorder %v2448_v23, 0.0  ;;  %vm2465_vm10 = vcmp.ge.f32.partialorder %v2449_v24, 0.0  ;;  %v2480_v27 = vmul.f32 0.2, %v2448_v23  ;;  %4626 = vmatprep.subr.bf16.mxu1 %v17765_v3  ;;  %v2519_v16 = vld [vmem:[%s17752_s10 + $0x78] sm:$0xff]  ;;  %v2520_v0 = vld [vmem:[%s17752_s10 + $0x80] sm:$0xff] }
 0x428   :  { %v2481_v6 = vmul.f32 0.2, %v2449_v24  ;;  %v2451_v49 = vadd.f32 %v13597_v33, %v2428_v43  ;;  %vm2466_vm11 = vcmp.ge.f32.partialorder %v2450_v44, 0.0  ;;  %v2482_v38 = vmul.f32 0.2, %v2450_v44  ;;  %v2521_v48 = vld [vmem:[%s17752_s10 + $0x88] sm:$0xff] }
 0x429   :  { %v2496_v53 = vsel %vm2464_vm9, %v2448_v23, %v2480_v27  ;;  %v2429_v50 = vmul.f32 %v13592_v37, %v2406_v9  ;;  %v2408_v61 = vmul.f32 %v13587_v40, %v13543_v13  ;;  %v2409_v19 = vmul.f32 %v13587_v40, %v13545_v22  ;;  %v2522_v28 = vld [vmem:[%s17752_s10 + $0x90] sm:$0xff]  ;;  %v2524_v23 = vld [vmem:[%s17752_s10 + $0xa0] sm:$0xff]  ;;  %v2527_v9 = vld [vmem:[%s17752_s10 + $0xb8] sm:$0xff] }
 0x42a   :  { %11062 = vmatpush3.bf16.msra.mxu0 %v11059_v58  ;;  %v2497_v29 = vsel %vm2465_vm10, %v2449_v24, %v2481_v6  ;;  %vm2467_vm13 = vcmp.ge.f32.partialorder %v2451_v49, 0.0  ;;  %v2483_v47 = vmul.f32 0.2, %v2451_v49  ;;  %v2498_v20 = vsel %vm2466_vm11, %v2450_v44, %v2482_v38  ;;  %4627 = vmatpush1.bf16.msra.mxu1 %v12077_v62  ;;  %v2516_v58 = vld [vmem:[%s17752_s10 + $0x60] sm:$0xff]  ;;  %v2525_v24 = vld [vmem:[%s17752_s10 + $0xa8] sm:$0xff]  ;;  %v2526_v43 = vld [vmem:[%s17752_s10 + $0xb0] sm:$0xff] }
 0x42b   :  { %11064 = vmatprep.subr.bf16.mxu0 %v11063_v25  ;;  %v11067_v26 = vpack.c.bf16 %v2497_v29, %v2496_v53  ;;  %v2452_v34 = vadd.f32 %v13597_v33, %v2429_v50  ;;  %v2431_v13 = vmul.f32 %v13592_v37, %v2408_v61  ;;  %v2501_v1 = vsel %vm2469_vm12, %v13629_v59, %v2485_v52  ;;  %v12078_v59 = vld [vmem:[%s17753_s11 + $0x48] sm:$0xff]   ;;  %v2528_v30 = vld [vmem:[%s17752_s10 + $0xc0] sm:$0xff]  ;;  %v2530_v52 = vld [vmem:[%s17752_s10 + $0xd0] sm:$0xff] }
 0x42c   :  { %v2499_v10 = vsel %vm2467_vm13, %v2451_v49, %v2483_v47  ;;  %v2432_v46 = vmul.f32 %v13592_v37, %v2409_v19  ;;  %4628 = vmatprep.subr.bf16.mxu1 %v17765_v3  ;;  %v2529_v44 = vld [vmem:[%s17752_s10 + $0xc8] sm:$0xff]  ;;  %v2532_v27 = vld [vmem:[%s17752_s10 + $0xe0] sm:$0xff]  ;;  %v2534_v49 = vld [vmem:[%s17752_s10 + $0xf0] sm:$0xff] }
 0x42d   :  { %v11071_v17 = vpack.c.bf16 %v2499_v10, %v2498_v20  ;;  %vm2468_vm14 = vcmp.ge.f32.partialorder %v2452_v34, 0.0  ;;  %v2484_v5 = vmul.f32 0.2, %v2452_v34  ;;  %v2454_v31 = vadd.f32 %v13597_v33, %v2431_v13  ;;  %v2533_v6 = vld [vmem:[%s17752_s10 + $0xe8] sm:$0xff]  ;;  %v2535_v38 = vld [vmem:[%s17752_s10 + $0xf8] sm:$0xff]  ;;  %v2536_v35 = vld [vmem:[%s17752_s10 + $0x100] sm:$0xff] }
 0x42e   :  { %11066 = vmatpush3.bf16.msra.mxu0 %v11063_v25  ;;  %v2455_v22 = vadd.f32 %v13597_v33, %v2432_v46  ;;  %4629 = vmatpush1.bf16.msra.mxu1 %v12078_v59  ;;  %v2531_v25 = vld [vmem:[%s17752_s10 + $0xd8] sm:$0xff]  ;;  %v2537_v53 = vld [vmem:[%s17752_s10 + $0x108] sm:$0xff]  ;;  %v2538_v50 = vld [vmem:[%s17752_s10 + $0x110] sm:$0xff] }
 0x42f   :  { %11068 = vmatprep.subr.bf16.mxu0 %v11067_v26  ;;  %v2500_v15 = vsel %vm2468_vm14, %v2452_v34, %v2484_v5  ;;  %vm2470_vm15 = vcmp.ge.f32.partialorder %v2454_v31, 0.0  ;;  %v2486_v12 = vmul.f32 0.2, %v2454_v31  ;;  %4630 = vmatprep.subr.bf16.mxu1 %v17765_v3  ;;  %v2539_v61 = vld [vmem:[%s17752_s10 + $0x118] sm:$0xff]  ;;  %v2540_v29 = vld [vmem:[%s17752_s10 + $0x120] sm:$0xff]  ;;  %v2541_v47 = vld [vmem:[%s17752_s10 + $0x128] sm:$0xff] }
 0x430   :  { %v11075_v40 = vpack.c.bf16 %v2501_v1, %v2500_v15  ;;  %vm2471_vm0 = vcmp.ge.f32.partialorder %v2455_v22, 0.0  ;;  %v2487_v36 = vmul.f32 0.2, %v2455_v22  ;;  %v2542_v20 = vld [vmem:[%s17752_s10 + $0x130] sm:$0xff]  ;;  %v2543_v62 = vld [vmem:[%s17752_s10 + $0x138] sm:$0xff]  ;;  %v2545_v34 = vld [vmem:[%s17752_s10 + $0x148] sm:$0xff] }
 0x431   :  { %v2502_v37 = vsel %vm2470_vm15, %v2454_v31, %v2486_v12  ;;  %v2546_v19 = vld [vmem:[%s17752_s10 + $0x150] sm:$0xff]  ;;  %v2547_v13 = vld [vmem:[%s17752_s10 + $0x158] sm:$0xff]  ;;  %v2548_v10 = vld [vmem:[%s17752_s10 + $0x160] sm:$0xff] }
 0x432   :  { %11070 = vmatpush3.bf16.msra.mxu0 %v11067_v26  ;;  %v2503_v33 = vsel %vm2471_vm0, %v2455_v22, %v2487_v36  ;;  %4631 = vmatpush1.bf16.msra.mxu1 %v12079_v42  ;;  %v2544_v26 = vld [vmem:[%s17752_s10 + $0x140] sm:$0xff]  ;;  %v2549_v1 = vld [vmem:[%s17752_s10 + $0x168] sm:$0xff]  ;;  %v2550_v31 = vld [vmem:[%s17752_s10 + $0x170] sm:$0xff] }
 0x433   :  { %11072 = vmatprep.subr.bf16.mxu0 %v11071_v17  ;;  %v11079_v7 = vpack.c.bf16 %v2503_v33, %v2502_v37  ;;  %4632 = vmatprep.subr.bf16.mxu1 %v17765_v3  ;;  %v12347_v5 = vld [vmem:[#allocation3] sm:$0xff]  ;;  %v3163_v22 = vld [vmem:[#allocation4 + $0xf] sm:$0xff]  ;;  %v2551_v12 = vld [vmem:[%s17752_s10 + $0x178] sm:$0xff] }
 0x434   :  { %v13856_v46 = vpack.c.bf16 %v12347_v5, %v12347_v5  ;;  %v3162_v15 = vld [vmem:[#allocation4 + $0x7] sm:$0xff]  ;;  %v2554_v37 = vld [vmem:[%s17752_s10 + $0x190] sm:$0xff]  ;;  %v2555_v33 = vld [vmem:[%s17752_s10 + $0x198] sm:$0xff] }
 0x435   :  { %v2552_v59 = vld [vmem:[%s17752_s10 + $0x180] sm:$0xff]  ;;  %v2553_v36 = vld [vmem:[%s17752_s10 + $0x188] sm:$0xff] }
 0x436   :  { %11074 = vmatpush3.bf16.msra.mxu0 %v11071_v17  ;;  %4633 = vmatpush1.bf16.msra.mxu1 %v12080_v41  ;;  %v12084_v17 = vld [vmem:[%s17753_s11 + $0x78] sm:$0xff]   ;;  %v12085_v42 = vld [vmem:[%s17753_s11 + $0x200] sm:$0xff]   ;;  %v12086_v41 = vld [vmem:[%s17753_s11 + $0x208] sm:$0xff]  }
 0x437   :  { %11076 = vmatprep.subr.bf16.mxu0 %v11075_v40  ;;  %4634 = vmatprep.subr.bf16.mxu1 %v17765_v3 }
 0x438   :  { %4642 = vmatprep.mubr.bf16.mxu1 %v13856_v46 }
 0x43a   :  { %11078 = vmatpush3.bf16.msra.mxu0 %v11075_v40  ;;  %4635 = vmatpush1.bf16.msra.mxu1 %v12081_v60  ;;  %v3226_v40 = vpack.c.bf16 %v3163_v22, %v3162_v15  ;;  %v2557_v60 = vld [vmem:[%s17752_s10 + $0x1a8] sm:$0xff] }
 0x43b   :  { %11080 = vmatprep.subr.bf16.mxu0 %v11079_v7  ;;  %4636 = vmatprep.subr.bf16.mxu1 %v17765_v3 }
 0x43e   :  { %11082 = vmatpush3.bf16.msra.mxu0 %v11079_v7  ;;  %4637 = vmatpush1.bf16.msra.mxu1 %v12082_v4  ;;  %v2556_v7 = vld [vmem:[%s17752_s10 + $0x1a0] sm:$0xff]  ;;  %v2559_v4 = vld [vmem:[%s17752_s10 + $0x1b8] sm:$0xff] }
 0x43f   :  { %4638 = vmatprep.subr.bf16.mxu1 %v17765_v3  ;;  %10883 = vmatprep.subr.bf16.mxu0 %v12085_v42 }
 0x441   :  { %10788 = vmatmul.mubr.f32.vlgmr.msra.gmra.mrb[80].mxu0 %v2505_v11  ;;  %v2558_v11 = vld [vmem:[%s17752_s10 + $0x1b0] sm:$0xff] }
 0x442   :  { %10790 = vmatprep.mubr.f32.mxu0 %v2506_v39  ;;  %4639 = vmatpush1.bf16.msra.mxu1 %v12083_v8  ;;  %v12087_v39 = vld [vmem:[%s17753_s11 + $0x210] sm:$0xff]   ;;  %v2561_v8 = vld [vmem:[%s17752_s10 + $0x1c8] sm:$0xff] }
 0x443   :  { %4640 = vmatprep.subr.bf16.mxu1 %v17765_v3  ;;  %10884 = vmatpush3.bf16.msra.mxu0 %v12085_v42 }
 0x444   :  { %10885 = vmatprep.subr.bf16.mxu0 %v12086_v41 }
 0x445   :  { %10791 = vmatmul.mubr.f32.gmra.mrb[82].mxu0 %v2507_v2  ;;  %v2560_v2 = vld [vmem:[%s17752_s10 + $0x1c0] sm:$0xff] }
 0x446   :  { %10793 = vmatprep.mubr.f32.mxu0 %v2508_v55  ;;  %4641 = vmatpush1.bf16.msra.mxu1 %v12084_v17  ;;  %v12088_v55 = vld [vmem:[%s17753_s11 + $0x218] sm:$0xff]  }
 0x447   :  { %4899 = vmatprep.subr.bf16.mxu1 %v17765_v3  ;;  %10886 = vmatpush3.bf16.msra.mxu0 %v12086_v41 }
 0x448   :  { %10887 = vmatprep.subr.bf16.mxu0 %v12087_v39 }
 0x449   :  { %10794 = vmatmul.mubr.f32.gmra.mrb[84].mxu0 %v2509_v56  ;;  %4643 = vmatmul.mubr.bf16.vlgmr.msra.gmra.mrb[112].mxu1 %v3226_v40  ;;  %v2562_v56 = vld [vmem:[%s17752_s10 + $0x1d0] sm:$0xff]  ;;  %v12100_v40 = vld [vmem:[%s17753_s11 + $0xb8] sm:$0xff]  }
 0x44a   :  { %10796 = vmatprep.mubr.f32.mxu0 %v2510_v18  ;;  %v12090_v18 = vld [vmem:[%s17753_s11 + $0x220] sm:$0xff]  }
 0x44b   :  { %10888 = vmatpush3.bf16.msra.mxu0 %v12087_v39 }
 0x44c   :  { %10889 = vmatprep.subr.bf16.mxu0 %v12088_v55 }
 0x44d   :  { %10797 = vmatmul.mubr.f32.gmra.mrb[86].mxu0 %v2511_v45  ;;  %v2563_v45 = vld [vmem:[%s17752_s10 + $0x1d8] sm:$0xff] }
 0x44e   :  { %10799 = vmatprep.mubr.f32.mxu0 %v2512_v63  ;;  %v2564_v63 = vld [vmem:[%s17752_s10 + $0x1e0] sm:$0xff] }
 0x44f   :  { %10890 = vmatpush3.bf16.msra.mxu0 %v12088_v55 }
 0x450   :  { %10891 = vmatprep.subr.bf16.mxu0 %v12090_v18 }
 0x451   :  { %10800 = vmatmul.mubr.f32.gmra.mrb[88].mxu0 %v2513_v54  ;;  %v12091_v54 = vld [vmem:[%s17753_s11 + $0x228] sm:$0xff]  }
 0x452   :  { %10802 = vmatprep.mubr.f32.mxu0 %v2514_v57  ;;  %v2565_v57 = vld [vmem:[%s17752_s10 + $0x1e8] sm:$0xff] }
 0x453   :  { %10892 = vmatpush3.bf16.msra.mxu0 %v12090_v18 }
 0x454   :  { %10893 = vmatprep.subr.bf16.mxu0 %v12091_v54 }
 0x455   :  { %10803 = vmatmul.mubr.f32.gmra.mrb[90].mxu0 %v2515_v14  ;;  %v12092_v14 = vld [vmem:[%s17753_s11 + $0x230] sm:$0xff]  }
 0x456   :  { %10805 = vmatprep.mubr.f32.mxu0 %v2516_v58  ;;  %v12089_v58 = vld [vmem:[%s17753_s11 + $0x80] sm:$0xff]  }
 0x457   :  { %10894 = vmatpush3.bf16.msra.mxu0 %v12091_v54  ;;  %4900 = vmatpush1.bf16.msra.mxu1 %v12089_v58 }
 0x458   :  { %10895 = vmatprep.subr.bf16.mxu0 %v12092_v14  ;;  %4901 = vmatprep.subr.bf16.mxu1 %v17765_v3 }
 0x459   :  { %10806 = vmatmul.mubr.f32.gmra.mrb[92].mxu0 %v2517_v51  ;;  %v2566_v51 = vld [vmem:[%s17752_s10 + $0x1f0] sm:$0xff] }
 0x45a   :  { %10808 = vmatprep.mubr.f32.mxu0 %v2518_v32  ;;  %v2567_v32 = vld [vmem:[%s17752_s10 + $0x1f8] sm:$0xff] }
 0x45b   :  { %10896 = vmatpush3.bf16.msra.mxu0 %v12092_v14 }
 0x45d   :  { %10809 = vmatmul.mubr.f32.gmra.mrb[94].mxu0 %v2519_v16  ;;  %v12093_v16 = vld [vmem:[%s17753_s11 + $0x238] sm:$0xff]  }
 0x45e   :  { %10811 = vmatprep.mubr.f32.mxu0 %v2520_v0  ;;  %10897 = vmatprep.subr.bf16.mxu0 %v12093_v16  ;;  %v12094_v0 = vld [vmem:[%s17753_s11 + $0x88] sm:$0xff]  }
 0x45f   :  { %10898 = vmatpush3.bf16.msra.mxu0 %v12093_v16  ;;  %4902 = vmatpush1.bf16.msra.mxu1 %v12094_v0 }
 0x460   :  { %8381 = vmatprep.subr.bf16.mxu0 %v17765_v3  ;;  %4903 = vmatprep.subr.bf16.mxu1 %v17765_v3 }
 0x461   :  { %10812 = vmatmul.mubr.f32.gmra.mrb[96].mxu0 %v2521_v48  ;;  %v12095_v48 = vld [vmem:[%s17753_s11 + $0x90] sm:$0xff]  }
 0x462   :  { %10814 = vmatprep.mubr.f32.mxu0 %v2522_v28  ;;  %v12096_v28 = vld [vmem:[%s17753_s11 + $0x98] sm:$0xff]  }
 0x463   :  { %4904 = vmatpush1.bf16.msra.mxu1 %v12095_v48 }
 0x464   :  { %4905 = vmatprep.subr.bf16.mxu1 %v17765_v3 }
 0x465   :  { %10815 = vmatmul.mubr.f32.gmra.mrb[98].mxu0 %v2523_v21  ;;  %v12097_v21 = vld [vmem:[%s17753_s11 + $0xa0] sm:$0xff]  }
 0x466   :  { %10817 = vmatprep.mubr.f32.mxu0 %v2524_v23  ;;  %v12098_v23 = vld [vmem:[%s17753_s11 + $0xa8] sm:$0xff]  }
 0x467   :  { %4906 = vmatpush1.bf16.msra.mxu1 %v12096_v28 }
 0x468   :  { %4907 = vmatprep.subr.bf16.mxu1 %v17765_v3 }
 0x469   :  { %10818 = vmatmul.mubr.f32.gmra.mrb[100].mxu0 %v2525_v24 }
 0x46a   :  { %10820 = vmatprep.mubr.f32.mxu0 %v2526_v43 }
 0x46b   :  { %4908 = vmatpush1.bf16.msra.mxu1 %v12097_v21 }
 0x46c   :  { %4909 = vmatprep.subr.bf16.mxu1 %v17765_v3 }
 0x46d   :  { %10821 = vmatmul.mubr.f32.gmra.mrb[102].mxu0 %v2527_v9 }
 0x46e   :  { %10823 = vmatprep.mubr.f32.mxu0 %v2528_v30 }
 0x46f   :  { %4910 = vmatpush1.bf16.msra.mxu1 %v12098_v23  ;;  %v12101_v23 = vld [vmem:[%s17753_s11 + $0xc0] sm:$0xff]  }
 0x470   :  { %4911 = vmatprep.subr.bf16.mxu1 %v17765_v3 }
 0x471   :  { %10824 = vmatmul.mubr.f32.gmra.mrb[104].mxu0 %v2529_v44  ;;  %v12099_v44 = vld [vmem:[%s17753_s11 + $0xb0] sm:$0xff]  }
 0x472   :  { %10826 = vmatprep.mubr.f32.mxu0 %v2530_v52 }
 0x473   :  { %4912 = vmatpush1.bf16.msra.mxu1 %v12099_v44 }
 0x474   :  { %4913 = vmatprep.subr.bf16.mxu1 %v17765_v3 }
 0x475   :  { %10827 = vmatmul.mubr.f32.gmra.mrb[106].mxu0 %v2531_v25 }
 0x476   :  { %10829 = vmatprep.mubr.f32.mxu0 %v2532_v27 }
 0x477   :  { %4914 = vmatpush1.bf16.msra.mxu1 %v12100_v40  ;;  %v12102_v40 = vld [vmem:[%s17753_s11 + $0xc8] sm:$0xff]  }
 0x478   :  { %4915 = vmatprep.subr.bf16.mxu1 %v17765_v3 }
 0x479   :  { %10830 = vmatmul.mubr.f32.gmra.mrb[108].mxu0 %v2533_v6 }
 0x47a   :  { %10832 = vmatprep.mubr.f32.mxu0 %v2534_v49 }
 0x47b   :  { %4916 = vmatpush1.bf16.msra.mxu1 %v12101_v23 }
 0x47c   :  { %4917 = vmatprep.subr.bf16.mxu1 %v17765_v3 }
 0x47d   :  { %10833 = vmatmul.mubr.f32.gmra.mrb[110].mxu0 %v2535_v38 }
 0x47e   :  { %10835 = vmatprep.mubr.f32.mxu0 %v2536_v35 }
 0x47f   :  { %4918 = vmatpush1.bf16.msra.mxu1 %v12102_v40 }
 0x480   :  { %4919 = vmatprep.subr.bf16.mxu1 %v17765_v3 }
 0x481   :  { %10836 = vmatmul.mubr.f32.gmra.mrb[112].mxu0 %v2537_v53 }
 0x482   :  { %10838 = vmatprep.mubr.f32.mxu0 %v2538_v50 }
 0x485   :  { %10839 = vmatmul.mubr.f32.gmra.mrb[114].mxu0 %v2539_v61 }
 0x486   :  { %10841 = vmatprep.mubr.f32.mxu0 %v2540_v29 }
 0x489   :  { %10842 = vmatmul.mubr.f32.gmra.mrb[116].mxu0 %v2541_v47 }
 0x48a   :  { %10844 = vmatprep.mubr.f32.mxu0 %v2542_v20 }
 0x48d   :  { %10845 = vmatmul.mubr.f32.gmra.mrb[118].mxu0 %v2543_v62 }
 0x48e   :  { %10847 = vmatprep.mubr.f32.mxu0 %v2544_v26 }
 0x491   :  { %10848 = vmatmul.mubr.f32.gmra.mrb[120].mxu0 %v2545_v34 }
 0x492   :  { %10850 = vmatprep.mubr.f32.mxu0 %v2546_v19 }
 0x495   :  { %10851 = vmatmul.mubr.f32.gmra.mrb[122].mxu0 %v2547_v13 }
 0x496   :  { %10853 = vmatprep.mubr.f32.mxu0 %v2548_v10 }
 0x499   :  { %10854 = vmatmul.mubr.f32.gmra.mrb[124].mxu0 %v2549_v1 }
 0x49a   :  { %10856 = vmatprep.mubr.f32.mxu0 %v2550_v31 }
 0x49d   :  { %10857 = vmatmul.mubr.f32.gmra.mrb[126].mxu0 %v2551_v12 }
 0x49e   :  { %10859 = vmatprep.mubr.f32.mxu0 %v2552_v59 }
 0x4a1   :  { %10860 = vmatmul.mubr.f32.gmra.mrb[128].mxu0 %v2553_v36 }
 0x4a2   :  { %10862 = vmatprep.mubr.f32.mxu0 %v2554_v37 }
 0x4a5   :  { %10863 = vmatmul.mubr.f32.gmra.mrb[130].mxu0 %v2555_v33 }
 0x4a6   :  { %10865 = vmatprep.mubr.f32.mxu0 %v2556_v7 }
 0x4a9   :  { %10866 = vmatmul.mubr.f32.gmra.mrb[132].mxu0 %v2557_v60 }
 0x4aa   :  { %10868 = vmatprep.mubr.f32.mxu0 %v2558_v11 }
 0x4ad   :  { %10869 = vmatmul.mubr.f32.gmra.mrb[134].mxu0 %v2559_v4 }
 0x4ae   :  { %10871 = vmatprep.mubr.f32.mxu0 %v2560_v2 }
 0x4b1   :  { %10872 = vmatmul.mubr.f32.gmra.mrb[136].mxu0 %v2561_v8 }
 0x4b2   :  { %10874 = vmatprep.mubr.f32.mxu0 %v2562_v56 }
 0x4b5   :  { %10875 = vmatmul.mubr.f32.gmra.mrb[138].mxu0 %v2563_v45 }
 0x4b6   :  { %10877 = vmatprep.mubr.f32.mxu0 %v2564_v63 }
 0x4b9   :  { %10878 = vmatmul.mubr.f32.gmra.mrb[140].mxu0 %v2565_v57 }
 0x4ba   :  { %10880 = vmatprep.mubr.f32.mxu0 %v2566_v51 }
 0x4bd   :  { %10881 = vmatmul.mubr.f32.gmra.mrb[142].mxu0 %v2567_v32 }
 0x514   :  { %v10789_v24 = vpop.f32.mrb[80].mxu0 }
 0x515   :  { %3099 = vst [vmem:[#allocation4 + $0x30] sm:$0xff] %v10789_v24  ;;  %v2634_v43 = vpop.f32.mrb[81].mxu0 }
 0x516   :  { %3098 = vst [vmem:[#allocation4 + $0x28] sm:$0xff] %v2634_v43  ;;  %v3323_v9 = vpack.c.bf16 %v10789_v24, %v2634_v43 }
 0x518   :  { %v10792_v30 = vpop.f32.mrb[82].mxu0  ;;  %4650 = vmatprep.mubr.bf16.mxu1 %v3323_v9 }
 0x519   :  { %3101 = vst [vmem:[#allocation4 + $0x50] sm:$0xff] %v10792_v30  ;;  %v2644_v52 = vpop.f32.mrb[83].mxu0 }
 0x51a   :  { %3100 = vst [vmem:[#allocation4 + $0x48] sm:$0xff] %v2644_v52  ;;  %v3324_v25 = vpack.c.bf16 %v10792_v30, %v2644_v52 }
 0x51c   :  { %v10795_v27 = vpop.f32.mrb[84].mxu0 }
 0x51d   :  { %v3164_v6 = vld [vmem:[#allocation4 + $0x27] sm:$0xff]  ;;  %v3165_v49 = vld [vmem:[#allocation4 + $0x2f] sm:$0xff]  ;;  %3103 = vst [vmem:[#allocation4 + $0x70] sm:$0xff] %v10795_v27  ;;  %v2654_v38 = vpop.f32.mrb[85].mxu0 }
 0x51e   :  { %v3227_v35 = vpack.c.bf16 %v3165_v49, %v3164_v6  ;;  %3102 = vst [vmem:[#allocation4 + $0x68] sm:$0xff] %v2654_v38  ;;  %v3325_v53 = vpack.c.bf16 %v10795_v27, %v2654_v38 }
 0x520   :  { %4651 = vmatmul.mubr.bf16.gmra.mrb[116].mxu1 %v3227_v35  ;;  %v10798_v50 = vpop.f32.mrb[86].mxu0  ;;  %v3932_v61 = vld [vmem:[#allocation4 + $0x51] sm:$0xff] }
 0x521   :  { %4658 = vmatprep.mubr.bf16.mxu1 %v3324_v25  ;;  %v3166_v29 = vld [vmem:[#allocation4 + $0x47] sm:$0xff]  ;;  %v3167_v47 = vld [vmem:[#allocation4 + $0x4f] sm:$0xff]  ;;  %3105 = vst [vmem:[#allocation4 + $0x90] sm:$0xff] %v10798_v50  ;;  %v2664_v20 = vpop.f32.mrb[87].mxu0 }
 0x522   :  { %v3931_v62 = vld [vmem:[#allocation4 + $0x49] sm:$0xff]  ;;  %3104 = vst [vmem:[#allocation4 + $0x88] sm:$0xff] %v2664_v20  ;;  %v3326_v26 = vpack.c.bf16 %v10798_v50, %v2664_v20  ;;  %v3228_v19 = vpack.c.bf16 %v3167_v47, %v3166_v29 }
 0x523   :  { %v3995_v34 = vpack.c.bf16 %v3932_v61, %v3931_v62 }
 0x524   :  { %v13967_v13 = vpop.f32.mrb[88].mxu0  ;;  %v3934_v10 = vld [vmem:[#allocation4 + $0x71] sm:$0xff] }
 0x525   :  { %10899 = vmatprep.mubr.bf16.mxu0 %v3995_v34  ;;  %3107 = vst [vmem:[#allocation4 + $0xb0] sm:$0xff] %v13967_v13  ;;  %v2674_v1 = vpop.f32.mrb[89].mxu0  ;;  %v3933_v17 = vld [vmem:[#allocation4 + $0x69] sm:$0xff] }
 0x526   :  { %3106 = vst [vmem:[#allocation4 + $0xa8] sm:$0xff] %v2674_v1  ;;  %v3327_v5 = vpack.c.bf16 %v13967_v13, %v2674_v1  ;;  %v3996_v31 = vpack.c.bf16 %v3934_v10, %v3933_v17  ;;  %v3168_v12 = vld [vmem:[#allocation4 + $0x67] sm:$0xff]  ;;  %v3169_v59 = vld [vmem:[#allocation4 + $0x6f] sm:$0xff] }
 0x527   :  { %v3229_v7 = vpack.c.bf16 %v3169_v59, %v3168_v12 }
 0x528   :  { %4659 = vmatmul.mubr.bf16.gmra.mrb[120].mxu1 %v3228_v19  ;;  %v13971_v15 = vpop.f32.mrb[90].mxu0  ;;  %10900 = vmatmul.mubr.bf16.vlgmr.msra.gmra.mrb[144].mxu0 %v3996_v31  ;;  %v3936_v22 = vld [vmem:[#allocation4 + $0x91] sm:$0xff] }
 0x529   :  { %4666 = vmatprep.mubr.bf16.mxu1 %v3325_v53  ;;  %3109 = vst [vmem:[#allocation4 + $0xd0] sm:$0xff] %v13971_v15  ;;  %v13977_v36 = vpop.f32.mrb[91].mxu0  ;;  %v3935_v37 = vld [vmem:[#allocation4 + $0x89] sm:$0xff] }
 0x52a   :  { %3108 = vst [vmem:[#allocation4 + $0xc8] sm:$0xff] %v13977_v36  ;;  %v3328_v42 = vpack.c.bf16 %v13971_v15, %v13977_v36  ;;  %v13982_v33 = vpack.c.bf16 %v3936_v22, %v3935_v37  ;;  %v3170_v56 = vld [vmem:[#allocation4 + $0x87] sm:$0xff]  ;;  %v3171_v18 = vld [vmem:[#allocation4 + $0x8f] sm:$0xff] }
 0x52b   :  { %v3230_v14 = vpack.c.bf16 %v3171_v18, %v3170_v56 }
 0x52c   :  { %v13985_v41 = vpop.f32.mrb[92].mxu0  ;;  %10903 = vmatprep.mubr.bf16.mxu0 %v13982_v33  ;;  %v3938_v60 = vld [vmem:[#allocation4 + $0xb1] sm:$0xff] }
 0x52d   :  { %3111 = vst [vmem:[#allocation4 + $0xf0] sm:$0xff] %v13985_v41  ;;  %v13989_v11 = vpop.f32.mrb[93].mxu0  ;;  %v3937_v39 = vld [vmem:[#allocation4 + $0xa9] sm:$0xff] }
 0x52e   :  { %3110 = vst [vmem:[#allocation4 + $0xe8] sm:$0xff] %v13989_v11  ;;  %v3329_v4 = vpack.c.bf16 %v13985_v41, %v13989_v11  ;;  %v13994_v2 = vpack.c.bf16 %v3938_v60, %v3937_v39  ;;  %v3172_v24 = vld [vmem:[#allocation4 + $0xa7] sm:$0xff]  ;;  %v3173_v43 = vld [vmem:[#allocation4 + $0xaf] sm:$0xff] }
 0x52f   :  { %v3231_v25 = vpack.c.bf16 %v3173_v43, %v3172_v24 }
 0x530   :  { %4667 = vmatmul.mubr.bf16.gmra.mrb[124].mxu1 %v3229_v7  ;;  %v13996_v55 = vpop.f32.mrb[94].mxu0  ;;  %10904 = vmatmul.mubr.bf16.gmra.mrb[148].mxu0 %v13994_v2  ;;  %v3940_v8 = vld [vmem:[#allocation4 + $0xd1] sm:$0xff] }
 0x531   :  { %4674 = vmatprep.mubr.bf16.mxu1 %v3326_v26  ;;  %3113 = vst [vmem:[#allocation4 + $0x110] sm:$0xff] %v13996_v55  ;;  %v14000_v45 = vpop.f32.mrb[95].mxu0  ;;  %v3939_v63 = vld [vmem:[#allocation4 + $0xc9] sm:$0xff] }
 0x532   :  { %3112 = vst [vmem:[#allocation4 + $0x108] sm:$0xff] %v14000_v45  ;;  %v3330_v54 = vpack.c.bf16 %v13996_v55, %v14000_v45  ;;  %v14005_v57 = vpack.c.bf16 %v3940_v8, %v3939_v63  ;;  %v3174_v29 = vld [vmem:[#allocation4 + $0xc7] sm:$0xff]  ;;  %v3175_v47 = vld [vmem:[#allocation4 + $0xcf] sm:$0xff] }
 0x533   :  { %v3232_v19 = vpack.c.bf16 %v3175_v47, %v3174_v29  ;;  %v3962_v29 = vld [vmem:[#allocation4 + $0x231] sm:$0xff] }
 0x534   :  { %v14007_v58 = vpop.f32.mrb[96].mxu0  ;;  %10907 = vmatprep.mubr.bf16.mxu0 %v14005_v57  ;;  %v3942_v51 = vld [vmem:[#allocation4 + $0xf1] sm:$0xff] }
 0x535   :  { %3115 = vst [vmem:[#allocation4 + $0x130] sm:$0xff] %v14007_v58  ;;  %v14011_v32 = vpop.f32.mrb[97].mxu0  ;;  %v3941_v16 = vld [vmem:[#allocation4 + $0xe9] sm:$0xff] }
 0x536   :  { %3114 = vst [vmem:[#allocation4 + $0x128] sm:$0xff] %v14011_v32  ;;  %v3331_v0 = vpack.c.bf16 %v14007_v58, %v14011_v32  ;;  %v14016_v48 = vpack.c.bf16 %v3942_v51, %v3941_v16  ;;  %v3176_v12 = vld [vmem:[#allocation4 + $0xe7] sm:$0xff]  ;;  %v3177_v59 = vld [vmem:[#allocation4 + $0xef] sm:$0xff] }
 0x537   :  { %v3233_v60 = vpack.c.bf16 %v3177_v59, %v3176_v12  ;;  %v12103_v47 = vld [vmem:[%s17753_s11 + $0xd0] sm:$0xff]  }
 0x538   :  { %4675 = vmatmul.mubr.bf16.gmra.mrb[128].mxu1 %v3230_v14  ;;  %v14018_v28 = vpop.f32.mrb[98].mxu0  ;;  %10908 = vmatmul.mubr.bf16.gmra.mrb[152].mxu0 %v14016_v48  ;;  %v3944_v21 = vld [vmem:[#allocation4 + $0x111] sm:$0xff] }
 0x539   :  { %4682 = vmatprep.mubr.bf16.mxu1 %v3327_v5  ;;  %3117 = vst [vmem:[#allocation4 + $0x150] sm:$0xff] %v14018_v28  ;;  %v14025_v9 = vpop.f32.mrb[99].mxu0  ;;  %v3943_v30 = vld [vmem:[#allocation4 + $0x109] sm:$0xff]  ;;  %4920 = vmatpush1.bf16.msra.mxu1 %v12103_v47 }
 0x53a   :  { %3116 = vst [vmem:[#allocation4 + $0x148] sm:$0xff] %v14025_v9  ;;  %v3332_v44 = vpack.c.bf16 %v14018_v28, %v14025_v9  ;;  %v14030_v52 = vpack.c.bf16 %v3944_v21, %v3943_v30  ;;  %v3178_v14 = vld [vmem:[#allocation4 + $0x107] sm:$0xff]  ;;  %v3179_v51 = vld [vmem:[#allocation4 + $0x10f] sm:$0xff]  ;;  %4921 = vmatprep.subr.bf16.mxu1 %v17765_v3 }
 0x53b   :  { %v3234_v24 = vpack.c.bf16 %v3179_v51, %v3178_v14 }
 0x53c   :  { %v14033_v27 = vpop.f32.mrb[100].mxu0  ;;  %10911 = vmatprep.mubr.bf16.mxu0 %v14030_v52  ;;  %v3946_v6 = vld [vmem:[#allocation4 + $0x131] sm:$0xff] }
 0x53d   :  { %3119 = vst [vmem:[#allocation4 + $0x170] sm:$0xff] %v14033_v27  ;;  %v14037_v49 = vpop.f32.mrb[101].mxu0  ;;  %v3945_v38 = vld [vmem:[#allocation4 + $0x129] sm:$0xff] }
 0x53e   :  { %3118 = vst [vmem:[#allocation4 + $0x168] sm:$0xff] %v14037_v49  ;;  %v3333_v35 = vpack.c.bf16 %v14033_v27, %v14037_v49  ;;  %v14042_v53 = vpack.c.bf16 %v3946_v6, %v3945_v38  ;;  %v3961_v6 = vld [vmem:[#allocation4 + $0x229] sm:$0xff] }
 0x53f   :  { %v4010_v58 = vpack.c.bf16 %v3962_v29, %v3961_v6 }
 0x540   :  { %4683 = vmatmul.mubr.bf16.gmra.mrb[132].mxu1 %v3231_v25  ;;  %v14044_v50 = vpop.f32.mrb[102].mxu0  ;;  %10912 = vmatmul.mubr.bf16.gmra.mrb[156].mxu0 %v14042_v53  ;;  %v3948_v61 = vld [vmem:[#allocation4 + $0x151] sm:$0xff] }
 0x541   :  { %4690 = vmatprep.mubr.bf16.mxu1 %v3328_v42  ;;  %3121 = vst [vmem:[#allocation4 + $0x190] sm:$0xff] %v14044_v50  ;;  %v14051_v20 = vpop.f32.mrb[103].mxu0  ;;  %v3947_v62 = vld [vmem:[#allocation4 + $0x149] sm:$0xff] }
 0x542   :  { %3120 = vst [vmem:[#allocation4 + $0x188] sm:$0xff] %v14051_v20  ;;  %v3334_v26 = vpack.c.bf16 %v14044_v50, %v14051_v20  ;;  %v14056_v34 = vpack.c.bf16 %v3948_v61, %v3947_v62  ;;  %v3180_v62 = vld [vmem:[#allocation4 + $0x127] sm:$0xff] }
 0x544   :  { %v14058_v13 = vpop.f32.mrb[104].mxu0  ;;  %10915 = vmatprep.mubr.bf16.mxu0 %v14056_v34  ;;  %v3950_v10 = vld [vmem:[#allocation4 + $0x171] sm:$0xff] }
 0x545   :  { %3123 = vst [vmem:[#allocation4 + $0x1b0] sm:$0xff] %v14058_v13  ;;  %v14062_v1 = vpop.f32.mrb[105].mxu0  ;;  %v3949_v17 = vld [vmem:[#allocation4 + $0x169] sm:$0xff] }
 0x546   :  { %3122 = vst [vmem:[#allocation4 + $0x1a8] sm:$0xff] %v14062_v1  ;;  %v3335_v5 = vpack.c.bf16 %v14058_v13, %v14062_v1  ;;  %v14067_v31 = vpack.c.bf16 %v3950_v10, %v3949_v17  ;;  %v3184_v29 = vld [vmem:[#allocation4 + $0x167] sm:$0xff]  ;;  %v3185_v47 = vld [vmem:[#allocation4 + $0x16f] sm:$0xff] }
 0x548   :  { %4691 = vmatmul.mubr.bf16.gmra.mrb[136].mxu1 %v3232_v19  ;;  %v14069_v15 = vpop.f32.mrb[106].mxu0  ;;  %10916 = vmatmul.mubr.bf16.gmra.mrb[160].mxu0 %v14067_v31  ;;  %v3952_v22 = vld [vmem:[#allocation4 + $0x191] sm:$0xff] }
 0x549   :  { %4698 = vmatprep.mubr.bf16.mxu1 %v3329_v4  ;;  %3125 = vst [vmem:[#allocation4 + $0x1d0] sm:$0xff] %v14069_v15  ;;  %v14079_v36 = vpop.f32.mrb[107].mxu0  ;;  %v3951_v37 = vld [vmem:[#allocation4 + $0x189] sm:$0xff] }
 0x54a   :  { %3124 = vst [vmem:[#allocation4 + $0x1c8] sm:$0xff] %v14079_v36  ;;  %v3336_v42 = vpack.c.bf16 %v14069_v15, %v14079_v36  ;;  %v14084_v7 = vpack.c.bf16 %v3952_v22, %v3951_v37  ;;  %v3181_v19 = vld [vmem:[#allocation4 + $0x12f] sm:$0xff] }
 0x54b   :  { %v3235_v12 = vpack.c.bf16 %v3181_v19, %v3180_v62 }
 0x54c   :  { %v14087_v41 = vpop.f32.mrb[108].mxu0  ;;  %10919 = vmatprep.mubr.bf16.mxu0 %v14084_v7  ;;  %v3954_v11 = vld [vmem:[#allocation4 + $0x1b1] sm:$0xff] }
 0x54d   :  { %3127 = vst [vmem:[#allocation4 + $0x1f0] sm:$0xff] %v14087_v41  ;;  %v14091_v39 = vpop.f32.mrb[109].mxu0  ;;  %v3953_v4 = vld [vmem:[#allocation4 + $0x1a9] sm:$0xff] }
 0x54e   :  { %3126 = vst [vmem:[#allocation4 + $0x1e8] sm:$0xff] %v14091_v39  ;;  %v3337_v8 = vpack.c.bf16 %v14087_v41, %v14091_v39  ;;  %v14096_v56 = vpack.c.bf16 %v3954_v11, %v3953_v4  ;;  %v3182_v11 = vld [vmem:[#allocation4 + $0x147] sm:$0xff]  ;;  %v3183_v4 = vld [vmem:[#allocation4 + $0x14f] sm:$0xff] }
 0x550   :  { %4699 = vmatmul.mubr.bf16.gmra.mrb[140].mxu1 %v3233_v60  ;;  %v10834_v18 = vpop.f32.mrb[110].mxu0  ;;  %10920 = vmatmul.mubr.bf16.gmra.mrb[164].mxu0 %v14096_v56  ;;  %v3956_v63 = vld [vmem:[#allocation4 + $0x1d1] sm:$0xff] }
 0x551   :  { %4706 = vmatprep.mubr.bf16.mxu1 %v3330_v54  ;;  %3129 = vst [vmem:[#allocation4 + $0x210] sm:$0xff] %v10834_v18  ;;  %v2784_v16 = vpop.f32.mrb[111].mxu0  ;;  %v3955_v21 = vld [vmem:[#allocation4 + $0x1c9] sm:$0xff] }
 0x552   :  { %3128 = vst [vmem:[#allocation4 + $0x208] sm:$0xff] %v2784_v16  ;;  %v14102_v23 = vpack.c.bf16 %v3956_v63, %v3955_v21  ;;  %v3236_v16 = vpack.c.bf16 %v3183_v4, %v3182_v11 }
 0x554   :  { %v14104_v43 = vpop.f32.mrb[112].mxu0  ;;  %10923 = vmatprep.mubr.bf16.mxu0 %v14102_v23  ;;  %v3958_v30 = vld [vmem:[#allocation4 + $0x1f1] sm:$0xff] }
 0x555   :  { %3131 = vst [vmem:[#allocation4 + $0x270] sm:$0xff] %v14104_v43  ;;  %v14108_v25 = vpop.f32.mrb[113].mxu0  ;;  %v3957_v55 = vld [vmem:[#allocation4 + $0x1e9] sm:$0xff] }
 0x556   :  { %3130 = vst [vmem:[#allocation4 + $0x268] sm:$0xff] %v14108_v25  ;;  %v14113_v54 = vpack.c.bf16 %v3958_v30, %v3957_v55 }
 0x558   :  { %4707 = vmatmul.mubr.bf16.gmra.mrb[144].mxu1 %v3234_v24  ;;  %v14115_v38 = vpop.f32.mrb[114].mxu0  ;;  %10924 = vmatmul.mubr.bf16.gmra.mrb[168].mxu0 %v14113_v54  ;;  %v3960_v61 = vld [vmem:[#allocation4 + $0x211] sm:$0xff] }
 0x559   :  { %4714 = vmatprep.mubr.bf16.mxu1 %v3331_v0  ;;  %3133 = vst [vmem:[#allocation4 + $0x290] sm:$0xff] %v14115_v38  ;;  %v14125_v10 = vpop.f32.mrb[115].mxu0  ;;  %v3959_v17 = vld [vmem:[#allocation4 + $0x209] sm:$0xff] }
 0x55a   :  { %3132 = vst [vmem:[#allocation4 + $0x288] sm:$0xff] %v14125_v10  ;;  %v4009_v40 = vpack.c.bf16 %v3960_v61, %v3959_v17  ;;  %v12104_v61 = vld [vmem:[%s17753_s11 + $0xd8] sm:$0xff]  }
 0x55b   :  { %4922 = vmatpush1.bf16.msra.mxu1 %v12104_v61 }
 0x55c   :  { %v14131_v59 = vpop.f32.mrb[116].mxu0  ;;  %10927 = vmatprep.mubr.bf16.mxu0 %v4009_v40  ;;  %4923 = vmatprep.subr.bf16.mxu1 %v17765_v3 }
 0x55d   :  { %3135 = vst [vmem:[#allocation4 + $0x2b0] sm:$0xff] %v14131_v59  ;;  %v14134_v32 = vpop.f32.mrb[117].mxu0 }
 0x55e   :  { %3134 = vst [vmem:[#allocation4 + $0x2a8] sm:$0xff] %v14134_v32 }
 0x560   :  { %4715 = vmatmul.mubr.bf16.gmra.mrb[148].mxu1 %v3235_v12  ;;  %v14139_v37 = vpop.f32.mrb[118].mxu0  ;;  %10928 = vmatmul.mubr.bf16.gmra.mrb[172].mxu0 %v4010_v58  ;;  %v3964_v60 = vld [vmem:[#allocation4 + $0x291] sm:$0xff]  ;;  %v3237_v12 = vpack.c.bf16 %v3185_v47, %v3184_v29 }
 0x561   :  { %4722 = vmatprep.mubr.bf16.mxu1 %v3332_v44  ;;  %3137 = vst [vmem:[#allocation4 + $0x2d0] sm:$0xff] %v14139_v37  ;;  %v14145_v18 = vpop.f32.mrb[119].mxu0  ;;  %v3963_v63 = vld [vmem:[#allocation4 + $0x289] sm:$0xff] }
 0x562   :  { %3136 = vst [vmem:[#allocation4 + $0x2c8] sm:$0xff] %v14145_v18  ;;  %v14150_v51 = vpack.c.bf16 %v3964_v60, %v3963_v63 }
 0x564   :  { %v14152_v21 = vpop.f32.mrb[120].mxu0  ;;  %10931 = vmatprep.mubr.bf16.mxu0 %v14150_v51  ;;  %v3966_v28 = vld [vmem:[#allocation4 + $0x2b1] sm:$0xff] }
 0x565   :  { %3139 = vst [vmem:[#allocation4 + $0x2f0] sm:$0xff] %v14152_v21  ;;  %v14156_v9 = vpop.f32.mrb[121].mxu0  ;;  %v3965_v44 = vld [vmem:[#allocation4 + $0x2a9] sm:$0xff] }
 0x566   :  { %3138 = vst [vmem:[#allocation4 + $0x2e8] sm:$0xff] %v14156_v9  ;;  %v14161_v30 = vpack.c.bf16 %v3966_v28, %v3965_v44  ;;  %v3187_v28 = vld [vmem:[#allocation4 + $0x18f] sm:$0xff] }
 0x568   :  { %4723 = vmatmul.mubr.bf16.gmra.mrb[152].mxu1 %v3236_v16  ;;  %v14163_v55 = vpop.f32.mrb[122].mxu0  ;;  %10932 = vmatmul.mubr.bf16.gmra.mrb[176].mxu0 %v14161_v30  ;;  %v3968_v6 = vld [vmem:[#allocation4 + $0x2d1] sm:$0xff]  ;;  %v3186_v16 = vld [vmem:[#allocation4 + $0x187] sm:$0xff] }
 0x569   :  { %4730 = vmatprep.mubr.bf16.mxu1 %v3333_v35  ;;  %3141 = vst [vmem:[#allocation4 + $0x310] sm:$0xff] %v14163_v55  ;;  %v14173_v62 = vpop.f32.mrb[123].mxu0  ;;  %v3967_v19 = vld [vmem:[#allocation4 + $0x2c9] sm:$0xff]  ;;  %v14206_v47 = vpack.c.bf16 %v3187_v28, %v3186_v16  ;;  %v12105_v16 = vld [vmem:[%s17753_s11 + $0xe0] sm:$0xff]  }
 0x56a   :  { %3140 = vst [vmem:[#allocation4 + $0x308] sm:$0xff] %v14173_v62  ;;  %v14178_v40 = vpack.c.bf16 %v3968_v6, %v3967_v19  ;;  %v3188_v28 = vld [vmem:[#allocation4 + $0x1a7] sm:$0xff]  ;;  %4924 = vmatpush1.bf16.msra.mxu1 %v12105_v16 }
 0x56b   :  { %4925 = vmatprep.subr.bf16.mxu1 %v17765_v3 }
 0x56c   :  { %v14181_v27 = vpop.f32.mrb[124].mxu0  ;;  %10935 = vmatprep.mubr.bf16.mxu0 %v14178_v40  ;;  %v3970_v49 = vld [vmem:[#allocation4 + $0x2f1] sm:$0xff] }
 0x56d   :  { %3143 = vst [vmem:[#allocation4 + $0x330] sm:$0xff] %v14181_v27  ;;  %v14185_v35 = vpop.f32.mrb[125].mxu0  ;;  %v3969_v58 = vld [vmem:[#allocation4 + $0x2e9] sm:$0xff] }
 0x56e   :  { %3142 = vst [vmem:[#allocation4 + $0x328] sm:$0xff] %v14185_v35  ;;  %v14190_v11 = vpack.c.bf16 %v3970_v49, %v3969_v58 }
 0x570   :  { %4731 = vmatmul.mubr.bf16.gmra.mrb[156].mxu1 %v3237_v12  ;;  %v14192_v4 = vpop.f32.mrb[126].mxu0  ;;  %10936 = vmatmul.mubr.bf16.gmra.mrb[180].mxu0 %v14190_v11  ;;  %v3972_v63 = vld [vmem:[#allocation4 + $0x311] sm:$0xff] }
 0x571   :  { %4738 = vmatprep.mubr.bf16.mxu1 %v3334_v26  ;;  %3145 = vst [vmem:[#allocation4 + $0x350] sm:$0xff] %v14192_v4  ;;  %v14199_v44 = vpop.f32.mrb[127].mxu0  ;;  %v3971_v6 = vld [vmem:[#allocation4 + $0x309] sm:$0xff] }
 0x572   :  { %3144 = vst [vmem:[#allocation4 + $0x348] sm:$0xff] %v14199_v44  ;;  %v14204_v29 = vpack.c.bf16 %v3972_v63, %v3971_v6  ;;  %v3189_v6 = vld [vmem:[#allocation4 + $0x1af] sm:$0xff] }
 0x573   :  { %v14238_v60 = vpack.c.bf16 %v3189_v6, %v3188_v28  ;;  %v3191_v12 = vld [vmem:[#allocation4 + $0x1cf] sm:$0xff] }
 0x574   :  { %17875 = vst [vmem:[#allocation6_spill] sm:$0xff] %v14204_v29  ;;  %v14208_v19 = vpop.f32.mrb[128].mxu0  ;;  %10939 = vmatprep.mubr.bf16.mxu0 %v14204_v29  ;;  %v3974_v50 = vld [vmem:[#allocation4 + $0x331] sm:$0xff] }
 0x575   :  { %3147 = vst [vmem:[#allocation4 + $0x370] sm:$0xff] %v14208_v19  ;;  %v14212_v20 = vpop.f32.mrb[129].mxu0  ;;  %v3973_v26 = vld [vmem:[#allocation4 + $0x329] sm:$0xff] }
 0x576   :  { %3146 = vst [vmem:[#allocation4 + $0x368] sm:$0xff] %v14212_v20  ;;  %v14217_v49 = vpack.c.bf16 %v3974_v50, %v3973_v26 }
 0x578   :  { %17876 = vst [vmem:[#allocation7_spill] sm:$0xff] %v14217_v49  ;;  %4739 = vmatmul.mubr.bf16.gmra.mrb[160].mxu1 %v14206_v47  ;;  %v14220_v58 = vpop.f32.mrb[130].mxu0  ;;  %10940 = vmatmul.mubr.bf16.gmra.mrb[184].mxu0 %v14217_v49  ;;  %v3976_v63 = vld [vmem:[#allocation4 + $0x351] sm:$0xff] }
 0x579   :  { %4746 = vmatprep.mubr.bf16.mxu1 %v3335_v5  ;;  %3149 = vst [vmem:[#allocation4 + $0x390] sm:$0xff] %v14220_v58  ;;  %v14230_v50 = vpop.f32.mrb[131].mxu0  ;;  %v3975_v26 = vld [vmem:[#allocation4 + $0x349] sm:$0xff] }
 0x57a   :  { %3148 = vst [vmem:[#allocation4 + $0x388] sm:$0xff] %v14230_v50  ;;  %v14235_v61 = vpack.c.bf16 %v3976_v63, %v3975_v26  ;;  %v3190_v26 = vld [vmem:[#allocation4 + $0x1c7] sm:$0xff] }
 0x57b   :  { %v14266_v14 = vpack.c.bf16 %v3191_v12, %v3190_v26  ;;  %v3193_v26 = vld [vmem:[#allocation4 + $0x1ef] sm:$0xff] }
 0x57c   :  { %17877 = vst [vmem:[#allocation8_spill] sm:$0xff] %v14235_v61  ;;  %v14240_v13 = vpop.f32.mrb[132].mxu0  ;;  %10943 = vmatprep.mubr.bf16.mxu0 %v14235_v61  ;;  %v3978_v1 = vld [vmem:[#allocation4 + $0x371] sm:$0xff] }
 0x57d   :  { %3151 = vst [vmem:[#allocation4 + $0x3b0] sm:$0xff] %v14240_v13  ;;  %v14244_v5 = vpop.f32.mrb[133].mxu0  ;;  %v3977_v17 = vld [vmem:[#allocation4 + $0x369] sm:$0xff] }
 0x57e   :  { %3150 = vst [vmem:[#allocation4 + $0x3a8] sm:$0xff] %v14244_v5  ;;  %v14249_v16 = vpack.c.bf16 %v3978_v1, %v3977_v17 }
 0x580   :  { %17878 = vst [vmem:[#allocation9_spill] sm:$0xff] %v14249_v16  ;;  %4747 = vmatmul.mubr.bf16.gmra.mrb[164].mxu1 %v14238_v60  ;;  %v14252_v28 = vpop.f32.mrb[134].mxu0  ;;  %10944 = vmatmul.mubr.bf16.gmra.mrb[188].mxu0 %v14249_v16  ;;  %v3980_v6 = vld [vmem:[#allocation4 + $0x391] sm:$0xff] }
 0x581   :  { %4754 = vmatprep.mubr.bf16.mxu1 %v3336_v42  ;;  %3153 = vst [vmem:[#allocation4 + $0x3d0] sm:$0xff] %v14252_v28  ;;  %v14259_v24 = vpop.f32.mrb[135].mxu0  ;;  %v3979_v63 = vld [vmem:[#allocation4 + $0x389] sm:$0xff] }
 0x582   :  { %3152 = vst [vmem:[#allocation4 + $0x3c8] sm:$0xff] %v14259_v24  ;;  %v14264_v1 = vpack.c.bf16 %v3980_v6, %v3979_v63  ;;  %v12106_v63 = vld [vmem:[%s17753_s11 + $0xe8] sm:$0xff]  }
 0x583   :  { %v3192_v6 = vld [vmem:[#allocation4 + $0x1e7] sm:$0xff]  ;;  %4926 = vmatpush1.bf16.msra.mxu1 %v12106_v63 }
 0x584   :  { %17879 = vst [vmem:[#allocation10_spill] sm:$0xff] %v14264_v1  ;;  %v14268_v0 = vpop.f32.mrb[136].mxu0  ;;  %10947 = vmatprep.mubr.bf16.mxu0 %v14264_v1  ;;  %v3982_v15 = vld [vmem:[#allocation4 + $0x3b1] sm:$0xff]  ;;  %4927 = vmatprep.subr.bf16.mxu1 %v17765_v3  ;;  %v14298_v41 = vpack.c.bf16 %v3193_v26, %v3192_v6  ;;  %v3194_v6 = vld [vmem:[#allocation4 + $0x247] sm:$0xff] }
 0x585   :  { %3155 = vst [vmem:[#allocation4 + $0x3f0] sm:$0xff] %v14268_v0  ;;  %v14272_v36 = vpop.f32.mrb[137].mxu0  ;;  %v3981_v42 = vld [vmem:[#allocation4 + $0x3a9] sm:$0xff] }
 0x586   :  { %3154 = vst [vmem:[#allocation4 + $0x3e8] sm:$0xff] %v14272_v36  ;;  %v14277_v17 = vpack.c.bf16 %v3982_v15, %v3981_v42  ;;  %v3195_v26 = vld [vmem:[#allocation4 + $0x24f] sm:$0xff] }
 0x588   :  { %17880 = vst [vmem:[#allocation11_spill] sm:$0xff] %v14277_v17  ;;  %4755 = vmatmul.mubr.bf16.gmra.mrb[168].mxu1 %v14266_v14  ;;  %v14280_v12 = vpop.f32.mrb[138].mxu0  ;;  %10948 = vmatmul.mubr.bf16.gmra.mrb[192].mxu0 %v14277_v17  ;;  %v3984_v45 = vld [vmem:[#allocation4 + $0x3d1] sm:$0xff] }
 0x589   :  { %4762 = vmatprep.mubr.bf16.mxu1 %v3337_v8  ;;  %3157 = vst [vmem:[#allocation4 + $0x410] sm:$0xff] %v14280_v12  ;;  %v14290_v15 = vpop.f32.mrb[139].mxu0  ;;  %v3983_v42 = vld [vmem:[#allocation4 + $0x3c9] sm:$0xff] }
 0x58a   :  { %3156 = vst [vmem:[#allocation4 + $0x408] sm:$0xff] %v14290_v15  ;;  %v14296_v17 = vpack.c.bf16 %v3984_v45, %v3983_v42  ;;  %v12107_v45 = vld [vmem:[%s17753_s11 + $0xf0] sm:$0xff]   ;;  %v12108_v42 = vld [vmem:[%s17753_s11 + $0xf8] sm:$0xff]  }
 0x58b   :  { %4928 = vmatpush1.bf16.msra.mxu1 %v12107_v45  ;;  %v3197_v45 = vld [vmem:[#allocation4 + $0x26f] sm:$0xff] }
 0x58c   :  { %17881 = vst [vmem:[#allocation12_spill] sm:$0xff] %v14296_v17  ;;  %v14300_v39 = vpop.f32.mrb[140].mxu0  ;;  %10951 = vmatprep.mubr.bf16.mxu0 %v14296_v17  ;;  %v3986_v1 = vld [vmem:[#allocation4 + $0x3f1] sm:$0xff]  ;;  %v3242_v17 = vpack.c.bf16 %v3195_v26, %v3194_v6 }
 0x58d   :  { %3159 = vst [vmem:[#allocation4 + $0x430] sm:$0xff] %v14300_v39  ;;  %v14303_v8 = vpop.f32.mrb[141].mxu0  ;;  %v3985_v22 = vld [vmem:[#allocation4 + $0x3e9] sm:$0xff] }
 0x58e   :  { %3158 = vst [vmem:[#allocation4 + $0x428] sm:$0xff] %v14303_v8  ;;  %v14309_v3 = vpack.c.bf16 %v3986_v1, %v3985_v22  ;;  %v17883_v22 = vmov 0  }
 0x58f   :  { %4929 = vmatprep.subr.bf16.mxu1 %v17883_v22 }
 0x590   :  { %17882 = vst [vmem:[#allocation13_spill] sm:$0xff] %v14309_v3  ;;  %4763 = vmatmul.mubr.bf16.gmra.mrb[172].mxu1 %v14298_v41  ;;  %10952 = vmatmul.mubr.bf16.gmra.mrb[196].mxu0 %v14309_v3  ;;  %v10882_v63 = vpop.f32.mrb[142].mxu0  ;;  %v17884_v3 = vpack.c.bf16 %v14104_v43, %v14108_v25  ;;  %v3988_v61 = vld [vmem:[#allocation4 + $0x411] sm:$0xff] }
 0x591   :  { %4770 = vmatprep.mubr.bf16.mxu1 %v13856_v46  ;;  %3161 = vst [vmem:[#allocation4 + $0x450] sm:$0xff] %v10882_v63  ;;  %v2944_v1 = vpop.f32.mrb[143].mxu0  ;;  %4930 = vmatpush1.bf16.msra.mxu1 %v12108_v42  ;;  %v3196_v46 = vld [vmem:[#allocation4 + $0x267] sm:$0xff]  ;;  %v3199_v43 = vld [vmem:[#allocation4 + $0x28f] sm:$0xff] }
 0x592   :  { %3160 = vst [vmem:[#allocation4 + $0x448] sm:$0xff] %v2944_v1  ;;  %5188 = vmatprep.subr.bf16.mxu1 %v17883_v22  ;;  %v3987_v16 = vld [vmem:[#allocation4 + $0x409] sm:$0xff]  ;;  %v14327_v29 = vpack.c.bf16 %v3197_v45, %v3196_v46 }
 0x593   :  { %v14325_v49 = vpack.c.bf16 %v3988_v61, %v3987_v16  ;;  %v17886_v61 = vpack.c.bf16 %v14131_v59, %v14134_v32  ;;  %v3200_v16 = vld [vmem:[#allocation4 + $0x2a7] sm:$0xff]  ;;  %v3201_v42 = vld [vmem:[#allocation4 + $0x2af] sm:$0xff]  ;;  %v17888_v59 = vpack.c.bf16 %v14152_v21, %v14156_v9  ;;  %v17890_v21 = vpack.c.bf16 %v14181_v27, %v14185_v35 }
 0x594   :  { %v3990_v6 = vld [vmem:[#allocation4 + $0x431] sm:$0xff]  ;;  %v14343_v1 = vpack.c.bf16 %v3201_v42, %v3200_v16  ;;  %v3204_v32 = vld [vmem:[#allocation4 + $0x2e7] sm:$0xff]  ;;  %v17892_v27 = vpack.c.bf16 %v14208_v19, %v14212_v20  ;;  %v17894_v19 = vpack.c.bf16 %v14240_v13, %v14244_v5  ;;  %v17896_v13 = vpack.c.bf16 %v14268_v0, %v14272_v36 }
 0x595   :  { %10955 = vmatprep.mubr.bf16.mxu0 %v14325_v49  ;;  %v3989_v63 = vld [vmem:[#allocation4 + $0x429] sm:$0xff] }
 0x596   :  { %v14330_v26 = vpack.c.bf16 %v3990_v6, %v3989_v63  ;;  %v3203_v46 = vld [vmem:[#allocation4 + $0x2cf] sm:$0xff]  ;;  %v3208_v9 = vld [vmem:[#allocation4 + $0x327] sm:$0xff] }
 0x597   :  { %v3205_v63 = vld [vmem:[#allocation4 + $0x2ef] sm:$0xff]  ;;  %v3212_v35 = vld [vmem:[#allocation4 + $0x367] sm:$0xff] }
 0x598   :  { %4771 = vmatmul.mubr.bf16.gmra.mrb[176].mxu1 %v3242_v17  ;;  %v17885_v17 = vpack.c.bf16 %v14115_v38, %v14125_v10  ;;  %10956 = vmatmul.mubr.bf16.gmra.mrb[200].mxu0 %v14330_v26  ;;  %v17887_v38 = vpack.c.bf16 %v14139_v37, %v14145_v18  ;;  %v3202_v10 = vld [vmem:[#allocation4 + $0x2c7] sm:$0xff]  ;;  %v14355_v6 = vpack.c.bf16 %v3205_v63, %v3204_v32  ;;  %v3211_v16 = vld [vmem:[#allocation4 + $0x34f] sm:$0xff] }
 0x599   :  { %4778 = vmatprep.mubr.bf16.mxu1 %v17884_v3  ;;  %v3198_v3 = vld [vmem:[#allocation4 + $0x287] sm:$0xff]  ;;  %v14349_v45 = vpack.c.bf16 %v3203_v46, %v3202_v10  ;;  %v17889_v37 = vpack.c.bf16 %v14163_v55, %v14173_v62  ;;  %v17891_v55 = vpack.c.bf16 %v14192_v4, %v14199_v44  ;;  %v17893_v4 = vpack.c.bf16 %v14220_v58, %v14230_v50  ;;  %v3215_v46 = vld [vmem:[#allocation4 + $0x38f] sm:$0xff] }
 0x59a   :  { %v14337_v25 = vpack.c.bf16 %v3199_v43, %v3198_v3  ;;  %v3206_v18 = vld [vmem:[#allocation4 + $0x307] sm:$0xff]  ;;  %v3209_v43 = vld [vmem:[#allocation4 + $0x32f] sm:$0xff]  ;;  %v17895_v58 = vpack.c.bf16 %v14252_v28, %v14259_v24 }
 0x59b   :  { %v3210_v62 = vld [vmem:[#allocation4 + $0x347] sm:$0xff]  ;;  %v3217_v32 = vld [vmem:[#allocation4 + $0x3af] sm:$0xff] }
 0x59c   :  { %v14373_v42 = vpack.c.bf16 %v3211_v16, %v3210_v62  ;;  %v3214_v44 = vld [vmem:[#allocation4 + $0x387] sm:$0xff]  ;;  %v3223_v36 = vld [vmem:[#allocation4 + $0x40f] sm:$0xff] }
 0x59d   :  { %v3216_v20 = vld [vmem:[#allocation4 + $0x3a7] sm:$0xff] }
 0x59e   :  { %v14391_v63 = vpack.c.bf16 %v3217_v32, %v3216_v20  ;;  %v3218_v50 = vld [vmem:[#allocation4 + $0x3c7] sm:$0xff]  ;;  %v3451_v20 = vld [vmem:[#allocation4 + $0x2f] sm:$0xff] }
 0x59f   :  { %v3220_v5 = vld [vmem:[#allocation4 + $0x3e7] sm:$0xff] }
 0x5a0   :  { %4779 = vmatmul.mubr.bf16.gmra.mrb[180].mxu1 %v14327_v29  ;;  %v3222_v0 = vld [vmem:[#allocation4 + $0x407] sm:$0xff] }
 0x5a1   :  { %4786 = vmatprep.mubr.bf16.mxu1 %v17885_v17  ;;  %v3207_v17 = vld [vmem:[#allocation4 + $0x30f] sm:$0xff]  ;;  %v14419_v16 = vpack.c.bf16 %v3223_v36, %v3222_v0  ;;  %v12109_v36 = vld [vmem:[%s17753_s11 + $0x100] sm:$0xff]  }
 0x5a2   :  { %v14361_v3 = vpack.c.bf16 %v3207_v17, %v3206_v18  ;;  %v3221_v17 = vld [vmem:[#allocation4 + $0x3ef] sm:$0xff] }
 0x5a8   :  { %4787 = vmatmul.mubr.bf16.gmra.mrb[184].mxu1 %v14337_v25 }
 0x5a9   :  { %4794 = vmatprep.mubr.bf16.mxu1 %v17886_v61  ;;  %v14367_v61 = vpack.c.bf16 %v3209_v43, %v3208_v9  ;;  %v14405_v9 = vpack.c.bf16 %v3221_v17, %v3220_v5  ;;  %v3452_v17 = vld [vmem:[#allocation4 + $0x47] sm:$0xff] }
 0x5b0   :  { %4795 = vmatmul.mubr.bf16.gmra.mrb[188].mxu1 %v14343_v1 }
 0x5b1   :  { %4802 = vmatprep.mubr.bf16.mxu1 %v17887_v38  ;;  %v3213_v38 = vld [vmem:[#allocation4 + $0x36f] sm:$0xff] }
 0x5b2   :  { %v14379_v10 = vpack.c.bf16 %v3213_v38, %v3212_v35 }
 0x5b8   :  { %4803 = vmatmul.mubr.bf16.gmra.mrb[192].mxu1 %v14349_v45 }
 0x5b9   :  { %4810 = vmatprep.mubr.bf16.mxu1 %v17888_v59  ;;  %v14385_v59 = vpack.c.bf16 %v3215_v46, %v3214_v44 }
 0x5c0   :  { %4811 = vmatmul.mubr.bf16.gmra.mrb[196].mxu1 %v14355_v6 }
 0x5c1   :  { %4818 = vmatprep.mubr.bf16.mxu1 %v17889_v37  ;;  %v3219_v37 = vld [vmem:[#allocation4 + $0x3cf] sm:$0xff] }
 0x5c2   :  { %v14397_v18 = vpack.c.bf16 %v3219_v37, %v3218_v50 }
 0x5c8   :  { %4819 = vmatmul.mubr.bf16.gmra.mrb[200].mxu1 %v14361_v3 }
 0x5c9   :  { %4826 = vmatprep.mubr.bf16.mxu1 %v17890_v21 }
 0x5d0   :  { %4827 = vmatmul.mubr.bf16.gmra.mrb[204].mxu1 %v14367_v61 }
 0x5d1   :  { %4834 = vmatprep.mubr.bf16.mxu1 %v17891_v55  ;;  %v17897_v55 = vpack.c.bf16 %v14280_v12, %v14290_v15  ;;  %v3224_v12 = vld [vmem:[#allocation4 + $0x427] sm:$0xff]  ;;  %v3225_v15 = vld [vmem:[#allocation4 + $0x42f] sm:$0xff] }
 0x5d2   :  { %v14433_v46 = vpack.c.bf16 %v3225_v15, %v3224_v12 }
 0x5d8   :  { %4835 = vmatmul.mubr.bf16.gmra.mrb[208].mxu1 %v14373_v42 }
 0x5d9   :  { %4842 = vmatprep.mubr.bf16.mxu1 %v17892_v27 }
 0x5e0   :  { %4843 = vmatmul.mubr.bf16.gmra.mrb[212].mxu1 %v14379_v10 }
 0x5e1   :  { %4850 = vmatprep.mubr.bf16.mxu1 %v17893_v4  ;;  %v17898_v4 = vpack.c.bf16 %v14300_v39, %v14303_v8  ;;  %v3354_v39 = vld [vmem:[#allocation4 + $0x9] sm:$0xff]  ;;  %v3355_v8 = vld [vmem:[#allocation4 + $0x11] sm:$0xff] }
 0x5e2   :  { %v3418_v5 = vpack.c.bf16 %v3355_v8, %v3354_v39  ;;  %v3454_v8 = vld [vmem:[#allocation4 + $0x67] sm:$0xff] }
 0x5e8   :  { %4851 = vmatmul.mubr.bf16.gmra.mrb[216].mxu1 %v14385_v59 }
 0x5e9   :  { %4858 = vmatprep.mubr.bf16.mxu1 %v17894_v19  ;;  %v3450_v19 = vld [vmem:[#allocation4 + $0x27] sm:$0xff] }
 0x5ea   :  { %v3514_v37 = vpack.c.bf16 %v3451_v20, %v3450_v19  ;;  %v12110_v19 = vld [vmem:[%s17753_s11 + $0x108] sm:$0xff]  }
 0x5eb   :  { %v3356_v20 = vld [vmem:[#allocation4 + $0x29] sm:$0xff] }
 0x5f0   :  { %4859 = vmatmul.mubr.bf16.gmra.mrb[220].mxu1 %v14391_v63 }
 0x5f1   :  { %4866 = vmatprep.mubr.bf16.mxu1 %v17895_v58 }
 0x5f8   :  { %4867 = vmatmul.mubr.bf16.gmra.mrb[224].mxu1 %v14397_v18 }
 0x5f9   :  { %4874 = vmatprep.mubr.bf16.mxu1 %v17896_v13 }
 0x5fb   :  { %v14403_v21 = vpop.f32.mrb[144].mxu0 }
 0x5fc   :  { %v14407_v43 = vpop.f32.mrb[145].mxu0 }
 0x5fd   :  { %v14409_v24 = vpop.f32.mrb[146].mxu0 }
 0x5fe   :  { %v14411_v28 = vpop.f32.mrb[147].mxu0 }
 0x600   :  { %4875 = vmatmul.mubr.bf16.gmra.mrb[228].mxu1 %v14405_v9 }
 0x601   :  { %4882 = vmatprep.mubr.bf16.mxu1 %v17897_v55  ;;  %v3453_v55 = vld [vmem:[#allocation4 + $0x4f] sm:$0xff] }
 0x602   :  { %v3515_v15 = vpack.c.bf16 %v3453_v55, %v3452_v17 }
 0x603   :  { %v14417_v62 = vpop.f32.mrb[148].mxu0 }
 0x604   :  { %v14421_v27 = vpop.f32.mrb[149].mxu0 }
 0x605   :  { %v14423_v35 = vpop.f32.mrb[150].mxu0 }
 0x606   :  { %v14425_v38 = vpop.f32.mrb[151].mxu0 }
 0x608   :  { %4883 = vmatmul.mubr.bf16.gmra.mrb[232].mxu1 %v14419_v16 }
 0x609   :  { %4890 = vmatprep.mubr.bf16.mxu1 %v17898_v4 }
 0x60b   :  { %v14431_v44 = vpop.f32.mrb[152].mxu0 }
 0x60c   :  { %v14435_v32 = vpop.f32.mrb[153].mxu0 }
 0x60d   :  { %v14437_v58 = vpop.f32.mrb[154].mxu0 }
 0x60e   :  { %v14439_v50 = vpop.f32.mrb[155].mxu0 }
 0x610   :  { %4891 = vmatmul.mubr.bf16.gmra.mrb[236].mxu1 %v14433_v46 }
 0x611   :  { %4931 = vmatprep.mubr.bf16.mxu1 %v3514_v37  ;;  %v3357_v37 = vld [vmem:[#allocation4 + $0x31] sm:$0xff] }
 0x612   :  { %v14466_v55 = vpack.c.bf16 %v3357_v37, %v3356_v20  ;;  %v3456_v20 = vld [vmem:[#allocation4 + $0x87] sm:$0xff]  ;;  %v3457_v37 = vld [vmem:[#allocation4 + $0x8f] sm:$0xff] }
 0x613   :  { %v14442_v13 = vpop.f32.mrb[156].mxu0 }
 0x614   :  { %17899 = vst [vmem:[#allocation14_spill] sm:$0xff] %v14442_v13  ;;  %v14444_v0 = vpop.f32.mrb[157].mxu0  ;;  %v3455_v13 = vld [vmem:[#allocation4 + $0x6f] sm:$0xff] }
 0x615   :  { %17900 = vst [vmem:[#allocation15_spill] sm:$0xff] %v14444_v0  ;;  %v14449_v4 = vpop.f32.mrb[158].mxu0 }
 0x616   :  { %17901 = vst [vmem:[#allocation16_spill] sm:$0xff] %v14449_v4  ;;  %v14451_v12 = vpop.f32.mrb[159].mxu0 }
 0x617   :  { %17902 = vst [vmem:[#allocation17_spill] sm:$0xff] %v14451_v12 }
 0x618   :  { %4932 = vmatmul.mubr.bf16.vlgmr.msra.gmra.mrb[112].mxu1 %v3418_v5  ;;  %v12111_v5 = vld [vmem:[%s17753_s11 + $0x110] sm:$0xff]  }
 0x619   :  { %4939 = vmatprep.mubr.bf16.mxu1 %v3515_v15  ;;  %5189 = vmatpush1.bf16.msra.mxu1 %v12109_v36  ;;  %v3516_v15 = vpack.c.bf16 %v3455_v13, %v3454_v8  ;;  %v12113_v8 = vld [vmem:[%s17753_s11 + $0x120] sm:$0xff]  }
 0x61a   :  { %5190 = vmatprep.subr.bf16.mxu1 %v17883_v22 }
 0x61b   :  { %v14457_v39 = vpop.f32.mrb[160].mxu0 }
 0x61c   :  { %17903 = vst [vmem:[#allocation18_spill] sm:$0xff] %v14457_v39  ;;  %v14459_v0 = vpop.f32.mrb[161].mxu0  ;;  %v3358_v39 = vld [vmem:[#allocation4 + $0x49] sm:$0xff] }
 0x61d   :  { %17904 = vst [vmem:[#allocation19_spill] sm:$0xff] %v14459_v0  ;;  %5191 = vmatpush1.bf16.msra.mxu1 %v12110_v19  ;;  %v14464_v17 = vpop.f32.mrb[162].mxu0  ;;  %v12112_v19 = vld [vmem:[%s17753_s11 + $0x118] sm:$0xff]  }
 0x61e   :  { %17905 = vst [vmem:[#allocation20_spill] sm:$0xff] %v14464_v17  ;;  %5192 = vmatprep.subr.bf16.mxu1 %v17883_v22  ;;  %v14469_v36 = vpop.f32.mrb[163].mxu0  ;;  %v3359_v0 = vld [vmem:[#allocation4 + $0x51] sm:$0xff] }
 0x61f   :  { %17906 = vst [vmem:[#allocation21_spill] sm:$0xff] %v14469_v36  ;;  %v3517_v36 = vpack.c.bf16 %v3457_v37, %v3456_v20 }
 0x620   :  { %4940 = vmatmul.mubr.bf16.gmra.mrb[116].mxu1 %v14466_v55 }
 0x621   :  { %4947 = vmatprep.mubr.bf16.mxu1 %v3516_v15  ;;  %5193 = vmatpush1.bf16.msra.mxu1 %v12111_v5  ;;  %v14485_v5 = vpack.c.bf16 %v3359_v0, %v3358_v39  ;;  %v3458_v0 = vld [vmem:[#allocation4 + $0xa7] sm:$0xff]  ;;  %v3459_v39 = vld [vmem:[#allocation4 + $0xaf] sm:$0xff] }
 0x622   :  { %5194 = vmatprep.subr.bf16.mxu1 %v17883_v22 }
 0x623   :  { %v14476_v17 = vpop.f32.mrb[164].mxu0 }
 0x624   :  { %17907 = vst [vmem:[#allocation22_spill] sm:$0xff] %v14476_v17  ;;  %v14478_v4 = vpop.f32.mrb[165].mxu0  ;;  %v3361_v17 = vld [vmem:[#allocation4 + $0x71] sm:$0xff] }
 0x625   :  { %17908 = vst [vmem:[#allocation23_spill] sm:$0xff] %v14478_v4  ;;  %5195 = vmatpush1.bf16.msra.mxu1 %v12112_v19  ;;  %v14480_v13 = vpop.f32.mrb[166].mxu0  ;;  %v12114_v19 = vld [vmem:[%s17753_s11 + $0x128] sm:$0xff]  }
 0x626   :  { %17909 = vst [vmem:[#allocation24_spill] sm:$0xff] %v14480_v13  ;;  %v14487_v15 = vpop.f32.mrb[167].mxu0  ;;  %5196 = vmatprep.subr.bf16.mxu1 %v17883_v22  ;;  %v3360_v13 = vld [vmem:[#allocation4 + $0x69] sm:$0xff] }
 0x627   :  { %17910 = vst [vmem:[#allocation25_spill] sm:$0xff] %v14487_v15  ;;  %v14504_v20 = vpack.c.bf16 %v3361_v17, %v3360_v13  ;;  %v3461_v17 = vld [vmem:[#allocation4 + $0xcf] sm:$0xff] }
 0x628   :  { %4948 = vmatmul.mubr.bf16.gmra.mrb[120].mxu1 %v14485_v5 }
 0x629   :  { %4955 = vmatprep.mubr.bf16.mxu1 %v3517_v36  ;;  %5197 = vmatpush1.bf16.msra.mxu1 %v12113_v8  ;;  %v12115_v36 = vld [vmem:[%s17753_s11 + $0x130] sm:$0xff]   ;;  %v3518_v8 = vpack.c.bf16 %v3459_v39, %v3458_v0 }
 0x62a   :  { %5198 = vmatprep.subr.bf16.mxu1 %v17883_v22 }
 0x62b   :  { %v14495_v4 = vpop.f32.mrb[168].mxu0 }
 0x62c   :  { %17911 = vst [vmem:[#allocation26_spill] sm:$0xff] %v14495_v4  ;;  %v14497_v15 = vpop.f32.mrb[169].mxu0  ;;  %v3460_v4 = vld [vmem:[#allocation4 + $0xc7] sm:$0xff] }
 0x62d   :  { %17912 = vst [vmem:[#allocation27_spill] sm:$0xff] %v14497_v15  ;;  %v14499_v12 = vpop.f32.mrb[170].mxu0  ;;  %5199 = vmatpush1.bf16.msra.mxu1 %v12114_v19  ;;  %v3519_v39 = vpack.c.bf16 %v3461_v17, %v3460_v4  ;;  %v3464_v17 = vld [vmem:[#allocation4 + $0x107] sm:$0xff] }
 0x62e   :  { %17913 = vst [vmem:[#allocation28_spill] sm:$0xff] %v14499_v12  ;;  %v14506_v37 = vpop.f32.mrb[171].mxu0  ;;  %5200 = vmatprep.subr.bf16.mxu1 %v17883_v22  ;;  %v12116_v12 = vld [vmem:[%s17753_s11 + $0x138] sm:$0xff]  }
 0x62f   :  { %17914 = vst [vmem:[#allocation29_spill] sm:$0xff] %v14506_v37 }
 0x630   :  { %4956 = vmatmul.mubr.bf16.gmra.mrb[124].mxu1 %v14504_v20 }
 0x631   :  { %4963 = vmatprep.mubr.bf16.mxu1 %v3518_v8  ;;  %5201 = vmatpush1.bf16.msra.mxu1 %v12115_v36  ;;  %v12117_v36 = vld [vmem:[%s17753_s11 + $0x140] sm:$0xff]  }
 0x632   :  { %5202 = vmatprep.subr.bf16.mxu1 %v17883_v22 }
 0x633   :  { %v14514_v19 = vpop.f32.mrb[172].mxu0 }
 0x634   :  { %17915 = vst [vmem:[#allocation30_spill] sm:$0xff] %v14514_v19  ;;  %v14516_v13 = vpop.f32.mrb[173].mxu0  ;;  %v3462_v19 = vld [vmem:[#allocation4 + $0xe7] sm:$0xff] }
 0x635   :  { %17916 = vst [vmem:[#allocation31_spill] sm:$0xff] %v14516_v13  ;;  %v14518_v37 = vpop.f32.mrb[174].mxu0  ;;  %5203 = vmatpush1.bf16.msra.mxu1 %v12116_v12  ;;  %v3463_v13 = vld [vmem:[#allocation4 + $0xef] sm:$0xff] }
 0x636   :  { %17917 = vst [vmem:[#allocation32_spill] sm:$0xff] %v14518_v37  ;;  %v14520_v0 = vpop.f32.mrb[175].mxu0  ;;  %5204 = vmatprep.subr.bf16.mxu1 %v17883_v22  ;;  %v3520_v4 = vpack.c.bf16 %v3463_v13, %v3462_v19  ;;  %v12118_v19 = vld [vmem:[%s17753_s11 + $0x148] sm:$0xff]  }
 0x637   :  { %17918 = vst [vmem:[#allocation33_spill] sm:$0xff] %v14520_v0  ;;  %v3466_v13 = vld [vmem:[#allocation4 + $0x127] sm:$0xff] }
 0x638   :  { %4964 = vmatmul.mubr.bf16.gmra.mrb[128].mxu1 %v13982_v33 }
 0x639   :  { %4971 = vmatprep.mubr.bf16.mxu1 %v3519_v39  ;;  %5205 = vmatpush1.bf16.msra.mxu1 %v12117_v36  ;;  %v3465_v39 = vld [vmem:[#allocation4 + $0x10f] sm:$0xff] }
 0x63a   :  { %5206 = vmatprep.subr.bf16.mxu1 %v17883_v22 }
 0x63b   :  { %v14527_v8 = vpop.f32.mrb[176].mxu0 }
 0x63c   :  { %17919 = vst [vmem:[#allocation34_spill] sm:$0xff] %v14527_v8  ;;  %v14529_v15 = vpop.f32.mrb[177].mxu0 }
 0x63d   :  { %17920 = vst [vmem:[#allocation35_spill] sm:$0xff] %v14529_v15  ;;  %v14532_v12 = vpop.f32.mrb[178].mxu0  ;;  %v3521_v15 = vpack.c.bf16 %v3465_v39, %v3464_v17  ;;  %5207 = vmatpush1.bf16.msra.mxu1 %v12118_v19  ;;  %v3469_v39 = vld [vmem:[#allocation4 + $0x14f] sm:$0xff] }
 0x63e   :  { %v14534_v37 = vpop.f32.mrb[179].mxu0  ;;  %5208 = vmatprep.subr.bf16.mxu1 %v17883_v22 }
 0x640   :  { %4972 = vmatmul.mubr.bf16.gmra.mrb[132].mxu1 %v13994_v2 }
 0x641   :  { %4979 = vmatprep.mubr.bf16.mxu1 %v3520_v4  ;;  %v3467_v4 = vld [vmem:[#allocation4 + $0x12f] sm:$0xff] }
 0x642   :  { %v3522_v17 = vpack.c.bf16 %v3467_v4, %v3466_v13  ;;  %v12119_v13 = vld [vmem:[%s17753_s11 + $0x150] sm:$0xff]   ;;  %v3470_v4 = vld [vmem:[#allocation4 + $0x167] sm:$0xff] }
 0x643   :  { %v14537_v33 = vpop.f32.mrb[180].mxu0  ;;  %5209 = vmatpush1.bf16.msra.mxu1 %v12119_v13 }
 0x644   :  { %17921 = vst [vmem:[#allocation36_spill] sm:$0xff] %v14537_v33  ;;  %v14539_v8 = vpop.f32.mrb[181].mxu0  ;;  %5210 = vmatprep.subr.bf16.mxu1 %v17883_v22 }
 0x645   :  { %17922 = vst [vmem:[#allocation37_spill] sm:$0xff] %v14539_v8  ;;  %v14541_v36 = vpop.f32.mrb[182].mxu0 }
 0x646   :  { %17923 = vst [vmem:[#allocation38_spill] sm:$0xff] %v14541_v36  ;;  %v14543_v0 = vpop.f32.mrb[183].mxu0 }
 0x647   :  { %17924 = vst [vmem:[#allocation39_spill] sm:$0xff] %v14543_v0 }
 0x648   :  { %4980 = vmatmul.mubr.bf16.gmra.mrb[136].mxu1 %v14005_v57 }
 0x649   :  { %4987 = vmatprep.mubr.bf16.mxu1 %v3521_v15  ;;  %v3468_v15 = vld [vmem:[#allocation4 + $0x147] sm:$0xff] }
 0x64b   :  { %v14549_v2 = vpop.f32.mrb[184].mxu0 }
 0x64c   :  { %17925 = vst [vmem:[#allocation40_spill] sm:$0xff] %v14549_v2  ;;  %v14551_v33 = vpop.f32.mrb[185].mxu0 }
 0x64d   :  { %17926 = vst [vmem:[#allocation41_spill] sm:$0xff] %v14551_v33  ;;  %v14554_v36 = vpop.f32.mrb[186].mxu0  ;;  %v3523_v33 = vpack.c.bf16 %v3469_v39, %v3468_v15 }
 0x64e   :  { %v14556_v0 = vpop.f32.mrb[187].mxu0 }
 0x650   :  { %4988 = vmatmul.mubr.bf16.gmra.mrb[140].mxu1 %v14016_v48 }
 0x651   :  { %4995 = vmatprep.mubr.bf16.mxu1 %v3522_v17  ;;  %v3471_v17 = vld [vmem:[#allocation4 + $0x16f] sm:$0xff] }
 0x652   :  { %v3524_v15 = vpack.c.bf16 %v3471_v17, %v3470_v4 }
 0x653   :  { %v14559_v57 = vpop.f32.mrb[188].mxu0 }
 0x654   :  { %17927 = vst [vmem:[#allocation42_spill] sm:$0xff] %v14559_v57  ;;  %v14561_v2 = vpop.f32.mrb[189].mxu0 }
 0x655   :  { %v14563_v19 = vpop.f32.mrb[190].mxu0 }
 0x656   :  { %17928 = vst [vmem:[#allocation43_spill] sm:$0xff] %v14563_v19  ;;  %v14565_v8 = vpop.f32.mrb[191].mxu0 }
 0x657   :  { %17929 = vst [vmem:[#allocation44_spill] sm:$0xff] %v14565_v8 }
 0x658   :  { %4996 = vmatmul.mubr.bf16.gmra.mrb[144].mxu1 %v14030_v52 }
 0x659   :  { %5003 = vmatprep.mubr.bf16.mxu1 %v3523_v33 }
 0x65b   :  { %v14571_v48 = vpop.f32.mrb[192].mxu0 }
 0x65c   :  { %v14573_v57 = vpop.f32.mrb[193].mxu0 }
 0x65d   :  { %v14576_v19 = vpop.f32.mrb[194].mxu0 }
 0x65e   :  { %17930 = vst [vmem:[#allocation45_spill] sm:$0xff] %v14576_v19  ;;  %v14578_v8 = vpop.f32.mrb[195].mxu0  ;;  %v12120_v19 = vld [vmem:[%s17753_s11 + $0x158] sm:$0xff]  }
 0x65f   :  { %5211 = vmatpush1.bf16.msra.mxu1 %v12120_v19 }
 0x660   :  { %5004 = vmatmul.mubr.bf16.gmra.mrb[148].mxu1 %v14042_v53  ;;  %5212 = vmatprep.subr.bf16.mxu1 %v17883_v22 }
 0x661   :  { %5011 = vmatprep.mubr.bf16.mxu1 %v3524_v15 }
 0x663   :  { %v14581_v52 = vpop.f32.mrb[196].mxu0 }
 0x664   :  { %17931 = vst [vmem:[#allocation46_spill] sm:$0xff] %v14581_v52  ;;  %v14583_v33 = vpop.f32.mrb[197].mxu0  ;;  %v3703_v52 = vld [vmem:[#allocation4 + $0x431] sm:$0xff] }
 0x665   :  { %v14585_v39 = vpop.f32.mrb[198].mxu0 }
 0x666   :  { %17932 = vst [vmem:[#allocation47_spill] sm:$0xff] %v14585_v39  ;;  %v14587_v13 = vpop.f32.mrb[199].mxu0  ;;  %v3701_v39 = vld [vmem:[#allocation4 + $0x411] sm:$0xff] }
 0x668   :  { %5012 = vmatmul.mubr.bf16.gmra.mrb[152].mxu1 %v14056_v34 }
 0x669   :  { %5019 = vmatprep.mubr.bf16.mxu1 %v14206_v47  ;;  %v12121_v47 = vld [vmem:[%s17753_s11 + $0x160] sm:$0xff]  }
 0x66a   :  { %5213 = vmatpush1.bf16.msra.mxu1 %v12121_v47  ;;  %v3389_v47 = vld [vmem:[#allocation4 + $0x271] sm:$0xff] }
 0x66b   :  { %v14597_v53 = vpop.f32.mrb[200].mxu0  ;;  %5214 = vmatprep.subr.bf16.mxu1 %v17883_v22 }
 0x66c   :  { %17933 = vst [vmem:[#allocation48_spill] sm:$0xff] %v14597_v53  ;;  %v14599_v4 = vpop.f32.mrb[201].mxu0  ;;  %v3695_v53 = vld [vmem:[#allocation4 + $0x3b1] sm:$0xff] }
 0x66d   :  { %17934 = vst [vmem:[#allocation49_spill] sm:$0xff] %v14599_v4  ;;  %v14601_v17 = vpop.f32.mrb[202].mxu0  ;;  %v3699_v4 = vld [vmem:[#allocation4 + $0x3f1] sm:$0xff] }
 0x66e   :  { %17935 = vst [vmem:[#allocation50_spill] sm:$0xff] %v14601_v17  ;;  %v14603_v34 = vpop.f32.mrb[203].mxu0  ;;  %v3693_v17 = vld [vmem:[#allocation4 + $0x391] sm:$0xff] }
 0x66f   :  { %17936 = vst [vmem:[#allocation51_spill] sm:$0xff] %v14603_v34  ;;  %v3697_v34 = vld [vmem:[#allocation4 + $0x3d1] sm:$0xff] }
 0x670   :  { %5020 = vmatmul.mubr.bf16.gmra.mrb[156].mxu1 %v14067_v31  ;;  %v3480_v31 = vld [vmem:[#allocation4 + $0x207] sm:$0xff] }
 0x671   :  { %5027 = vmatprep.mubr.bf16.mxu1 %v14238_v60  ;;  %v3481_v60 = vld [vmem:[#allocation4 + $0x20f] sm:$0xff] }
 0x672   :  { %v3529_v19 = vpack.c.bf16 %v3481_v60, %v3480_v31  ;;  %v3992_v60 = vld [vmem:[#allocation4 + $0x451] sm:$0xff] }
 0x678   :  { %5028 = vmatmul.mubr.bf16.gmra.mrb[160].mxu1 %v14084_v7  ;;  %v12122_v7 = vld [vmem:[%s17753_s11 + $0x168] sm:$0xff]  }
 0x679   :  { %5035 = vmatprep.mubr.bf16.mxu1 %v14266_v14  ;;  %5215 = vmatpush1.bf16.msra.mxu1 %v12122_v7  ;;  %v3386_v14 = vld [vmem:[#allocation4 + $0x249] sm:$0xff] }
 0x67a   :  { %5216 = vmatprep.subr.bf16.mxu1 %v17883_v22  ;;  %v3551_v7 = vld [vmem:[#allocation4 + $0x70] sm:$0xff] }
 0x680   :  { %5036 = vmatmul.mubr.bf16.gmra.mrb[164].mxu1 %v14096_v56  ;;  %v12123_v56 = vld [vmem:[%s17753_s11 + $0x170] sm:$0xff]  }
 0x681   :  { %5043 = vmatprep.mubr.bf16.mxu1 %v14298_v41  ;;  %v3387_v41 = vld [vmem:[#allocation4 + $0x251] sm:$0xff]  ;;  %5217 = vmatpush1.bf16.msra.mxu1 %v12123_v56  ;;  %v3648_v56 = vld [vmem:[#allocation4 + $0x89] sm:$0xff] }
 0x682   :  { %5218 = vmatprep.subr.bf16.mxu1 %v17883_v22  ;;  %v3434_v15 = vpack.c.bf16 %v3387_v41, %v3386_v14  ;;  %v3649_v14 = vld [vmem:[#allocation4 + $0x91] sm:$0xff]  ;;  %v12129_v41 = vld [vmem:[%s17753_s11 + $0x1a0] sm:$0xff]  }
 0x688   :  { %5044 = vmatmul.mubr.bf16.gmra.mrb[168].mxu1 %v14102_v23  ;;  %v12124_v23 = vld [vmem:[%s17753_s11 + $0x178] sm:$0xff]  }
 0x689   :  { %5051 = vmatprep.mubr.bf16.mxu1 %v3529_v19  ;;  %5219 = vmatpush1.bf16.msra.mxu1 %v12124_v23 }
 0x68a   :  { %5477 = vmatprep.subr.bf16.mxu1 %v17883_v22 }
 0x690   :  { %5052 = vmatmul.mubr.bf16.gmra.mrb[172].mxu1 %v14113_v54  ;;  %v3388_v54 = vld [vmem:[#allocation4 + $0x269] sm:$0xff] }
 0x691   :  { %5059 = vmatprep.mubr.bf16.mxu1 %v14327_v29  ;;  %v14629_v31 = vpack.c.bf16 %v3389_v47, %v3388_v54  ;;  %v3991_v29 = vld [vmem:[#allocation4 + $0x449] sm:$0xff] }
 0x692   :  { %v14633_v19 = vpack.c.bf16 %v3992_v60, %v3991_v29  ;;  %v3552_v54 = vld [vmem:[#allocation4 + $0x88] sm:$0xff]  ;;  %v3553_v47 = vld [vmem:[#allocation4 + $0x90] sm:$0xff] }
 0x693   :  { %v3650_v29 = vld [vmem:[#allocation4 + $0xa9] sm:$0xff]  ;;  %v3651_v60 = vld [vmem:[#allocation4 + $0xb1] sm:$0xff] }
 0x694   :  { %10959 = vmatprep.mubr.bf16.mxu0 %v14633_v19 }
 0x698   :  { %5060 = vmatmul.mubr.bf16.gmra.mrb[176].mxu1 %v3434_v15  ;;  %v12130_v15 = vld [vmem:[%s17753_s11 + $0x1a8] sm:$0xff]  }
 0x699   :  { %5067 = vmatprep.mubr.bf16.mxu1 %v14337_v25  ;;  %v17937_v25 = vld [vmem:[#allocation6_spill] sm:$0xff] }
 0x6a0   :  { %5068 = vmatmul.mubr.bf16.gmra.mrb[180].mxu1 %v14629_v31 }
 0x6a1   :  { %5075 = vmatprep.mubr.bf16.mxu1 %v14343_v1  ;;  %v17938_v1 = vld [vmem:[#allocation7_spill] sm:$0xff] }
 0x6a8   :  { %5076 = vmatmul.mubr.bf16.gmra.mrb[184].mxu1 %v14150_v51  ;;  %v17939_v51 = vld [vmem:[#allocation8_spill] sm:$0xff] }
 0x6a9   :  { %5083 = vmatprep.mubr.bf16.mxu1 %v14349_v45  ;;  %v17943_v45 = vld [vmem:[#allocation12_spill] sm:$0xff] }
 0x6b0   :  { %5084 = vmatmul.mubr.bf16.gmra.mrb[188].mxu1 %v14161_v30  ;;  %v17940_v30 = vld [vmem:[#allocation9_spill] sm:$0xff] }
 0x6b1   :  { %5091 = vmatprep.mubr.bf16.mxu1 %v14355_v6  ;;  %v17944_v6 = vld [vmem:[#allocation13_spill] sm:$0xff] }
 0x6b8   :  { %5092 = vmatmul.mubr.bf16.gmra.mrb[192].mxu1 %v14178_v40  ;;  %v17941_v40 = vld [vmem:[#allocation10_spill] sm:$0xff] }
 0x6b9   :  { %5099 = vmatprep.mubr.bf16.mxu1 %v14361_v3  ;;  %v3512_v3 = vld [vmem:[#allocation4 + $0x447] sm:$0xff] }
 0x6c0   :  { %5100 = vmatmul.mubr.bf16.gmra.mrb[196].mxu1 %v14190_v11  ;;  %v17942_v11 = vld [vmem:[#allocation11_spill] sm:$0xff] }
 0x6c1   :  { %5107 = vmatprep.mubr.bf16.mxu1 %v14367_v61  ;;  %v3513_v61 = vld [vmem:[#allocation4 + $0x44f] sm:$0xff] }
 0x6c8   :  { %5108 = vmatmul.mubr.bf16.gmra.mrb[200].mxu1 %v17937_v25  ;;  %v12131_v25 = vld [vmem:[%s17753_s11 + $0x1b0] sm:$0xff]  }
 0x6c9   :  { %5115 = vmatprep.mubr.bf16.mxu1 %v14373_v42  ;;  %v3545_v42 = vpack.c.bf16 %v3513_v61, %v3512_v3 }
 0x6d0   :  { %5116 = vmatmul.mubr.bf16.gmra.mrb[204].mxu1 %v17938_v1  ;;  %v14697_v1 = vpack.c.bf16 %v3553_v47, %v3552_v54  ;;  %v3659_v54 = vld [vmem:[#allocation4 + $0x131] sm:$0xff] }
 0x6d1   :  { %5123 = vmatprep.mubr.bf16.mxu1 %v14379_v10  ;;  %v3546_v10 = vld [vmem:[#allocation4 + $0x28] sm:$0xff] }
 0x6d8   :  { %5124 = vmatmul.mubr.bf16.gmra.mrb[208].mxu1 %v17939_v51  ;;  %v3710_v51 = vpack.c.bf16 %v3651_v60, %v3650_v29  ;;  %v3562_v60 = vld [vmem:[#allocation4 + $0x128] sm:$0xff] }
 0x6d9   :  { %5131 = vmatprep.mubr.bf16.mxu1 %v14385_v59  ;;  %v3547_v59 = vld [vmem:[#allocation4 + $0x30] sm:$0xff] }
 0x6e0   :  { %5132 = vmatmul.mubr.bf16.gmra.mrb[212].mxu1 %v17940_v30  ;;  %v12132_v30 = vld [vmem:[%s17753_s11 + $0x1b8] sm:$0xff]  }
 0x6e1   :  { %5139 = vmatprep.mubr.bf16.mxu1 %v14391_v63  ;;  %v12125_v63 = vld [vmem:[%s17753_s11 + $0x180] sm:$0xff]  }
 0x6e8   :  { %5140 = vmatmul.mubr.bf16.gmra.mrb[216].mxu1 %v17941_v40  ;;  %v3554_v40 = vld [vmem:[#allocation4 + $0xa8] sm:$0xff] }
 0x6e9   :  { %5147 = vmatprep.mubr.bf16.mxu1 %v14397_v18  ;;  %v3610_v18 = vpack.c.bf16 %v3547_v59, %v3546_v10  ;;  %v3556_v10 = vld [vmem:[#allocation4 + $0xc8] sm:$0xff]  ;;  %v3557_v59 = vld [vmem:[#allocation4 + $0xd0] sm:$0xff] }
 0x6f0   :  { %5148 = vmatmul.mubr.bf16.gmra.mrb[220].mxu1 %v17942_v11  ;;  %v3555_v11 = vld [vmem:[#allocation4 + $0xb0] sm:$0xff] }
 0x6f1   :  { %5155 = vmatprep.mubr.bf16.mxu1 %v14405_v9  ;;  %v3549_v9 = vld [vmem:[#allocation4 + $0x50] sm:$0xff]  ;;  %v14705_v3 = vpack.c.bf16 %v3555_v11, %v3554_v40 }
 0x6f8   :  { %5156 = vmatmul.mubr.bf16.gmra.mrb[224].mxu1 %v17943_v45  ;;  %v3652_v45 = vld [vmem:[#allocation4 + $0xc9] sm:$0xff] }
 0x6f9   :  { %5163 = vmatprep.mubr.bf16.mxu1 %v14419_v16  ;;  %v12127_v16 = vld [vmem:[%s17753_s11 + $0x190] sm:$0xff]  }
 0x700   :  { %5164 = vmatmul.mubr.bf16.gmra.mrb[228].mxu1 %v17944_v6  ;;  %v3653_v6 = vld [vmem:[#allocation4 + $0xd1] sm:$0xff] }
 0x701   :  { %5171 = vmatprep.mubr.bf16.mxu1 %v14433_v46  ;;  %v3711_v61 = vpack.c.bf16 %v3653_v6, %v3652_v45  ;;  %v12135_v45 = vld [vmem:[%s17753_s11 + $0x1d0] sm:$0xff]   ;;  %v3564_v6 = vld [vmem:[#allocation4 + $0x148] sm:$0xff] }
 0x708   :  { %5172 = vmatmul.mubr.bf16.gmra.mrb[232].mxu1 %v14325_v49  ;;  %v12126_v49 = vld [vmem:[%s17753_s11 + $0x188] sm:$0xff]  }
 0x709   :  { %5179 = vmatprep.mubr.bf16.mxu1 %v3545_v42  ;;  %v12133_v42 = vld [vmem:[%s17753_s11 + $0x1c0] sm:$0xff]  }
 0x710   :  { %5180 = vmatmul.mubr.bf16.gmra.mrb[236].mxu1 %v14330_v26  ;;  %v3548_v26 = vld [vmem:[#allocation4 + $0x48] sm:$0xff] }
 0x711   :  { %5220 = vmatprep.mubr.bf16.mxu1 %v14466_v55  ;;  %v14674_v46 = vpack.c.bf16 %v3549_v9, %v3548_v26  ;;  %v12128_v55 = vld [vmem:[%s17753_s11 + $0x198] sm:$0xff]   ;;  %v3558_v9 = vld [vmem:[#allocation4 + $0xe8] sm:$0xff] }
 0x718   :  { %5221 = vmatmul.mubr.bf16.vlgmr.msra.gmra.mrb[112].mxu1 %v3610_v18  ;;  %v3655_v18 = vld [vmem:[#allocation4 + $0xf1] sm:$0xff] }
 0x719   :  { %5228 = vmatprep.mubr.bf16.mxu1 %v14485_v5  ;;  %5478 = vmatpush1.bf16.msra.mxu1 %v12125_v63  ;;  %v3550_v5 = vld [vmem:[#allocation4 + $0x68] sm:$0xff] }
 0x71a   :  { %5479 = vmatprep.subr.bf16.mxu1 %v17883_v22  ;;  %v14686_v23 = vpack.c.bf16 %v3551_v7, %v3550_v5  ;;  %v3654_v63 = vld [vmem:[#allocation4 + $0xe9] sm:$0xff]  ;;  %v3657_v5 = vld [vmem:[#allocation4 + $0x111] sm:$0xff] }
 0x71b   :  { %v3712_v26 = vpack.c.bf16 %v3655_v18, %v3654_v63  ;;  %v3566_v18 = vld [vmem:[#allocation4 + $0x168] sm:$0xff] }
 0x71d   :  { %5480 = vmatpush1.bf16.msra.mxu1 %v12126_v49  ;;  %v14713_v49 = vpack.c.bf16 %v3557_v59, %v3556_v10  ;;  %v3663_v10 = vld [vmem:[#allocation4 + $0x171] sm:$0xff] }
 0x71e   :  { %5481 = vmatprep.subr.bf16.mxu1 %v17883_v22 }
 0x720   :  { %5229 = vmatmul.mubr.bf16.gmra.mrb[116].mxu1 %v14674_v46 }
 0x721   :  { %5236 = vmatprep.mubr.bf16.mxu1 %v14504_v20  ;;  %5482 = vmatpush1.bf16.msra.mxu1 %v12127_v16  ;;  %v3709_v20 = vpack.c.bf16 %v3649_v14, %v3648_v56  ;;  %v3559_v16 = vld [vmem:[#allocation4 + $0xf0] sm:$0xff]  ;;  %v12134_v14 = vld [vmem:[%s17753_s11 + $0x1c8] sm:$0xff]  }
 0x722   :  { %5483 = vmatprep.subr.bf16.mxu1 %v17883_v22  ;;  %v14716_v7 = vpack.c.bf16 %v3559_v16, %v3558_v9  ;;  %v3664_v9 = vld [vmem:[#allocation4 + $0x189] sm:$0xff]  ;;  %v3665_v16 = vld [vmem:[#allocation4 + $0x191] sm:$0xff] }
 0x725   :  { %5484 = vmatpush1.bf16.msra.mxu1 %v12128_v55  ;;  %v3656_v55 = vld [vmem:[#allocation4 + $0x109] sm:$0xff] }
 0x726   :  { %5485 = vmatprep.subr.bf16.mxu1 %v17883_v22  ;;  %v3713_v56 = vpack.c.bf16 %v3657_v5, %v3656_v55  ;;  %v3717_v5 = vpack.c.bf16 %v3665_v16, %v3664_v9  ;;  %v3574_v9 = vld [vmem:[#allocation4 + $0x1e8] sm:$0xff]  ;;  %v3575_v16 = vld [vmem:[#allocation4 + $0x1f0] sm:$0xff] }
 0x728   :  { %5237 = vmatmul.mubr.bf16.gmra.mrb[120].mxu1 %v14686_v23 }
 0x729   :  { %5244 = vmatprep.mubr.bf16.mxu1 %v3709_v20  ;;  %5486 = vmatpush1.bf16.msra.mxu1 %v12129_v41  ;;  %v3560_v41 = vld [vmem:[#allocation4 + $0x108] sm:$0xff]  ;;  %v3561_v20 = vld [vmem:[#allocation4 + $0x110] sm:$0xff] }
 0x72a   :  { %5487 = vmatprep.subr.bf16.mxu1 %v17883_v22  ;;  %v14723_v47 = vpack.c.bf16 %v3561_v20, %v3560_v41  ;;  %v3569_v41 = vld [vmem:[#allocation4 + $0x190] sm:$0xff] }
 0x72b   :  { %v3666_v20 = vld [vmem:[#allocation4 + $0x1a9] sm:$0xff] }
 0x72d   :  { %5488 = vmatpush1.bf16.msra.mxu1 %v12130_v15  ;;  %v3658_v15 = vld [vmem:[#allocation4 + $0x129] sm:$0xff] }
 0x72e   :  { %5489 = vmatprep.subr.bf16.mxu1 %v17883_v22  ;;  %v3714_v29 = vpack.c.bf16 %v3659_v54, %v3658_v15  ;;  %v3667_v15 = vld [vmem:[#allocation4 + $0x1b1] sm:$0xff] }
 0x730   :  { %5245 = vmatmul.mubr.bf16.gmra.mrb[124].mxu1 %v14697_v1 }
 0x731   :  { %5252 = vmatprep.mubr.bf16.mxu1 %v3710_v51  ;;  %5490 = vmatpush1.bf16.msra.mxu1 %v12131_v25  ;;  %v3563_v25 = vld [vmem:[#allocation4 + $0x130] sm:$0xff] }
 0x732   :  { %5491 = vmatprep.subr.bf16.mxu1 %v17883_v22  ;;  %v3660_v51 = vld [vmem:[#allocation4 + $0x149] sm:$0xff]  ;;  %v14726_v40 = vpack.c.bf16 %v3563_v25, %v3562_v60 }
 0x733   :  { %v3570_v60 = vld [vmem:[#allocation4 + $0x1a8] sm:$0xff]  ;;  %v3571_v25 = vld [vmem:[#allocation4 + $0x1b0] sm:$0xff] }
 0x735   :  { %5492 = vmatpush1.bf16.msra.mxu1 %v12132_v30  ;;  %v3661_v30 = vld [vmem:[#allocation4 + $0x151] sm:$0xff] }
 0x736   :  { %5493 = vmatprep.subr.bf16.mxu1 %v17883_v22  ;;  %v3715_v11 = vpack.c.bf16 %v3661_v30, %v3660_v51  ;;  %v3668_v51 = vld [vmem:[#allocation4 + $0x1c9] sm:$0xff]  ;;  %v3669_v30 = vld [vmem:[#allocation4 + $0x1d1] sm:$0xff] }
 0x738   :  { %5253 = vmatmul.mubr.bf16.gmra.mrb[128].mxu1 %v14705_v3 }
 0x739   :  { %5260 = vmatprep.mubr.bf16.mxu1 %v3711_v61  ;;  %5494 = vmatpush1.bf16.msra.mxu1 %v12133_v42  ;;  %v3565_v61 = vld [vmem:[#allocation4 + $0x150] sm:$0xff] }
 0x73a   :  { %5495 = vmatprep.subr.bf16.mxu1 %v17883_v22  ;;  %v3662_v42 = vld [vmem:[#allocation4 + $0x169] sm:$0xff]  ;;  %v14733_v59 = vpack.c.bf16 %v3565_v61, %v3564_v6  ;;  %v12137_v6 = vld [vmem:[%s17753_s11 + $0x1e0] sm:$0xff]  }
 0x73b   :  { %v3716_v63 = vpack.c.bf16 %v3663_v10, %v3662_v42  ;;  %v3572_v61 = vld [vmem:[#allocation4 + $0x1c8] sm:$0xff]  ;;  %v3573_v42 = vld [vmem:[#allocation4 + $0x1d0] sm:$0xff] }
 0x73c   :  { %v3670_v10 = vld [vmem:[#allocation4 + $0x1e9] sm:$0xff] }
 0x73d   :  { %5496 = vmatpush1.bf16.msra.mxu1 %v12134_v14  ;;  %v3568_v14 = vld [vmem:[#allocation4 + $0x188] sm:$0xff] }
 0x73e   :  { %5497 = vmatprep.subr.bf16.mxu1 %v17883_v22  ;;  %v14743_v54 = vpack.c.bf16 %v3569_v41, %v3568_v14  ;;  %v14756_v14 = vpack.c.bf16 %v3575_v16, %v3574_v9  ;;  %v3678_v9 = vld [vmem:[#allocation4 + $0x2a9] sm:$0xff] }
 0x740   :  { %5261 = vmatmul.mubr.bf16.gmra.mrb[132].mxu1 %v14713_v49 }
 0x741   :  { %5268 = vmatprep.mubr.bf16.mxu1 %v3712_v26  ;;  %5498 = vmatpush1.bf16.msra.mxu1 %v12135_v45  ;;  %v3567_v26 = vld [vmem:[#allocation4 + $0x170] sm:$0xff]  ;;  %v3719_v45 = vpack.c.bf16 %v3669_v30, %v3668_v51  ;;  %v12140_v51 = vld [vmem:[%s17753_s11 + $0x1f8] sm:$0xff]   ;;  %v3578_v30 = vld [vmem:[#allocation4 + $0x268] sm:$0xff] }
 0x742   :  { %5499 = vmatprep.subr.bf16.mxu1 %v17883_v22  ;;  %v14736_v55 = vpack.c.bf16 %v3567_v26, %v3566_v18  ;;  %v14753_v18 = vpack.c.bf16 %v3573_v42, %v3572_v61  ;;  %v3677_v61 = vld [vmem:[#allocation4 + $0x291] sm:$0xff] }
 0x748   :  { %5269 = vmatmul.mubr.bf16.gmra.mrb[136].mxu1 %v14716_v7 }
 0x749   :  { %5276 = vmatprep.mubr.bf16.mxu1 %v3713_v56  ;;  %v12136_v56 = vld [vmem:[%s17753_s11 + $0x1d8] sm:$0xff]  }
 0x74a   :  { %5500 = vmatpush1.bf16.msra.mxu1 %v12136_v56  ;;  %v3673_v56 = vld [vmem:[#allocation4 + $0x211] sm:$0xff] }
 0x74b   :  { %5501 = vmatprep.subr.bf16.mxu1 %v17883_v22 }
 0x74e   :  { %5502 = vmatpush1.bf16.msra.mxu1 %v12137_v6  ;;  %v3676_v6 = vld [vmem:[#allocation4 + $0x289] sm:$0xff] }
 0x74f   :  { %5503 = vmatprep.subr.bf16.mxu1 %v17883_v22 }
 0x750   :  { %5277 = vmatmul.mubr.bf16.gmra.mrb[140].mxu1 %v14723_v47 }
 0x751   :  { %5284 = vmatprep.mubr.bf16.mxu1 %v3714_v29  ;;  %v3718_v29 = vpack.c.bf16 %v3667_v15, %v3666_v20  ;;  %v12138_v20 = vld [vmem:[%s17753_s11 + $0x1e8] sm:$0xff]  }
 0x752   :  { %v3576_v15 = vld [vmem:[#allocation4 + $0x208] sm:$0xff]  ;;  %5504 = vmatpush1.bf16.msra.mxu1 %v12138_v20 }
 0x753   :  { %5505 = vmatprep.subr.bf16.mxu1 %v17883_v22  ;;  %v3680_v20 = vld [vmem:[#allocation4 + $0x2c9] sm:$0xff] }
 0x758   :  { %5285 = vmatmul.mubr.bf16.gmra.mrb[144].mxu1 %v14726_v40 }
 0x759   :  { %5292 = vmatprep.mubr.bf16.mxu1 %v3715_v11  ;;  %v14746_v11 = vpack.c.bf16 %v3571_v25, %v3570_v60  ;;  %v12139_v25 = vld [vmem:[%s17753_s11 + $0x1f0] sm:$0xff]  }
 0x75a   :  { %5506 = vmatpush1.bf16.msra.mxu1 %v12139_v25 }
 0x75b   :  { %5507 = vmatprep.subr.bf16.mxu1 %v17883_v22  ;;  %v3691_v22 = vld [vmem:[#allocation4 + $0x371] sm:$0xff] }
 0x75e   :  { %5508 = vmatpush1.bf16.msra.mxu1 %v12140_v51  ;;  %v3584_v51 = vld [vmem:[#allocation4 + $0x2c8] sm:$0xff] }
 0x760   :  { %5293 = vmatmul.mubr.bf16.gmra.mrb[148].mxu1 %v14733_v59 }
 0x761   :  { %5300 = vmatprep.mubr.bf16.mxu1 %v3716_v63  ;;  %v3671_v63 = vld [vmem:[#allocation4 + $0x1f1] sm:$0xff] }
 0x762   :  { %v3720_v26 = vpack.c.bf16 %v3671_v63, %v3670_v10  ;;  %v3723_v10 = vpack.c.bf16 %v3677_v61, %v3676_v6  ;;  %v3580_v63 = vld [vmem:[#allocation4 + $0x288] sm:$0xff]  ;;  %v3683_v6 = vld [vmem:[#allocation4 + $0x2f1] sm:$0xff] }
 0x768   :  { %5301 = vmatmul.mubr.bf16.gmra.mrb[152].mxu1 %v14736_v55 }
 0x769   :  { %5308 = vmatprep.mubr.bf16.mxu1 %v3717_v5  ;;  %v3672_v5 = vld [vmem:[#allocation4 + $0x209] sm:$0xff] }
 0x76a   :  { %v3721_v41 = vpack.c.bf16 %v3673_v56, %v3672_v5  ;;  %v3582_v56 = vld [vmem:[#allocation4 + $0x2a8] sm:$0xff] }
 0x770   :  { %5309 = vmatmul.mubr.bf16.gmra.mrb[156].mxu1 %v14743_v54 }
 0x771   :  { %5316 = vmatprep.mubr.bf16.mxu1 %v3718_v29  ;;  %v3577_v29 = vld [vmem:[#allocation4 + $0x210] sm:$0xff] }
 0x772   :  { %v14763_v60 = vpack.c.bf16 %v3577_v29, %v3576_v15  ;;  %v3681_v15 = vld [vmem:[#allocation4 + $0x2d1] sm:$0xff] }
 0x773   :  { %v3725_v25 = vpack.c.bf16 %v3681_v15, %v3680_v20  ;;  %v3686_v20 = vld [vmem:[#allocation4 + $0x329] sm:$0xff]  ;;  %v3687_v15 = vld [vmem:[#allocation4 + $0x331] sm:$0xff] }
 0x778   :  { %5317 = vmatmul.mubr.bf16.gmra.mrb[160].mxu1 %v14746_v11 }
 0x779   :  { %5324 = vmatprep.mubr.bf16.mxu1 %v3719_v45  ;;  %v3579_v45 = vld [vmem:[#allocation4 + $0x270] sm:$0xff] }
 0x77a   :  { %v3626_v42 = vpack.c.bf16 %v3579_v45, %v3578_v30  ;;  %v3585_v30 = vld [vmem:[#allocation4 + $0x2d0] sm:$0xff] }
 0x77b   :  { %v3682_v45 = vld [vmem:[#allocation4 + $0x2e9] sm:$0xff]  ;;  %v14780_v61 = vpack.c.bf16 %v3585_v30, %v3584_v51  ;;  %v3728_v51 = vpack.c.bf16 %v3687_v15, %v3686_v20 }
 0x77c   :  { %v3590_v30 = vld [vmem:[#allocation4 + $0x328] sm:$0xff]  ;;  %v3595_v15 = vld [vmem:[#allocation4 + $0x370] sm:$0xff] }
 0x77d   :  { %v3594_v20 = vld [vmem:[#allocation4 + $0x368] sm:$0xff] }
 0x780   :  { %5325 = vmatmul.mubr.bf16.gmra.mrb[164].mxu1 %v14753_v18 }
 0x781   :  { %5332 = vmatprep.mubr.bf16.mxu1 %v3720_v26  ;;  %v3581_v26 = vld [vmem:[#allocation4 + $0x290] sm:$0xff] }
 0x782   :  { %v14774_v16 = vpack.c.bf16 %v3581_v26, %v3580_v63  ;;  %v3587_v63 = vld [vmem:[#allocation4 + $0x2f0] sm:$0xff] }
 0x783   :  { %v3684_v26 = vld [vmem:[#allocation4 + $0x309] sm:$0xff] }
 0x788   :  { %5333 = vmatmul.mubr.bf16.gmra.mrb[168].mxu1 %v14756_v14 }
 0x789   :  { %5340 = vmatprep.mubr.bf16.mxu1 %v3721_v41  ;;  %v3583_v41 = vld [vmem:[#allocation4 + $0x2b0] sm:$0xff] }
 0x78a   :  { %v14777_v29 = vpack.c.bf16 %v3583_v41, %v3582_v56  ;;  %v3588_v56 = vld [vmem:[#allocation4 + $0x308] sm:$0xff]  ;;  %v3589_v41 = vld [vmem:[#allocation4 + $0x310] sm:$0xff] }
 0x790   :  { %5341 = vmatmul.mubr.bf16.gmra.mrb[172].mxu1 %v14763_v60 }
 0x791   :  { %5348 = vmatprep.mubr.bf16.mxu1 %v14629_v31  ;;  %v3679_v31 = vld [vmem:[#allocation4 + $0x2b1] sm:$0xff] }
 0x792   :  { %v3724_v5 = vpack.c.bf16 %v3679_v31, %v3678_v9  ;;  %v3685_v9 = vld [vmem:[#allocation4 + $0x311] sm:$0xff] }
 0x798   :  { %5349 = vmatmul.mubr.bf16.gmra.mrb[176].mxu1 %v3626_v42  ;;  %v3726_v42 = vpack.c.bf16 %v3683_v6, %v3682_v45  ;;  %v3591_v45 = vld [vmem:[#allocation4 + $0x330] sm:$0xff] }
 0x799   :  { %5356 = vmatprep.mubr.bf16.mxu1 %v3723_v10  ;;  %v3586_v10 = vld [vmem:[#allocation4 + $0x2e8] sm:$0xff] }
 0x79a   :  { %v14783_v31 = vpack.c.bf16 %v3587_v63, %v3586_v10  ;;  %v3688_v6 = vld [vmem:[#allocation4 + $0x349] sm:$0xff]  ;;  %v14789_v10 = vpack.c.bf16 %v3591_v45, %v3590_v30  ;;  %v14795_v30 = vpack.c.bf16 %v3595_v15, %v3594_v20 }
 0x79b   :  { %v3600_v15 = vld [vmem:[#allocation4 + $0x3c8] sm:$0xff] }
 0x7a0   :  { %5357 = vmatmul.mubr.bf16.gmra.mrb[180].mxu1 %v14774_v16 }
 0x7a1   :  { %5364 = vmatprep.mubr.bf16.mxu1 %v3724_v5  ;;  %v3727_v5 = vpack.c.bf16 %v3685_v9, %v3684_v26  ;;  %v3592_v26 = vld [vmem:[#allocation4 + $0x348] sm:$0xff]  ;;  %v3593_v9 = vld [vmem:[#allocation4 + $0x350] sm:$0xff] }
 0x7a8   :  { %5365 = vmatmul.mubr.bf16.gmra.mrb[184].mxu1 %v14777_v29 }
 0x7a9   :  { %5372 = vmatprep.mubr.bf16.mxu1 %v3725_v25  ;;  %v14786_v25 = vpack.c.bf16 %v3589_v41, %v3588_v56  ;;  %v14792_v56 = vpack.c.bf16 %v3593_v9, %v3592_v26  ;;  %v3598_v9 = vld [vmem:[#allocation4 + $0x3a8] sm:$0xff] }
 0x7b0   :  { %5373 = vmatmul.mubr.bf16.gmra.mrb[188].mxu1 %v14780_v61 }
 0x7b1   :  { %5380 = vmatprep.mubr.bf16.mxu1 %v3726_v42  ;;  %v3689_v42 = vld [vmem:[#allocation4 + $0x351] sm:$0xff] }
 0x7b2   :  { %v3729_v63 = vpack.c.bf16 %v3689_v42, %v3688_v6  ;;  %v3596_v6 = vld [vmem:[#allocation4 + $0x388] sm:$0xff]  ;;  %v3597_v42 = vld [vmem:[#allocation4 + $0x390] sm:$0xff] }
 0x7b3   :  { %v14798_v26 = vpack.c.bf16 %v3597_v42, %v3596_v6  ;;  %v3602_v42 = vld [vmem:[#allocation4 + $0x3e8] sm:$0xff] }
 0x7b8   :  { %5381 = vmatmul.mubr.bf16.gmra.mrb[192].mxu1 %v14783_v31 }
 0x7b9   :  { %5388 = vmatprep.mubr.bf16.mxu1 %v3727_v5  ;;  %v3690_v5 = vld [vmem:[#allocation4 + $0x369] sm:$0xff] }
 0x7ba   :  { %v3730_v41 = vpack.c.bf16 %v3691_v22, %v3690_v5  ;;  %v3599_v5 = vld [vmem:[#allocation4 + $0x3b0] sm:$0xff] }
 0x7bb   :  { %v14801_v20 = vpack.c.bf16 %v3599_v5, %v3598_v9  ;;  %v3604_v5 = vld [vmem:[#allocation4 + $0x408] sm:$0xff] }
 0x7c0   :  { %5389 = vmatmul.mubr.bf16.gmra.mrb[196].mxu1 %v14786_v25 }
 0x7c1   :  { %5396 = vmatprep.mubr.bf16.mxu1 %v3728_v51  ;;  %v3692_v51 = vld [vmem:[#allocation4 + $0x389] sm:$0xff] }
 0x7c2   :  { %v3731_v45 = vpack.c.bf16 %v3693_v17, %v3692_v51  ;;  %v3601_v51 = vld [vmem:[#allocation4 + $0x3d0] sm:$0xff] }
 0x7c3   :  { %v14804_v6 = vpack.c.bf16 %v3601_v51, %v3600_v15  ;;  %v3606_v51 = vld [vmem:[#allocation4 + $0x428] sm:$0xff] }
 0x7c8   :  { %5397 = vmatmul.mubr.bf16.gmra.mrb[200].mxu1 %v14789_v10 }
 0x7c9   :  { %5404 = vmatprep.mubr.bf16.mxu1 %v3729_v63  ;;  %v3694_v63 = vld [vmem:[#allocation4 + $0x3a9] sm:$0xff] }
 0x7ca   :  { %v3732_v22 = vpack.c.bf16 %v3695_v53, %v3694_v63  ;;  %v3603_v63 = vld [vmem:[#allocation4 + $0x3f0] sm:$0xff] }
 0x7cb   :  { %v14807_v9 = vpack.c.bf16 %v3603_v63, %v3602_v42  ;;  %v3609_v42 = vld [vmem:[#allocation4 + $0x450] sm:$0xff] }
 0x7d0   :  { %5405 = vmatmul.mubr.bf16.gmra.mrb[204].mxu1 %v14792_v56 }
 0x7d1   :  { %5412 = vmatprep.mubr.bf16.mxu1 %v3730_v41  ;;  %v3696_v41 = vld [vmem:[#allocation4 + $0x3c9] sm:$0xff] }
 0x7d2   :  { %v3733_v17 = vpack.c.bf16 %v3697_v34, %v3696_v41  ;;  %v3605_v41 = vld [vmem:[#allocation4 + $0x410] sm:$0xff] }
 0x7d3   :  { %v14810_v15 = vpack.c.bf16 %v3605_v41, %v3604_v5  ;;  %v3741_v5 = vld [vmem:[#allocation4 + $0x67] sm:$0xff]  ;;  %v3742_v41 = vld [vmem:[#allocation4 + $0x6f] sm:$0xff] }
 0x7d8   :  { %5413 = vmatmul.mubr.bf16.gmra.mrb[208].mxu1 %v14795_v30 }
 0x7d9   :  { %5420 = vmatprep.mubr.bf16.mxu1 %v3731_v45  ;;  %v3698_v45 = vld [vmem:[#allocation4 + $0x3e9] sm:$0xff] }
 0x7da   :  { %v3734_v53 = vpack.c.bf16 %v3699_v4, %v3698_v45  ;;  %v3607_v45 = vld [vmem:[#allocation4 + $0x430] sm:$0xff] }
 0x7e0   :  { %5421 = vmatmul.mubr.bf16.gmra.mrb[212].mxu1 %v14798_v26 }
 0x7e1   :  { %5428 = vmatprep.mubr.bf16.mxu1 %v3732_v22  ;;  %v3700_v22 = vld [vmem:[#allocation4 + $0x409] sm:$0xff] }
 0x7e2   :  { %v3735_v34 = vpack.c.bf16 %v3701_v39, %v3700_v22  ;;  %v3608_v39 = vld [vmem:[#allocation4 + $0x448] sm:$0xff] }
 0x7e3   :  { %v14817_v63 = vpack.c.bf16 %v3609_v42, %v3608_v39  ;;  %v3740_v22 = vld [vmem:[#allocation4 + $0x4f] sm:$0xff]  ;;  %v3747_v42 = vld [vmem:[#allocation4 + $0xc7] sm:$0xff] }
 0x7e8   :  { %5429 = vmatmul.mubr.bf16.gmra.mrb[216].mxu1 %v14801_v20 }
 0x7e9   :  { %5436 = vmatprep.mubr.bf16.mxu1 %v3733_v17  ;;  %v3702_v17 = vld [vmem:[#allocation4 + $0x429] sm:$0xff] }
 0x7ea   :  { %v3736_v4 = vpack.c.bf16 %v3703_v52, %v3702_v17  ;;  %v3739_v52 = vld [vmem:[#allocation4 + $0x47] sm:$0xff]  ;;  %v3804_v17 = vpack.c.bf16 %v3742_v41, %v3741_v5 }
 0x7eb   :  { %v3751_v5 = vld [vmem:[#allocation4 + $0x107] sm:$0xff] }
 0x7f0   :  { %5437 = vmatmul.mubr.bf16.gmra.mrb[220].mxu1 %v14804_v6 }
 0x7f1   :  { %5444 = vmatprep.mubr.bf16.mxu1 %v3734_v53  ;;  %v14813_v53 = vpack.c.bf16 %v3607_v45, %v3606_v51  ;;  %v3745_v45 = vld [vmem:[#allocation4 + $0xa7] sm:$0xff] }
 0x7f8   :  { %5445 = vmatmul.mubr.bf16.gmra.mrb[224].mxu1 %v14807_v9 }
 0x7f9   :  { %5452 = vmatprep.mubr.bf16.mxu1 %v3735_v34  ;;  %v3803_v34 = vpack.c.bf16 %v3740_v22, %v3739_v52  ;;  %v3749_v22 = vld [vmem:[#allocation4 + $0xe7] sm:$0xff] }
 0x800   :  { %5453 = vmatmul.mubr.bf16.gmra.mrb[228].mxu1 %v14810_v15 }
 0x801   :  { %5460 = vmatprep.mubr.bf16.mxu1 %v3736_v4  ;;  %v3744_v4 = vld [vmem:[#allocation4 + $0x8f] sm:$0xff] }
 0x808   :  { %5461 = vmatmul.mubr.bf16.gmra.mrb[232].mxu1 %v14813_v53 }
 0x809   :  { %5468 = vmatprep.mubr.bf16.mxu1 %v14633_v19  ;;  %v3743_v19 = vld [vmem:[#allocation4 + $0x87] sm:$0xff] }
 0x80a   :  { %v3805_v51 = vpack.c.bf16 %v3744_v4, %v3743_v19  ;;  %v3755_v4 = vld [vmem:[#allocation4 + $0x147] sm:$0xff] }
 0x810   :  { %5469 = vmatmul.mubr.bf16.gmra.mrb[236].mxu1 %v14817_v63 }
 0x811   :  { %5509 = vmatprep.mubr.bf16.mxu1 %v14674_v46  ;;  %v3746_v46 = vld [vmem:[#allocation4 + $0xaf] sm:$0xff] }
 0x812   :  { %v3806_v39 = vpack.c.bf16 %v3746_v46, %v3745_v45  ;;  %v3757_v45 = vld [vmem:[#allocation4 + $0x167] sm:$0xff] }
 0x818   :  { %5510 = vmatmul.mubr.bf16.vlgmr.msra.gmra.mrb[112].mxu1 %v3803_v34 }
 0x819   :  { %5517 = vmatprep.mubr.bf16.mxu1 %v14686_v23  ;;  %v3748_v23 = vld [vmem:[#allocation4 + $0xcf] sm:$0xff] }
 0x81a   :  { %v3807_v52 = vpack.c.bf16 %v3748_v23, %v3747_v42  ;;  %v3761_v23 = vld [vmem:[#allocation4 + $0x1a7] sm:$0xff] }
 0x820   :  { %5518 = vmatmul.mubr.bf16.gmra.mrb[116].mxu1 %v3804_v17  ;;  %v3753_v17 = vld [vmem:[#allocation4 + $0x127] sm:$0xff] }
 0x821   :  { %5525 = vmatprep.mubr.bf16.mxu1 %v14697_v1  ;;  %v3750_v1 = vld [vmem:[#allocation4 + $0xef] sm:$0xff] }
 0x822   :  { %v3808_v34 = vpack.c.bf16 %v3750_v1, %v3749_v22  ;;  %v3763_v22 = vld [vmem:[#allocation4 + $0x1c7] sm:$0xff] }
 0x828   :  { %5526 = vmatmul.mubr.bf16.gmra.mrb[120].mxu1 %v3805_v51 }
 0x829   :  { %5533 = vmatprep.mubr.bf16.mxu1 %v14705_v3  ;;  %v3752_v3 = vld [vmem:[#allocation4 + $0x10f] sm:$0xff] }
 0x82a   :  { %v3809_v41 = vpack.c.bf16 %v3752_v3, %v3751_v5  ;;  %v3767_v3 = vld [vmem:[#allocation4 + $0x207] sm:$0xff] }
 0x830   :  { %5534 = vmatmul.mubr.bf16.gmra.mrb[124].mxu1 %v3806_v39  ;;  %v3759_v39 = vld [vmem:[#allocation4 + $0x187] sm:$0xff] }
 0x831   :  { %5541 = vmatprep.mubr.bf16.mxu1 %v14713_v49  ;;  %v3754_v49 = vld [vmem:[#allocation4 + $0x12f] sm:$0xff] }
 0x832   :  { %v3810_v19 = vpack.c.bf16 %v3754_v49, %v3753_v17 }
 0x838   :  { %5542 = vmatmul.mubr.bf16.gmra.mrb[128].mxu1 %v3807_v52 }
 0x839   :  { %5549 = vmatprep.mubr.bf16.mxu1 %v14716_v7  ;;  %v3756_v7 = vld [vmem:[#allocation4 + $0x14f] sm:$0xff] }
 0x83a   :  { %v3811_v51 = vpack.c.bf16 %v3756_v7, %v3755_v4  ;;  %v3993_v4 = vld [vmem:[#allocation4 + $0x469] sm:$0xff]  ;;  %v3994_v7 = vld [vmem:[#allocation4 + $0x471] sm:$0xff] }
 0x840   :  { %5550 = vmatmul.mubr.bf16.gmra.mrb[132].mxu1 %v3808_v34  ;;  %v3765_v34 = vld [vmem:[#allocation4 + $0x1e7] sm:$0xff] }
 0x841   :  { %5557 = vmatprep.mubr.bf16.mxu1 %v14723_v47  ;;  %v3758_v47 = vld [vmem:[#allocation4 + $0x16f] sm:$0xff] }
 0x842   :  { %v3812_v46 = vpack.c.bf16 %v3758_v47, %v3757_v45  ;;  %v3772_v45 = vld [vmem:[#allocation4 + $0x28f] sm:$0xff] }
 0x848   :  { %5558 = vmatmul.mubr.bf16.gmra.mrb[136].mxu1 %v3809_v41  ;;  %v12348_v41 = vld [vmem:[#allocation3] sm:$0xff] }
 0x849   :  { %5565 = vmatprep.mubr.bf16.mxu1 %v14726_v40  ;;  %v3760_v40 = vld [vmem:[#allocation4 + $0x18f] sm:$0xff]  ;;  %v14835_v17 = vpack.c.bf16 %v12348_v41, %v12348_v41 }
 0x84a   :  { %v3813_v42 = vpack.c.bf16 %v3760_v40, %v3759_v39  ;;  %v3774_v39 = vld [vmem:[#allocation4 + $0x2af] sm:$0xff] }
 0x850   :  { %5566 = vmatmul.mubr.bf16.gmra.mrb[140].mxu1 %v3810_v19  ;;  %v3770_v19 = vld [vmem:[#allocation4 + $0x22f] sm:$0xff] }
 0x851   :  { %5573 = vmatprep.mubr.bf16.mxu1 %v14733_v59  ;;  %v3762_v59 = vld [vmem:[#allocation4 + $0x1af] sm:$0xff] }
 0x852   :  { %v3814_v52 = vpack.c.bf16 %v3762_v59, %v3761_v23  ;;  %v3776_v23 = vld [vmem:[#allocation4 + $0x2cf] sm:$0xff] }
 0x858   :  { %5574 = vmatmul.mubr.bf16.gmra.mrb[144].mxu1 %v3811_v51 }
 0x859   :  { %5581 = vmatprep.mubr.bf16.mxu1 %v14736_v55  ;;  %v3764_v55 = vld [vmem:[#allocation4 + $0x1cf] sm:$0xff] }
 0x85a   :  { %v3815_v1 = vpack.c.bf16 %v3764_v55, %v3763_v22  ;;  %v3779_v55 = vld [vmem:[#allocation4 + $0x307] sm:$0xff] }
 0x860   :  { %5582 = vmatmul.mubr.bf16.gmra.mrb[148].mxu1 %v3812_v46  ;;  %v3773_v46 = vld [vmem:[#allocation4 + $0x2a7] sm:$0xff] }
 0x861   :  { %5589 = vmatprep.mubr.bf16.mxu1 %v14743_v54  ;;  %v3766_v54 = vld [vmem:[#allocation4 + $0x1ef] sm:$0xff]  ;;  %v3820_v40 = vpack.c.bf16 %v3774_v39, %v3773_v46 }
 0x862   :  { %v3816_v5 = vpack.c.bf16 %v3766_v54, %v3765_v34  ;;  %v3781_v34 = vld [vmem:[#allocation4 + $0x327] sm:$0xff] }
 0x868   :  { %5590 = vmatmul.mubr.bf16.gmra.mrb[152].mxu1 %v3813_v42  ;;  %v3775_v42 = vld [vmem:[#allocation4 + $0x2c7] sm:$0xff] }
 0x869   :  { %5597 = vmatprep.mubr.bf16.mxu1 %v14746_v11  ;;  %v3768_v11 = vld [vmem:[#allocation4 + $0x20f] sm:$0xff]  ;;  %v3821_v59 = vpack.c.bf16 %v3776_v23, %v3775_v42 }
 0x86a   :  { %v3817_v49 = vpack.c.bf16 %v3768_v11, %v3767_v3  ;;  %v3785_v11 = vld [vmem:[#allocation4 + $0x367] sm:$0xff] }
 0x870   :  { %5598 = vmatmul.mubr.bf16.gmra.mrb[156].mxu1 %v3814_v52  ;;  %v3777_v52 = vld [vmem:[#allocation4 + $0x2e7] sm:$0xff] }
 0x871   :  { %5605 = vmatprep.mubr.bf16.mxu1 %v14753_v18  ;;  %v3769_v18 = vld [vmem:[#allocation4 + $0x227] sm:$0xff] }
 0x872   :  { %v3818_v51 = vpack.c.bf16 %v3770_v19, %v3769_v18  ;;  %v3789_v19 = vld [vmem:[#allocation4 + $0x3a7] sm:$0xff] }
 0x878   :  { %5606 = vmatmul.mubr.bf16.gmra.mrb[160].mxu1 %v3815_v1 }
 0x879   :  { %5613 = vmatprep.mubr.bf16.mxu1 %v14756_v14  ;;  %v4026_v14 = vpack.c.bf16 %v3994_v7, %v3993_v4  ;;  %v3791_v7 = vld [vmem:[#allocation4 + $0x3c7] sm:$0xff] }
 0x87b   :  { %10960 = vmatmul.mubr.bf16.gmra.mrb[204].mxu0 %v4026_v14 }
 0x880   :  { %5614 = vmatmul.mubr.bf16.gmra.mrb[164].mxu1 %v3816_v5  ;;  %v3783_v5 = vld [vmem:[#allocation4 + $0x347] sm:$0xff] }
 0x881   :  { %5621 = vmatprep.mubr.bf16.mxu1 %v14763_v60  ;;  %v3771_v60 = vld [vmem:[#allocation4 + $0x287] sm:$0xff] }
 0x882   :  { %v3819_v47 = vpack.c.bf16 %v3772_v45, %v3771_v60  ;;  %v3793_v60 = vld [vmem:[#allocation4 + $0x3e7] sm:$0xff] }
 0x888   :  { %5622 = vmatmul.mubr.bf16.gmra.mrb[168].mxu1 %v3817_v49  ;;  %v3787_v49 = vld [vmem:[#allocation4 + $0x387] sm:$0xff] }
 0x889   :  { %5629 = vmatprep.mubr.bf16.mxu1 %v14835_v17 }
 0x890   :  { %5630 = vmatmul.mubr.bf16.gmra.mrb[172].mxu1 %v3818_v51 }
 0x891   :  { %5637 = vmatprep.mubr.bf16.mxu1 %v14774_v16  ;;  %v3778_v16 = vld [vmem:[#allocation4 + $0x2ef] sm:$0xff] }
 0x892   :  { %v3822_v22 = vpack.c.bf16 %v3778_v16, %v3777_v52  ;;  %v3796_v52 = vld [vmem:[#allocation4 + $0x40f] sm:$0xff] }
 0x898   :  { %5638 = vmatmul.mubr.bf16.gmra.mrb[176].mxu1 %v3819_v47 }
 0x899   :  { %5645 = vmatprep.mubr.bf16.mxu1 %v14777_v29  ;;  %v3780_v29 = vld [vmem:[#allocation4 + $0x30f] sm:$0xff] }
 0x89a   :  { %v3823_v1 = vpack.c.bf16 %v3780_v29, %v3779_v55 }
 0x8a0   :  { %5646 = vmatmul.mubr.bf16.gmra.mrb[180].mxu1 %v3820_v40 }
 0x8a1   :  { %5653 = vmatprep.mubr.bf16.mxu1 %v14780_v61  ;;  %v3782_v61 = vld [vmem:[#allocation4 + $0x32f] sm:$0xff] }
 0x8a2   :  { %v3824_v54 = vpack.c.bf16 %v3782_v61, %v3781_v34  ;;  %v3797_v61 = vld [vmem:[#allocation4 + $0x427] sm:$0xff] }
 0x8a8   :  { %5654 = vmatmul.mubr.bf16.gmra.mrb[184].mxu1 %v3821_v59  ;;  %v3795_v59 = vld [vmem:[#allocation4 + $0x407] sm:$0xff] }
 0x8a9   :  { %5661 = vmatprep.mubr.bf16.mxu1 %v14783_v31  ;;  %v3784_v31 = vld [vmem:[#allocation4 + $0x34f] sm:$0xff]  ;;  %v3831_v34 = vpack.c.bf16 %v3796_v52, %v3795_v59 }
 0x8aa   :  { %v3825_v3 = vpack.c.bf16 %v3784_v31, %v3783_v5 }
 0x8b0   :  { %5662 = vmatmul.mubr.bf16.gmra.mrb[188].mxu1 %v3822_v22 }
 0x8b1   :  { %5669 = vmatprep.mubr.bf16.mxu1 %v14786_v25  ;;  %v3786_v25 = vld [vmem:[#allocation4 + $0x36f] sm:$0xff] }
 0x8b2   :  { %v3826_v41 = vpack.c.bf16 %v3786_v25, %v3785_v11 }
 0x8b8   :  { %5670 = vmatmul.mubr.bf16.gmra.mrb[192].mxu1 %v3823_v1 }
 0x8b9   :  { %5677 = vmatprep.mubr.bf16.mxu1 %v14789_v10  ;;  %v3788_v10 = vld [vmem:[#allocation4 + $0x38f] sm:$0xff] }
 0x8ba   :  { %v3827_v18 = vpack.c.bf16 %v3788_v10, %v3787_v49  ;;  %v3799_v49 = vld [vmem:[#allocation4 + $0x447] sm:$0xff]  ;;  %v3800_v10 = vld [vmem:[#allocation4 + $0x44f] sm:$0xff] }
 0x8c0   :  { %5678 = vmatmul.mubr.bf16.gmra.mrb[196].mxu1 %v3824_v54  ;;  %v3798_v54 = vld [vmem:[#allocation4 + $0x42f] sm:$0xff] }
 0x8c1   :  { %5685 = vmatprep.mubr.bf16.mxu1 %v14792_v56  ;;  %v3790_v56 = vld [vmem:[#allocation4 + $0x3af] sm:$0xff] }
 0x8c2   :  { %v3828_v4 = vpack.c.bf16 %v3790_v56, %v3789_v19 }
 0x8c8   :  { %5686 = vmatmul.mubr.bf16.gmra.mrb[200].mxu1 %v3825_v3 }
 0x8c9   :  { %5693 = vmatprep.mubr.bf16.mxu1 %v14795_v30  ;;  %v3792_v30 = vld [vmem:[#allocation4 + $0x3cf] sm:$0xff] }
 0x8ca   :  { %v3829_v14 = vpack.c.bf16 %v3792_v30, %v3791_v7  ;;  %v3833_v30 = vpack.c.bf16 %v3800_v10, %v3799_v49  ;;  %v17948_v49 = vld [vmem:[#allocation16_spill] sm:$0xff] }
 0x8d0   :  { %5694 = vmatmul.mubr.bf16.gmra.mrb[204].mxu1 %v3826_v41  ;;  %v3832_v41 = vpack.c.bf16 %v3798_v54, %v3797_v61  ;;  %v17946_v54 = vld [vmem:[#allocation17_spill] sm:$0xff] }
 0x8d1   :  { %5701 = vmatprep.mubr.bf16.mxu1 %v14798_v26  ;;  %v14853_v26 = vld [vmem:[%s17756_s12] ss:$0 sm:$0xff] }
 0x8d8   :  { %5702 = vmatmul.mubr.bf16.gmra.mrb[208].mxu1 %v3827_v18 }
 0x8d9   :  { %5709 = vmatprep.mubr.bf16.mxu1 %v14801_v20  ;;  %v3794_v20 = vld [vmem:[#allocation4 + $0x3ef] sm:$0xff] }
 0x8da   :  { %v3830_v42 = vpack.c.bf16 %v3794_v20, %v3793_v60 }
 0x8e0   :  { %5710 = vmatmul.mubr.bf16.gmra.mrb[212].mxu1 %v3828_v4 }
 0x8e1   :  { %5717 = vmatprep.mubr.bf16.mxu1 %v14804_v6 }
 0x8e8   :  { %5718 = vmatmul.mubr.bf16.gmra.mrb[216].mxu1 %v3829_v14  ;;  %v3802_v14 = vld [vmem:[#allocation4 + $0x46f] sm:$0xff] }
 0x8e9   :  { %5725 = vmatprep.mubr.bf16.mxu1 %v14807_v9 }
 0x8eb   :  { %v5511_v51 = vpop.f32.mrb[112].mxu1 }
 0x8ec   :  { %v11099_v45 = vadd.f32 %v14853_v26, %v5511_v51  ;;  %v5513_v47 = vpop.f32.mrb[113].mxu1 }
 0x8ed   :  { %v5514_v46 = vpop.f32.mrb[114].mxu1 }
 0x8ee   :  { %v14857_v6 = vadd.f32 %v11099_v45, %v14407_v43  ;;  %v11100_v39 = vadd.f32 %v14853_v26, %v5514_v46  ;;  %v5516_v40 = vpop.f32.mrb[115].mxu1 }
 0x8f0   :  { %v14861_v9 = vadd.f32 %v11100_v39, %v14411_v28  ;;  %5726 = vmatmul.mubr.bf16.gmra.mrb[220].mxu1 %v3830_v42 }
 0x8f1   :  { %5733 = vmatprep.mubr.bf16.mxu1 %v14810_v15 }
 0x8f3   :  { %v5519_v23 = vpop.f32.mrb[116].mxu1 }
 0x8f4   :  { %v11101_v16 = vadd.f32 %v14853_v26, %v5519_v23  ;;  %v5521_v22 = vpop.f32.mrb[117].mxu1 }
 0x8f5   :  { %v5522_v55 = vpop.f32.mrb[118].mxu1 }
 0x8f6   :  { %v14866_v43 = vadd.f32 %v11101_v16, %v14403_v21  ;;  %v11102_v29 = vadd.f32 %v14853_v26, %v5522_v55  ;;  %v5524_v1 = vpop.f32.mrb[119].mxu1 }
 0x8f7   :  { %v17945_v1 = vld [vmem:[#allocation15_spill] sm:$0xff] }
 0x8f8   :  { %v14870_v28 = vadd.f32 %v11102_v29, %v14409_v24  ;;  %5734 = vmatmul.mubr.bf16.gmra.mrb[224].mxu1 %v3831_v34 }
 0x8f9   :  { %5741 = vmatprep.mubr.bf16.mxu1 %v14813_v53 }
 0x8fb   :  { %v5527_v15 = vpop.f32.mrb[120].mxu1 }
 0x8fc   :  { %v11103_v5 = vadd.f32 %v14853_v26, %v5527_v15  ;;  %v5529_v31 = vpop.f32.mrb[121].mxu1 }
 0x8fd   :  { %v5530_v3 = vpop.f32.mrb[122].mxu1 }
 0x8fe   :  { %v14875_v21 = vadd.f32 %v11103_v5, %v14421_v27  ;;  %v11104_v11 = vadd.f32 %v14853_v26, %v5530_v3  ;;  %v5532_v25 = vpop.f32.mrb[123].mxu1 }
 0x900   :  { %v14879_v24 = vadd.f32 %v11104_v11, %v14425_v38  ;;  %5742 = vmatmul.mubr.bf16.gmra.mrb[228].mxu1 %v3832_v41  ;;  %v17947_v11 = vld [vmem:[#allocation14_spill] sm:$0xff] }
 0x901   :  { %5749 = vmatprep.mubr.bf16.mxu1 %v14817_v63  ;;  %v3801_v63 = vld [vmem:[#allocation4 + $0x467] sm:$0xff] }
 0x902   :  { %v3834_v45 = vpack.c.bf16 %v3802_v14, %v3801_v63  ;;  %v17949_v63 = vld [vmem:[#allocation19_spill] sm:$0xff] }
 0x903   :  { %v5535_v53 = vpop.f32.mrb[124].mxu1 }
 0x904   :  { %v11105_v18 = vadd.f32 %v14853_v26, %v5535_v53  ;;  %v5537_v19 = vpop.f32.mrb[125].mxu1 }
 0x905   :  { %v5538_v56 = vpop.f32.mrb[126].mxu1 }
 0x906   :  { %v14884_v27 = vadd.f32 %v11105_v18, %v14417_v62  ;;  %v11106_v4 = vadd.f32 %v14853_v26, %v5538_v56  ;;  %v5540_v7 = vpop.f32.mrb[127].mxu1  ;;  %v6055_v18 = vadd.f32 %v14861_v9, %v14857_v6 }
 0x908   :  { %v14888_v38 = vadd.f32 %v11106_v4, %v14423_v35  ;;  %5750 = vmatmul.mubr.bf16.gmra.mrb[232].mxu1 %v3833_v30  ;;  %v6056_v56 = vadd.f32 %v6055_v18, %v14866_v43 }
 0x909   :  { %5757 = vmatprep.mubr.bf16.mxu1 %v14835_v17 }
 0x90b   :  { %v5543_v51 = vpop.f32.mrb[128].mxu1 }
 0x90c   :  { %v11107_v60 = vadd.f32 %v14853_v26, %v5543_v51  ;;  %v5545_v20 = vpop.f32.mrb[129].mxu1 }
 0x90d   :  { %v5546_v47 = vpop.f32.mrb[130].mxu1  ;;  %v6057_v20 = vadd.f32 %v6056_v56, %v14870_v28 }
 0x90e   :  { %v14893_v62 = vadd.f32 %v11107_v60, %v14435_v32  ;;  %v11108_v46 = vadd.f32 %v14853_v26, %v5546_v47  ;;  %v5548_v39 = vpop.f32.mrb[131].mxu1 }
 0x910   :  { %v14897_v35 = vadd.f32 %v11108_v46, %v14439_v50  ;;  %5758 = vmatmul.mubr.bf16.gmra.mrb[236].mxu1 %v3834_v45  ;;  %v17950_v45 = vld [vmem:[#allocation21_spill] sm:$0xff]  ;;  %v6058_v46 = vadd.f32 %v6057_v20, %v14875_v21 }
 0x913   :  { %v5551_v40 = vpop.f32.mrb[132].mxu1 }
 0x914   :  { %v11109_v17 = vadd.f32 %v14853_v26, %v5551_v40  ;;  %v5553_v42 = vpop.f32.mrb[133].mxu1 }
 0x915   :  { %v5554_v23 = vpop.f32.mrb[134].mxu1 }
 0x916   :  { %v14901_v59 = vadd.f32 %v11109_v17, %v14431_v44  ;;  %v11110_v52 = vadd.f32 %v14853_v26, %v5554_v23  ;;  %v5556_v16 = vpop.f32.mrb[135].mxu1  ;;  %v6059_v23 = vadd.f32 %v6058_v46, %v14879_v24 }
 0x918   :  { %v14905_v32 = vadd.f32 %v11110_v52, %v14437_v58  ;;  %v17951_v52 = vld [vmem:[#allocation18_spill] sm:$0xff] }
 0x91b   :  { %v5559_v22 = vpop.f32.mrb[136].mxu1 }
 0x91c   :  { %v11111_v55 = vadd.f32 %v14853_v26, %v5559_v22  ;;  %v5561_v50 = vpop.f32.mrb[137].mxu1 }
 0x91d   :  { %v5562_v29 = vpop.f32.mrb[138].mxu1  ;;  %v6060_v50 = vadd.f32 %v6059_v23, %v14884_v27 }
 0x91e   :  { %v14909_v34 = vadd.f32 %v11111_v55, %v17945_v1  ;;  %v11112_v15 = vadd.f32 %v14853_v26, %v5562_v29  ;;  %v5564_v61 = vpop.f32.mrb[139].mxu1  ;;  %v17952_v29 = vld [vmem:[#allocation20_spill] sm:$0xff] }
 0x91f   :  { %v6061_v61 = vadd.f32 %v6060_v50, %v14888_v38  ;;  %v17957_v50 = vld [vmem:[#allocation27_spill] sm:$0xff] }
 0x920   :  { %v14913_v44 = vadd.f32 %v11112_v15, %v17946_v54 }
 0x923   :  { %v5567_v5 = vpop.f32.mrb[140].mxu1 }
 0x924   :  { %v11113_v31 = vadd.f32 %v14853_v26, %v5567_v5  ;;  %v5569_v3 = vpop.f32.mrb[141].mxu1 }
 0x925   :  { %v5570_v58 = vpop.f32.mrb[142].mxu1  ;;  %v6062_v3 = vadd.f32 %v6061_v61, %v14893_v62 }
 0x926   :  { %v14917_v25 = vadd.f32 %v11113_v31, %v17947_v11  ;;  %v11114_v41 = vadd.f32 %v14853_v26, %v5570_v58  ;;  %v5572_v53 = vpop.f32.mrb[143].mxu1  ;;  %v17953_v58 = vld [vmem:[#allocation23_spill] sm:$0xff] }
 0x928   :  { %v14921_v10 = vadd.f32 %v11114_v41, %v17948_v49  ;;  %v17954_v49 = vld [vmem:[#allocation25_spill] sm:$0xff] }
 0x92b   :  { %v5575_v19 = vpop.f32.mrb[144].mxu1 }
 0x92c   :  { %v11115_v4 = vadd.f32 %v14853_v26, %v5575_v19  ;;  %v5577_v7 = vpop.f32.mrb[145].mxu1  ;;  %v6063_v19 = vadd.f32 %v6062_v3, %v14897_v35 }
 0x92d   :  { %v5578_v30 = vpop.f32.mrb[146].mxu1 }
 0x92e   :  { %v14928_v14 = vadd.f32 %v11115_v4, %v17949_v63  ;;  %v11116_v51 = vadd.f32 %v14853_v26, %v5578_v30  ;;  %v5580_v60 = vpop.f32.mrb[147].mxu1  ;;  %v6064_v4 = vadd.f32 %v6063_v19, %v14901_v59 }
 0x930   :  { %v14933_v47 = vadd.f32 %v11116_v51, %v17950_v45  ;;  %v17955_v51 = vld [vmem:[#allocation22_spill] sm:$0xff]  ;;  %v6065_v46 = vadd.f32 %v6064_v4, %v14905_v32 }
 0x933   :  { %v5583_v39 = vpop.f32.mrb[148].mxu1 }
 0x934   :  { %v11117_v40 = vadd.f32 %v14853_v26, %v5583_v39  ;;  %v5585_v17 = vpop.f32.mrb[149].mxu1  ;;  %v17956_v39 = vld [vmem:[#allocation24_spill] sm:$0xff] }
 0x935   :  { %v5586_v42 = vpop.f32.mrb[150].mxu1  ;;  %v6066_v17 = vadd.f32 %v6065_v46, %v14909_v34 }
 0x936   :  { %v14939_v16 = vadd.f32 %v11117_v40, %v17951_v52  ;;  %v11118_v22 = vadd.f32 %v14853_v26, %v5586_v42  ;;  %v5588_v55 = vpop.f32.mrb[151].mxu1 }
 0x937   :  { %v6067_v55 = vadd.f32 %v6066_v17, %v14913_v44 }
 0x938   :  { %v14944_v1 = vadd.f32 %v11118_v22, %v17952_v29 }
 0x93b   :  { %v5591_v15 = vpop.f32.mrb[152].mxu1 }
 0x93c   :  { %v11119_v54 = vadd.f32 %v14853_v26, %v5591_v15  ;;  %v5593_v5 = vpop.f32.mrb[153].mxu1 }
 0x93d   :  { %v5594_v31 = vpop.f32.mrb[154].mxu1  ;;  %v17958_v5 = vld [vmem:[#allocation29_spill] sm:$0xff] }
 0x93e   :  { %v14950_v11 = vadd.f32 %v11119_v54, %v17953_v58  ;;  %v11120_v41 = vadd.f32 %v14853_v26, %v5594_v31  ;;  %v5596_v53 = vpop.f32.mrb[155].mxu1  ;;  %v6068_v54 = vadd.f32 %v6067_v55, %v14917_v25 }
 0x940   :  { %v14954_v18 = vadd.f32 %v11120_v41, %v17954_v49  ;;  %v6069_v58 = vadd.f32 %v6068_v54, %v14921_v10 }
 0x942   :  { %v6070_v19 = vadd.f32 %v6069_v58, %v14928_v14 }
 0x943   :  { %v5599_v56 = vpop.f32.mrb[156].mxu1 }
 0x944   :  { %v11121_v7 = vadd.f32 %v14853_v26, %v5599_v56  ;;  %v5601_v30 = vpop.f32.mrb[157].mxu1  ;;  %v17959_v56 = vld [vmem:[#allocation26_spill] sm:$0xff] }
 0x945   :  { %v5602_v63 = vpop.f32.mrb[158].mxu1 }
 0x946   :  { %v14960_v60 = vadd.f32 %v11121_v7, %v17955_v51  ;;  %v11122_v20 = vadd.f32 %v14853_v26, %v5602_v63  ;;  %v5604_v45 = vpop.f32.mrb[159].mxu1  ;;  %v17960_v63 = vld [vmem:[#allocation28_spill] sm:$0xff] }
 0x948   :  { %v14965_v40 = vadd.f32 %v11122_v20, %v17956_v39  ;;  %v6071_v20 = vadd.f32 %v6070_v19, %v14933_v47 }
 0x94a   :  { %v6072_v46 = vadd.f32 %v6071_v20, %v14939_v16 }
 0x94b   :  { %v5607_v42 = vpop.f32.mrb[160].mxu1 }
 0x94c   :  { %v11123_v23 = vadd.f32 %v14853_v26, %v5607_v42  ;;  %v5609_v52 = vpop.f32.mrb[161].mxu1 }
 0x94d   :  { %v5610_v22 = vpop.f32.mrb[162].mxu1 }
 0x94e   :  { %v14971_v29 = vadd.f32 %v11123_v23, %v17957_v50  ;;  %v11124_v15 = vadd.f32 %v14853_v26, %v5610_v22  ;;  %v5612_v61 = vpop.f32.mrb[163].mxu1  ;;  %v17961_v23 = vld [vmem:[#allocation31_spill] sm:$0xff]  ;;  %v6073_v50 = vadd.f32 %v6072_v46, %v14944_v1  ;;  %v14999_v54 = vpop.f32.mrb[204].mxu0 }
 0x950   :  { %v14976_v31 = vadd.f32 %v11124_v15, %v17958_v5  ;;  %v17963_v15 = vld [vmem:[#allocation33_spill] sm:$0xff]  ;;  %v15001_v5 = vpop.f32.mrb[205].mxu0 }
 0x951   :  { %v15004_v58 = vpop.f32.mrb[206].mxu0 }
 0x953   :  { %v5615_v3 = vpop.f32.mrb[164].mxu1 }
 0x954   :  { %v11125_v41 = vadd.f32 %v14853_v26, %v5615_v3  ;;  %v5617_v53 = vpop.f32.mrb[165].mxu1  ;;  %v6074_v3 = vadd.f32 %v6073_v50, %v14950_v11 }
 0x955   :  { %v5618_v49 = vpop.f32.mrb[166].mxu1  ;;  %v15006_v53 = vpop.f32.mrb[207].mxu0 }
 0x956   :  { %v14982_v4 = vadd.f32 %v11125_v41, %v17959_v56  ;;  %v11126_v7 = vadd.f32 %v14853_v26, %v5618_v49  ;;  %v5620_v30 = vpop.f32.mrb[167].mxu1 }
 0x957   :  { %v17965_v30 = vld [vmem:[#allocation30_spill] sm:$0xff] }
 0x958   :  { %v14986_v51 = vadd.f32 %v11126_v7, %v17960_v63  ;;  %v6075_v7 = vadd.f32 %v6074_v3, %v14954_v18  ;;  %v17969_v3 = vld [vmem:[#allocation35_spill] sm:$0xff] }
 0x95a   :  { %v6076_v46 = vadd.f32 %v6075_v7, %v14960_v60 }
 0x95b   :  { %v5623_v45 = vpop.f32.mrb[168].mxu1 }
 0x95c   :  { %v11127_v39 = vadd.f32 %v14853_v26, %v5623_v45  ;;  %v5625_v17 = vpop.f32.mrb[169].mxu1 }
 0x95d   :  { %v5626_v42 = vpop.f32.mrb[170].mxu1 }
 0x95e   :  { %v14992_v52 = vadd.f32 %v11127_v39, %v17961_v23  ;;  %v11128_v22 = vadd.f32 %v14853_v26, %v5626_v42  ;;  %v5628_v55 = vpop.f32.mrb[171].mxu1  ;;  %v17967_v39 = vld [vmem:[#allocation32_spill] sm:$0xff]  ;;  %v6077_v23 = vadd.f32 %v6076_v46, %v14965_v40 }
 0x960   :  { %17962 = vst [vmem:[#allocation6_spill] sm:$0xff] %v14992_v52  ;;  %v14997_v61 = vadd.f32 %v11128_v22, %v17963_v15  ;;  %v6078_v15 = vadd.f32 %v6077_v23, %v14971_v29 }
 0x962   :  { %17964 = vst [vmem:[#allocation7_spill] sm:$0xff] %v14997_v61  ;;  %v6079_v7 = vadd.f32 %v6078_v15, %v14976_v31 }
 0x963   :  { %v5631_v41 = vpop.f32.mrb[172].mxu1 }
 0x964   :  { %v11129_v49 = vadd.f32 %v14853_v26, %v5631_v41  ;;  %v5633_v19 = vpop.f32.mrb[173].mxu1 }
 0x965   :  { %v5634_v56 = vpop.f32.mrb[174].mxu1 }
 0x966   :  { %v15011_v63 = vadd.f32 %v11129_v49, %v17965_v30  ;;  %v11130_v20 = vadd.f32 %v14853_v26, %v5634_v56  ;;  %v5636_v45 = vpop.f32.mrb[175].mxu1 }
 0x968   :  { %17966 = vst [vmem:[#allocation8_spill] sm:$0xff] %v15011_v63  ;;  %v15016_v17 = vadd.f32 %v11130_v20, %v17967_v39  ;;  %v6080_v20 = vadd.f32 %v6079_v7, %v14982_v4 }
 0x96a   :  { %17968 = vst [vmem:[#allocation9_spill] sm:$0xff] %v15016_v17 }
 0x96b   :  { %v5639_v42 = vpop.f32.mrb[176].mxu1 }
 0x96c   :  { %v11131_v22 = vadd.f32 %v14853_v26, %v5639_v42  ;;  %v5641_v55 = vpop.f32.mrb[177].mxu1  ;;  %v17970_v42 = vld [vmem:[#allocation34_spill] sm:$0xff] }
 0x96d   :  { %v5642_v50 = vpop.f32.mrb[178].mxu1 }
 0x96e   :  { %v15022_v41 = vadd.f32 %v11131_v22, %v17969_v3  ;;  %v11132_v49 = vadd.f32 %v14853_v26, %v5642_v50  ;;  %v5644_v19 = vpop.f32.mrb[179].mxu1  ;;  %v6081_v50 = vadd.f32 %v6080_v20, %v14986_v51 }
 0x970   :  { %v15026_v56 = vadd.f32 %v11132_v49, %v14534_v37  ;;  %v6082_v15 = vadd.f32 %v6081_v50, %v14992_v52 }
 0x973   :  { %v5647_v30 = vpop.f32.mrb[180].mxu1 }
 0x974   :  { %v11133_v45 = vadd.f32 %v14853_v26, %v5647_v30  ;;  %v5649_v46 = vpop.f32.mrb[181].mxu1  ;;  %v6083_v30 = vadd.f32 %v6082_v15, %v14997_v61  ;;  %v17974_v61 = vld [vmem:[#allocation36_spill] sm:$0xff] }
 0x975   :  { %v5650_v39 = vpop.f32.mrb[182].mxu1  ;;  %v17972_v46 = vld [vmem:[#allocation37_spill] sm:$0xff] }
 0x976   :  { %v15032_v23 = vadd.f32 %v11133_v45, %v17970_v42  ;;  %v11134_v22 = vadd.f32 %v14853_v26, %v5650_v39  ;;  %v5652_v55 = vpop.f32.mrb[183].mxu1  ;;  %v6084_v20 = vadd.f32 %v6083_v30, %v15011_v63  ;;  %v17978_v63 = vld [vmem:[#allocation41_spill] sm:$0xff] }
 0x977   :  { %v17973_v55 = vld [vmem:[#allocation39_spill] sm:$0xff] }
 0x978   :  { %17971 = vst [vmem:[#allocation10_spill] sm:$0xff] %v15032_v23  ;;  %v15037_v37 = vadd.f32 %v11134_v22, %v14532_v12  ;;  %v6085_v50 = vadd.f32 %v6084_v20, %v15016_v17 }
 0x97a   :  { %v6086_v15 = vadd.f32 %v6085_v50, %v15022_v41 }
 0x97b   :  { %v5655_v3 = vpop.f32.mrb[184].mxu1 }
 0x97c   :  { %v11135_v49 = vadd.f32 %v14853_v26, %v5655_v3  ;;  %v5657_v19 = vpop.f32.mrb[185].mxu1 }
 0x97d   :  { %v5658_v7 = vpop.f32.mrb[186].mxu1 }
 0x97e   :  { %v15043_v45 = vadd.f32 %v11135_v49, %v17972_v46  ;;  %v11136_v39 = vadd.f32 %v14853_v26, %v5658_v7  ;;  %v5660_v42 = vpop.f32.mrb[187].mxu1 }
 0x97f   :  { %v17976_v42 = vld [vmem:[#allocation38_spill] sm:$0xff] }
 0x980   :  { %v15048_v12 = vadd.f32 %v11136_v39, %v17973_v55  ;;  %v6087_v39 = vadd.f32 %v6086_v15, %v15026_v56 }
 0x982   :  { %v6088_v20 = vadd.f32 %v6087_v39, %v15032_v23  ;;  %v17979_v23 = vld [vmem:[#allocation40_spill] sm:$0xff] }
 0x983   :  { %v5663_v22 = vpop.f32.mrb[188].mxu1 }
 0x984   :  { %v11137_v3 = vadd.f32 %v14853_v26, %v5663_v22  ;;  %v5665_v19 = vpop.f32.mrb[189].mxu1 }
 0x985   :  { %v5666_v52 = vpop.f32.mrb[190].mxu1 }
 0x986   :  { %v15054_v49 = vadd.f32 %v11137_v3, %v17974_v61  ;;  %v11138_v7 = vadd.f32 %v14853_v26, %v5666_v52  ;;  %v5668_v46 = vpop.f32.mrb[191].mxu1  ;;  %v6089_v52 = vadd.f32 %v6088_v20, %v15037_v37 }
 0x988   :  { %17975 = vst [vmem:[#allocation11_spill] sm:$0xff] %v15054_v49  ;;  %v15058_v30 = vadd.f32 %v11138_v7, %v17976_v42  ;;  %v6090_v15 = vadd.f32 %v6089_v52, %v15043_v45 }
 0x98a   :  { %17977 = vst [vmem:[#allocation12_spill] sm:$0xff] %v15058_v30 }
 0x98b   :  { %v5671_v55 = vpop.f32.mrb[192].mxu1 }
 0x98c   :  { %v11139_v22 = vadd.f32 %v14853_v26, %v5671_v55  ;;  %v5673_v19 = vpop.f32.mrb[193].mxu1 }
 0x98d   :  { %v5674_v17 = vpop.f32.mrb[194].mxu1  ;;  %v6091_v19 = vadd.f32 %v6090_v15, %v15048_v12 }
 0x98e   :  { %v15064_v50 = vadd.f32 %v11139_v22, %v17978_v63  ;;  %v11140_v61 = vadd.f32 %v14853_v26, %v5674_v17  ;;  %v5676_v3 = vpop.f32.mrb[195].mxu1 }
 0x98f   :  { %v6092_v20 = vadd.f32 %v6091_v19, %v15054_v49  ;;  %v17985_v49 = vld [vmem:[#allocation42_spill] sm:$0xff] }
 0x990   :  { %v15069_v7 = vadd.f32 %v11140_v61, %v14556_v0 }
 0x991   :  { %v6093_v3 = vadd.f32 %v6092_v20, %v15058_v30 }
 0x993   :  { %v5679_v46 = vpop.f32.mrb[196].mxu1  ;;  %v6094_v15 = vadd.f32 %v6093_v3, %v15064_v50 }
 0x994   :  { %v11141_v42 = vadd.f32 %v14853_v26, %v5679_v46  ;;  %v5681_v39 = vpop.f32.mrb[197].mxu1 }
 0x995   :  { %v5682_v55 = vpop.f32.mrb[198].mxu1 }
 0x996   :  { %v15075_v63 = vadd.f32 %v11141_v42, %v17979_v23  ;;  %v11142_v17 = vadd.f32 %v14853_v26, %v5682_v55  ;;  %v5684_v22 = vpop.f32.mrb[199].mxu1 }
 0x997   :  { %v17983_v22 = vld [vmem:[#allocation44_spill] sm:$0xff] }
 0x998   :  { %17980 = vst [vmem:[#allocation13_spill] sm:$0xff] %v15075_v63  ;;  %v15080_v0 = vadd.f32 %v11142_v17, %v14554_v36  ;;  %v6095_v36 = vadd.f32 %v6094_v15, %v15069_v7 }
 0x99a   :  { %17981 = vst [vmem:[#allocation15_spill] sm:$0xff] %v15080_v0  ;;  %v6096_v20 = vadd.f32 %v6095_v36, %v15075_v63 }
 0x99b   :  { %v5687_v61 = vpop.f32.mrb[200].mxu1 }
 0x99c   :  { %v11143_v52 = vadd.f32 %v14853_v26, %v5687_v61  ;;  %v5689_v46 = vpop.f32.mrb[201].mxu1 }
 0x99d   :  { %v5690_v39 = vpop.f32.mrb[202].mxu1 }
 0x99e   :  { %v15086_v23 = vadd.f32 %v11143_v52, %v14561_v2  ;;  %v11144_v42 = vadd.f32 %v14853_v26, %v5690_v39  ;;  %v5692_v55 = vpop.f32.mrb[203].mxu1  ;;  %v6097_v39 = vadd.f32 %v6096_v20, %v15080_v0 }
 0x99f   :  { %v17987_v55 = vld [vmem:[#allocation43_spill] sm:$0xff] }
 0x9a0   :  { %17982 = vst [vmem:[#allocation17_spill] sm:$0xff] %v15086_v23  ;;  %v15090_v19 = vadd.f32 %v11144_v42, %v17983_v22  ;;  %v6098_v15 = vadd.f32 %v6097_v39, %v15086_v23  ;;  %v18001_v23 = vld [vmem:[#allocation50_spill] sm:$0xff] }
 0x9a2   :  { %17984 = vst [vmem:[#allocation14_spill] sm:$0xff] %v15090_v19 }
 0x9a3   :  { %v5695_v17 = vpop.f32.mrb[204].mxu1 }
 0x9a4   :  { %v11145_v61 = vadd.f32 %v14853_v26, %v5695_v17  ;;  %v5697_v46 = vpop.f32.mrb[205].mxu1 }
 0x9a5   :  { %v5698_v30 = vpop.f32.mrb[206].mxu1  ;;  %v6099_v46 = vadd.f32 %v6098_v15, %v15090_v19 }
 0x9a6   :  { %v15096_v3 = vadd.f32 %v11145_v61, %v17985_v49  ;;  %v11146_v2 = vadd.f32 %v14853_v26, %v5698_v30  ;;  %v5700_v52 = vpop.f32.mrb[207].mxu1 }
 0x9a8   :  { %17986 = vst [vmem:[#allocation16_spill] sm:$0xff] %v15096_v3  ;;  %v15101_v42 = vadd.f32 %v11146_v2, %v17987_v55  ;;  %v6100_v20 = vadd.f32 %v6099_v46, %v15096_v3 }
 0x9aa   :  { %17988 = vst [vmem:[#allocation19_spill] sm:$0xff] %v15101_v42  ;;  %v6101_v39 = vadd.f32 %v6100_v20, %v15101_v42 }
 0x9ab   :  { %v5703_v22 = vpop.f32.mrb[208].mxu1 }
 0x9ac   :  { %v11147_v36 = vadd.f32 %v14853_v26, %v5703_v22  ;;  %v5705_v63 = vpop.f32.mrb[209].mxu1 }
 0x9ad   :  { %v5706_v17 = vpop.f32.mrb[210].mxu1 }
 0x9ae   :  { %v15107_v49 = vadd.f32 %v11147_v36, %v14573_v57  ;;  %v11148_v30 = vadd.f32 %v14853_v26, %v5706_v17  ;;  %v5708_v61 = vpop.f32.mrb[211].mxu1 }
 0x9af   :  { %v17992_v61 = vld [vmem:[#allocation45_spill] sm:$0xff] }
 0x9b0   :  { %17989 = vst [vmem:[#allocation21_spill] sm:$0xff] %v15107_v49  ;;  %v15112_v2 = vadd.f32 %v11148_v30, %v14578_v8  ;;  %v6102_v15 = vadd.f32 %v6101_v39, %v15107_v49  ;;  %v17998_v49 = vld [vmem:[#allocation49_spill] sm:$0xff] }
 0x9b2   :  { %17990 = vst [vmem:[#allocation18_spill] sm:$0xff] %v15112_v2  ;;  %v6103_v8 = vadd.f32 %v6102_v15, %v15112_v2  ;;  %v17997_v2 = vld [vmem:[#allocation47_spill] sm:$0xff] }
 0x9b3   :  { %v5711_v52 = vpop.f32.mrb[212].mxu1 }
 0x9b4   :  { %v11149_v55 = vadd.f32 %v14853_v26, %v5711_v52  ;;  %v5713_v63 = vpop.f32.mrb[213].mxu1 }
 0x9b5   :  { %v5714_v22 = vpop.f32.mrb[214].mxu1 }
 0x9b6   :  { %v15118_v57 = vadd.f32 %v11149_v55, %v14571_v48  ;;  %v11150_v36 = vadd.f32 %v14853_v26, %v5714_v22  ;;  %v5716_v17 = vpop.f32.mrb[215].mxu1 }
 0x9b8   :  { %17991 = vst [vmem:[#allocation20_spill] sm:$0xff] %v15118_v57  ;;  %v15122_v46 = vadd.f32 %v11150_v36, %v17992_v61  ;;  %v6104_v20 = vadd.f32 %v6103_v8, %v15118_v57  ;;  %v17996_v57 = vld [vmem:[#allocation46_spill] sm:$0xff] }
 0x9ba   :  { %17993 = vst [vmem:[#allocation23_spill] sm:$0xff] %v15122_v46  ;;  %v6105_v22 = vadd.f32 %v6104_v20, %v15122_v46 }
 0x9bb   :  { %v5719_v30 = vpop.f32.mrb[216].mxu1 }
 0x9bc   :  { %v11151_v52 = vadd.f32 %v14853_v26, %v5719_v30  ;;  %v5721_v63 = vpop.f32.mrb[217].mxu1 }
 0x9bd   :  { %v5722_v42 = vpop.f32.mrb[218].mxu1 }
 0x9be   :  { %v15128_v39 = vadd.f32 %v11151_v52, %v14583_v33  ;;  %v11152_v48 = vadd.f32 %v14853_v26, %v5722_v42  ;;  %v5724_v55 = vpop.f32.mrb[219].mxu1 }
 0x9c0   :  { %17994 = vst [vmem:[#allocation25_spill] sm:$0xff] %v15128_v39  ;;  %v15133_v36 = vadd.f32 %v11152_v48, %v14587_v13  ;;  %v6106_v15 = vadd.f32 %v6105_v22, %v15128_v39 }
 0x9c2   :  { %17995 = vst [vmem:[#allocation22_spill] sm:$0xff] %v15133_v36  ;;  %v6107_v63 = vadd.f32 %v6106_v15, %v15133_v36  ;;  %v17999_v36 = vld [vmem:[#allocation51_spill] sm:$0xff] }
 0x9c3   :  { %v5727_v17 = vpop.f32.mrb[220].mxu1 }
 0x9c4   :  { %v11153_v61 = vadd.f32 %v14853_v26, %v5727_v17  ;;  %v5729_v8 = vpop.f32.mrb[221].mxu1 }
 0x9c5   :  { %v5730_v30 = vpop.f32.mrb[222].mxu1 }
 0x9c6   :  { %v6017_v33 = vadd.f32 %v11153_v61, %v17996_v57  ;;  %v11154_v52 = vadd.f32 %v14853_v26, %v5730_v30  ;;  %v5732_v42 = vpop.f32.mrb[223].mxu1 }
 0x9c8   :  { %v6108_v55 = vadd.f32 %v6107_v63, %v6017_v33  ;;  %v6020_v20 = vadd.f32 %v11154_v52, %v17997_v2  ;;  %v18000_v52 = vld [vmem:[#allocation48_spill] sm:$0xff] }
 0x9ca   :  { %v6109_v46 = vadd.f32 %v6108_v55, %v6020_v20 }
 0x9cb   :  { %v5735_v13 = vpop.f32.mrb[224].mxu1 }
 0x9cc   :  { %v11155_v48 = vadd.f32 %v14853_v26, %v5735_v13  ;;  %v5737_v22 = vpop.f32.mrb[225].mxu1 }
 0x9cd   :  { %v5738_v39 = vpop.f32.mrb[226].mxu1 }
 0x9ce   :  { %v6025_v17 = vadd.f32 %v11155_v48, %v17998_v49  ;;  %v11156_v8 = vadd.f32 %v14853_v26, %v5738_v39  ;;  %v5740_v3 = vpop.f32.mrb[227].mxu1 }
 0x9d0   :  { %v6110_v15 = vadd.f32 %v6109_v46, %v6025_v17  ;;  %v6028_v57 = vadd.f32 %v11156_v8, %v17999_v36 }
 0x9d2   :  { %v6111_v61 = vadd.f32 %v6110_v15, %v6028_v57 }
 0x9d3   :  { %v5743_v30 = vpop.f32.mrb[228].mxu1 }
 0x9d4   :  { %v11157_v63 = vadd.f32 %v14853_v26, %v5743_v30  ;;  %v5745_v42 = vpop.f32.mrb[229].mxu1 }
 0x9d5   :  { %v5746_v2 = vpop.f32.mrb[230].mxu1 }
 0x9d6   :  { %v6033_v55 = vadd.f32 %v11157_v63, %v18000_v52  ;;  %v11158_v13 = vadd.f32 %v14853_v26, %v5746_v2  ;;  %v5748_v22 = vpop.f32.mrb[231].mxu1 }
 0x9d8   :  { %v6112_v19 = vadd.f32 %v6111_v61, %v6033_v55  ;;  %v6036_v49 = vadd.f32 %v11158_v13, %v18001_v23 }
 0x9da   :  { %v6113_v48 = vadd.f32 %v6112_v19, %v6036_v49 }
 0x9db   :  { %v5751_v39 = vpop.f32.mrb[232].mxu1 }
 0x9dc   :  { %v11159_v3 = vadd.f32 %v14853_v26, %v5751_v39  ;;  %v5753_v46 = vpop.f32.mrb[233].mxu1 }
 0x9dd   :  { %v5754_v36 = vpop.f32.mrb[234].mxu1 }
 0x9de   :  { %v11160_v8 = vadd.f32 %v14853_v26, %v5754_v36  ;;  %v6041_v15 = vadd.f32 %v11159_v3, %v15001_v5  ;;  %v5756_v30 = vpop.f32.mrb[235].mxu1 }
 0x9e0   :  { %v6114_v42 = vadd.f32 %v6113_v48, %v6041_v15  ;;  %v6044_v63 = vadd.f32 %v11160_v8, %v15006_v53 }
 0x9e2   :  { %v6115_v52 = vadd.f32 %v6114_v42, %v6044_v63 }
 0x9e3   :  { %v5759_v2 = vpop.f32.mrb[236].mxu1 }
 0x9e4   :  { %v11161_v61 = vadd.f32 %v14853_v26, %v5759_v2  ;;  %v5761_v22 = vpop.f32.mrb[237].mxu1 }
 0x9e5   :  { %v5762_v23 = vpop.f32.mrb[238].mxu1 }
 0x9e6   :  { %v6049_v19 = vadd.f32 %v11161_v61, %v14999_v54  ;;  %v11162_v13 = vadd.f32 %v14853_v26, %v5762_v23  ;;  %v5764_v39 = vpop.f32.mrb[239].mxu1 }
 0x9e8   :  { %v6116_v46 = vadd.f32 %v6115_v52, %v6049_v19  ;;  %v6052_v36 = vadd.f32 %v11162_v13, %v15004_v58 }
 0x9ea   :  { %v6117_v0 = vadd.f32 %v6116_v46, %v6052_v36 }
 0x9ec   :  { %v6118_v5 = vrot.slane %v6117_v0, 4 }
 0x9ee   :  { %v6119_v3 = vadd.f32 %v6118_v5, %v6117_v0 }
 0x9f0   :  { %v6120_v48 = vrot.slane %v6119_v3, 2 }
 0x9f2   :  { %v6121_v30 = vadd.f32 %v6120_v48, %v6119_v3 }
 0x9f4   :  { %v6122_v53 = vrot.slane %v6121_v30, 1 }
 0x9f6   :  { %v6123_v8 = vadd.f32 %v6122_v53, %v6121_v30 }
 0x9f8   :  { %v15157_v42 = vmul.f32 0.001953125, %v6123_v8 }
 0x9fa   :  { %v15160_v2 = vsub.f32 %v6017_v33, %v15157_v42  ;;  %v15163_v54 = vsub.f32 %v6020_v20, %v15157_v42  ;;  %v15166_v26 = vsub.f32 %v6025_v17, %v15157_v42  ;;  %v15169_v58 = vsub.f32 %v6028_v57, %v15157_v42 }
 0x9fb   :  { %v15172_v0 = vsub.f32 %v6033_v55, %v15157_v42  ;;  %v15175_v52 = vsub.f32 %v6036_v49, %v15157_v42  ;;  %v15178_v61 = vsub.f32 %v6041_v15, %v15157_v42  ;;  %v15181_v33 = vsub.f32 %v6044_v63, %v15157_v42 }
 0x9fc   :  { %v15184_v20 = vsub.f32 %v6049_v19, %v15157_v42  ;;  %v15187_v17 = vsub.f32 %v6052_v36, %v15157_v42  ;;  %v15191_v57 = vsub.f32 %v14857_v6, %v15157_v42  ;;  %v15195_v55 = vsub.f32 %v14861_v9, %v15157_v42 }
 0x9fd   :  { %18002 = vst [vmem:[#allocation24_spill] sm:$0xff] %v15175_v52  ;;  %18003 = vst [vmem:[#allocation27_spill] sm:$0xff] %v15178_v61  ;;  %v15199_v49 = vsub.f32 %v14866_v43, %v15157_v42  ;;  %v15207_v22 = vsub.f32 %v14870_v28, %v15157_v42  ;;  %v15211_v6 = vsub.f32 %v14875_v21, %v15157_v42 }
 0x9fe   :  { %18004 = vst [vmem:[#allocation29_spill] sm:$0xff] %v15181_v33  ;;  %18005 = vst [vmem:[#allocation26_spill] sm:$0xff] %v15184_v20  ;;  %v6190_v15 = vmul.f32 %v15191_v57, %v15191_v57  ;;  %v6191_v63 = vmul.f32 %v15195_v55, %v15195_v55  ;;  %v15217_v43 = vsub.f32 %v14879_v24, %v15157_v42 }
 0x9ff   :  { %18006 = vst [vmem:[#allocation28_spill] sm:$0xff] %v15191_v57  ;;  %18007 = vst [vmem:[#allocation31_spill] sm:$0xff] %v15195_v55  ;;  %v6192_v9 = vmul.f32 %v15199_v49, %v15199_v49  ;;  %v6193_v19 = vmul.f32 %v15207_v22, %v15207_v22  ;;  %v15223_v28 = vsub.f32 %v14884_v27, %v15157_v42  ;;  %v18031_v57 = vld [vmem:[#allocation21_spill] sm:$0xff] }
 0xa00   :  { %18008 = vst [vmem:[#allocation33_spill] sm:$0xff] %v15199_v49  ;;  %18009 = vst [vmem:[#allocation30_spill] sm:$0xff] %v15207_v22  ;;  %v6254_v23 = vadd.f32 %v6191_v63, %v6190_v15  ;;  %v6194_v21 = vmul.f32 %v15211_v6, %v15211_v6  ;;  %v15229_v46 = vsub.f32 %v14888_v38, %v15157_v42  ;;  %v18027_v49 = vld [vmem:[#allocation16_spill] sm:$0xff] }
 0xa01   :  { %18010 = vst [vmem:[#allocation32_spill] sm:$0xff] %v15211_v6  ;;  %18011 = vst [vmem:[#allocation35_spill] sm:$0xff] %v15217_v43  ;;  %v6195_v24 = vmul.f32 %v15217_v43, %v15217_v43  ;;  %v15235_v5 = vsub.f32 %v14893_v62, %v15157_v42  ;;  %v6196_v27 = vmul.f32 %v15223_v28, %v15223_v28  ;;  %v18023_v6 = vld [vmem:[#allocation17_spill] sm:$0xff] }
 0xa02   :  { %v6255_v13 = vadd.f32 %v6254_v23, %v6192_v9  ;;  %v15241_v48 = vsub.f32 %v14897_v35, %v15157_v42  ;;  %v6197_v38 = vmul.f32 %v15229_v46, %v15229_v46  ;;  %v15247_v53 = vsub.f32 %v14901_v59, %v15157_v42 }
 0xa03   :  { %v6198_v62 = vmul.f32 %v15235_v5, %v15235_v5  ;;  %v15253_v15 = vsub.f32 %v14905_v32, %v15157_v42  ;;  %v15259_v9 = vsub.f32 %v14909_v34, %v15157_v42  ;;  %v15474_v22 = vsub.f32 %v18023_v6, %v15157_v42  ;;  %v12147_v6 = vld [vmem:[%s17757_s15 + $0x30] sm:$0xff]  }
 0xa04   :  { %v6256_v39 = vadd.f32 %v6255_v13, %v6193_v19  ;;  %v6199_v35 = vmul.f32 %v15241_v48, %v15241_v48  ;;  %v6200_v59 = vmul.f32 %v15247_v53, %v15247_v53  ;;  %v15265_v19 = vsub.f32 %v14913_v44, %v15157_v42 }
 0xa05   :  { %v6201_v32 = vmul.f32 %v15253_v15, %v15253_v15  ;;  %v6202_v34 = vmul.f32 %v15259_v9, %v15259_v9  ;;  %18024 = vst [vmem:[#allocation37_spill] sm:$0xff] %v15474_v22  ;;  %v15490_v55 = vsub.f32 %v18027_v49, %v15157_v42  ;;  %v12148_v49 = vld [vmem:[%s17757_s15 + $0x38] sm:$0xff]  }
 0xa06   :  { %v6257_v36 = vadd.f32 %v6256_v39, %v6194_v21  ;;  %v15271_v21 = vsub.f32 %v14917_v25, %v15157_v42  ;;  %v6203_v44 = vmul.f32 %v15265_v19, %v15265_v19 }
 0xa07   :  { %18028 = vst [vmem:[#allocation36_spill] sm:$0xff] %v15490_v55 }
 0xa08   :  { %v6258_v3 = vadd.f32 %v6257_v36, %v6195_v24  ;;  %v15277_v24 = vsub.f32 %v14921_v10, %v15157_v42  ;;  %v6204_v25 = vmul.f32 %v15271_v21, %v15271_v21 }
 0xa0a   :  { %v6259_v30 = vadd.f32 %v6258_v3, %v6196_v27  ;;  %v15283_v27 = vsub.f32 %v14928_v14, %v15157_v42  ;;  %v6205_v10 = vmul.f32 %v15277_v24, %v15277_v24 }
 0xa0c   :  { %v6260_v8 = vadd.f32 %v6259_v30, %v6197_v38  ;;  %v15289_v38 = vsub.f32 %v14933_v47, %v15157_v42  ;;  %v6206_v14 = vmul.f32 %v15283_v27, %v15283_v27 }
 0xa0e   :  { %v6261_v63 = vadd.f32 %v6260_v8, %v6198_v62  ;;  %v15295_v62 = vsub.f32 %v14939_v16, %v15157_v42  ;;  %v6207_v47 = vmul.f32 %v15289_v38, %v15289_v38 }
 0xa10   :  { %v6262_v23 = vadd.f32 %v6261_v63, %v6199_v35  ;;  %v15301_v35 = vsub.f32 %v14944_v1, %v15157_v42  ;;  %v6208_v16 = vmul.f32 %v15295_v62, %v15295_v62 }
 0xa12   :  { %v6263_v13 = vadd.f32 %v6262_v23, %v6200_v59  ;;  %v15307_v59 = vsub.f32 %v14950_v11, %v15157_v42  ;;  %v6209_v1 = vmul.f32 %v15301_v35, %v15301_v35 }
 0xa14   :  { %v6264_v39 = vadd.f32 %v6263_v13, %v6201_v32  ;;  %v15313_v32 = vsub.f32 %v14954_v18, %v15157_v42  ;;  %v6210_v11 = vmul.f32 %v15307_v59, %v15307_v59 }
 0xa16   :  { %v6265_v36 = vadd.f32 %v6264_v39, %v6202_v34  ;;  %v15319_v34 = vsub.f32 %v14960_v60, %v15157_v42  ;;  %v6211_v18 = vmul.f32 %v15313_v32, %v15313_v32 }
 0xa18   :  { %v6266_v3 = vadd.f32 %v6265_v36, %v6203_v44  ;;  %v15325_v44 = vsub.f32 %v14965_v40, %v15157_v42  ;;  %v6212_v60 = vmul.f32 %v15319_v34, %v15319_v34 }
 0xa1a   :  { %v6267_v30 = vadd.f32 %v6266_v3, %v6204_v25  ;;  %v15331_v25 = vsub.f32 %v14971_v29, %v15157_v42  ;;  %v6213_v40 = vmul.f32 %v15325_v44, %v15325_v44 }
 0xa1c   :  { %v6268_v8 = vadd.f32 %v6267_v30, %v6205_v10  ;;  %v15337_v10 = vsub.f32 %v14976_v31, %v15157_v42  ;;  %v6214_v29 = vmul.f32 %v15331_v25, %v15331_v25 }
 0xa1e   :  { %v6269_v63 = vadd.f32 %v6268_v8, %v6206_v14  ;;  %v15343_v14 = vsub.f32 %v14982_v4, %v15157_v42  ;;  %v6215_v31 = vmul.f32 %v15337_v10, %v15337_v10 }
 0xa20   :  { %v6270_v23 = vadd.f32 %v6269_v63, %v6207_v47  ;;  %v15349_v47 = vsub.f32 %v14986_v51, %v15157_v42  ;;  %v6216_v4 = vmul.f32 %v15343_v14, %v15343_v14 }
 0xa22   :  { %v6271_v13 = vadd.f32 %v6270_v23, %v6208_v16  ;;  %v18012_v16 = vld [vmem:[#allocation6_spill] sm:$0xff]  ;;  %v6217_v51 = vmul.f32 %v15349_v47, %v15349_v47 }
 0xa23   :  { %v15355_v23 = vsub.f32 %v18012_v16, %v15157_v42 }
 0xa24   :  { %v6272_v39 = vadd.f32 %v6271_v13, %v6209_v1  ;;  %v18013_v13 = vld [vmem:[#allocation7_spill] sm:$0xff] }
 0xa26   :  { %v6273_v36 = vadd.f32 %v6272_v39, %v6210_v11  ;;  %v15361_v11 = vsub.f32 %v18013_v13, %v15157_v42 }
 0xa28   :  { %v6274_v3 = vadd.f32 %v6273_v36, %v6211_v18  ;;  %v18014_v18 = vld [vmem:[#allocation8_spill] sm:$0xff] }
 0xa29   :  { %v15367_v36 = vsub.f32 %v18014_v18, %v15157_v42 }
 0xa2a   :  { %v6275_v30 = vadd.f32 %v6274_v3, %v6212_v60  ;;  %v6218_v60 = vmul.f32 %v15355_v23, %v15355_v23 }
 0xa2c   :  { %v6276_v8 = vadd.f32 %v6275_v30, %v6213_v40  ;;  %v18015_v40 = vld [vmem:[#allocation9_spill] sm:$0xff] }
 0xa2d   :  { %v15373_v30 = vsub.f32 %v18015_v40, %v15157_v42 }
 0xa2e   :  { %v6277_v63 = vadd.f32 %v6276_v8, %v6214_v29  ;;  %v6219_v29 = vmul.f32 %v15361_v11, %v15361_v11 }
 0xa30   :  { %v6278_v1 = vadd.f32 %v6277_v63, %v6215_v31  ;;  %v15379_v31 = vsub.f32 %v15022_v41, %v15157_v42  ;;  %v6220_v63 = vmul.f32 %v15367_v36, %v15367_v36 }
 0xa32   :  { %v6279_v39 = vadd.f32 %v6278_v1, %v6216_v4  ;;  %v15385_v4 = vsub.f32 %v15026_v56, %v15157_v42  ;;  %v6221_v1 = vmul.f32 %v15373_v30, %v15373_v30  ;;  %v6222_v18 = vmul.f32 %v15379_v31, %v15379_v31 }
 0xa33   :  { %v15401_v56 = vsub.f32 %v15037_v37, %v15157_v42  ;;  %v15417_v37 = vsub.f32 %v15048_v12, %v15157_v42  ;;  %v18019_v12 = vld [vmem:[#allocation12_spill] sm:$0xff] }
 0xa34   :  { %v6280_v3 = vadd.f32 %v6279_v39, %v6217_v51  ;;  %v12141_v51 = vld [vmem:[%s17757_s15] sm:$0xff]   ;;  %v6223_v40 = vmul.f32 %v15385_v4, %v15385_v4 }
 0xa35   :  { %v18016_v39 = vld [vmem:[#allocation10_spill] sm:$0xff]  ;;  %8382 = vmatpush1.bf16.msra.mxu0 %v12141_v51 }
 0xa36   :  { %v6281_v8 = vadd.f32 %v6280_v3, %v6218_v60  ;;  %v15394_v41 = vsub.f32 %v18016_v39, %v15157_v42  ;;  %v18017_v3 = vmov 0   ;;  %v18018_v39 = vld [vmem:[#allocation11_spill] sm:$0xff] }
 0xa37   :  { %8383 = vmatprep.subr.bf16.mxu0 %v18017_v3 }
 0xa38   :  { %v6282_v16 = vadd.f32 %v6281_v8, %v6219_v29  ;;  %v12142_v8 = vld [vmem:[%s17757_s15 + $0x8] sm:$0xff]  }
 0xa39   :  { %8384 = vmatpush1.bf16.msra.mxu0 %v12142_v8  ;;  %v6227_v8 = vmul.f32 %v15417_v37, %v15417_v37 }
 0xa3a   :  { %v6283_v13 = vadd.f32 %v6282_v16, %v6220_v63  ;;  %v15410_v63 = vsub.f32 %v15043_v45, %v15157_v42  ;;  %v6224_v16 = vmul.f32 %v15394_v41, %v15394_v41  ;;  %8385 = vmatprep.subr.bf16.mxu0 %v18017_v3  ;;  %v12143_v45 = vld [vmem:[%s17757_s15 + $0x10] sm:$0xff]  }
 0xa3c   :  { %v6284_v60 = vadd.f32 %v6283_v13, %v6221_v1  ;;  %v6225_v13 = vmul.f32 %v15401_v56, %v15401_v56 }
 0xa3d   :  { %8386 = vmatpush1.bf16.msra.mxu0 %v12143_v45  ;;  %v15449_v45 = vsub.f32 %v15069_v7, %v15157_v42  ;;  %v18021_v7 = vld [vmem:[#allocation15_spill] sm:$0xff] }
 0xa3e   :  { %v6285_v29 = vadd.f32 %v6284_v60, %v6222_v18  ;;  %v15426_v18 = vsub.f32 %v18018_v39, %v15157_v42  ;;  %v6226_v60 = vmul.f32 %v15410_v63, %v15410_v63  ;;  %8387 = vmatprep.subr.bf16.mxu0 %v18017_v3  ;;  %v15442_v39 = vsub.f32 %v15064_v50, %v15157_v42  ;;  %v12145_v50 = vld [vmem:[%s17757_s15 + $0x20] sm:$0xff]  }
 0xa40   :  { %v6286_v1 = vadd.f32 %v6285_v29, %v6223_v40  ;;  %v15433_v29 = vsub.f32 %v18019_v12, %v15157_v42  ;;  %v18020_v12 = vld [vmem:[#allocation13_spill] sm:$0xff] }
 0xa41   :  { %v15458_v43 = vsub.f32 %v18020_v12, %v15157_v42  ;;  %v12146_v12 = vld [vmem:[%s17757_s15 + $0x28] sm:$0xff]  }
 0xa42   :  { %v6287_v51 = vadd.f32 %v6286_v1, %v6224_v16  ;;  %v12144_v1 = vld [vmem:[%s17757_s15 + $0x18] sm:$0xff]  }
 0xa43   :  { %8388 = vmatpush1.bf16.msra.mxu0 %v12144_v1  ;;  %v15465_v1 = vsub.f32 %v18021_v7, %v15157_v42 }
 0xa44   :  { %v6288_v40 = vadd.f32 %v6287_v51, %v6225_v13  ;;  %v6228_v13 = vmul.f32 %v15426_v18, %v15426_v18  ;;  %8389 = vmatprep.subr.bf16.mxu0 %v18017_v3 }
 0xa45   :  { %18022 = vst [vmem:[#allocation34_spill] sm:$0xff] %v15465_v1 }
 0xa46   :  { %v6289_v16 = vadd.f32 %v6288_v40, %v6226_v60  ;;  %v6229_v60 = vmul.f32 %v15433_v29, %v15433_v29 }
 0xa47   :  { %8390 = vmatpush1.bf16.msra.mxu0 %v12145_v50  ;;  %v18025_v50 = vld [vmem:[#allocation14_spill] sm:$0xff] }
 0xa48   :  { %v6290_v51 = vadd.f32 %v6289_v16, %v6227_v8  ;;  %v6230_v8 = vmul.f32 %v15442_v39, %v15442_v39  ;;  %8391 = vmatprep.subr.bf16.mxu0 %v18017_v3  ;;  %v15481_v7 = vsub.f32 %v18025_v50, %v15157_v42 }
 0xa4a   :  { %v6291_v40 = vadd.f32 %v6290_v51, %v6228_v13  ;;  %v6231_v13 = vmul.f32 %v15449_v45, %v15449_v45  ;;  %18026 = vst [vmem:[#allocation39_spill] sm:$0xff] %v15481_v7 }
 0xa4b   :  { %8392 = vmatpush1.bf16.msra.mxu0 %v12146_v12  ;;  %v18029_v12 = vld [vmem:[#allocation19_spill] sm:$0xff] }
 0xa4c   :  { %v6292_v16 = vadd.f32 %v6291_v40, %v6229_v60  ;;  %v6232_v60 = vmul.f32 %v15458_v43, %v15458_v43  ;;  %8393 = vmatprep.subr.bf16.mxu0 %v18017_v3  ;;  %v15497_v50 = vsub.f32 %v18029_v12, %v15157_v42 }
 0xa4e   :  { %v6293_v51 = vadd.f32 %v6292_v16, %v6230_v8  ;;  %v6233_v8 = vmul.f32 %v15465_v1, %v15465_v1  ;;  %18030 = vst [vmem:[#allocation38_spill] sm:$0xff] %v15497_v50  ;;  %v15506_v1 = vsub.f32 %v18031_v57, %v15157_v42  ;;  %v12149_v57 = vld [vmem:[%s17757_s15 + $0x40] sm:$0xff]  }
 0xa4f   :  { %8394 = vmatpush1.bf16.msra.mxu0 %v12147_v6  ;;  %v18032_v6 = vld [vmem:[#allocation18_spill] sm:$0xff] }
 0xa50   :  { %v6294_v40 = vadd.f32 %v6293_v51, %v6231_v13  ;;  %v6234_v13 = vmul.f32 %v15474_v22, %v15474_v22  ;;  %8395 = vmatprep.subr.bf16.mxu0 %v18017_v3  ;;  %v15513_v12 = vsub.f32 %v18032_v6, %v15157_v42 }
 0xa52   :  { %v6295_v16 = vadd.f32 %v6294_v40, %v6232_v60  ;;  %v6235_v60 = vmul.f32 %v15481_v7, %v15481_v7  ;;  %v18033_v7 = vld [vmem:[#allocation20_spill] sm:$0xff] }
 0xa53   :  { %8396 = vmatpush1.bf16.msra.mxu0 %v12148_v49  ;;  %v15522_v22 = vsub.f32 %v18033_v7, %v15157_v42  ;;  %v18035_v49 = vld [vmem:[#allocation23_spill] sm:$0xff] }
 0xa54   :  { %v6296_v51 = vadd.f32 %v6295_v16, %v6233_v8  ;;  %v6236_v8 = vmul.f32 %v15490_v55, %v15490_v55  ;;  %8397 = vmatprep.subr.bf16.mxu0 %v18017_v3  ;;  %v15529_v6 = vsub.f32 %v18035_v49, %v15157_v42  ;;  %v12150_v7 = vld [vmem:[%s17757_s15 + $0x48] sm:$0xff]  }
 0xa55   :  { %18034 = vst [vmem:[#allocation41_spill] sm:$0xff] %v15522_v22 }
 0xa56   :  { %v6297_v40 = vadd.f32 %v6296_v51, %v6234_v13  ;;  %v6237_v13 = vmul.f32 %v15497_v50, %v15497_v50  ;;  %v18036_v50 = vld [vmem:[#allocation25_spill] sm:$0xff] }
 0xa57   :  { %8398 = vmatpush1.bf16.msra.mxu0 %v12149_v57  ;;  %v15538_v55 = vsub.f32 %v18036_v50, %v15157_v42  ;;  %v18037_v57 = vld [vmem:[#allocation22_spill] sm:$0xff]  ;;  %v12152_v50 = vld [vmem:[%s17757_s15 + $0x50] sm:$0xff]  }
 0xa58   :  { %v6298_v16 = vadd.f32 %v6297_v40, %v6235_v60  ;;  %v6238_v60 = vmul.f32 %v15506_v1, %v15506_v1  ;;  %8399 = vmatprep.subr.bf16.mxu0 %v18017_v3  ;;  %v15545_v49 = vsub.f32 %v18037_v57, %v15157_v42  ;;  %v6244_v57 = vmul.f32 %v15160_v2, %v15160_v2 }
 0xa5a   :  { %v6299_v51 = vadd.f32 %v6298_v16, %v6236_v8  ;;  %v6239_v8 = vmul.f32 %v15513_v12, %v15513_v12  ;;  %v6243_v42 = vmul.f32 %v15545_v49, %v15545_v49 }
 0xa5b   :  { %8400 = vmatpush1.bf16.msra.mxu0 %v12150_v7 }
 0xa5c   :  { %v6300_v40 = vadd.f32 %v6299_v51, %v6237_v13  ;;  %v6240_v13 = vmul.f32 %v15522_v22, %v15522_v22  ;;  %8401 = vmatprep.subr.bf16.mxu0 %v18017_v3  ;;  %v12151_v22 = vld [vmem:[%s17757_s15 + $0x200] sm:$0xff]  }
 0xa5d   :  { %10963 = vmatprep.subr.bf16.mxu1 %v12151_v22 }
 0xa5e   :  { %v6301_v16 = vadd.f32 %v6300_v40, %v6238_v60  ;;  %v6241_v60 = vmul.f32 %v15529_v6, %v15529_v6  ;;  %10964 = vmatpush3.bf16.msra.mxu1 %v12151_v22 }
 0xa5f   :  { %8402 = vmatpush1.bf16.msra.mxu0 %v12152_v50  ;;  %v12156_v50 = vld [vmem:[%s17757_s15 + $0x60] sm:$0xff]  }
 0xa60   :  { %v6302_v51 = vadd.f32 %v6301_v16, %v6239_v8  ;;  %v6242_v8 = vmul.f32 %v15538_v55, %v15538_v55  ;;  %8403 = vmatprep.subr.bf16.mxu0 %v18017_v3 }
 0xa62   :  { %v6303_v40 = vadd.f32 %v6302_v51, %v6240_v13  ;;  %v12154_v13 = vld [vmem:[%s17757_s15 + $0x58] sm:$0xff]   ;;  %v12153_v51 = vld [vmem:[%s17757_s15 + $0x208] sm:$0xff]  }
 0xa63   :  { %8404 = vmatpush1.bf16.msra.mxu0 %v12154_v13  ;;  %10965 = vmatprep.subr.bf16.mxu1 %v12153_v51 }
 0xa64   :  { %v6304_v16 = vadd.f32 %v6303_v40, %v6241_v60  ;;  %8405 = vmatprep.subr.bf16.mxu0 %v18017_v3  ;;  %v6245_v40 = vmul.f32 %v15163_v54, %v15163_v54  ;;  %10966 = vmatpush3.bf16.msra.mxu1 %v12153_v51  ;;  %v12158_v51 = vld [vmem:[%s17757_s15 + $0x68] sm:$0xff]  }
 0xa66   :  { %v6305_v7 = vadd.f32 %v6304_v16, %v6242_v8  ;;  %v12155_v8 = vld [vmem:[%s17757_s15 + $0x210] sm:$0xff]   ;;  %v6246_v16 = vmul.f32 %v15166_v26, %v15166_v26 }
 0xa67   :  { %8406 = vmatpush1.bf16.msra.mxu0 %v12156_v50  ;;  %10967 = vmatprep.subr.bf16.mxu1 %v12155_v8 }
 0xa68   :  { %v6306_v60 = vadd.f32 %v6305_v7, %v6243_v42  ;;  %8407 = vmatprep.subr.bf16.mxu0 %v18017_v3  ;;  %v6247_v7 = vmul.f32 %v15169_v58, %v15169_v58  ;;  %10968 = vmatpush3.bf16.msra.mxu1 %v12155_v8  ;;  %v12160_v8 = vld [vmem:[%s17757_s15 + $0x70] sm:$0xff]  }
 0xa6a   :  { %v6307_v22 = vadd.f32 %v6306_v60, %v6244_v57  ;;  %v12157_v57 = vld [vmem:[%s17757_s15 + $0x218] sm:$0xff]   ;;  %v6248_v60 = vmul.f32 %v15172_v0, %v15172_v0 }
 0xa6b   :  { %8408 = vmatpush1.bf16.msra.mxu0 %v12158_v51  ;;  %10969 = vmatprep.subr.bf16.mxu1 %v12157_v57 }
 0xa6c   :  { %v6308_v42 = vadd.f32 %v6307_v22, %v6245_v40  ;;  %8409 = vmatprep.subr.bf16.mxu0 %v18017_v3  ;;  %v6249_v22 = vmul.f32 %v15175_v52, %v15175_v52  ;;  %10970 = vmatpush3.bf16.msra.mxu1 %v12157_v57  ;;  %v12162_v57 = vld [vmem:[%s17757_s15 + $0x78] sm:$0xff]  }
 0xa6e   :  { %v6309_v13 = vadd.f32 %v6308_v42, %v6246_v16  ;;  %v12159_v16 = vld [vmem:[%s17757_s15 + $0x220] sm:$0xff]   ;;  %v6250_v42 = vmul.f32 %v15178_v61, %v15178_v61 }
 0xa6f   :  { %8410 = vmatpush1.bf16.msra.mxu0 %v12160_v8  ;;  %10971 = vmatprep.subr.bf16.mxu1 %v12159_v16  ;;  %v6933_v61 = vld [vmem:[#allocation5 + $0x7] sm:$0xff] }
 0xa70   :  { %v6310_v40 = vadd.f32 %v6309_v13, %v6247_v7  ;;  %8411 = vmatprep.subr.bf16.mxu0 %v18017_v3  ;;  %v6251_v13 = vmul.f32 %v15181_v33, %v15181_v33  ;;  %10972 = vmatpush3.bf16.msra.mxu1 %v12159_v16  ;;  %v6934_v33 = vld [vmem:[#allocation5 + $0xf] sm:$0xff] }
 0xa71   :  { %v6997_v16 = vpack.c.bf16 %v6934_v33, %v6933_v61 }
 0xa72   :  { %v6311_v50 = vadd.f32 %v6310_v40, %v6248_v60  ;;  %v12161_v60 = vld [vmem:[%s17757_s15 + $0x228] sm:$0xff]   ;;  %v6252_v40 = vmul.f32 %v15184_v20, %v15184_v20 }
 0xa73   :  { %8412 = vmatpush1.bf16.msra.mxu0 %v12162_v57  ;;  %10973 = vmatprep.subr.bf16.mxu1 %v12161_v60 }
 0xa74   :  { %v6312_v7 = vadd.f32 %v6311_v50, %v6249_v22  ;;  %v12349_v50 = vld [vmem:[#allocation3] sm:$0xff]  ;;  %8670 = vmatprep.subr.bf16.mxu0 %v18017_v3  ;;  %10974 = vmatpush3.bf16.msra.mxu1 %v12161_v60 }
 0xa75   :  { %v15612_v8 = vpack.c.bf16 %v12349_v50, %v12349_v50 }
 0xa76   :  { %v6313_v51 = vadd.f32 %v6312_v7, %v6250_v42  ;;  %v6253_v42 = vmul.f32 %v15187_v17, %v15187_v17 }
 0xa77   :  { %18038 = vst [vmem:[#allocation40_spill] sm:$0xff] %v15612_v8  ;;  %8413 = vmatprep.mubr.bf16.mxu0 %v15612_v8 }
 0xa78   :  { %v6314_v22 = vadd.f32 %v6313_v51, %v6251_v13  ;;  %v12163_v13 = vld [vmem:[%s17757_s15 + $0x230] sm:$0xff]   ;;  %8414 = vmatmul.mubr.bf16.vlgmr.msra.gmra.mrb[208].mxu0 %v6997_v16  ;;  %v12164_v51 = vld [vmem:[%s17757_s15 + $0x238] sm:$0xff]   ;;  %v12165_v16 = vld [vmem:[%s17757_s15 + $0x80] sm:$0xff]  }
 0xa79   :  { %10975 = vmatprep.subr.bf16.mxu1 %v12163_v13  ;;  %8671 = vmatpush1.bf16.msra.mxu0 %v12165_v16 }
 0xa7a   :  { %v6315_v7 = vadd.f32 %v6314_v22, %v6252_v40  ;;  %10976 = vmatpush3.bf16.msra.mxu1 %v12163_v13  ;;  %8672 = vmatprep.subr.bf16.mxu0 %v18017_v3 }
 0xa7b   :  { %10977 = vmatprep.subr.bf16.mxu1 %v12164_v51 }
 0xa7c   :  { %v6316_v57 = vadd.f32 %v6315_v7, %v6253_v42  ;;  %v15632_v42 = vld [vmem:[%s17758_s13] ss:$0 sm:$0xff] }
 0xa7d   :  { %18040 = vst [vmem:[#allocation42_spill] sm:$0xff] %v15632_v42 }
 0xa7e   :  { %v6317_v61 = vrot.slane %v6316_v57, 4  ;;  %10978 = vmatpush3.bf16.msra.mxu1 %v12164_v51 }
 0xa80   :  { %v6318_v33 = vadd.f32 %v6317_v61, %v6316_v57 }
 0xa82   :  { %v6319_v50 = vrot.slane %v6318_v33, 2 }
 0xa84   :  { %v6320_v60 = vadd.f32 %v6319_v50, %v6318_v33 }
 0xa86   :  { %v6321_v40 = vrot.slane %v6320_v60, 1 }
 0xa88   :  { %v6322_v22 = vadd.f32 %v6321_v40, %v6320_v60 }
 0xa8a   :  { %v6323_v8 = vmul.f32 0.001953125, %v6322_v22 }
 0xa8c   :  { %v6324_v20 = vadd.f32 0.8, %v6323_v8 }
 0xa8e   :  { %12217 = vrsqrt.f32 %v6324_v20  ;;  %v15640_v20 = vld [vmem:[%s17759_s14] ss:$0 sm:$0xff] }
 0xa8f   :  { %18041 = vst [vmem:[#allocation43_spill] sm:$0xff] %v15640_v20 }
 0xa98   :  { %v15627_v52 = vpop.eup %12217 }
 0xa99   :  { %18039 = vst [vmem:[#allocation44_spill] sm:$0xff] %v15627_v52  ;;  %v6389_v7 = vmul.f32 %v15627_v52, %v15187_v17  ;;  %v15645_v13 = vmul.f32 %v15627_v52, %v15223_v28  ;;  %v15649_v51 = vmul.f32 %v15627_v52, %v15229_v46  ;;  %v15654_v17 = vmul.f32 %v15627_v52, %v15235_v5 }
 0xa9a   :  { %v15658_v61 = vmul.f32 %v15627_v52, %v15241_v48  ;;  %v15662_v33 = vmul.f32 %v15627_v52, %v15247_v53  ;;  %v15666_v28 = vmul.f32 %v15627_v52, %v15253_v15  ;;  %v15670_v46 = vmul.f32 %v15627_v52, %v15259_v9 }
 0xa9b   :  { %v6460_v8 = vmul.f32 %v15632_v42, %v6389_v7  ;;  %v15674_v5 = vmul.f32 %v15627_v52, %v15265_v19  ;;  %v15678_v48 = vmul.f32 %v15627_v52, %v15271_v21  ;;  %v6341_v53 = vmul.f32 %v15627_v52, %v15277_v24 }
 0xa9c   :  { %v6342_v15 = vmul.f32 %v15627_v52, %v15283_v27  ;;  %v6343_v9 = vmul.f32 %v15627_v52, %v15289_v38  ;;  %v6344_v60 = vmul.f32 %v15627_v52, %v15295_v62  ;;  %v6345_v19 = vmul.f32 %v15627_v52, %v15301_v35 }
 0xa9d   :  { %v6531_v57 = vadd.f32 %v15640_v20, %v6460_v8  ;;  %18042 = vst [vmem:[#allocation45_spill] sm:$0xff] %v15674_v5  ;;  %18043 = vst [vmem:[#allocation46_spill] sm:$0xff] %v15678_v48  ;;  %v6346_v21 = vmul.f32 %v15627_v52, %v15307_v59  ;;  %v6347_v22 = vmul.f32 %v15627_v52, %v15313_v32  ;;  %v18052_v48 = vld [vmem:[#allocation29_spill] sm:$0xff]  ;;  %v18053_v5 = vld [vmem:[#allocation26_spill] sm:$0xff] }
 0xa9e   :  { %v6348_v24 = vmul.f32 %v15627_v52, %v15319_v34  ;;  %v6349_v27 = vmul.f32 %v15627_v52, %v15325_v44  ;;  %v6350_v38 = vmul.f32 %v15627_v52, %v15331_v25  ;;  %v6351_v62 = vmul.f32 %v15627_v52, %v15337_v10 }
 0xa9f   :  { %vm6595_vm1 = vcmp.ge.f32.partialorder %v6531_v57, 0.0  ;;  %v6659_v50 = vmul.f32 0.2, %v6531_v57  ;;  %v6352_v35 = vmul.f32 %v15627_v52, %v15343_v14  ;;  %v6353_v59 = vmul.f32 %v15627_v52, %v15349_v47 }
 0xaa0   :  { %v6354_v32 = vmul.f32 %v15627_v52, %v15355_v23  ;;  %v6355_v34 = vmul.f32 %v15627_v52, %v15361_v11  ;;  %v6356_v44 = vmul.f32 %v15627_v52, %v15367_v36  ;;  %v6357_v25 = vmul.f32 %v15627_v52, %v15373_v30 }
 0xaa1   :  { %v6723_v40 = vsel %vm6595_vm1, %v6531_v57, %v6659_v50  ;;  %v6358_v10 = vmul.f32 %v15627_v52, %v15379_v31  ;;  %v6359_v14 = vmul.f32 %v15627_v52, %v15385_v4  ;;  %v6360_v47 = vmul.f32 %v15627_v52, %v15394_v41  ;;  %v12166_v4 = vld [vmem:[%s17757_s15 + $0x88] sm:$0xff]   ;;  %v18047_v57 = vld [vmem:[#allocation36_spill] sm:$0xff] }
 0xaa2   :  { %6932 = vst [vmem:[#allocation5 + $0x450] sm:$0xff] %v6723_v40  ;;  %v6361_v23 = vmul.f32 %v15627_v52, %v15401_v56  ;;  %v6362_v11 = vmul.f32 %v15627_v52, %v15410_v63  ;;  %v6363_v36 = vmul.f32 %v15627_v52, %v15417_v37  ;;  %v6364_v30 = vmul.f32 %v15627_v52, %v15426_v18  ;;  %v18044_v37 = vld [vmem:[#allocation34_spill] sm:$0xff]  ;;  %v18045_v18 = vld [vmem:[#allocation37_spill] sm:$0xff] }
 0xaa3   :  { %v6365_v31 = vmul.f32 %v15627_v52, %v15433_v29  ;;  %v6366_v41 = vmul.f32 %v15627_v52, %v15442_v39  ;;  %v6367_v56 = vmul.f32 %v15627_v52, %v15449_v45  ;;  %v6368_v63 = vmul.f32 %v15627_v52, %v15458_v43  ;;  %v18046_v29 = vld [vmem:[#allocation39_spill] sm:$0xff]  ;;  %v18048_v40 = vld [vmem:[#allocation38_spill] sm:$0xff]  ;;  %8673 = vmatpush1.bf16.msra.mxu0 %v12166_v4 }
 0xaa4   :  { %v6369_v16 = vmul.f32 %v15627_v52, %v18044_v37  ;;  %v6370_v7 = vmul.f32 %v15627_v52, %v18045_v18  ;;  %v6371_v8 = vmul.f32 %v15627_v52, %v18046_v29  ;;  %v6372_v50 = vmul.f32 %v15627_v52, %v18047_v57  ;;  %v18049_v37 = vld [vmem:[#allocation41_spill] sm:$0xff]  ;;  %8674 = vmatprep.subr.bf16.mxu0 %v18017_v3  ;;  %v18051_v3 = vld [vmem:[#allocation27_spill] sm:$0xff] }
 0xaa5   :  { %v6373_v39 = vmul.f32 %v15627_v52, %v18048_v40  ;;  %v6374_v45 = vmul.f32 %v15627_v52, %v15506_v1  ;;  %v6375_v43 = vmul.f32 %v15627_v52, %v15513_v12  ;;  %v6376_v20 = vmul.f32 %v15627_v52, %v18049_v37  ;;  %v18050_v37 = vld [vmem:[#allocation24_spill] sm:$0xff] }
 0xaa6   :  { %v6377_v18 = vmul.f32 %v15627_v52, %v15529_v6  ;;  %v6378_v29 = vmul.f32 %v15627_v52, %v15538_v55  ;;  %v6379_v4 = vmul.f32 %v15627_v52, %v15545_v49  ;;  %v6380_v1 = vmul.f32 %v15627_v52, %v15160_v2 }
 0xaa7   :  { %v6381_v12 = vmul.f32 %v15627_v52, %v15163_v54  ;;  %v6382_v57 = vmul.f32 %v15627_v52, %v15166_v26  ;;  %v6383_v6 = vmul.f32 %v15627_v52, %v15169_v58  ;;  %v6384_v40 = vmul.f32 %v15627_v52, %v15172_v0 }
 0xaa8   :  { %v6385_v55 = vmul.f32 %v15627_v52, %v18050_v37  ;;  %v6386_v49 = vmul.f32 %v15627_v52, %v18051_v3  ;;  %v6387_v2 = vmul.f32 %v15627_v52, %v18052_v48  ;;  %v6388_v54 = vmul.f32 %v15627_v52, %v18053_v5  ;;  %v18054_v52 = vld [vmem:[#allocation45_spill] sm:$0xff] }
 0xaa9   :  { %v6403_v26 = vmul.f32 %v15632_v42, %v15645_v13  ;;  %v6404_v58 = vmul.f32 %v15632_v42, %v15649_v51  ;;  %v6405_v0 = vmul.f32 %v15632_v42, %v15654_v17  ;;  %v6406_v37 = vmul.f32 %v15632_v42, %v15658_v61  ;;  %v18055_v51 = vld [vmem:[#allocation46_spill] sm:$0xff] }
 0xaaa   :  { %v6407_v3 = vmul.f32 %v15632_v42, %v15662_v33  ;;  %v6408_v48 = vmul.f32 %v15632_v42, %v15666_v28  ;;  %v6409_v5 = vmul.f32 %v15632_v42, %v15670_v46  ;;  %v6410_v13 = vmul.f32 %v15632_v42, %v18054_v52 }
 0xaab   :  { %v6411_v17 = vmul.f32 %v15632_v42, %v18055_v51  ;;  %v6412_v61 = vmul.f32 %v15632_v42, %v6341_v53  ;;  %v6413_v33 = vmul.f32 %v15632_v42, %v6342_v15  ;;  %v6414_v28 = vmul.f32 %v15632_v42, %v6343_v9 }
 0xaac   :  { %v6415_v46 = vmul.f32 %v15632_v42, %v6344_v60  ;;  %v6416_v52 = vmul.f32 %v15632_v42, %v6345_v19  ;;  %v6417_v51 = vmul.f32 %v15632_v42, %v6346_v21  ;;  %v6418_v53 = vmul.f32 %v15632_v42, %v6347_v22 }
 0xaad   :  { %v6419_v15 = vmul.f32 %v15632_v42, %v6348_v24  ;;  %v6420_v9 = vmul.f32 %v15632_v42, %v6349_v27  ;;  %v6421_v60 = vmul.f32 %v15632_v42, %v6350_v38  ;;  %v6422_v19 = vmul.f32 %v15632_v42, %v6351_v62 }
 0xaae   :  { %v6423_v21 = vmul.f32 %v15632_v42, %v6352_v35  ;;  %v6424_v22 = vmul.f32 %v15632_v42, %v6353_v59  ;;  %v6425_v24 = vmul.f32 %v15632_v42, %v6354_v32  ;;  %v6426_v27 = vmul.f32 %v15632_v42, %v6355_v34 }
 0xaaf   :  { %v6427_v38 = vmul.f32 %v15632_v42, %v6356_v44  ;;  %v6428_v62 = vmul.f32 %v15632_v42, %v6357_v25  ;;  %v6429_v35 = vmul.f32 %v15632_v42, %v6358_v10  ;;  %v6430_v59 = vmul.f32 %v15632_v42, %v6359_v14 }
 0xab0   :  { %v6431_v32 = vmul.f32 %v15632_v42, %v6360_v47  ;;  %v6432_v34 = vmul.f32 %v15632_v42, %v6361_v23  ;;  %v6433_v44 = vmul.f32 %v15632_v42, %v6362_v11  ;;  %v6434_v25 = vmul.f32 %v15632_v42, %v6363_v36 }
 0xab1   :  { %v6435_v10 = vmul.f32 %v15632_v42, %v6364_v30  ;;  %v6436_v14 = vmul.f32 %v15632_v42, %v6365_v31  ;;  %v6437_v47 = vmul.f32 %v15632_v42, %v6366_v41  ;;  %v6438_v23 = vmul.f32 %v15632_v42, %v6367_v56  ;;  %v12167_v56 = vld [vmem:[%s17757_s15 + $0x90] sm:$0xff]  }
 0xab2   :  { %v6439_v11 = vmul.f32 %v15632_v42, %v6368_v63  ;;  %v6440_v36 = vmul.f32 %v15632_v42, %v6369_v16  ;;  %v6441_v30 = vmul.f32 %v15632_v42, %v6370_v7  ;;  %v6442_v31 = vmul.f32 %v15632_v42, %v6371_v8  ;;  %8675 = vmatpush1.bf16.msra.mxu0 %v12167_v56 }
 0xab3   :  { %v6443_v41 = vmul.f32 %v15632_v42, %v6372_v50  ;;  %v6444_v63 = vmul.f32 %v15632_v42, %v6373_v39  ;;  %v6445_v16 = vmul.f32 %v15632_v42, %v6374_v45  ;;  %v6446_v7 = vmul.f32 %v15632_v42, %v6375_v43 }
 0xab4   :  { %v6447_v8 = vmul.f32 %v15632_v42, %v6376_v20  ;;  %v6448_v50 = vmul.f32 %v15632_v42, %v6377_v18  ;;  %v6449_v39 = vmul.f32 %v15632_v42, %v6378_v29  ;;  %v6450_v45 = vmul.f32 %v15632_v42, %v6379_v4 }
 0xab5   :  { %v6451_v43 = vmul.f32 %v15632_v42, %v6380_v1  ;;  %v6452_v20 = vmul.f32 %v15632_v42, %v6381_v12  ;;  %v6453_v18 = vmul.f32 %v15632_v42, %v6382_v57  ;;  %v6454_v29 = vmul.f32 %v15632_v42, %v6383_v6 }
 0xab6   :  { %v6455_v4 = vmul.f32 %v15632_v42, %v6384_v40  ;;  %v18056_v1 = vmov 0   ;;  %v6456_v56 = vmul.f32 %v15632_v42, %v6385_v55  ;;  %v6457_v12 = vmul.f32 %v15632_v42, %v6386_v49  ;;  %v18057_v40 = vld [vmem:[#allocation43_spill] sm:$0xff] }
 0xab7   :  { %8676 = vmatprep.subr.bf16.mxu0 %v18056_v1  ;;  %v6458_v57 = vmul.f32 %v15632_v42, %v6387_v2  ;;  %v6459_v6 = vmul.f32 %v15632_v42, %v6388_v54  ;;  %v15851_v1 = vadd.f32 %v18057_v40, %v6403_v26  ;;  %v15854_v55 = vadd.f32 %v18057_v40, %v6404_v58 }
 0xab8   :  { %v15857_v49 = vadd.f32 %v18057_v40, %v6405_v0  ;;  %v15860_v2 = vadd.f32 %v18057_v40, %v6406_v37  ;;  %v15863_v42 = vadd.f32 %v18057_v40, %v6407_v3  ;;  %v15866_v54 = vadd.f32 %v18057_v40, %v6408_v48 }
 0xab9   :  { %18058 = vst [vmem:[#allocation47_spill] sm:$0xff] %v15851_v1  ;;  %v15869_v26 = vadd.f32 %v18057_v40, %v6409_v5  ;;  %v15872_v1 = vadd.f32 %v18057_v40, %v6410_v13  ;;  %v15875_v58 = vadd.f32 %v18057_v40, %v6411_v17  ;;  %v15878_v0 = vadd.f32 %v18057_v40, %v6412_v61 }
 0xaba   :  { %v15881_v37 = vadd.f32 %v18057_v40, %v6413_v33  ;;  %v15884_v3 = vadd.f32 %v18057_v40, %v6414_v28  ;;  %v15887_v48 = vadd.f32 %v18057_v40, %v6415_v46  ;;  %v15890_v5 = vadd.f32 %v18057_v40, %v6416_v52 }
 0xabb   :  { %v15893_v13 = vadd.f32 %v18057_v40, %v6417_v51  ;;  %v15896_v17 = vadd.f32 %v18057_v40, %v6418_v53  ;;  %v15899_v61 = vadd.f32 %v18057_v40, %v6419_v15  ;;  %v15902_v33 = vadd.f32 %v18057_v40, %v6420_v9 }
 0xabc   :  { %v15905_v28 = vadd.f32 %v18057_v40, %v6421_v60  ;;  %v15908_v46 = vadd.f32 %v18057_v40, %v6422_v19  ;;  %v15911_v52 = vadd.f32 %v18057_v40, %v6423_v21  ;;  %v15914_v51 = vadd.f32 %v18057_v40, %v6424_v22 }
 0xabd   :  { %v15917_v53 = vadd.f32 %v18057_v40, %v6425_v24  ;;  %v15920_v15 = vadd.f32 %v18057_v40, %v6426_v27  ;;  %v15923_v9 = vadd.f32 %v18057_v40, %v6427_v38  ;;  %v15926_v60 = vadd.f32 %v18057_v40, %v6428_v62 }
 0xabe   :  { %v15929_v19 = vadd.f32 %v18057_v40, %v6429_v35  ;;  %v15932_v21 = vadd.f32 %v18057_v40, %v6430_v59  ;;  %v15935_v22 = vadd.f32 %v18057_v40, %v6431_v32  ;;  %v15938_v24 = vadd.f32 %v18057_v40, %v6432_v34 }
 0xabf   :  { %v15941_v27 = vadd.f32 %v18057_v40, %v6433_v44  ;;  %v15944_v38 = vadd.f32 %v18057_v40, %v6434_v25  ;;  %v15947_v62 = vadd.f32 %v18057_v40, %v6435_v10  ;;  %v15950_v35 = vadd.f32 %v18057_v40, %v6436_v14 }
 0xac0   :  { %v15953_v59 = vadd.f32 %v18057_v40, %v6437_v47  ;;  %v15956_v32 = vadd.f32 %v18057_v40, %v6438_v23  ;;  %v15959_v34 = vadd.f32 %v18057_v40, %v6439_v11  ;;  %v15962_v44 = vadd.f32 %v18057_v40, %v6440_v36  ;;  %v12168_v23 = vld [vmem:[%s17757_s15 + $0x98] sm:$0xff]  }
 0xac1   :  { %v15965_v25 = vadd.f32 %v18057_v40, %v6441_v30  ;;  %v15968_v10 = vadd.f32 %v18057_v40, %v6442_v31  ;;  %v15971_v14 = vadd.f32 %v18057_v40, %v6443_v41  ;;  %v15974_v47 = vadd.f32 %v18057_v40, %v6444_v63  ;;  %8677 = vmatpush1.bf16.msra.mxu0 %v12168_v23  ;;  %v18077_v23 = vld [vmem:[#allocation28_spill] sm:$0xff] }
 0xac2   :  { %v15980_v11 = vadd.f32 %v18057_v40, %v6445_v16  ;;  %v15983_v36 = vadd.f32 %v18057_v40, %v6446_v7  ;;  %v15986_v30 = vadd.f32 %v18057_v40, %v6447_v8  ;;  %v15989_v31 = vadd.f32 %v18057_v40, %v6448_v50 }
 0xac3   :  { %18059 = vst [vmem:[#allocation49_spill] sm:$0xff] %v15968_v10  ;;  %18060 = vst [vmem:[#allocation51_spill] sm:$0xff] %v15974_v47  ;;  %v15992_v41 = vadd.f32 %v18057_v40, %v6449_v39  ;;  %v15995_v63 = vadd.f32 %v18057_v40, %v6450_v45  ;;  %v15998_v47 = vadd.f32 %v18057_v40, %v6451_v43  ;;  %v18073_v45 = vmov 0  }
 0xac4   :  { %18061 = vst [vmem:[#allocation48_spill] sm:$0xff] %v15980_v11  ;;  %18062 = vst [vmem:[#allocation50_spill] sm:$0xff] %v15983_v36  ;;  %v16001_v16 = vadd.f32 %v18057_v40, %v6452_v20  ;;  %v16004_v7 = vadd.f32 %v18057_v40, %v6453_v18  ;;  %v16007_v8 = vadd.f32 %v18057_v40, %v6454_v29  ;;  %8678 = vmatprep.subr.bf16.mxu0 %v18073_v45  ;;  %v18078_v29 = vld [vmem:[#allocation44_spill] sm:$0xff] }
 0xac5   :  { %18063 = vst [vmem:[#allocation6_spill] sm:$0xff] %v15986_v30  ;;  %18064 = vst [vmem:[#allocation7_spill] sm:$0xff] %v15989_v31  ;;  %v16010_v50 = vadd.f32 %v18057_v40, %v6455_v4  ;;  %v16013_v39 = vadd.f32 %v18057_v40, %v6456_v56  ;;  %v16017_v43 = vadd.f32 %v18057_v40, %v6457_v12  ;;  %v18082_v12 = vld [vmem:[#allocation32_spill] sm:$0xff]  ;;  %vm6539_vm9 = vcmp.ge.f32.partialorder %v15854_v55, 0.0 }
 0xac6   :  { %18065 = vst [vmem:[#allocation8_spill] sm:$0xff] %v15992_v41  ;;  %18066 = vst [vmem:[#allocation9_spill] sm:$0xff] %v15995_v63  ;;  %v16020_v20 = vadd.f32 %v18057_v40, %v6458_v57  ;;  %v16023_v18 = vadd.f32 %v18057_v40, %v6459_v6  ;;  %v18083_v57 = vld [vmem:[#allocation35_spill] sm:$0xff]  ;;  %v18084_v6 = vld [vmem:[#allocation42_spill] sm:$0xff]  ;;  %vm6540_vm10 = vcmp.ge.f32.partialorder %v15857_v49, 0.0  ;;  %vm6541_vm11 = vcmp.ge.f32.partialorder %v15860_v2, 0.0 }
 0xac7   :  { %18067 = vst [vmem:[#allocation10_spill] sm:$0xff] %v15998_v47  ;;  %18068 = vst [vmem:[#allocation11_spill] sm:$0xff] %v16001_v16  ;;  %vm6542_vm12 = vcmp.ge.f32.partialorder %v15863_v42, 0.0  ;;  %vm6543_vm13 = vcmp.ge.f32.partialorder %v15866_v54, 0.0  ;;  %vm6544_vm14 = vcmp.ge.f32.partialorder %v15869_v26, 0.0  ;;  %vm6545_vm15 = vcmp.ge.f32.partialorder %v15872_v1, 0.0 }
 0xac8   :  { %18069 = vst [vmem:[#allocation12_spill] sm:$0xff] %v16004_v7  ;;  %18070 = vst [vmem:[#allocation13_spill] sm:$0xff] %v16007_v8  ;;  %v6326_v8 = vmul.f32 %v18078_v29, %v18077_v23  ;;  %v18079_v7 = vld [vmem:[#allocation31_spill] sm:$0xff]  ;;  %v16076_v31 = vmul.f32 0.2, %v15866_v54  ;;  %vm6546_vm0 = vcmp.ge.f32.partialorder %v15875_v58, 0.0 }
 0xac9   :  { %18071 = vst [vmem:[#allocation15_spill] sm:$0xff] %v16010_v50  ;;  %18072 = vst [vmem:[#allocation17_spill] sm:$0xff] %v16013_v39  ;;  %v6327_v4 = vmul.f32 %v18078_v29, %v18079_v7  ;;  %v18080_v50 = vld [vmem:[#allocation33_spill] sm:$0xff]  ;;  %v18081_v39 = vld [vmem:[#allocation30_spill] sm:$0xff]  ;;  %vm6547_vm1 = vcmp.ge.f32.partialorder %v15878_v0, 0.0 }
 0xaca   :  { %18074 = vst [vmem:[#allocation14_spill] sm:$0xff] %v16017_v43  ;;  %18075 = vst [vmem:[#allocation16_spill] sm:$0xff] %v16020_v20  ;;  %v6328_v56 = vmul.f32 %v18078_v29, %v18080_v50  ;;  %v6329_v16 = vmul.f32 %v18078_v29, %v18081_v39  ;;  %v6330_v43 = vmul.f32 %v18078_v29, %v18082_v12 }
 0xacb   :  { %18076 = vst [vmem:[#allocation19_spill] sm:$0xff] %v16023_v18  ;;  %v6331_v20 = vmul.f32 %v18078_v29, %v18083_v57  ;;  %v6397_v18 = vmul.f32 %v18084_v6, %v6326_v8  ;;  %v6398_v47 = vmul.f32 %v18084_v6, %v6327_v4 }
 0xacc   :  { %v6399_v23 = vmul.f32 %v18084_v6, %v6328_v56  ;;  %v6400_v7 = vmul.f32 %v18084_v6, %v6329_v16  ;;  %v6401_v63 = vmul.f32 %v18084_v6, %v6330_v43  ;;  %v12169_v16 = vld [vmem:[%s17757_s15 + $0xa0] sm:$0xff]  }
 0xacd   :  { %v6402_v50 = vmul.f32 %v18084_v6, %v6331_v20  ;;  %v6468_v39 = vadd.f32 %v18057_v40, %v6397_v18  ;;  %v6469_v41 = vadd.f32 %v18057_v40, %v6398_v47  ;;  %8679 = vmatpush1.bf16.msra.mxu0 %v12169_v16  ;;  %v18085_v47 = vld [vmem:[#allocation47_spill] sm:$0xff]  ;;  %v6603_v6 = vmul.f32 0.2, %v15854_v55 }
 0xace   :  { %v6470_v12 = vadd.f32 %v18057_v40, %v6399_v23  ;;  %v6471_v29 = vadd.f32 %v18057_v40, %v6400_v7  ;;  %v6472_v8 = vadd.f32 %v18057_v40, %v6401_v63  ;;  %vm6538_vm8 = vcmp.ge.f32.partialorder %v18085_v47, 0.0  ;;  %8680 = vmatprep.subr.bf16.mxu0 %v18073_v45 }
 0xacf   :  { %v6473_v4 = vadd.f32 %v18057_v40, %v6402_v50  ;;  %vm6532_vm2 = vcmp.ge.f32.partialorder %v6468_v39, 0.0  ;;  %vm6533_vm3 = vcmp.ge.f32.partialorder %v6469_v41, 0.0  ;;  %v6596_v40 = vmul.f32 0.2, %v6468_v39 }
 0xad0   :  { %vm6534_vm4 = vcmp.ge.f32.partialorder %v6470_v12, 0.0  ;;  %vm6535_vm5 = vcmp.ge.f32.partialorder %v6471_v29, 0.0  ;;  %vm6536_vm6 = vcmp.ge.f32.partialorder %v6472_v8, 0.0  ;;  %v6597_v63 = vmul.f32 0.2, %v6469_v41 }
 0xad1   :  { %vm6537_vm7 = vcmp.ge.f32.partialorder %v6473_v4, 0.0  ;;  %v6598_v43 = vmul.f32 0.2, %v6470_v12  ;;  %v6599_v20 = vmul.f32 0.2, %v6471_v29  ;;  %v16062_v23 = vsel %vm6532_vm2, %v6468_v39, %v6596_v40 }
 0xad2   :  { %v6600_v18 = vmul.f32 0.2, %v6472_v8  ;;  %v6601_v56 = vmul.f32 0.2, %v6473_v4  ;;  %v6602_v57 = vmul.f32 0.2, %v18085_v47  ;;  %v16071_v45 = vsel %vm6533_vm3, %v6469_v41, %v6597_v63 }
 0xad3   :  { %18086 = vst [vmem:[#allocation21_spill] sm:$0xff] %v16062_v23  ;;  %v6604_v7 = vmul.f32 0.2, %v15857_v49  ;;  %v6605_v50 = vmul.f32 0.2, %v15860_v2  ;;  %18087 = vst [vmem:[#allocation18_spill] sm:$0xff] %v16071_v45  ;;  %v16085_v30 = vsel %vm6534_vm4, %v6470_v12, %v6598_v43  ;;  %v16099_v36 = vsel %vm6535_vm5, %v6471_v29, %v6599_v20 }
 0xad4   :  { %v16068_v16 = vmul.f32 0.2, %v15863_v42  ;;  %6869 = vst [vmem:[#allocation5 + $0x28] sm:$0xff] %v16062_v23  ;;  %v16079_v39 = vmul.f32 0.2, %v15869_v26  ;;  %18088 = vst [vmem:[#allocation20_spill] sm:$0xff] %v16085_v30 }
 0xad5   :  { %v16082_v40 = vmul.f32 0.2, %v15872_v1  ;;  %6870 = vst [vmem:[#allocation5 + $0x30] sm:$0xff] %v16071_v45  ;;  %v16090_v41 = vmul.f32 0.2, %v15875_v58  ;;  %18090 = vst [vmem:[#allocation25_spill] sm:$0xff] %v16099_v36 }
 0xad6   :  { %v16093_v63 = vmul.f32 0.2, %v15878_v0  ;;  %v16096_v23 = vmul.f32 0.2, %v15881_v37  ;;  %6871 = vst [vmem:[#allocation5 + $0x48] sm:$0xff] %v16085_v30  ;;  %6872 = vst [vmem:[#allocation5 + $0x50] sm:$0xff] %v16099_v36 }
 0xad7   :  { %v16104_v12 = vmul.f32 0.2, %v15884_v3  ;;  %v16107_v43 = vmul.f32 0.2, %v15887_v48  ;;  %v16110_v45 = vmul.f32 0.2, %v15890_v5 }
 0xad8   :  { %18089 = vst [vmem:[#allocation23_spill] sm:$0xff] %v16093_v63  ;;  %v16113_v63 = vsel %vm6536_vm6, %v6472_v8, %v6600_v18  ;;  %vm6548_vm2 = vcmp.ge.f32.partialorder %v15881_v37, 0.0  ;;  %v16118_v29 = vmul.f32 0.2, %v15893_v13  ;;  %v16121_v20 = vmul.f32 0.2, %v15896_v17 }
 0xad9   :  { %18091 = vst [vmem:[#allocation22_spill] sm:$0xff] %v16107_v43  ;;  %18092 = vst [vmem:[#allocation34_spill] sm:$0xff] %v16113_v63  ;;  %v16124_v30 = vmul.f32 0.2, %v15899_v61  ;;  %v16127_v43 = vsel %vm6537_vm7, %v6473_v4, %v6601_v56  ;;  %vm6549_vm3 = vcmp.ge.f32.partialorder %v15884_v3, 0.0  ;;  %vm6550_vm4 = vcmp.ge.f32.partialorder %v15887_v48, 0.0 }
 0xada   :  { %18094 = vst [vmem:[#allocation39_spill] sm:$0xff] %v16127_v43  ;;  %6873 = vst [vmem:[#allocation5 + $0x68] sm:$0xff] %v16113_v63  ;;  %v16132_v8 = vmul.f32 0.2, %v15902_v33  ;;  %v16135_v18 = vmul.f32 0.2, %v15905_v28 }
 0xadb   :  { %18093 = vst [vmem:[#allocation37_spill] sm:$0xff] %v16124_v30  ;;  %v16138_v36 = vmul.f32 0.2, %v15908_v46  ;;  %v16143_v30 = vsel %vm6538_vm8, %v18085_v47, %v6602_v57  ;;  %6874 = vst [vmem:[#allocation5 + $0x70] sm:$0xff] %v16127_v43  ;;  %v16148_v4 = vmul.f32 0.2, %v15911_v52 }
 0xadc   :  { %18096 = vst [vmem:[#allocation38_spill] sm:$0xff] %v16143_v30  ;;  %v16151_v56 = vmul.f32 0.2, %v15914_v51  ;;  %v16154_v63 = vmul.f32 0.2, %v15917_v53  ;;  %6875 = vst [vmem:[#allocation5 + $0x88] sm:$0xff] %v16143_v30 }
 0xadd   :  { %18095 = vst [vmem:[#allocation36_spill] sm:$0xff] %v16138_v36  ;;  %v16159_v36 = vsel %vm6539_vm9, %v15854_v55, %v6603_v6  ;;  %vm6551_vm5 = vcmp.ge.f32.partialorder %v15890_v5, 0.0  ;;  %v16166_v47 = vmul.f32 0.2, %v15920_v15  ;;  %v16169_v57 = vmul.f32 0.2, %v15923_v9 }
 0xade   :  { %18097 = vst [vmem:[#allocation41_spill] sm:$0xff] %v16159_v36  ;;  %v16172_v43 = vmul.f32 0.2, %v15926_v60  ;;  %v16177_v55 = vsel %vm6540_vm10, %v15857_v49, %v6604_v7  ;;  %6876 = vst [vmem:[#allocation5 + $0x90] sm:$0xff] %v16159_v36  ;;  %vm6554_vm8 = vcmp.ge.f32.partialorder %v15899_v61, 0.0  ;;  %v16196_v49 = vsel %vm6541_vm11, %v15860_v2, %v6605_v50 }
 0xadf   :  { %18099 = vst [vmem:[#allocation27_spill] sm:$0xff] %v16177_v55  ;;  %v16185_v6 = vmul.f32 0.2, %v15929_v19  ;;  %v16188_v30 = vmul.f32 0.2, %v15932_v21  ;;  %18101 = vst [vmem:[#allocation26_spill] sm:$0xff] %v16196_v49  ;;  %v16216_v2 = vsel %vm6542_vm12, %v15863_v42, %v16068_v16  ;;  %v16236_v42 = vsel %vm6543_vm13, %v15866_v54, %v16076_v31 }
 0xae0   :  { %18098 = vst [vmem:[#allocation24_spill] sm:$0xff] %v16172_v43  ;;  %v16191_v43 = vmul.f32 0.2, %v15935_v22  ;;  %6877 = vst [vmem:[#allocation5 + $0xa8] sm:$0xff] %v16177_v55  ;;  %vm6558_vm10 = vcmp.ge.f32.partialorder %v15911_v52, 0.0  ;;  %vm6562_vm11 = vcmp.ge.f32.partialorder %v15923_v9, 0.0  ;;  %v16256_v54 = vsel %vm6544_vm14, %v15869_v26, %v16079_v39 }
 0xae1   :  { %v16204_v7 = vmul.f32 0.2, %v15938_v24  ;;  %v16207_v36 = vmul.f32 0.2, %v15941_v27  ;;  %18103 = vst [vmem:[#allocation46_spill] sm:$0xff] %v16216_v2  ;;  %6878 = vst [vmem:[#allocation5 + $0xb0] sm:$0xff] %v16196_v49  ;;  %v16276_v26 = vsel %vm6545_vm15, %v15872_v1, %v16082_v40  ;;  %v16296_v1 = vsel %vm6546_vm0, %v15875_v58, %v16090_v41 }
 0xae2   :  { %18100 = vst [vmem:[#allocation29_spill] sm:$0xff] %v16191_v43  ;;  %v16210_v43 = vmul.f32 0.2, %v15944_v38  ;;  %v16224_v50 = vmul.f32 0.2, %v15947_v62  ;;  %18105 = vst [vmem:[#allocation28_spill] sm:$0xff] %v16236_v42 }
 0xae3   :  { %v16227_v55 = vmul.f32 0.2, %v15950_v35  ;;  %6879 = vst [vmem:[#allocation5 + $0xc8] sm:$0xff] %v16216_v2  ;;  %vm6566_vm12 = vcmp.ge.f32.partialorder %v15935_v22, 0.0  ;;  %v16244_v16 = vmul.f32 0.2, %v15956_v32 }
 0xae4   :  { %18102 = vst [vmem:[#allocation45_spill] sm:$0xff] %v16210_v43  ;;  %v16230_v43 = vmul.f32 0.2, %v15953_v59  ;;  %v16247_v49 = vmul.f32 0.2, %v15959_v34  ;;  %18107 = vst [vmem:[#allocation31_spill] sm:$0xff] %v16256_v54 }
 0xae5   :  { %6880 = vst [vmem:[#allocation5 + $0xd0] sm:$0xff] %v16236_v42  ;;  %vm6570_vm13 = vcmp.ge.f32.partialorder %v15947_v62, 0.0  ;;  %v16264_v31 = vmul.f32 0.2, %v15965_v25  ;;  %v16267_v2 = vmul.f32 0.2, %v15968_v10 }
 0xae6   :  { %18104 = vst [vmem:[#allocation43_spill] sm:$0xff] %v16230_v43  ;;  %v16250_v43 = vmul.f32 0.2, %v15962_v44  ;;  %18111 = vst [vmem:[#allocation35_spill] sm:$0xff] %v16276_v26  ;;  %vm6574_vm14 = vcmp.ge.f32.partialorder %v15959_v34, 0.0  ;;  %v18112_v39 = vld [vmem:[#allocation51_spill] sm:$0xff] }
 0xae7   :  { %18108 = vst [vmem:[#allocation33_spill] sm:$0xff] %v16264_v31  ;;  %18109 = vst [vmem:[#allocation30_spill] sm:$0xff] %v16267_v2  ;;  %v16284_v42 = vmul.f32 0.2, %v18112_v39  ;;  %v18115_v2 = vld [vmem:[#allocation50_spill] sm:$0xff]  ;;  %vm6578_vm15 = vcmp.ge.f32.partialorder %v15971_v14, 0.0 }
 0xae8   :  { %18106 = vst [vmem:[#allocation44_spill] sm:$0xff] %v16250_v43  ;;  %v16270_v43 = vmul.f32 0.2, %v15971_v14  ;;  %6881 = vst [vmem:[#allocation5 + $0xe8] sm:$0xff] %v16256_v54  ;;  %v16290_v31 = vmul.f32 0.2, %v18115_v2 }
 0xae9   :  { %18113 = vst [vmem:[#allocation42_spill] sm:$0xff] %v16284_v42  ;;  %18117 = vst [vmem:[#allocation52_spill] sm:$0xff] %v16296_v1  ;;  %v18118_v40 = vld [vmem:[#allocation6_spill] sm:$0xff]  ;;  %v18122_v42 = vld [vmem:[#allocation8_spill] sm:$0xff]  ;;  %vm18143_vm9 = vcmp.ge.f32.partialorder %v15893_v13, 0.0 }
 0xaea   :  { %18110 = vst [vmem:[#allocation32_spill] sm:$0xff] %v16270_v43  ;;  %v16287_v43 = vmul.f32 0.2, %v15980_v11  ;;  %18116 = vst [vmem:[#allocation51_spill] sm:$0xff] %v16290_v31  ;;  %v16304_v54 = vmul.f32 0.2, %v18118_v40 }
 0xaeb   :  { %6882 = vst [vmem:[#allocation5 + $0xf0] sm:$0xff] %v16276_v26  ;;  %v18120_v31 = vld [vmem:[#allocation7_spill] sm:$0xff]  ;;  %v16310_v10 = vmul.f32 0.2, %v18122_v42  ;;  %6883 = vst [vmem:[#allocation5 + $0x108] sm:$0xff] %v16296_v1  ;;  %vm6582_vm0 = vcmp.ge.f32.partialorder %v18118_v40, 0.0 }
 0xaec   :  { %18114 = vst [vmem:[#allocation47_spill] sm:$0xff] %v16287_v43  ;;  %18119 = vst [vmem:[#allocation6_spill] sm:$0xff] %v16304_v54  ;;  %v16307_v43 = vmul.f32 0.2, %v18120_v31  ;;  %v18124_v58 = vld [vmem:[#allocation23_spill] sm:$0xff]  ;;  %v18126_v26 = vld [vmem:[#allocation9_spill] sm:$0xff] }
 0xaed   :  { %18123 = vst [vmem:[#allocation8_spill] sm:$0xff] %v16310_v10  ;;  %v16316_v41 = vsel %vm6547_vm1, %v15878_v0, %v18124_v58  ;;  %v18128_v10 = vld [vmem:[#allocation10_spill] sm:$0xff]  ;;  %v18130_v2 = vld [vmem:[#allocation11_spill] sm:$0xff]  ;;  %v16336_v0 = vsel %vm6548_vm2, %v15881_v37, %v16096_v23  ;;  %v18133_v58 = vld [vmem:[#allocation12_spill] sm:$0xff]  ;;  %v16356_v37 = vsel %vm6549_vm3, %v15884_v3, %v16104_v12 }
 0xaee   :  { %18121 = vst [vmem:[#allocation7_spill] sm:$0xff] %v16307_v43  ;;  %18125 = vst [vmem:[#allocation23_spill] sm:$0xff] %v16316_v41  ;;  %v16324_v43 = vmul.f32 0.2, %v18126_v26  ;;  %v16327_v54 = vmul.f32 0.2, %v18128_v10 }
 0xaef   :  { %v16330_v11 = vmul.f32 0.2, %v18130_v2  ;;  %18132 = vst [vmem:[#allocation54_spill] sm:$0xff] %v16336_v0  ;;  %6884 = vst [vmem:[#allocation5 + $0x110] sm:$0xff] %v16316_v41  ;;  %vm6586_vm1 = vcmp.ge.f32.partialorder %v18128_v10, 0.0  ;;  %v18134_v1 = vld [vmem:[#allocation13_spill] sm:$0xff] }
 0xaf0   :  { %18127 = vst [vmem:[#allocation53_spill] sm:$0xff] %v16324_v43  ;;  %18129 = vst [vmem:[#allocation10_spill] sm:$0xff] %v16327_v54  ;;  %v16344_v54 = vmul.f32 0.2, %v18133_v58  ;;  %v18136_v26 = vld [vmem:[#allocation15_spill] sm:$0xff]  ;;  %v18138_v23 = vld [vmem:[#allocation17_spill] sm:$0xff] }
 0xaf1   :  { %18131 = vst [vmem:[#allocation11_spill] sm:$0xff] %v16330_v11  ;;  %v16347_v11 = vmul.f32 0.2, %v18134_v1  ;;  %v16350_v43 = vmul.f32 0.2, %v18136_v26  ;;  %6885 = vst [vmem:[#allocation5 + $0x128] sm:$0xff] %v16336_v0 }
 0xaf2   :  { %vm6590_vm2 = vcmp.ge.f32.partialorder %v18136_v26, 0.0  ;;  %vm6591_vm6 = vcmp.ge.f32.partialorder %v18138_v23, 0.0  ;;  %v18139_v41 = vld [vmem:[#allocation14_spill] sm:$0xff]  ;;  %v18140_v58 = vld [vmem:[#allocation16_spill] sm:$0xff]  ;;  %v16364_v1 = vmul.f32 0.2, %v18138_v23 }
 0xaf3   :  { %18135 = vst [vmem:[#allocation55_spill] sm:$0xff] %v16347_v11  ;;  %18137 = vst [vmem:[#allocation56_spill] sm:$0xff] %v16350_v43  ;;  %vm6592_vm7 = vcmp.ge.f32.partialorder %v18139_v41, 0.0  ;;  %v16367_v43 = vmul.f32 0.2, %v18139_v41  ;;  %v18141_v3 = vld [vmem:[#allocation22_spill] sm:$0xff]  ;;  %v16387_v41 = vsel %vm6551_vm5, %v15890_v5, %v16110_v45 }
 0xaf4   :  { %v16370_v11 = vmul.f32 0.2, %v18140_v58  ;;  %v16376_v12 = vsel %vm6550_vm4, %v15887_v48, %v18141_v3  ;;  %6886 = vst [vmem:[#allocation5 + $0x130] sm:$0xff] %v16356_v37  ;;  %v18142_v0 = vld [vmem:[#allocation19_spill] sm:$0xff]  ;;  %v16393_v58 = vsel %vm18143_vm9, %v15893_v13, %v16118_v29  ;;  %vm18144_vm4 = vcmp.ge.f32.partialorder %v15896_v17, 0.0  ;;  %v18145_v3 = vld [vmem:[#allocation37_spill] sm:$0xff] }
 0xaf5   :  { %vm6594_vm3 = vcmp.ge.f32.partialorder %v18142_v0, 0.0  ;;  %v16381_v26 = vmul.f32 0.2, %v18142_v0  ;;  %v16399_v48 = vsel %vm18144_vm4, %v15896_v17, %v16121_v20  ;;  %6887 = vst [vmem:[#allocation5 + $0x148] sm:$0xff] %v16376_v12  ;;  %v16406_v5 = vsel %vm6554_vm8, %v15899_v61, %v18145_v3  ;;  %v18148_v45 = vld [vmem:[#allocation36_spill] sm:$0xff]  ;;  %6888 = vst [vmem:[#allocation5 + $0x150] sm:$0xff] %v16387_v41 }
 0xaf6   :  { %vm18146_vm5 = vcmp.ge.f32.partialorder %v15902_v33, 0.0  ;;  %vm18147_vm9 = vcmp.ge.f32.partialorder %v15905_v28, 0.0  ;;  %vm18149_vm4 = vcmp.ge.f32.partialorder %v15908_v46, 0.0  ;;  %6889 = vst [vmem:[#allocation5 + $0x168] sm:$0xff] %v16393_v58  ;;  %6890 = vst [vmem:[#allocation5 + $0x170] sm:$0xff] %v16399_v48  ;;  %v16433_v61 = vsel %vm6558_vm10, %v15911_v52, %v16148_v4  ;;  %v18171_v4 = vld [vmem:[#allocation49_spill] sm:$0xff] }
 0xaf7   :  { %v16412_v13 = vsel %vm18146_vm5, %v15902_v33, %v16132_v8  ;;  %v16418_v17 = vsel %vm18147_vm9, %v15905_v28, %v16135_v18  ;;  %v16424_v29 = vsel %vm18149_vm4, %v15908_v46, %v18148_v45  ;;  %vm18150_vm8 = vcmp.ge.f32.partialorder %v15914_v51, 0.0  ;;  %6891 = vst [vmem:[#allocation5 + $0x188] sm:$0xff] %v16406_v5  ;;  %6895 = vst [vmem:[#allocation5 + $0x1c8] sm:$0xff] %v16433_v61  ;;  %v18170_v18 = vld [vmem:[#allocation30_spill] sm:$0xff]  ;;  %v18183_v3 = vld [vmem:[#allocation7_spill] sm:$0xff] }
 0xaf8   :  { %v16439_v33 = vsel %vm18150_vm8, %v15914_v51, %v16151_v56  ;;  %vm18151_vm5 = vcmp.ge.f32.partialorder %v15917_v53, 0.0  ;;  %vm18152_vm9 = vcmp.ge.f32.partialorder %v15920_v15, 0.0  ;;  %6892 = vst [vmem:[#allocation5 + $0x190] sm:$0xff] %v16412_v13  ;;  %6893 = vst [vmem:[#allocation5 + $0x1a8] sm:$0xff] %v16418_v17  ;;  %v6690_v52 = vsel %vm6562_vm11, %v15923_v9, %v16169_v57  ;;  %v18153_v51 = vld [vmem:[#allocation24_spill] sm:$0xff]  ;;  %v18157_v9 = vld [vmem:[#allocation29_spill] sm:$0xff] }
 0xaf9   :  { %v16445_v28 = vsel %vm18151_vm5, %v15917_v53, %v16154_v63  ;;  %v16451_v46 = vsel %vm18152_vm9, %v15920_v15, %v16166_v47  ;;  %6894 = vst [vmem:[#allocation5 + $0x1b0] sm:$0xff] %v16424_v29  ;;  %vm18154_vm10 = vcmp.ge.f32.partialorder %v15926_v60, 0.0  ;;  %vm18155_vm4 = vcmp.ge.f32.partialorder %v15929_v19, 0.0  ;;  %6896 = vst [vmem:[#allocation5 + $0x1d0] sm:$0xff] %v16439_v33  ;;  %v18176_v57 = vld [vmem:[#allocation47_spill] sm:$0xff] }
 0xafa   :  { %v6691_v53 = vsel %vm18154_vm10, %v15926_v60, %v18153_v51  ;;  %v16469_v15 = vsel %vm18155_vm4, %v15929_v19, %v16185_v6  ;;  %vm18156_vm8 = vcmp.ge.f32.partialorder %v15932_v21, 0.0  ;;  %6897 = vst [vmem:[#allocation5 + $0x1e8] sm:$0xff] %v16445_v28  ;;  %6898 = vst [vmem:[#allocation5 + $0x1f0] sm:$0xff] %v16451_v46  ;;  %v16485_v60 = vsel %vm6566_vm12, %v15935_v22, %v18157_v9  ;;  %v18188_v9 = vld [vmem:[#allocation9_spill] sm:$0xff] }
 0xafb   :  { %v16475_v63 = vsel %vm18156_vm8, %v15932_v21, %v16188_v30  ;;  %vm18158_vm11 = vcmp.ge.f32.partialorder %v15938_v24, 0.0  ;;  %vm18159_vm5 = vcmp.ge.f32.partialorder %v15941_v27, 0.0  ;;  %v18160_v30 = vld [vmem:[#allocation45_spill] sm:$0xff]  ;;  %vm18161_vm9 = vcmp.ge.f32.partialorder %v15944_v38, 0.0  ;;  %6899 = vst [vmem:[#allocation5 + $0x208] sm:$0xff] %v6690_v52  ;;  %6900 = vst [vmem:[#allocation5 + $0x210] sm:$0xff] %v6691_v53 }
 0xafc   :  { %v16491_v19 = vsel %vm18158_vm11, %v15938_v24, %v16204_v7  ;;  %v16497_v21 = vsel %vm18159_vm5, %v15941_v27, %v16207_v36  ;;  %v16503_v20 = vsel %vm18161_vm9, %v15944_v38, %v18160_v30  ;;  %6901 = vst [vmem:[#allocation5 + $0x268] sm:$0xff] %v16469_v15  ;;  %6902 = vst [vmem:[#allocation5 + $0x270] sm:$0xff] %v16475_v63  ;;  %vm18162_vm12 = vcmp.ge.f32.partialorder %v15950_v35, 0.0  ;;  %v18163_v27 = vld [vmem:[#allocation43_spill] sm:$0xff]  ;;  %v18180_v7 = vld [vmem:[#allocation50_spill] sm:$0xff] }
 0xafd   :  { %v16511_v22 = vsel %vm6570_vm13, %v15947_v62, %v16224_v50  ;;  %v16517_v24 = vsel %vm18162_vm12, %v15950_v35, %v16227_v55  ;;  %vm18164_vm10 = vcmp.ge.f32.partialorder %v15953_v59, 0.0  ;;  %vm18165_vm4 = vcmp.ge.f32.partialorder %v15956_v32, 0.0  ;;  %6903 = vst [vmem:[#allocation5 + $0x288] sm:$0xff] %v16485_v60  ;;  %6904 = vst [vmem:[#allocation5 + $0x290] sm:$0xff] %v16491_v19  ;;  %v18166_v35 = vld [vmem:[#allocation44_spill] sm:$0xff]  ;;  %v18187_v53 = vld [vmem:[#allocation53_spill] sm:$0xff] }
 0xafe   :  { %v16523_v38 = vsel %vm18164_vm10, %v15953_v59, %v18163_v27  ;;  %v16529_v36 = vsel %vm18165_vm4, %v15956_v32, %v16244_v16  ;;  %6905 = vst [vmem:[#allocation5 + $0x2a8] sm:$0xff] %v16497_v21  ;;  %6906 = vst [vmem:[#allocation5 + $0x2b0] sm:$0xff] %v16503_v20  ;;  %v16539_v62 = vsel %vm6574_vm14, %v15959_v34, %v16247_v49  ;;  %vm18167_vm13 = vcmp.ge.f32.partialorder %v15962_v44, 0.0  ;;  %v18168_v32 = vld [vmem:[#allocation33_spill] sm:$0xff]  ;;  %v18173_v34 = vld [vmem:[#allocation32_spill] sm:$0xff] }
 0xaff   :  { %v16545_v59 = vsel %vm18167_vm13, %v15962_v44, %v18166_v35  ;;  %vm18169_vm8 = vcmp.ge.f32.partialorder %v15965_v25, 0.0  ;;  %vm18172_vm11 = vcmp.ge.f32.partialorder %v18171_v4, 0.0  ;;  %6907 = vst [vmem:[#allocation5 + $0x2c8] sm:$0xff] %v16511_v22  ;;  %6908 = vst [vmem:[#allocation5 + $0x2d0] sm:$0xff] %v16517_v24  ;;  %v16567_v44 = vsel %vm6578_vm15, %v15971_v14, %v18173_v34  ;;  %v18177_v55 = vld [vmem:[#allocation48_spill] sm:$0xff]  ;;  %v18179_v49 = vld [vmem:[#allocation51_spill] sm:$0xff] }
 0xb00   :  { %v16551_v8 = vsel %vm18169_vm8, %v15965_v25, %v18168_v32  ;;  %v16557_v56 = vsel %vm18172_vm11, %v18171_v4, %v18170_v18  ;;  %6909 = vst [vmem:[#allocation5 + $0x2e8] sm:$0xff] %v16523_v38  ;;  %6910 = vst [vmem:[#allocation5 + $0x2f0] sm:$0xff] %v16529_v36  ;;  %v18174_v25 = vld [vmem:[#allocation42_spill] sm:$0xff]  ;;  %vm18175_vm14 = vcmp.ge.f32.partialorder %v18112_v39, 0.0  ;;  %vm18178_vm5 = vcmp.ge.f32.partialorder %v18177_v55, 0.0  ;;  %v7702_v14 = vld [vmem:[#allocation5 + $0x49] sm:$0xff] }
 0xb01   :  { %v16573_v47 = vsel %vm18175_vm14, %v18112_v39, %v18174_v25  ;;  %v16579_v6 = vsel %vm18178_vm5, %v18177_v55, %v18176_v57  ;;  %vm18181_vm9 = vcmp.ge.f32.partialorder %v18180_v7, 0.0  ;;  %6911 = vst [vmem:[#allocation5 + $0x308] sm:$0xff] %v16539_v62  ;;  %6912 = vst [vmem:[#allocation5 + $0x310] sm:$0xff] %v16545_v59  ;;  %v18182_v16 = vld [vmem:[#allocation6_spill] sm:$0xff]  ;;  %vm18184_vm15 = vcmp.ge.f32.partialorder %v18120_v31, 0.0  ;;  %v18185_v52 = vld [vmem:[#allocation8_spill] sm:$0xff] }
 0xb02   :  { %v16585_v50 = vsel %vm18181_vm9, %v18180_v7, %v18179_v49  ;;  %6913 = vst [vmem:[#allocation5 + $0x328] sm:$0xff] %v16551_v8  ;;  %6914 = vst [vmem:[#allocation5 + $0x330] sm:$0xff] %v16557_v56  ;;  %v6710_v39 = vsel %vm6582_vm0, %v18118_v40, %v18182_v16  ;;  %v6711_v45 = vsel %vm18184_vm15, %v18120_v31, %v18183_v3  ;;  %vm18186_vm12 = vcmp.ge.f32.partialorder %v18122_v42, 0.0  ;;  %v7703_v40 = vld [vmem:[#allocation5 + $0x51] sm:$0xff]  ;;  %v6935_v31 = vld [vmem:[#allocation5 + $0x27] sm:$0xff] }
 0xb03   :  { %v6712_v51 = vsel %vm18186_vm12, %v18122_v42, %v18185_v52  ;;  %vm18189_vm10 = vcmp.ge.f32.partialorder %v18188_v9, 0.0  ;;  %6915 = vst [vmem:[#allocation5 + $0x348] sm:$0xff] %v16567_v44  ;;  %6916 = vst [vmem:[#allocation5 + $0x350] sm:$0xff] %v16573_v47  ;;  %v6936_v27 = vld [vmem:[#allocation5 + $0x2f] sm:$0xff]  ;;  %v18190_v35 = vld [vmem:[#allocation10_spill] sm:$0xff]  ;;  %vm18192_vm0 = vcmp.ge.f32.partialorder %v18130_v2, 0.0 }
 0xb04   :  { %v6713_v30 = vsel %vm18189_vm10, %v18188_v9, %v18187_v53  ;;  %6917 = vst [vmem:[#allocation5 + $0x368] sm:$0xff] %v16579_v6  ;;  %6918 = vst [vmem:[#allocation5 + $0x370] sm:$0xff] %v16585_v50  ;;  %v6714_v42 = vsel %vm6586_vm1, %v18128_v10, %v18190_v35  ;;  %v18191_v32 = vld [vmem:[#allocation11_spill] sm:$0xff]  ;;  %v18193_v4 = vld [vmem:[#allocation12_spill] sm:$0xff] }
 0xb05   :  { %v6715_v18 = vsel %vm18192_vm0, %v18130_v2, %v18191_v32  ;;  %vm18194_vm4 = vcmp.ge.f32.partialorder %v18193_v4, 0.0  ;;  %v18195_v25 = vld [vmem:[#allocation55_spill] sm:$0xff]  ;;  %v18196_v57 = vld [vmem:[#allocation13_spill] sm:$0xff]  ;;  %6919 = vst [vmem:[#allocation5 + $0x388] sm:$0xff] %v6710_v39  ;;  %6920 = vst [vmem:[#allocation5 + $0x390] sm:$0xff] %v6711_v45 }
 0xb06   :  { %v6716_v34 = vsel %vm18194_vm4, %v18193_v4, %v16344_v54  ;;  %vm18197_vm13 = vcmp.ge.f32.partialorder %v18196_v57, 0.0  ;;  %6921 = vst [vmem:[#allocation5 + $0x3a8] sm:$0xff] %v6712_v51  ;;  %6922 = vst [vmem:[#allocation5 + $0x3b0] sm:$0xff] %v6713_v30  ;;  %v7704_v10 = vld [vmem:[#allocation5 + $0x69] sm:$0xff]  ;;  %v7705_v49 = vld [vmem:[#allocation5 + $0x71] sm:$0xff]  ;;  %v6719_v54 = vsel %vm6591_vm6, %v18138_v23, %v16364_v1  ;;  %v6722_v1 = vsel %vm6594_vm3, %v18142_v0, %v16381_v26 }
 0xb07   :  { %v6717_v55 = vsel %vm18197_vm13, %v18196_v57, %v18195_v25  ;;  %v18198_v7 = vld [vmem:[#allocation56_spill] sm:$0xff]  ;;  %v18199_v16 = vld [vmem:[#allocation15_spill] sm:$0xff]  ;;  %v18200_v3 = vld [vmem:[#allocation14_spill] sm:$0xff]  ;;  %6923 = vst [vmem:[#allocation5 + $0x3c8] sm:$0xff] %v6714_v42  ;;  %v16649_v30 = vpack.c.bf16 %v7703_v40, %v7702_v14  ;;  %v16653_v35 = vpack.c.bf16 %v7705_v49, %v7704_v10 }
 0xb08   :  { %v6718_v2 = vsel %vm6590_vm2, %v18199_v16, %v18198_v7  ;;  %v6720_v39 = vsel %vm6592_vm7, %v18200_v3, %v16367_v43  ;;  %v18201_v45 = vld [vmem:[#allocation16_spill] sm:$0xff]  ;;  %6924 = vst [vmem:[#allocation5 + $0x3d0] sm:$0xff] %v6715_v18  ;;  %6925 = vst [vmem:[#allocation5 + $0x3e8] sm:$0xff] %v6716_v34  ;;  %v18203_v43 = vld [vmem:[#allocation21_spill] sm:$0xff] }
 0xb09   :  { %vm18202_vm1 = vcmp.ge.f32.partialorder %v18201_v45, 0.0  ;;  %6926 = vst [vmem:[#allocation5 + $0x3f0] sm:$0xff] %v6717_v55  ;;  %v7706_v51 = vld [vmem:[#allocation5 + $0x89] sm:$0xff]  ;;  %v7707_v53 = vld [vmem:[#allocation5 + $0x91] sm:$0xff]  ;;  %6927 = vst [vmem:[#allocation5 + $0x408] sm:$0xff] %v6718_v2  ;;  %10979 = vmatprep.mubr.bf16.mxu1 %v16649_v30 }
 0xb0a   :  { %v6721_v52 = vsel %vm18202_vm1, %v18201_v45, %v16370_v11  ;;  %6928 = vst [vmem:[#allocation5 + $0x410] sm:$0xff] %v6719_v54  ;;  %6929 = vst [vmem:[#allocation5 + $0x428] sm:$0xff] %v6720_v39  ;;  %v18204_v23 = vld [vmem:[#allocation18_spill] sm:$0xff]  ;;  %v16651_v11 = vpack.c.bf16 %v6936_v27, %v6935_v31  ;;  %v18205_v42 = vld [vmem:[#allocation20_spill] sm:$0xff]  ;;  %v16658_v0 = vpack.c.bf16 %v7707_v53, %v7706_v51  ;;  %10980 = vmatmul.mubr.bf16.vlgmr.msra.gmra.mrb[240].mxu1 %v16653_v35 }
 0xb0b   :  { %6930 = vst [vmem:[#allocation5 + $0x430] sm:$0xff] %v6721_v52  ;;  %v7094_v9 = vpack.c.bf16 %v18204_v23, %v18203_v43  ;;  %6931 = vst [vmem:[#allocation5 + $0x448] sm:$0xff] %v6722_v1  ;;  %v18206_v32 = vld [vmem:[#allocation25_spill] sm:$0xff]  ;;  %v18207_v18 = vld [vmem:[#allocation38_spill] sm:$0xff] }
 0xb0c   :  { %v7095_v26 = vpack.c.bf16 %v18206_v32, %v18205_v42  ;;  %v18208_v14 = vld [vmem:[#allocation41_spill] sm:$0xff]  ;;  %10983 = vmatprep.mubr.bf16.mxu1 %v16658_v0  ;;  %v6937_v31 = vld [vmem:[#allocation5 + $0x47] sm:$0xff]  ;;  %v6938_v25 = vld [vmem:[#allocation5 + $0x4f] sm:$0xff] }
 0xb0d   :  { %8421 = vmatprep.mubr.bf16.mxu0 %v7094_v9  ;;  %v7097_v40 = vpack.c.bf16 %v18208_v14, %v18207_v18  ;;  %v18209_v27 = vld [vmem:[#allocation27_spill] sm:$0xff]  ;;  %v18210_v4 = vld [vmem:[#allocation26_spill] sm:$0xff]  ;;  %v7709_v55 = vld [vmem:[#allocation5 + $0xb1] sm:$0xff]  ;;  %v16675_v43 = vpack.c.bf16 %v6938_v25, %v6937_v31 }
 0xb0e   :  { %8422 = vmatmul.mubr.bf16.gmra.mrb[212].mxu0 %v16651_v11  ;;  %v7098_v34 = vpack.c.bf16 %v18210_v4, %v18209_v27  ;;  %v7708_v57 = vld [vmem:[#allocation5 + $0xa9] sm:$0xff]  ;;  %v18211_v10 = vld [vmem:[#allocation46_spill] sm:$0xff]  ;;  %v7711_v2 = vld [vmem:[#allocation5 + $0xd1] sm:$0xff] }
 0xb0f   :  { %8429 = vmatprep.mubr.bf16.mxu0 %v7095_v26  ;;  %v18212_v49 = vld [vmem:[#allocation28_spill] sm:$0xff]  ;;  %v18213_v54 = vld [vmem:[#allocation31_spill] sm:$0xff]  ;;  %v18217_v53 = vld [vmem:[#allocation54_spill] sm:$0xff]  ;;  %v7769_v23 = vpack.c.bf16 %v7709_v55, %v7708_v57 }
 0xb10   :  { %v7099_v7 = vpack.c.bf16 %v18212_v49, %v18211_v10  ;;  %v7710_v16 = vld [vmem:[#allocation5 + $0xc9] sm:$0xff]  ;;  %v18218_v42 = vld [vmem:[#allocation34_spill] sm:$0xff]  ;;  %v7715_v31 = vld [vmem:[#allocation5 + $0x111] sm:$0xff] }
 0xb11   :  { %v18214_v3 = vld [vmem:[#allocation35_spill] sm:$0xff]  ;;  %v18215_v45 = vld [vmem:[#allocation52_spill] sm:$0xff]  ;;  %v7770_v18 = vpack.c.bf16 %v7711_v2, %v7710_v16 }
 0xb12   :  { %v7100_v39 = vpack.c.bf16 %v18214_v3, %v18213_v54  ;;  %v18216_v52 = vld [vmem:[#allocation23_spill] sm:$0xff]  ;;  %10984 = vmatmul.mubr.bf16.gmra.mrb[244].mxu1 %v7769_v23  ;;  %v7713_v2 = vld [vmem:[#allocation5 + $0xf1] sm:$0xff] }
 0xb13   :  { %v18219_v32 = vld [vmem:[#allocation39_spill] sm:$0xff]  ;;  %10987 = vmatprep.mubr.bf16.mxu1 %v7770_v18  ;;  %v12171_v23 = vld [vmem:[%s17757_s15 + $0xb0] sm:$0xff]   ;;  %v18221_v54 = vpack.c.bf16 %v18216_v52, %v18215_v45 }
 0xb14   :  { %v7096_v26 = vpack.c.bf16 %v18219_v32, %v18218_v42  ;;  %v6939_v25 = vld [vmem:[#allocation5 + $0x67] sm:$0xff]  ;;  %v6940_v42 = vld [vmem:[#allocation5 + $0x6f] sm:$0xff] }
 0xb15   :  { %v7712_v16 = vld [vmem:[#allocation5 + $0xe9] sm:$0xff]  ;;  %v16709_v9 = vpack.c.bf16 %v6940_v42, %v6939_v25  ;;  %v7717_v57 = vld [vmem:[#allocation5 + $0x131] sm:$0xff] }
 0xb16   :  { %8430 = vmatmul.mubr.bf16.gmra.mrb[216].mxu0 %v16675_v43  ;;  %v7714_v18 = vld [vmem:[#allocation5 + $0x109] sm:$0xff]  ;;  %v7771_v1 = vpack.c.bf16 %v7713_v2, %v7712_v16  ;;  %v18220_v16 = vmov 0  }
 0xb17   :  { %8437 = vmatprep.mubr.bf16.mxu0 %v7096_v26  ;;  %v12170_v14 = vld [vmem:[%s17757_s15 + $0xa8] sm:$0xff]   ;;  %v7772_v51 = vpack.c.bf16 %v7715_v31, %v7714_v18  ;;  %v7719_v18 = vld [vmem:[#allocation5 + $0x151] sm:$0xff] }
 0xb18   :  { %8681 = vmatpush1.bf16.msra.mxu0 %v12170_v14  ;;  %v6941_v25 = vld [vmem:[#allocation5 + $0x87] sm:$0xff]  ;;  %v6942_v42 = vld [vmem:[#allocation5 + $0x8f] sm:$0xff]  ;;  %v12172_v14 = vld [vmem:[%s17757_s15 + $0xb8] sm:$0xff]  }
 0xb19   :  { %8682 = vmatprep.subr.bf16.mxu0 %v18220_v16  ;;  %v7716_v2 = vld [vmem:[#allocation5 + $0x129] sm:$0xff]  ;;  %v7727_v26 = vld [vmem:[#allocation5 + $0x1d1] sm:$0xff] }
 0xb1a   :  { %10988 = vmatmul.mubr.bf16.gmra.mrb[248].mxu1 %v7771_v1  ;;  %v7718_v31 = vld [vmem:[#allocation5 + $0x149] sm:$0xff]  ;;  %v16724_v1 = vpack.c.bf16 %v6942_v42, %v6941_v25  ;;  %v7773_v55 = vpack.c.bf16 %v7717_v57, %v7716_v2  ;;  %v7721_v57 = vld [vmem:[#allocation5 + $0x171] sm:$0xff] }
 0xb1b   :  { %10991 = vmatprep.mubr.bf16.mxu1 %v7772_v51  ;;  %v12173_v51 = vld [vmem:[%s17757_s15 + $0xc0] sm:$0xff]   ;;  %v6944_v25 = vld [vmem:[#allocation5 + $0xaf] sm:$0xff] }
 0xb1c   :  { %8683 = vmatpush1.bf16.msra.mxu0 %v12171_v23  ;;  %v6943_v23 = vld [vmem:[#allocation5 + $0xa7] sm:$0xff]  ;;  %v12175_v45 = vld [vmem:[%s17757_s15 + $0xd0] sm:$0xff]  }
 0xb1d   :  { %8684 = vmatprep.subr.bf16.mxu0 %v18220_v16  ;;  %v7720_v42 = vld [vmem:[#allocation5 + $0x169] sm:$0xff] }
 0xb1e   :  { %8438 = vmatmul.mubr.bf16.gmra.mrb[220].mxu0 %v16709_v9  ;;  %v7722_v2 = vld [vmem:[#allocation5 + $0x189] sm:$0xff]  ;;  %v7775_v27 = vpack.c.bf16 %v7721_v57, %v7720_v42  ;;  %v7729_v57 = vld [vmem:[#allocation5 + $0x1f1] sm:$0xff] }
 0xb1f   :  { %8445 = vmatprep.mubr.bf16.mxu0 %v7097_v40  ;;  %v7774_v40 = vpack.c.bf16 %v7719_v18, %v7718_v31  ;;  %v6946_v31 = vld [vmem:[#allocation5 + $0xcf] sm:$0xff]  ;;  %v6947_v49 = vld [vmem:[#allocation5 + $0xe7] sm:$0xff] }
 0xb20   :  { %8685 = vmatpush1.bf16.msra.mxu0 %v12172_v14  ;;  %v7723_v14 = vld [vmem:[#allocation5 + $0x191] sm:$0xff]  ;;  %v7724_v18 = vld [vmem:[#allocation5 + $0x1a9] sm:$0xff] }
 0xb21   :  { %8686 = vmatprep.subr.bf16.mxu0 %v18220_v16  ;;  %v7776_v4 = vpack.c.bf16 %v7723_v14, %v7722_v2  ;;  %v12174_v10 = vld [vmem:[%s17757_s15 + $0xc8] sm:$0xff]   ;;  %v7731_v14 = vld [vmem:[#allocation5 + $0x211] sm:$0xff] }
 0xb22   :  { %10992 = vmatmul.mubr.bf16.gmra.mrb[252].mxu1 %v7773_v55  ;;  %v16735_v55 = vpack.c.bf16 %v6944_v25, %v6943_v23  ;;  %v7728_v42 = vld [vmem:[#allocation5 + $0x1e9] sm:$0xff] }
 0xb23   :  { %10995 = vmatprep.mubr.bf16.mxu1 %v7774_v40  ;;  %v7725_v40 = vld [vmem:[#allocation5 + $0x1b1] sm:$0xff]  ;;  %v7730_v2 = vld [vmem:[#allocation5 + $0x209] sm:$0xff] }
 0xb24   :  { %8687 = vmatpush1.bf16.msra.mxu0 %v12173_v51  ;;  %v7726_v51 = vld [vmem:[#allocation5 + $0x1c9] sm:$0xff]  ;;  %v7777_v23 = vpack.c.bf16 %v7725_v40, %v7724_v18 }
 0xb25   :  { %8688 = vmatprep.subr.bf16.mxu0 %v18220_v16  ;;  %v7778_v25 = vpack.c.bf16 %v7727_v26, %v7726_v51  ;;  %v7732_v3 = vld [vmem:[#allocation5 + $0x229] sm:$0xff]  ;;  %v7735_v51 = vld [vmem:[#allocation5 + $0x291] sm:$0xff] }
 0xb26   :  { %8446 = vmatmul.mubr.bf16.gmra.mrb[224].mxu0 %v16724_v1  ;;  %v7734_v40 = vld [vmem:[#allocation5 + $0x289] sm:$0xff] }
 0xb27   :  { %8453 = vmatprep.mubr.bf16.mxu0 %v7098_v34  ;;  %v6945_v34 = vld [vmem:[#allocation5 + $0xc7] sm:$0xff] }
 0xb28   :  { %v16741_v32 = vpack.c.bf16 %v6946_v31, %v6945_v34  ;;  %8689 = vmatpush1.bf16.msra.mxu0 %v12174_v10  ;;  %v6949_v34 = vld [vmem:[#allocation5 + $0x107] sm:$0xff]  ;;  %v6950_v31 = vld [vmem:[#allocation5 + $0x10f] sm:$0xff]  ;;  %v18222_v10 = vpack.c.bf16 %v16356_v37, %v18217_v53  ;;  %v18223_v37 = vpack.c.bf16 %v16387_v41, %v16376_v12  ;;  %v12176_v41 = vld [vmem:[%s17757_s15 + $0xd8] sm:$0xff]  }
 0xb29   :  { %8690 = vmatprep.subr.bf16.mxu0 %v18220_v16  ;;  %v6951_v52 = vld [vmem:[#allocation5 + $0x127] sm:$0xff] }
 0xb2a   :  { %10996 = vmatmul.mubr.bf16.gmra.mrb[0].mxu1 %v7775_v27  ;;  %v7779_v27 = vpack.c.bf16 %v7729_v57, %v7728_v42  ;;  %v7737_v42 = vld [vmem:[#allocation5 + $0x2b1] sm:$0xff]  ;;  %v7738_v57 = vld [vmem:[#allocation5 + $0x2c9] sm:$0xff] }
 0xb2b   :  { %10999 = vmatprep.mubr.bf16.mxu1 %v7776_v4  ;;  %v7780_v4 = vpack.c.bf16 %v7731_v14, %v7730_v2  ;;  %v7739_v2 = vld [vmem:[#allocation5 + $0x2d1] sm:$0xff]  ;;  %v6953_v53 = vld [vmem:[#allocation5 + $0x147] sm:$0xff] }
 0xb2c   :  { %8691 = vmatpush1.bf16.msra.mxu0 %v12175_v45  ;;  %v6955_v12 = vld [vmem:[#allocation5 + $0x167] sm:$0xff] }
 0xb2d   :  { %8692 = vmatprep.subr.bf16.mxu0 %v18220_v16  ;;  %v7744_v45 = vld [vmem:[#allocation5 + $0x329] sm:$0xff] }
 0xb2e   :  { %8454 = vmatmul.mubr.bf16.gmra.mrb[228].mxu0 %v16735_v55 }
 0xb2f   :  { %8461 = vmatprep.mubr.bf16.mxu0 %v7099_v7  ;;  %v6948_v7 = vld [vmem:[#allocation5 + $0xef] sm:$0xff] }
 0xb30   :  { %v16751_v26 = vpack.c.bf16 %v6948_v7, %v6947_v49  ;;  %v6952_v49 = vld [vmem:[#allocation5 + $0x12f] sm:$0xff]  ;;  %8693 = vmatpush1.bf16.msra.mxu0 %v12176_v41 }
 0xb31   :  { %v7736_v7 = vld [vmem:[#allocation5 + $0x2a9] sm:$0xff]  ;;  %v16767_v14 = vpack.c.bf16 %v6952_v49, %v6951_v52  ;;  %v7745_v52 = vld [vmem:[#allocation5 + $0x331] sm:$0xff]  ;;  %8694 = vmatprep.subr.bf16.mxu0 %v18220_v16 }
 0xb32   :  { %11000 = vmatmul.mubr.bf16.gmra.mrb[4].mxu1 %v7777_v23  ;;  %v16757_v23 = vpack.c.bf16 %v6950_v31, %v6949_v34  ;;  %v7742_v34 = vld [vmem:[#allocation5 + $0x309] sm:$0xff]  ;;  %v7743_v31 = vld [vmem:[#allocation5 + $0x311] sm:$0xff] }
 0xb33   :  { %11003 = vmatprep.mubr.bf16.mxu1 %v7778_v25  ;;  %v7782_v25 = vpack.c.bf16 %v7735_v51, %v7734_v40  ;;  %v7786_v51 = vpack.c.bf16 %v7743_v31, %v7742_v34  ;;  %v7746_v49 = vld [vmem:[#allocation5 + $0x349] sm:$0xff]  ;;  %v18226_v31 = vpack.c.bf16 %v16424_v29, %v16418_v17  ;;  %v18227_v17 = vpack.c.bf16 %v16439_v33, %v16433_v61 }
 0xb34   :  { %v7754_v41 = vld [vmem:[#allocation5 + $0x3c9] sm:$0xff] }
 0xb35   :  { %v6961_v29 = vld [vmem:[#allocation5 + $0x1c7] sm:$0xff] }
 0xb36   :  { %8462 = vmatmul.mubr.bf16.gmra.mrb[232].mxu0 %v16741_v32  ;;  %v12178_v61 = vld [vmem:[%s17757_s15 + $0xe8] sm:$0xff]  }
 0xb37   :  { %8469 = vmatprep.mubr.bf16.mxu0 %v7100_v39  ;;  %v7733_v39 = vld [vmem:[#allocation5 + $0x231] sm:$0xff]  ;;  %v6963_v33 = vld [vmem:[#allocation5 + $0x1e7] sm:$0xff] }
 0xb38   :  { %v7781_v18 = vpack.c.bf16 %v7733_v39, %v7732_v3  ;;  %v7740_v3 = vld [vmem:[#allocation5 + $0x2e9] sm:$0xff]  ;;  %v7741_v39 = vld [vmem:[#allocation5 + $0x2f1] sm:$0xff] }
 0xb39   :  { %v7785_v40 = vpack.c.bf16 %v7741_v39, %v7740_v3 }
 0xb3a   :  { %11004 = vmatmul.mubr.bf16.gmra.mrb[8].mxu1 %v7779_v27  ;;  %v7783_v27 = vpack.c.bf16 %v7737_v42, %v7736_v7  ;;  %v7747_v7 = vld [vmem:[#allocation5 + $0x351] sm:$0xff] }
 0xb3b   :  { %11007 = vmatprep.mubr.bf16.mxu1 %v7780_v4  ;;  %v7784_v4 = vpack.c.bf16 %v7739_v2, %v7738_v57  ;;  %v7787_v57 = vpack.c.bf16 %v7745_v52, %v7744_v45  ;;  %v7788_v2 = vpack.c.bf16 %v7747_v7, %v7746_v49  ;;  %v6962_v49 = vld [vmem:[#allocation5 + $0x1cf] sm:$0xff] }
 0xb3c   :  { %v7756_v7 = vld [vmem:[#allocation5 + $0x3e9] sm:$0xff] }
 0xb3e   :  { %8470 = vmatmul.mubr.bf16.gmra.mrb[236].mxu0 %v16751_v26 }
 0xb3f   :  { %8477 = vmatprep.mubr.bf16.mxu0 %v18221_v54  ;;  %v6954_v54 = vld [vmem:[#allocation5 + $0x14f] sm:$0xff] }
 0xb42   :  { %11008 = vmatmul.mubr.bf16.gmra.mrb[12].mxu1 %v7781_v18  ;;  %v16773_v18 = vpack.c.bf16 %v6954_v54, %v6953_v53  ;;  %v7750_v53 = vld [vmem:[#allocation5 + $0x389] sm:$0xff]  ;;  %v7751_v54 = vld [vmem:[#allocation5 + $0x391] sm:$0xff] }
 0xb43   :  { %11011 = vmatprep.mubr.bf16.mxu1 %v7782_v25  ;;  %v18224_v25 = vpack.c.bf16 %v16399_v48, %v16393_v58  ;;  %v18225_v58 = vpack.c.bf16 %v16412_v13, %v16406_v5  ;;  %v6957_v48 = vld [vmem:[#allocation5 + $0x187] sm:$0xff]  ;;  %v7790_v34 = vpack.c.bf16 %v7751_v54, %v7750_v53  ;;  %v6964_v53 = vld [vmem:[#allocation5 + $0x1ef] sm:$0xff] }
 0xb44   :  { %v12177_v5 = vld [vmem:[%s17757_s15 + $0xe0] sm:$0xff]   ;;  %v7760_v54 = vld [vmem:[#allocation5 + $0x429] sm:$0xff] }
 0xb45   :  { %v6959_v13 = vld [vmem:[#allocation5 + $0x1a7] sm:$0xff]  ;;  %8695 = vmatpush1.bf16.msra.mxu0 %v12177_v5  ;;  %v16815_v5 = vpack.c.bf16 %v6964_v53, %v6963_v33  ;;  %v6978_v53 = vld [vmem:[#allocation5 + $0x30f] sm:$0xff] }
 0xb46   :  { %8478 = vmatmul.mubr.bf16.gmra.mrb[240].mxu0 %v16757_v23  ;;  %8696 = vmatprep.subr.bf16.mxu0 %v18220_v16 }
 0xb47   :  { %8485 = vmatprep.mubr.bf16.mxu0 %v18222_v10  ;;  %v6956_v10 = vld [vmem:[#allocation5 + $0x16f] sm:$0xff] }
 0xb48   :  { %v16783_v42 = vpack.c.bf16 %v6956_v10, %v6955_v12  ;;  %v7755_v12 = vld [vmem:[#allocation5 + $0x3d1] sm:$0xff] }
 0xb49   :  { %v7792_v52 = vpack.c.bf16 %v7755_v12, %v7754_v41  ;;  %8697 = vmatpush1.bf16.msra.mxu0 %v12178_v61  ;;  %v12180_v12 = vld [vmem:[%s17757_s15 + $0xf8] sm:$0xff]   ;;  %v6976_v61 = vld [vmem:[#allocation5 + $0x2ef] sm:$0xff] }
 0xb4a   :  { %11012 = vmatmul.mubr.bf16.gmra.mrb[16].mxu1 %v7783_v27  ;;  %v6958_v27 = vld [vmem:[#allocation5 + $0x18f] sm:$0xff]  ;;  %8698 = vmatprep.subr.bf16.mxu0 %v18220_v16 }
 0xb4b   :  { %11015 = vmatprep.mubr.bf16.mxu1 %v7784_v4  ;;  %v7748_v4 = vld [vmem:[#allocation5 + $0x369] sm:$0xff]  ;;  %v16789_v3 = vpack.c.bf16 %v6958_v27, %v6957_v48  ;;  %v16805_v48 = vpack.c.bf16 %v6962_v49, %v6961_v29  ;;  %v18231_v49 = vpack.c.bf16 %v16491_v19, %v16485_v60  ;;  %v18233_v60 = vpack.c.bf16 %v16517_v24, %v16511_v22 }
 0xb4c   :  { %v6973_v19 = vld [vmem:[#allocation5 + $0x2c7] sm:$0xff]  ;;  %v18235_v22 = vpack.c.bf16 %v16545_v59, %v16539_v62  ;;  %v18237_v62 = vpack.c.bf16 %v16573_v47, %v16567_v44  ;;  %v6986_v47 = vld [vmem:[#allocation5 + $0x38f] sm:$0xff] }
 0xb4d   :  { %v6977_v24 = vld [vmem:[#allocation5 + $0x307] sm:$0xff] }
 0xb4e   :  { %8486 = vmatmul.mubr.bf16.gmra.mrb[244].mxu0 %v16767_v14  ;;  %v6981_v59 = vld [vmem:[#allocation5 + $0x347] sm:$0xff] }
 0xb4f   :  { %8493 = vmatprep.mubr.bf16.mxu0 %v18223_v37  ;;  %v7749_v37 = vld [vmem:[#allocation5 + $0x371] sm:$0xff]  ;;  %v6985_v44 = vld [vmem:[#allocation5 + $0x387] sm:$0xff] }
 0xb50   :  { %v7789_v39 = vpack.c.bf16 %v7749_v37, %v7748_v4  ;;  %v18228_v37 = vpack.c.bf16 %v16451_v46, %v16445_v28  ;;  %v12179_v28 = vld [vmem:[%s17757_s15 + $0xf0] sm:$0xff]  }
 0xb51   :  { %v18229_v46 = vld [vmem:[#allocation40_spill] sm:$0xff]  ;;  %8699 = vmatpush1.bf16.msra.mxu0 %v12179_v28  ;;  %v7081_v28 = vld [vmem:[#allocation5 + $0x388] sm:$0xff] }
 0xb52   :  { %11016 = vmatmul.mubr.bf16.gmra.mrb[20].mxu1 %v7785_v40  ;;  %v6960_v40 = vld [vmem:[#allocation5 + $0x1af] sm:$0xff]  ;;  %8700 = vmatprep.subr.bf16.mxu0 %v18220_v16 }
 0xb53   :  { %11019 = vmatprep.mubr.bf16.mxu1 %v7786_v51  ;;  %v7752_v51 = vld [vmem:[#allocation5 + $0x3a9] sm:$0xff]  ;;  %v16799_v10 = vpack.c.bf16 %v6960_v40, %v6959_v13 }
 0xb55   :  { %8701 = vmatpush1.bf16.msra.mxu0 %v12180_v12  ;;  %v7084_v12 = vld [vmem:[#allocation5 + $0x3b0] sm:$0xff] }
 0xb56   :  { %8494 = vmatmul.mubr.bf16.gmra.mrb[248].mxu0 %v16773_v18  ;;  %8959 = vmatprep.subr.bf16.mxu0 %v18220_v16 }
 0xb57   :  { %8501 = vmatprep.mubr.bf16.mxu0 %v18224_v25  ;;  %v7753_v25 = vld [vmem:[#allocation5 + $0x3b1] sm:$0xff] }
 0xb58   :  { %v7791_v45 = vpack.c.bf16 %v7753_v25, %v7752_v51  ;;  %v6965_v51 = vld [vmem:[#allocation5 + $0x247] sm:$0xff]  ;;  %v6966_v25 = vld [vmem:[#allocation5 + $0x24f] sm:$0xff] }
 0xb59   :  { %v7013_v41 = vpack.c.bf16 %v6966_v25, %v6965_v51 }
 0xb5a   :  { %11020 = vmatmul.mubr.bf16.gmra.mrb[24].mxu1 %v7787_v57  ;;  %v7757_v57 = vld [vmem:[#allocation5 + $0x3f1] sm:$0xff] }
 0xb5b   :  { %11023 = vmatprep.mubr.bf16.mxu1 %v7788_v2  ;;  %v7758_v2 = vld [vmem:[#allocation5 + $0x409] sm:$0xff]  ;;  %v7793_v27 = vpack.c.bf16 %v7757_v57, %v7756_v7 }
 0xb5c   :  { %v6969_v7 = vld [vmem:[#allocation5 + $0x287] sm:$0xff]  ;;  %v6970_v57 = vld [vmem:[#allocation5 + $0x28f] sm:$0xff] }
 0xb5e   :  { %8502 = vmatmul.mubr.bf16.gmra.mrb[252].mxu0 %v16783_v42 }
 0xb5f   :  { %8509 = vmatprep.mubr.bf16.mxu0 %v18225_v58  ;;  %v7759_v58 = vld [vmem:[#allocation5 + $0x411] sm:$0xff] }
 0xb60   :  { %v7794_v4 = vpack.c.bf16 %v7759_v58, %v7758_v2  ;;  %v16836_v2 = vpack.c.bf16 %v6970_v57, %v6969_v7  ;;  %v6972_v58 = vld [vmem:[#allocation5 + $0x2af] sm:$0xff] }
 0xb62   :  { %11024 = vmatmul.mubr.bf16.gmra.mrb[28].mxu1 %v7789_v39  ;;  %v7761_v39 = vld [vmem:[#allocation5 + $0x431] sm:$0xff] }
 0xb63   :  { %11027 = vmatprep.mubr.bf16.mxu1 %v7790_v34  ;;  %v7762_v34 = vld [vmem:[#allocation5 + $0x449] sm:$0xff]  ;;  %v7795_v13 = vpack.c.bf16 %v7761_v39, %v7760_v54  ;;  %v16860_v54 = vpack.c.bf16 %v6978_v53, %v6977_v24 }
 0xb64   :  { %v6980_v39 = vld [vmem:[#allocation5 + $0x32f] sm:$0xff]  ;;  %v6991_v53 = vld [vmem:[#allocation5 + $0x3e7] sm:$0xff] }
 0xb66   :  { %8510 = vmatmul.mubr.bf16.gmra.mrb[0].mxu0 %v16789_v3 }
 0xb67   :  { %8517 = vmatprep.mubr.bf16.mxu0 %v18226_v31  ;;  %v7763_v31 = vld [vmem:[#allocation5 + $0x451] sm:$0xff] }
 0xb68   :  { %v7796_v40 = vpack.c.bf16 %v7763_v31, %v7762_v34  ;;  %v6982_v31 = vld [vmem:[#allocation5 + $0x34f] sm:$0xff] }
 0xb6a   :  { %11028 = vmatmul.mubr.bf16.gmra.mrb[32].mxu1 %v7791_v45  ;;  %v18230_v45 = vpack.c.bf16 %v16475_v63, %v16469_v15  ;;  %v18232_v15 = vpack.c.bf16 %v16503_v20, %v16497_v21  ;;  %v6971_v63 = vld [vmem:[#allocation5 + $0x2a7] sm:$0xff]  ;;  %v18234_v21 = vpack.c.bf16 %v16529_v36, %v16523_v38  ;;  %v18236_v38 = vpack.c.bf16 %v16557_v56, %v16551_v8 }
 0xb6b   :  { %11031 = vmatprep.mubr.bf16.mxu1 %v7792_v52  ;;  %v6967_v52 = vld [vmem:[#allocation5 + $0x267] sm:$0xff]  ;;  %v18238_v8 = vpack.c.bf16 %v16585_v50, %v16579_v6  ;;  %v6988_v50 = vld [vmem:[#allocation5 + $0x3af] sm:$0xff] }
 0xb6c   :  { %v6975_v20 = vld [vmem:[#allocation5 + $0x2e7] sm:$0xff] }
 0xb6d   :  { %v16854_v33 = vpack.c.bf16 %v6976_v61, %v6975_v20  ;;  %v6979_v36 = vld [vmem:[#allocation5 + $0x327] sm:$0xff] }
 0xb6e   :  { %8518 = vmatmul.mubr.bf16.gmra.mrb[4].mxu0 %v16799_v10  ;;  %v16866_v34 = vpack.c.bf16 %v6980_v39, %v6979_v36  ;;  %v6983_v56 = vld [vmem:[#allocation5 + $0x367] sm:$0xff] }
 0xb6f   :  { %8525 = vmatprep.mubr.bf16.mxu0 %v18227_v17  ;;  %v6968_v17 = vld [vmem:[#allocation5 + $0x26f] sm:$0xff]  ;;  %v6987_v6 = vld [vmem:[#allocation5 + $0x3a7] sm:$0xff] }
 0xb70   :  { %v16830_v29 = vpack.c.bf16 %v6968_v17, %v6967_v52  ;;  %v7085_v17 = vld [vmem:[#allocation5 + $0x3c8] sm:$0xff]  ;;  %v16884_v7 = vpack.c.bf16 %v6988_v50, %v6987_v6 }
 0xb71   :  { %v7089_v39 = vld [vmem:[#allocation5 + $0x408] sm:$0xff] }
 0xb72   :  { %11032 = vmatmul.mubr.bf16.gmra.mrb[36].mxu1 %v7793_v27  ;;  %v16842_v27 = vpack.c.bf16 %v6972_v58, %v6971_v63  ;;  %v6989_v63 = vld [vmem:[#allocation5 + $0x3c7] sm:$0xff]  ;;  %v6990_v58 = vld [vmem:[#allocation5 + $0x3cf] sm:$0xff] }
 0xb73   :  { %11035 = vmatprep.mubr.bf16.mxu1 %v7794_v4  ;;  %v6974_v4 = vld [vmem:[#allocation5 + $0x2cf] sm:$0xff]  ;;  %v16895_v61 = vpack.c.bf16 %v6990_v58, %v6989_v63 }
 0xb76   :  { %8526 = vmatmul.mubr.bf16.gmra.mrb[8].mxu0 %v16805_v48 }
 0xb77   :  { %8533 = vmatprep.mubr.bf16.mxu0 %v18228_v37  ;;  %v16848_v37 = vpack.c.bf16 %v6974_v4, %v6973_v19  ;;  %v7087_v19 = vld [vmem:[#allocation5 + $0x3e8] sm:$0xff]  ;;  %v7088_v4 = vld [vmem:[#allocation5 + $0x3f0] sm:$0xff] }
 0xb7a   :  { %11036 = vmatmul.mubr.bf16.gmra.mrb[40].mxu1 %v7795_v13  ;;  %v16872_v13 = vpack.c.bf16 %v6982_v31, %v6981_v59 }
 0xb7b   :  { %11039 = vmatprep.mubr.bf16.mxu1 %v7796_v40  ;;  %v6984_v40 = vld [vmem:[#allocation5 + $0x36f] sm:$0xff] }
 0xb7c   :  { %v16878_v51 = vpack.c.bf16 %v6984_v40, %v6983_v56 }
 0xb7e   :  { %8534 = vmatmul.mubr.bf16.gmra.mrb[12].mxu0 %v16815_v5 }
 0xb7f   :  { %8541 = vmatprep.mubr.bf16.mxu0 %v18229_v46  ;;  %v7082_v46 = vld [vmem:[#allocation5 + $0x390] sm:$0xff] }
 0xb80   :  { %v7119_v25 = vpack.c.bf16 %v7082_v46, %v7081_v28  ;;  %v6993_v28 = vld [vmem:[#allocation5 + $0x407] sm:$0xff]  ;;  %v6994_v46 = vld [vmem:[#allocation5 + $0x40f] sm:$0xff] }
 0xb86   :  { %8542 = vmatmul.mubr.bf16.gmra.mrb[16].mxu0 %v7013_v41  ;;  %v7083_v41 = vld [vmem:[#allocation5 + $0x3a8] sm:$0xff] }
 0xb87   :  { %8549 = vmatprep.mubr.bf16.mxu0 %v18230_v45  ;;  %v16881_v45 = vpack.c.bf16 %v6986_v47, %v6985_v44  ;;  %v7120_v52 = vpack.c.bf16 %v7084_v12, %v7083_v41  ;;  %v7091_v44 = vld [vmem:[#allocation5 + $0x428] sm:$0xff]  ;;  %v7092_v47 = vld [vmem:[#allocation5 + $0x430] sm:$0xff] }
 0xb88   :  { %v7124_v6 = vpack.c.bf16 %v7092_v47, %v7091_v44  ;;  %v7127_v44 = vld [vmem:[#allocation5 + $0x29] sm:$0xff]  ;;  %v7128_v47 = vld [vmem:[#allocation5 + $0x31] sm:$0xff] }
 0xb8e   :  { %8550 = vmatmul.mubr.bf16.gmra.mrb[20].mxu0 %v16830_v29 }
 0xb8f   :  { %8557 = vmatprep.mubr.bf16.mxu0 %v18231_v49  ;;  %v7086_v49 = vld [vmem:[#allocation5 + $0x3d0] sm:$0xff] }
 0xb90   :  { %v7121_v57 = vpack.c.bf16 %v7086_v49, %v7085_v17  ;;  %v6995_v17 = vld [vmem:[#allocation5 + $0x427] sm:$0xff]  ;;  %v6996_v49 = vld [vmem:[#allocation5 + $0x42f] sm:$0xff] }
 0xb96   :  { %8558 = vmatmul.mubr.bf16.gmra.mrb[24].mxu0 %v16836_v2 }
 0xb97   :  { %8565 = vmatprep.mubr.bf16.mxu0 %v18232_v15 }
 0xb9e   :  { %8566 = vmatmul.mubr.bf16.gmra.mrb[28].mxu0 %v16842_v27 }
 0xb9f   :  { %8573 = vmatprep.mubr.bf16.mxu0 %v18233_v60 }
 0xba6   :  { %8574 = vmatmul.mubr.bf16.gmra.mrb[32].mxu0 %v16848_v37 }
 0xba7   :  { %8581 = vmatprep.mubr.bf16.mxu0 %v18234_v21 }
 0xbae   :  { %8582 = vmatmul.mubr.bf16.gmra.mrb[36].mxu0 %v16854_v33 }
 0xbaf   :  { %8589 = vmatprep.mubr.bf16.mxu0 %v18235_v22  ;;  %v7122_v22 = vpack.c.bf16 %v7088_v4, %v7087_v19  ;;  %v16928_v19 = vpack.c.bf16 %v6996_v49, %v6995_v17  ;;  %v7125_v4 = vld [vmem:[#allocation5 + $0x9] sm:$0xff] }
 0xbb6   :  { %8590 = vmatmul.mubr.bf16.gmra.mrb[40].mxu0 %v16860_v54 }
 0xbb7   :  { %8597 = vmatprep.mubr.bf16.mxu0 %v18236_v38  ;;  %v6992_v38 = vld [vmem:[#allocation5 + $0x3ef] sm:$0xff] }
 0xbbe   :  { %8598 = vmatmul.mubr.bf16.gmra.mrb[44].mxu0 %v16866_v34 }
 0xbbf   :  { %8605 = vmatprep.mubr.bf16.mxu0 %v18237_v62  ;;  %v7090_v62 = vld [vmem:[#allocation5 + $0x410] sm:$0xff] }
 0xbc0   :  { %v7123_v56 = vpack.c.bf16 %v7090_v62, %v7089_v39 }
 0xbc6   :  { %8606 = vmatmul.mubr.bf16.gmra.mrb[48].mxu0 %v16872_v13 }
 0xbc7   :  { %8613 = vmatprep.mubr.bf16.mxu0 %v18238_v8  ;;  %v16906_v8 = vpack.c.bf16 %v6992_v38, %v6991_v53 }
 0xbce   :  { %8614 = vmatmul.mubr.bf16.gmra.mrb[52].mxu0 %v16878_v51 }
 0xbcf   :  { %8621 = vmatprep.mubr.bf16.mxu0 %v7119_v25 }
 0xbd6   :  { %8622 = vmatmul.mubr.bf16.gmra.mrb[56].mxu0 %v16881_v45 }
 0xbd7   :  { %8629 = vmatprep.mubr.bf16.mxu0 %v7120_v52  ;;  %v16917_v52 = vpack.c.bf16 %v6994_v46, %v6993_v28 }
 0xbdd   :  { %v16887_v15 = vpop.f32.mrb[240].mxu1 }
 0xbde   :  { %8630 = vmatmul.mubr.bf16.gmra.mrb[60].mxu0 %v16884_v7  ;;  %v16889_v60 = vpop.f32.mrb[241].mxu1 }
 0xbdf   :  { %8637 = vmatprep.mubr.bf16.mxu0 %v7121_v57  ;;  %v16891_v21 = vpop.f32.mrb[242].mxu1 }
 0xbe0   :  { %v16893_v20 = vpop.f32.mrb[243].mxu1 }
 0xbe5   :  { %v16898_v24 = vpop.f32.mrb[244].mxu1 }
 0xbe6   :  { %8638 = vmatmul.mubr.bf16.gmra.mrb[64].mxu0 %v16895_v61  ;;  %v16900_v36 = vpop.f32.mrb[245].mxu1 }
 0xbe7   :  { %8645 = vmatprep.mubr.bf16.mxu0 %v7122_v22  ;;  %v16902_v59 = vpop.f32.mrb[246].mxu1  ;;  %v7126_v22 = vld [vmem:[#allocation5 + $0x11] sm:$0xff] }
 0xbe8   :  { %v16904_v31 = vpop.f32.mrb[247].mxu1  ;;  %v7189_v39 = vpack.c.bf16 %v7126_v22, %v7125_v4  ;;  %v16959_v4 = vpack.c.bf16 %v7128_v47, %v7127_v44  ;;  %v12184_v22 = vld [vmem:[%s17757_s15 + $0x118] sm:$0xff]   ;;  %v12185_v44 = vld [vmem:[%s17757_s15 + $0x120] sm:$0xff]  }
 0xbed   :  { %v16909_v40 = vpop.f32.mrb[248].mxu1 }
 0xbee   :  { %8646 = vmatmul.mubr.bf16.gmra.mrb[68].mxu0 %v16906_v8  ;;  %v16911_v25 = vpop.f32.mrb[249].mxu1 }
 0xbef   :  { %8653 = vmatprep.mubr.bf16.mxu0 %v7123_v56  ;;  %v16913_v41 = vpop.f32.mrb[250].mxu1  ;;  %v12181_v56 = vld [vmem:[%s17757_s15 + $0x100] sm:$0xff]  }
 0xbf0   :  { %v16915_v12 = vpop.f32.mrb[251].mxu1 }
 0xbf5   :  { %v16920_v50 = vpop.f32.mrb[252].mxu1 }
 0xbf6   :  { %8654 = vmatmul.mubr.bf16.gmra.mrb[72].mxu0 %v16917_v52  ;;  %v16922_v57 = vpop.f32.mrb[253].mxu1 }
 0xbf7   :  { %8661 = vmatprep.mubr.bf16.mxu0 %v7124_v6  ;;  %v16924_v63 = vpop.f32.mrb[254].mxu1 }
 0xbf8   :  { %v16926_v58 = vpop.f32.mrb[255].mxu1 }
 0xbfd   :  { %v16932_v53 = vpop.f32.mrb[0].mxu1 }
 0xbfe   :  { %8662 = vmatmul.mubr.bf16.gmra.mrb[76].mxu0 %v16928_v19  ;;  %v16934_v38 = vpop.f32.mrb[1].mxu1 }
 0xbff   :  { %8702 = vmatprep.mubr.bf16.mxu0 %v16651_v11  ;;  %v16936_v62 = vpop.f32.mrb[2].mxu1  ;;  %v12182_v11 = vld [vmem:[%s17757_s15 + $0x108] sm:$0xff]  }
 0xc00   :  { %v16941_v28 = vpop.f32.mrb[3].mxu1 }
 0xc05   :  { %v16948_v46 = vpop.f32.mrb[4].mxu1 }
 0xc06   :  { %8703 = vmatmul.mubr.bf16.vlgmr.msra.gmra.mrb[208].mxu0 %v7189_v39  ;;  %v16950_v6 = vpop.f32.mrb[5].mxu1 }
 0xc07   :  { %8710 = vmatprep.mubr.bf16.mxu0 %v16675_v43  ;;  %8960 = vmatpush1.bf16.msra.mxu0 %v12181_v56  ;;  %v16952_v17 = vpop.f32.mrb[6].mxu1  ;;  %v12183_v43 = vld [vmem:[%s17757_s15 + $0x110] sm:$0xff]  }
 0xc08   :  { %8961 = vmatprep.subr.bf16.mxu0 %v18220_v16  ;;  %18239 = vst [vmem:[#allocation17_spill] sm:$0xff] %v16952_v17  ;;  %v16957_v49 = vpop.f32.mrb[7].mxu1 }
 0xc0b   :  { %8962 = vmatpush1.bf16.msra.mxu0 %v12182_v11 }
 0xc0c   :  { %8963 = vmatprep.subr.bf16.mxu0 %v18220_v16 }
 0xc0d   :  { %v16968_v39 = vpop.f32.mrb[8].mxu1 }
 0xc0e   :  { %8711 = vmatmul.mubr.bf16.gmra.mrb[212].mxu0 %v16959_v4  ;;  %18240 = vst [vmem:[#allocation22_spill] sm:$0xff] %v16968_v39  ;;  %v16970_v56 = vpop.f32.mrb[9].mxu1 }
 0xc0f   :  { %8718 = vmatprep.mubr.bf16.mxu0 %v16709_v9  ;;  %8964 = vmatpush1.bf16.msra.mxu0 %v12183_v43  ;;  %18241 = vst [vmem:[#allocation19_spill] sm:$0xff] %v16970_v56  ;;  %v16972_v11 = vpop.f32.mrb[10].mxu1  ;;  %v12186_v9 = vld [vmem:[%s17757_s15 + $0x128] sm:$0xff]   ;;  %v12199_v56 = vld [vmem:[%s17757_s15 + $0x190] sm:$0xff]  }
 0xc10   :  { %8965 = vmatprep.subr.bf16.mxu0 %v18220_v16  ;;  %18242 = vst [vmem:[#allocation37_spill] sm:$0xff] %v16972_v11  ;;  %v16977_v47 = vpop.f32.mrb[11].mxu1 }
 0xc11   :  { %18243 = vst [vmem:[#allocation36_spill] sm:$0xff] %v16977_v47  ;;  %v7416_v47 = vld [vmem:[#allocation5 + $0x51] sm:$0xff] }
 0xc13   :  { %8966 = vmatpush1.bf16.msra.mxu0 %v12184_v22 }
 0xc14   :  { %8967 = vmatprep.subr.bf16.mxu0 %v18220_v16 }
 0xc15   :  { %v16986_v43 = vpop.f32.mrb[12].mxu1 }
 0xc16   :  { %8719 = vmatmul.mubr.bf16.gmra.mrb[216].mxu0 %v16649_v30  ;;  %18244 = vst [vmem:[#allocation24_spill] sm:$0xff] %v16986_v43  ;;  %v16988_v22 = vpop.f32.mrb[13].mxu1  ;;  %v12187_v30 = vld [vmem:[%s17757_s15 + $0x130] sm:$0xff]  }
 0xc17   :  { %8726 = vmatprep.mubr.bf16.mxu0 %v16724_v1  ;;  %8968 = vmatpush1.bf16.msra.mxu0 %v12185_v44  ;;  %18245 = vst [vmem:[#allocation29_spill] sm:$0xff] %v16988_v22  ;;  %v16990_v11 = vpop.f32.mrb[14].mxu1  ;;  %v12188_v1 = vld [vmem:[%s17757_s15 + $0x138] sm:$0xff]  }
 0xc18   :  { %8969 = vmatprep.subr.bf16.mxu0 %v18220_v16  ;;  %18246 = vst [vmem:[#allocation45_spill] sm:$0xff] %v16990_v11  ;;  %v16995_v39 = vpop.f32.mrb[15].mxu1 }
 0xc19   :  { %18247 = vst [vmem:[#allocation43_spill] sm:$0xff] %v16995_v39 }
 0xc1b   :  { %8970 = vmatpush1.bf16.msra.mxu0 %v12186_v9 }
 0xc1c   :  { %8971 = vmatprep.subr.bf16.mxu0 %v18220_v16 }
 0xc1d   :  { %v17004_v44 = vpop.f32.mrb[16].mxu1 }
 0xc1e   :  { %8727 = vmatmul.mubr.bf16.gmra.mrb[220].mxu0 %v16653_v35  ;;  %18248 = vst [vmem:[#allocation44_spill] sm:$0xff] %v17004_v44  ;;  %v17006_v9 = vpop.f32.mrb[17].mxu1  ;;  %v12189_v35 = vld [vmem:[%s17757_s15 + $0x140] sm:$0xff]   ;;  %v7136_v44 = vld [vmem:[#allocation5 + $0xb1] sm:$0xff] }
 0xc1f   :  { %8734 = vmatprep.mubr.bf16.mxu0 %v16735_v55  ;;  %8972 = vmatpush1.bf16.msra.mxu0 %v12187_v30  ;;  %18249 = vst [vmem:[#allocation33_spill] sm:$0xff] %v17006_v9  ;;  %v17008_v11 = vpop.f32.mrb[18].mxu1  ;;  %v7135_v30 = vld [vmem:[#allocation5 + $0xa9] sm:$0xff] }
 0xc20   :  { %8973 = vmatprep.subr.bf16.mxu0 %v18220_v16  ;;  %18250 = vst [vmem:[#allocation30_spill] sm:$0xff] %v17008_v11  ;;  %v17010_v43 = vpop.f32.mrb[19].mxu1 }
 0xc21   :  { %18251 = vst [vmem:[#allocation49_spill] sm:$0xff] %v17010_v43  ;;  %v7138_v43 = vld [vmem:[#allocation5 + $0xd1] sm:$0xff] }
 0xc23   :  { %8974 = vmatpush1.bf16.msra.mxu0 %v12188_v1 }
 0xc24   :  { %8975 = vmatprep.subr.bf16.mxu0 %v18220_v16 }
 0xc25   :  { %v17018_v55 = vpop.f32.mrb[20].mxu1 }
 0xc26   :  { %8735 = vmatmul.mubr.bf16.gmra.mrb[224].mxu0 %v16658_v0  ;;  %18252 = vst [vmem:[#allocation32_spill] sm:$0xff] %v17018_v55  ;;  %v17020_v9 = vpop.f32.mrb[21].mxu1  ;;  %v17027_v0 = vpack.c.bf16 %v7136_v44, %v7135_v30  ;;  %v7137_v55 = vld [vmem:[#allocation5 + $0xc9] sm:$0xff] }
 0xc27   :  { %8742 = vmatprep.mubr.bf16.mxu0 %v16741_v32  ;;  %8976 = vmatpush1.bf16.msra.mxu0 %v12189_v35  ;;  %18253 = vst [vmem:[#allocation42_spill] sm:$0xff] %v17020_v9  ;;  %v17023_v1 = vpop.f32.mrb[22].mxu1  ;;  %v17039_v22 = vpack.c.bf16 %v7138_v43, %v7137_v55  ;;  %v7139_v30 = vld [vmem:[#allocation5 + $0xe9] sm:$0xff] }
 0xc28   :  { %8977 = vmatprep.subr.bf16.mxu0 %v18220_v16  ;;  %18254 = vst [vmem:[#allocation47_spill] sm:$0xff] %v17023_v1  ;;  %v17025_v11 = vpop.f32.mrb[23].mxu1 }
 0xc29   :  { %18255 = vst [vmem:[#allocation48_spill] sm:$0xff] %v17025_v11 }
 0xc2d   :  { %v17031_v32 = vpop.f32.mrb[24].mxu1 }
 0xc2e   :  { %8743 = vmatmul.mubr.bf16.gmra.mrb[228].mxu0 %v17027_v0  ;;  %18256 = vst [vmem:[#allocation51_spill] sm:$0xff] %v17031_v32  ;;  %v17033_v39 = vpop.f32.mrb[25].mxu1  ;;  %v7140_v32 = vld [vmem:[#allocation5 + $0xf1] sm:$0xff] }
 0xc2f   :  { %8750 = vmatprep.mubr.bf16.mxu0 %v16751_v26  ;;  %18257 = vst [vmem:[#allocation50_spill] sm:$0xff] %v17033_v39  ;;  %v17035_v35 = vpop.f32.mrb[26].mxu1  ;;  %v12190_v26 = vld [vmem:[%s17757_s15 + $0x148] sm:$0xff]   ;;  %v17055_v55 = vpack.c.bf16 %v7140_v32, %v7139_v30 }
 0xc30   :  { %18258 = vst [vmem:[#allocation6_spill] sm:$0xff] %v17035_v35  ;;  %v17037_v9 = vpop.f32.mrb[27].mxu1  ;;  %8978 = vmatpush1.bf16.msra.mxu0 %v12190_v26  ;;  %v7143_v30 = vld [vmem:[#allocation5 + $0x129] sm:$0xff] }
 0xc31   :  { %18259 = vst [vmem:[#allocation7_spill] sm:$0xff] %v17037_v9  ;;  %8979 = vmatprep.subr.bf16.mxu0 %v18220_v16  ;;  %v7142_v9 = vld [vmem:[#allocation5 + $0x111] sm:$0xff] }
 0xc35   :  { %v17046_v44 = vpop.f32.mrb[28].mxu1 }
 0xc36   :  { %8751 = vmatmul.mubr.bf16.gmra.mrb[232].mxu0 %v17039_v22  ;;  %18260 = vst [vmem:[#allocation8_spill] sm:$0xff] %v17046_v44  ;;  %v17048_v39 = vpop.f32.mrb[29].mxu1  ;;  %v7141_v44 = vld [vmem:[#allocation5 + $0x109] sm:$0xff] }
 0xc37   :  { %8758 = vmatprep.mubr.bf16.mxu0 %v16757_v23  ;;  %18261 = vst [vmem:[#allocation53_spill] sm:$0xff] %v17048_v39  ;;  %v17051_v35 = vpop.f32.mrb[30].mxu1  ;;  %v17067_v11 = vpack.c.bf16 %v7142_v9, %v7141_v44 }
 0xc38   :  { %18262 = vst [vmem:[#allocation9_spill] sm:$0xff] %v17051_v35  ;;  %v17053_v43 = vpop.f32.mrb[31].mxu1 }
 0xc39   :  { %18263 = vst [vmem:[#allocation10_spill] sm:$0xff] %v17053_v43 }
 0xc3d   :  { %v17059_v23 = vpop.f32.mrb[32].mxu1 }
 0xc3e   :  { %8759 = vmatmul.mubr.bf16.gmra.mrb[236].mxu0 %v17055_v55  ;;  %18264 = vst [vmem:[#allocation11_spill] sm:$0xff] %v17059_v23  ;;  %v17061_v1 = vpop.f32.mrb[33].mxu1  ;;  %v7144_v23 = vld [vmem:[#allocation5 + $0x131] sm:$0xff] }
 0xc3f   :  { %8766 = vmatprep.mubr.bf16.mxu0 %v16767_v14  ;;  %18265 = vst [vmem:[#allocation12_spill] sm:$0xff] %v17061_v1  ;;  %v17063_v26 = vpop.f32.mrb[34].mxu1  ;;  %v12191_v14 = vld [vmem:[%s17757_s15 + $0x150] sm:$0xff]   ;;  %v17083_v44 = vpack.c.bf16 %v7144_v23, %v7143_v30 }
 0xc40   :  { %18266 = vst [vmem:[#allocation55_spill] sm:$0xff] %v17063_v26  ;;  %v17065_v39 = vpop.f32.mrb[35].mxu1  ;;  %8980 = vmatpush1.bf16.msra.mxu0 %v12191_v14  ;;  %v7147_v23 = vld [vmem:[#allocation5 + $0x169] sm:$0xff]  ;;  %v7148_v30 = vld [vmem:[#allocation5 + $0x171] sm:$0xff] }
 0xc41   :  { %18267 = vst [vmem:[#allocation13_spill] sm:$0xff] %v17065_v39  ;;  %8981 = vmatprep.subr.bf16.mxu0 %v18220_v16  ;;  %v7146_v39 = vld [vmem:[#allocation5 + $0x151] sm:$0xff] }
 0xc45   :  { %v17074_v32 = vpop.f32.mrb[36].mxu1 }
 0xc46   :  { %8767 = vmatmul.mubr.bf16.gmra.mrb[240].mxu0 %v17067_v11  ;;  %18268 = vst [vmem:[#allocation56_spill] sm:$0xff] %v17074_v32  ;;  %v17076_v1 = vpop.f32.mrb[37].mxu1  ;;  %v7145_v32 = vld [vmem:[#allocation5 + $0x149] sm:$0xff] }
 0xc47   :  { %8774 = vmatprep.mubr.bf16.mxu0 %v16773_v18  ;;  %18269 = vst [vmem:[#allocation15_spill] sm:$0xff] %v17076_v1  ;;  %v17079_v26 = vpop.f32.mrb[38].mxu1  ;;  %v17095_v43 = vpack.c.bf16 %v7146_v39, %v7145_v32  ;;  %v7149_v39 = vld [vmem:[#allocation5 + $0x189] sm:$0xff]  ;;  %v7150_v32 = vld [vmem:[#allocation5 + $0x191] sm:$0xff] }
 0xc48   :  { %18270 = vst [vmem:[#allocation14_spill] sm:$0xff] %v17079_v26  ;;  %v17081_v9 = vpop.f32.mrb[39].mxu1 }
 0xc49   :  { %18271 = vst [vmem:[#allocation16_spill] sm:$0xff] %v17081_v9 }
 0xc4d   :  { %v17087_v18 = vpop.f32.mrb[40].mxu1 }
 0xc4e   :  { %8775 = vmatmul.mubr.bf16.gmra.mrb[244].mxu0 %v17083_v44  ;;  %18272 = vst [vmem:[#allocation21_spill] sm:$0xff] %v17087_v18  ;;  %v17089_v35 = vpop.f32.mrb[41].mxu1  ;;  %v17103_v18 = vpack.c.bf16 %v7148_v30, %v7147_v23  ;;  %v7154_v30 = vld [vmem:[#allocation5 + $0x1d1] sm:$0xff] }
 0xc4f   :  { %8782 = vmatprep.mubr.bf16.mxu0 %v16783_v42  ;;  %18273 = vst [vmem:[#allocation18_spill] sm:$0xff] %v17089_v35  ;;  %v17091_v14 = vpop.f32.mrb[42].mxu1  ;;  %v12192_v42 = vld [vmem:[%s17757_s15 + $0x158] sm:$0xff]  }
 0xc50   :  { %18274 = vst [vmem:[#allocation20_spill] sm:$0xff] %v17091_v14  ;;  %v17093_v1 = vpop.f32.mrb[43].mxu1  ;;  %8982 = vmatpush1.bf16.msra.mxu0 %v12192_v42  ;;  %v17107_v14 = vpack.c.bf16 %v7150_v32, %v7149_v39  ;;  %v7151_v42 = vld [vmem:[#allocation5 + $0x1a9] sm:$0xff] }
 0xc51   :  { %18275 = vst [vmem:[#allocation25_spill] sm:$0xff] %v17093_v1  ;;  %8983 = vmatprep.subr.bf16.mxu0 %v18220_v16  ;;  %v7152_v1 = vld [vmem:[#allocation5 + $0x1b1] sm:$0xff]  ;;  %v7251_v39 = vld [vmem:[#allocation5 + $0x207] sm:$0xff] }
 0xc52   :  { %v17115_v23 = vpack.c.bf16 %v7152_v1, %v7151_v42  ;;  %v7252_v32 = vld [vmem:[#allocation5 + $0x20f] sm:$0xff] }
 0xc53   :  { %v7300_v35 = vpack.c.bf16 %v7252_v32, %v7251_v39  ;;  %v7155_v1 = vld [vmem:[#allocation5 + $0x1e9] sm:$0xff]  ;;  %v7156_v42 = vld [vmem:[#allocation5 + $0x1f1] sm:$0xff] }
 0xc54   :  { %v12196_v39 = vld [vmem:[%s17757_s15 + $0x178] sm:$0xff]  }
 0xc56   :  { %8783 = vmatmul.mubr.bf16.gmra.mrb[248].mxu0 %v17095_v43 }
 0xc57   :  { %8790 = vmatprep.mubr.bf16.mxu0 %v16789_v3  ;;  %v12193_v3 = vld [vmem:[%s17757_s15 + $0x160] sm:$0xff]  }
 0xc58   :  { %8984 = vmatpush1.bf16.msra.mxu0 %v12193_v3  ;;  %v12194_v3 = vld [vmem:[%s17757_s15 + $0x168] sm:$0xff]  }
 0xc59   :  { %8985 = vmatprep.subr.bf16.mxu0 %v18220_v16 }
 0xc5c   :  { %8986 = vmatpush1.bf16.msra.mxu0 %v12194_v3  ;;  %v7159_v3 = vld [vmem:[#allocation5 + $0x269] sm:$0xff] }
 0xc5d   :  { %8987 = vmatprep.subr.bf16.mxu0 %v18220_v16 }
 0xc5e   :  { %8791 = vmatmul.mubr.bf16.gmra.mrb[252].mxu0 %v17103_v18 }
 0xc5f   :  { %8798 = vmatprep.mubr.bf16.mxu0 %v16799_v10  ;;  %v7153_v10 = vld [vmem:[#allocation5 + $0x1c9] sm:$0xff] }
 0xc66   :  { %8799 = vmatmul.mubr.bf16.gmra.mrb[0].mxu0 %v17107_v14 }
 0xc67   :  { %8806 = vmatprep.mubr.bf16.mxu0 %v16805_v48  ;;  %v17119_v48 = vpack.c.bf16 %v7154_v30, %v7153_v10  ;;  %v12195_v10 = vld [vmem:[%s17757_s15 + $0x170] sm:$0xff]  }
 0xc68   :  { %v7158_v30 = vld [vmem:[#allocation5 + $0x251] sm:$0xff]  ;;  %8988 = vmatpush1.bf16.msra.mxu0 %v12195_v10 }
 0xc69   :  { %8989 = vmatprep.subr.bf16.mxu0 %v18220_v16  ;;  %v7162_v10 = vld [vmem:[#allocation5 + $0x291] sm:$0xff] }
 0xc6c   :  { %8990 = vmatpush1.bf16.msra.mxu0 %v12196_v39 }
 0xc6d   :  { %9248 = vmatprep.subr.bf16.mxu0 %v18220_v16 }
 0xc6e   :  { %8807 = vmatmul.mubr.bf16.gmra.mrb[4].mxu0 %v17115_v23 }
 0xc6f   :  { %8814 = vmatprep.mubr.bf16.mxu0 %v16815_v5  ;;  %v17126_v5 = vpack.c.bf16 %v7156_v42, %v7155_v1  ;;  %v7160_v1 = vld [vmem:[#allocation5 + $0x271] sm:$0xff] }
 0xc70   :  { %v17139_v42 = vpack.c.bf16 %v7160_v1, %v7159_v3  ;;  %v7168_v1 = vld [vmem:[#allocation5 + $0x2f1] sm:$0xff] }
 0xc76   :  { %8815 = vmatmul.mubr.bf16.gmra.mrb[8].mxu0 %v17119_v48 }
 0xc77   :  { %8822 = vmatprep.mubr.bf16.mxu0 %v7300_v35  ;;  %v7157_v35 = vld [vmem:[#allocation5 + $0x249] sm:$0xff] }
 0xc78   :  { %v7205_v32 = vpack.c.bf16 %v7158_v30, %v7157_v35  ;;  %v7163_v35 = vld [vmem:[#allocation5 + $0x2a9] sm:$0xff]  ;;  %v7164_v30 = vld [vmem:[#allocation5 + $0x2b1] sm:$0xff] }
 0xc79   :  { %v17147_v39 = vpack.c.bf16 %v7164_v30, %v7163_v35  ;;  %v7172_v30 = vld [vmem:[#allocation5 + $0x331] sm:$0xff] }
 0xc7e   :  { %8823 = vmatmul.mubr.bf16.gmra.mrb[12].mxu0 %v17126_v5 }
 0xc7f   :  { %8830 = vmatprep.mubr.bf16.mxu0 %v16830_v29  ;;  %v7161_v29 = vld [vmem:[#allocation5 + $0x289] sm:$0xff] }
 0xc80   :  { %v17143_v26 = vpack.c.bf16 %v7162_v10, %v7161_v29  ;;  %v7170_v10 = vld [vmem:[#allocation5 + $0x311] sm:$0xff] }
 0xc86   :  { %8831 = vmatmul.mubr.bf16.gmra.mrb[16].mxu0 %v7205_v32  ;;  %v7166_v32 = vld [vmem:[#allocation5 + $0x2d1] sm:$0xff] }
 0xc87   :  { %8838 = vmatprep.mubr.bf16.mxu0 %v16836_v2  ;;  %v7165_v2 = vld [vmem:[#allocation5 + $0x2c9] sm:$0xff] }
 0xc88   :  { %v17151_v3 = vpack.c.bf16 %v7166_v32, %v7165_v2  ;;  %v7174_v32 = vld [vmem:[#allocation5 + $0x351] sm:$0xff] }
 0xc8e   :  { %8839 = vmatmul.mubr.bf16.gmra.mrb[20].mxu0 %v17139_v42 }
 0xc8f   :  { %8846 = vmatprep.mubr.bf16.mxu0 %v16842_v27  ;;  %v7167_v27 = vld [vmem:[#allocation5 + $0x2e9] sm:$0xff] }
 0xc90   :  { %v17155_v29 = vpack.c.bf16 %v7168_v1, %v7167_v27  ;;  %v7176_v1 = vld [vmem:[#allocation5 + $0x371] sm:$0xff] }
 0xc96   :  { %8847 = vmatmul.mubr.bf16.gmra.mrb[24].mxu0 %v17143_v26 }
 0xc97   :  { %8854 = vmatprep.mubr.bf16.mxu0 %v16848_v37  ;;  %v7169_v37 = vld [vmem:[#allocation5 + $0x309] sm:$0xff] }
 0xc98   :  { %v17159_v35 = vpack.c.bf16 %v7170_v10, %v7169_v37  ;;  %v7178_v10 = vld [vmem:[#allocation5 + $0x391] sm:$0xff] }
 0xc9e   :  { %8855 = vmatmul.mubr.bf16.gmra.mrb[28].mxu0 %v17147_v39 }
 0xc9f   :  { %8862 = vmatprep.mubr.bf16.mxu0 %v16854_v33  ;;  %v7171_v33 = vld [vmem:[#allocation5 + $0x329] sm:$0xff] }
 0xca0   :  { %v17163_v2 = vpack.c.bf16 %v7172_v30, %v7171_v33  ;;  %v7180_v30 = vld [vmem:[#allocation5 + $0x3b1] sm:$0xff] }
 0xca6   :  { %8863 = vmatmul.mubr.bf16.gmra.mrb[32].mxu0 %v17151_v3 }
 0xca7   :  { %8870 = vmatprep.mubr.bf16.mxu0 %v16860_v54  ;;  %v7173_v54 = vld [vmem:[#allocation5 + $0x349] sm:$0xff] }
 0xca8   :  { %v17167_v27 = vpack.c.bf16 %v7174_v32, %v7173_v54  ;;  %v7182_v32 = vld [vmem:[#allocation5 + $0x3d1] sm:$0xff] }
 0xcae   :  { %8871 = vmatmul.mubr.bf16.gmra.mrb[36].mxu0 %v17155_v29 }
 0xcaf   :  { %8878 = vmatprep.mubr.bf16.mxu0 %v16866_v34  ;;  %v7175_v34 = vld [vmem:[#allocation5 + $0x369] sm:$0xff] }
 0xcb0   :  { %v17171_v37 = vpack.c.bf16 %v7176_v1, %v7175_v34  ;;  %v7184_v1 = vld [vmem:[#allocation5 + $0x3f1] sm:$0xff] }
 0xcb6   :  { %8879 = vmatmul.mubr.bf16.gmra.mrb[40].mxu0 %v17159_v35 }
 0xcb7   :  { %8886 = vmatprep.mubr.bf16.mxu0 %v16872_v13  ;;  %v7177_v13 = vld [vmem:[#allocation5 + $0x389] sm:$0xff] }
 0xcb8   :  { %v17175_v33 = vpack.c.bf16 %v7178_v10, %v7177_v13  ;;  %v7186_v10 = vld [vmem:[#allocation5 + $0x411] sm:$0xff] }
 0xcbe   :  { %8887 = vmatmul.mubr.bf16.gmra.mrb[44].mxu0 %v17163_v2 }
 0xcbf   :  { %8894 = vmatprep.mubr.bf16.mxu0 %v16878_v51  ;;  %v7179_v51 = vld [vmem:[#allocation5 + $0x3a9] sm:$0xff] }
 0xcc0   :  { %v17179_v54 = vpack.c.bf16 %v7180_v30, %v7179_v51  ;;  %v7283_v51 = vld [vmem:[#allocation5 + $0x447] sm:$0xff] }
 0xcc6   :  { %8895 = vmatmul.mubr.bf16.gmra.mrb[48].mxu0 %v17167_v27 }
 0xcc7   :  { %8902 = vmatprep.mubr.bf16.mxu0 %v16881_v45  ;;  %v7181_v45 = vld [vmem:[#allocation5 + $0x3c9] sm:$0xff] }
 0xcc8   :  { %v17183_v34 = vpack.c.bf16 %v7182_v32, %v7181_v45  ;;  %v7187_v32 = vld [vmem:[#allocation5 + $0x429] sm:$0xff] }
 0xcce   :  { %8903 = vmatmul.mubr.bf16.gmra.mrb[52].mxu0 %v17171_v37 }
 0xccf   :  { %8910 = vmatprep.mubr.bf16.mxu0 %v16884_v7  ;;  %v7183_v7 = vld [vmem:[#allocation5 + $0x3e9] sm:$0xff] }
 0xcd0   :  { %v17187_v13 = vpack.c.bf16 %v7184_v1, %v7183_v7  ;;  %v7317_v7 = vld [vmem:[#allocation5 + $0x28] sm:$0xff] }
 0xcd1   :  { %v7415_v1 = vld [vmem:[#allocation5 + $0x49] sm:$0xff] }
 0xcd6   :  { %8911 = vmatmul.mubr.bf16.gmra.mrb[56].mxu0 %v17175_v33 }
 0xcd7   :  { %8918 = vmatprep.mubr.bf16.mxu0 %v16895_v61  ;;  %v7185_v61 = vld [vmem:[#allocation5 + $0x409] sm:$0xff] }
 0xcd8   :  { %v17191_v30 = vpack.c.bf16 %v7186_v10, %v7185_v61  ;;  %v12197_v61 = vld [vmem:[%s17757_s15 + $0x180] sm:$0xff]  }
 0xcde   :  { %8919 = vmatmul.mubr.bf16.gmra.mrb[60].mxu0 %v17179_v54 }
 0xcdf   :  { %8926 = vmatprep.mubr.bf16.mxu0 %v16906_v8  ;;  %v7284_v8 = vld [vmem:[#allocation5 + $0x44f] sm:$0xff] }
 0xce0   :  { %v7316_v45 = vpack.c.bf16 %v7284_v8, %v7283_v51  ;;  %v7478_v51 = vpack.c.bf16 %v7416_v47, %v7415_v1  ;;  %v12198_v8 = vld [vmem:[%s17757_s15 + $0x188] sm:$0xff]  }
 0xce1   :  { %v7321_v1 = vld [vmem:[#allocation5 + $0x68] sm:$0xff] }
 0xce6   :  { %8927 = vmatmul.mubr.bf16.gmra.mrb[64].mxu0 %v17183_v34 }
 0xce7   :  { %8934 = vmatprep.mubr.bf16.mxu0 %v16917_v52  ;;  %v7188_v52 = vld [vmem:[#allocation5 + $0x431] sm:$0xff] }
 0xce8   :  { %v17194_v9 = vpack.c.bf16 %v7188_v52, %v7187_v32  ;;  %v7417_v32 = vld [vmem:[#allocation5 + $0x69] sm:$0xff]  ;;  %v7418_v52 = vld [vmem:[#allocation5 + $0x71] sm:$0xff] }
 0xce9   :  { %v7479_v47 = vpack.c.bf16 %v7418_v52, %v7417_v32  ;;  %v7323_v32 = vld [vmem:[#allocation5 + $0x88] sm:$0xff]  ;;  %v7324_v52 = vld [vmem:[#allocation5 + $0x90] sm:$0xff] }
 0xcee   :  { %8935 = vmatmul.mubr.bf16.gmra.mrb[68].mxu0 %v17187_v13 }
 0xcef   :  { %8942 = vmatprep.mubr.bf16.mxu0 %v16928_v19  ;;  %v7318_v19 = vld [vmem:[#allocation5 + $0x30] sm:$0xff] }
 0xcf0   :  { %v7381_v10 = vpack.c.bf16 %v7318_v19, %v7317_v7  ;;  %v12200_v19 = vld [vmem:[%s17757_s15 + $0x198] sm:$0xff]  }
 0xcf6   :  { %8943 = vmatmul.mubr.bf16.gmra.mrb[72].mxu0 %v17191_v30 }
 0xcf7   :  { %8950 = vmatprep.mubr.bf16.mxu0 %v7316_v45  ;;  %v7320_v45 = vld [vmem:[#allocation5 + $0x50] sm:$0xff] }
 0xcfe   :  { %8951 = vmatmul.mubr.bf16.gmra.mrb[76].mxu0 %v17194_v9 }
 0xcff   :  { %8991 = vmatprep.mubr.bf16.mxu0 %v16959_v4  ;;  %v7319_v4 = vld [vmem:[#allocation5 + $0x48] sm:$0xff] }
 0xd00   :  { %v17208_v7 = vpack.c.bf16 %v7320_v45, %v7319_v4  ;;  %v12202_v45 = vld [vmem:[%s17757_s15 + $0x1a8] sm:$0xff]  }
 0xd06   :  { %8992 = vmatmul.mubr.bf16.vlgmr.msra.gmra.mrb[208].mxu0 %v7381_v10  ;;  %v7419_v10 = vld [vmem:[#allocation5 + $0x89] sm:$0xff] }
 0xd07   :  { %8999 = vmatprep.mubr.bf16.mxu0 %v7478_v51  ;;  %9249 = vmatpush1.bf16.msra.mxu0 %v12197_v61  ;;  %v7322_v61 = vld [vmem:[#allocation5 + $0x70] sm:$0xff] }
 0xd08   :  { %9250 = vmatprep.subr.bf16.mxu0 %v18220_v16  ;;  %v7420_v51 = vld [vmem:[#allocation5 + $0x91] sm:$0xff]  ;;  %v17219_v4 = vpack.c.bf16 %v7322_v61, %v7321_v1  ;;  %v7325_v61 = vld [vmem:[#allocation5 + $0xa8] sm:$0xff] }
 0xd09   :  { %v12204_v1 = vld [vmem:[%s17757_s15 + $0x1b8] sm:$0xff]  }
 0xd0b   :  { %9251 = vmatpush1.bf16.msra.mxu0 %v12198_v8  ;;  %v12201_v8 = vld [vmem:[%s17757_s15 + $0x1a0] sm:$0xff]  }
 0xd0c   :  { %9252 = vmatprep.subr.bf16.mxu0 %v18220_v16 }
 0xd0e   :  { %9000 = vmatmul.mubr.bf16.gmra.mrb[212].mxu0 %v17208_v7 }
 0xd0f   :  { %9007 = vmatprep.mubr.bf16.mxu0 %v7479_v47  ;;  %9253 = vmatpush1.bf16.msra.mxu0 %v12199_v56  ;;  %v7480_v56 = vpack.c.bf16 %v7420_v51, %v7419_v10  ;;  %v12203_v47 = vld [vmem:[%s17757_s15 + $0x1b0] sm:$0xff]  }
 0xd10   :  { %9254 = vmatprep.subr.bf16.mxu0 %v18220_v16  ;;  %v7326_v10 = vld [vmem:[#allocation5 + $0xb0] sm:$0xff] }
 0xd11   :  { %v17239_v51 = vpack.c.bf16 %v7326_v10, %v7325_v61  ;;  %v7332_v61 = vld [vmem:[#allocation5 + $0x110] sm:$0xff] }
 0xd13   :  { %9255 = vmatpush1.bf16.msra.mxu0 %v12200_v19  ;;  %v17230_v19 = vpack.c.bf16 %v7324_v52, %v7323_v32  ;;  %v7329_v32 = vld [vmem:[#allocation5 + $0xe8] sm:$0xff]  ;;  %v7330_v52 = vld [vmem:[#allocation5 + $0xf0] sm:$0xff] }
 0xd14   :  { %9256 = vmatprep.subr.bf16.mxu0 %v18220_v16 }
 0xd16   :  { %9008 = vmatmul.mubr.bf16.gmra.mrb[216].mxu0 %v17219_v4 }
 0xd17   :  { %9015 = vmatprep.mubr.bf16.mxu0 %v7480_v56  ;;  %9257 = vmatpush1.bf16.msra.mxu0 %v12201_v8  ;;  %v7327_v8 = vld [vmem:[#allocation5 + $0xc8] sm:$0xff]  ;;  %v7328_v56 = vld [vmem:[#allocation5 + $0xd0] sm:$0xff] }
 0xd18   :  { %9258 = vmatprep.subr.bf16.mxu0 %v18220_v16 }
 0xd1b   :  { %9259 = vmatpush1.bf16.msra.mxu0 %v12202_v45  ;;  %v17248_v45 = vpack.c.bf16 %v7328_v56, %v7327_v8  ;;  %v7335_v56 = vld [vmem:[#allocation5 + $0x148] sm:$0xff] }
 0xd1c   :  { %9260 = vmatprep.subr.bf16.mxu0 %v18220_v16 }
 0xd1e   :  { %9016 = vmatmul.mubr.bf16.gmra.mrb[220].mxu0 %v17230_v19 }
 0xd1f   :  { %9023 = vmatprep.mubr.bf16.mxu0 %v17027_v0  ;;  %9261 = vmatpush1.bf16.msra.mxu0 %v12203_v47  ;;  %v12205_v0 = vld [vmem:[%s17757_s15 + $0x1c0] sm:$0xff]   ;;  %v17252_v47 = vpack.c.bf16 %v7330_v52, %v7329_v32  ;;  %v7336_v32 = vld [vmem:[#allocation5 + $0x150] sm:$0xff] }
 0xd20   :  { %9262 = vmatprep.subr.bf16.mxu0 %v18220_v16  ;;  %v17272_v52 = vpack.c.bf16 %v7336_v32, %v7335_v56  ;;  %v7343_v32 = vld [vmem:[#allocation5 + $0x1c8] sm:$0xff] }
 0xd23   :  { %9263 = vmatpush1.bf16.msra.mxu0 %v12204_v1  ;;  %v7331_v1 = vld [vmem:[#allocation5 + $0x108] sm:$0xff] }
 0xd24   :  { %9264 = vmatprep.subr.bf16.mxu0 %v18220_v16  ;;  %v17260_v10 = vpack.c.bf16 %v7332_v61, %v7331_v1  ;;  %v7339_v61 = vld [vmem:[#allocation5 + $0x188] sm:$0xff] }
 0xd26   :  { %9024 = vmatmul.mubr.bf16.gmra.mrb[224].mxu0 %v17239_v51 }
 0xd27   :  { %9031 = vmatprep.mubr.bf16.mxu0 %v17039_v22  ;;  %9265 = vmatpush1.bf16.msra.mxu0 %v12205_v0  ;;  %v12206_v22 = vld [vmem:[%s17757_s15 + $0x1c8] sm:$0xff]   ;;  %v7334_v0 = vld [vmem:[#allocation5 + $0x130] sm:$0xff] }
 0xd28   :  { %9266 = vmatprep.subr.bf16.mxu0 %v18220_v16 }
 0xd2b   :  { %9267 = vmatpush1.bf16.msra.mxu0 %v12206_v22  ;;  %v7338_v22 = vld [vmem:[#allocation5 + $0x170] sm:$0xff] }
 0xd2c   :  { %9268 = vmatprep.subr.bf16.mxu0 %v18220_v16 }
 0xd2e   :  { %9032 = vmatmul.mubr.bf16.gmra.mrb[228].mxu0 %v17248_v45 }
 0xd2f   :  { %9039 = vmatprep.mubr.bf16.mxu0 %v17055_v55  ;;  %v7333_v55 = vld [vmem:[#allocation5 + $0x128] sm:$0xff] }
 0xd30   :  { %v17264_v8 = vpack.c.bf16 %v7334_v0, %v7333_v55  ;;  %v7340_v55 = vld [vmem:[#allocation5 + $0x190] sm:$0xff] }
 0xd31   :  { %v17284_v0 = vpack.c.bf16 %v7340_v55, %v7339_v61  ;;  %v7443_v61 = vld [vmem:[#allocation5 + $0x209] sm:$0xff]  ;;  %v7444_v55 = vld [vmem:[#allocation5 + $0x211] sm:$0xff] }
 0xd36   :  { %9040 = vmatmul.mubr.bf16.gmra.mrb[232].mxu0 %v17252_v47 }
 0xd37   :  { %9047 = vmatprep.mubr.bf16.mxu0 %v17067_v11  ;;  %v12207_v11 = vld [vmem:[%s17757_s15 + $0x1d0] sm:$0xff]  }
 0xd38   :  { %9269 = vmatpush1.bf16.msra.mxu0 %v12207_v11  ;;  %v7342_v11 = vld [vmem:[#allocation5 + $0x1b0] sm:$0xff] }
 0xd39   :  { %9270 = vmatprep.subr.bf16.mxu0 %v18220_v16 }
 0xd3e   :  { %9048 = vmatmul.mubr.bf16.gmra.mrb[236].mxu0 %v17260_v10 }
 0xd3f   :  { %9055 = vmatprep.mubr.bf16.mxu0 %v17083_v44  ;;  %v7337_v44 = vld [vmem:[#allocation5 + $0x168] sm:$0xff] }
 0xd40   :  { %v17276_v1 = vpack.c.bf16 %v7338_v22, %v7337_v44  ;;  %v7344_v44 = vld [vmem:[#allocation5 + $0x1d0] sm:$0xff] }
 0xd41   :  { %v17296_v22 = vpack.c.bf16 %v7344_v44, %v7343_v32  ;;  %v7348_v32 = vld [vmem:[#allocation5 + $0x210] sm:$0xff] }
 0xd42   :  { %v12211_v44 = vld [vmem:[%s17757_s15 + $0x1f0] sm:$0xff]  }
 0xd46   :  { %9056 = vmatmul.mubr.bf16.gmra.mrb[240].mxu0 %v17264_v8 }
 0xd47   :  { %9063 = vmatprep.mubr.bf16.mxu0 %v17095_v43  ;;  %v12208_v43 = vld [vmem:[%s17757_s15 + $0x1d8] sm:$0xff]  }
 0xd48   :  { %9271 = vmatpush1.bf16.msra.mxu0 %v12208_v43  ;;  %v7346_v43 = vld [vmem:[#allocation5 + $0x1f0] sm:$0xff] }
 0xd49   :  { %9272 = vmatprep.subr.bf16.mxu0 %v18220_v16 }
 0xd4e   :  { %9064 = vmatmul.mubr.bf16.gmra.mrb[244].mxu0 %v17272_v52 }
 0xd4f   :  { %9071 = vmatprep.mubr.bf16.mxu0 %v17103_v18  ;;  %v7341_v18 = vld [vmem:[#allocation5 + $0x1a8] sm:$0xff] }
 0xd50   :  { %v17288_v56 = vpack.c.bf16 %v7342_v11, %v7341_v18  ;;  %v7492_v18 = vpack.c.bf16 %v7444_v55, %v7443_v61  ;;  %v12210_v11 = vld [vmem:[%s17757_s15 + $0x1e8] sm:$0xff]   ;;  %v7350_v61 = vld [vmem:[#allocation5 + $0x270] sm:$0xff] }
 0xd56   :  { %9072 = vmatmul.mubr.bf16.gmra.mrb[248].mxu0 %v17276_v1 }
 0xd57   :  { %9079 = vmatprep.mubr.bf16.mxu0 %v17107_v14  ;;  %v12209_v14 = vld [vmem:[%s17757_s15 + $0x1e0] sm:$0xff]  }
 0xd58   :  { %9273 = vmatpush1.bf16.msra.mxu0 %v12209_v14  ;;  %v7347_v14 = vld [vmem:[#allocation5 + $0x208] sm:$0xff] }
 0xd59   :  { %9274 = vmatprep.subr.bf16.mxu0 %v18220_v16 }
 0xd5c   :  { %9275 = vmatpush1.bf16.msra.mxu0 %v12210_v11  ;;  %v7352_v11 = vld [vmem:[#allocation5 + $0x290] sm:$0xff] }
 0xd5d   :  { %9276 = vmatprep.subr.bf16.mxu0 %v18220_v16 }
 0xd5e   :  { %9080 = vmatmul.mubr.bf16.gmra.mrb[252].mxu0 %v17284_v0 }
 0xd5f   :  { %9087 = vmatprep.mubr.bf16.mxu0 %v17115_v23  ;;  %v7345_v23 = vld [vmem:[#allocation5 + $0x1e8] sm:$0xff] }
 0xd60   :  { %9277 = vmatpush1.bf16.msra.mxu0 %v12211_v44 }
 0xd61   :  { %9278 = vmatprep.subr.bf16.mxu0 %v18220_v16  ;;  %v7355_v16 = vld [vmem:[#allocation5 + $0x2c8] sm:$0xff] }
 0xd66   :  { %9088 = vmatmul.mubr.bf16.gmra.mrb[0].mxu0 %v17288_v56 }
 0xd67   :  { %9095 = vmatprep.mubr.bf16.mxu0 %v17119_v48  ;;  %v17300_v48 = vpack.c.bf16 %v7346_v43, %v7345_v23  ;;  %v12212_v23 = vld [vmem:[%s17757_s15 + $0x1f8] sm:$0xff]   ;;  %v7349_v43 = vld [vmem:[#allocation5 + $0x268] sm:$0xff] }
 0xd68   :  { %v7397_v55 = vpack.c.bf16 %v7350_v61, %v7349_v43  ;;  %9279 = vmatpush1.bf16.msra.mxu0 %v12212_v23  ;;  %v7356_v23 = vld [vmem:[#allocation5 + $0x2d0] sm:$0xff] }
 0xd69   :  { %v17327_v43 = vpack.c.bf16 %v7356_v23, %v7355_v16  ;;  %v7358_v61 = vld [vmem:[#allocation5 + $0x2f0] sm:$0xff] }
 0xd6a   :  { %v7364_v16 = vld [vmem:[#allocation5 + $0x350] sm:$0xff] }
 0xd6e   :  { %9096 = vmatmul.mubr.bf16.gmra.mrb[4].mxu0 %v17296_v22 }
 0xd6f   :  { %9103 = vmatprep.mubr.bf16.mxu0 %v17126_v5  ;;  %v17307_v5 = vpack.c.bf16 %v7348_v32, %v7347_v14  ;;  %v7354_v32 = vld [vmem:[#allocation5 + $0x2b0] sm:$0xff] }
 0xd76   :  { %9104 = vmatmul.mubr.bf16.gmra.mrb[8].mxu0 %v17300_v48 }
 0xd77   :  { %9111 = vmatprep.mubr.bf16.mxu0 %v7492_v18  ;;  %v7351_v18 = vld [vmem:[#allocation5 + $0x288] sm:$0xff] }
 0xd78   :  { %v17319_v14 = vpack.c.bf16 %v7352_v11, %v7351_v18  ;;  %v7360_v18 = vld [vmem:[#allocation5 + $0x310] sm:$0xff] }
 0xd7e   :  { %9112 = vmatmul.mubr.bf16.gmra.mrb[12].mxu0 %v17307_v5 }
 0xd7f   :  { %9119 = vmatprep.mubr.bf16.mxu0 %v17139_v42  ;;  %v7353_v42 = vld [vmem:[#allocation5 + $0x2a8] sm:$0xff] }
 0xd80   :  { %v17323_v44 = vpack.c.bf16 %v7354_v32, %v7353_v42  ;;  %v7362_v42 = vld [vmem:[#allocation5 + $0x330] sm:$0xff] }
 0xd86   :  { %9120 = vmatmul.mubr.bf16.gmra.mrb[16].mxu0 %v7397_v55 }
 0xd87   :  { %9127 = vmatprep.mubr.bf16.mxu0 %v17143_v26  ;;  %v7357_v26 = vld [vmem:[#allocation5 + $0x2e8] sm:$0xff] }
 0xd88   :  { %v17331_v55 = vpack.c.bf16 %v7358_v61, %v7357_v26  ;;  %v7366_v26 = vld [vmem:[#allocation5 + $0x370] sm:$0xff] }
 0xd8e   :  { %9128 = vmatmul.mubr.bf16.gmra.mrb[20].mxu0 %v17319_v14 }
 0xd8f   :  { %9135 = vmatprep.mubr.bf16.mxu0 %v17147_v39  ;;  %v7359_v39 = vld [vmem:[#allocation5 + $0x308] sm:$0xff] }
 0xd90   :  { %v17335_v11 = vpack.c.bf16 %v7360_v18, %v7359_v39  ;;  %v7368_v39 = vld [vmem:[#allocation5 + $0x390] sm:$0xff] }
 0xd96   :  { %9136 = vmatmul.mubr.bf16.gmra.mrb[24].mxu0 %v17323_v44 }
 0xd97   :  { %9143 = vmatprep.mubr.bf16.mxu0 %v17151_v3  ;;  %v7361_v3 = vld [vmem:[#allocation5 + $0x328] sm:$0xff] }
 0xd98   :  { %v17339_v32 = vpack.c.bf16 %v7362_v42, %v7361_v3  ;;  %v7370_v3 = vld [vmem:[#allocation5 + $0x3b0] sm:$0xff] }
 0xd9e   :  { %9144 = vmatmul.mubr.bf16.gmra.mrb[28].mxu0 %v17327_v43 }
 0xd9f   :  { %9151 = vmatprep.mubr.bf16.mxu0 %v17155_v29  ;;  %v7363_v29 = vld [vmem:[#allocation5 + $0x348] sm:$0xff] }
 0xda0   :  { %v17343_v23 = vpack.c.bf16 %v7364_v16, %v7363_v29  ;;  %v7372_v29 = vld [vmem:[#allocation5 + $0x3d0] sm:$0xff] }
 0xda6   :  { %9152 = vmatmul.mubr.bf16.gmra.mrb[32].mxu0 %v17331_v55 }
 0xda7   :  { %9159 = vmatprep.mubr.bf16.mxu0 %v17159_v35  ;;  %v7365_v35 = vld [vmem:[#allocation5 + $0x368] sm:$0xff] }
 0xda8   :  { %v17347_v61 = vpack.c.bf16 %v7366_v26, %v7365_v35  ;;  %v7374_v35 = vld [vmem:[#allocation5 + $0x3f0] sm:$0xff] }
 0xdae   :  { %9160 = vmatmul.mubr.bf16.gmra.mrb[36].mxu0 %v17335_v11 }
 0xdaf   :  { %9167 = vmatprep.mubr.bf16.mxu0 %v17163_v2  ;;  %v7367_v2 = vld [vmem:[#allocation5 + $0x388] sm:$0xff] }
 0xdb0   :  { %v17351_v18 = vpack.c.bf16 %v7368_v39, %v7367_v2  ;;  %v7376_v2 = vld [vmem:[#allocation5 + $0x410] sm:$0xff] }
 0xdb6   :  { %9168 = vmatmul.mubr.bf16.gmra.mrb[40].mxu0 %v17339_v32 }
 0xdb7   :  { %9175 = vmatprep.mubr.bf16.mxu0 %v17167_v27  ;;  %v7369_v27 = vld [vmem:[#allocation5 + $0x3a8] sm:$0xff] }
 0xdb8   :  { %v17355_v42 = vpack.c.bf16 %v7370_v3, %v7369_v27  ;;  %v7378_v27 = vld [vmem:[#allocation5 + $0x430] sm:$0xff] }
 0xdb9   :  { %v7475_v3 = vld [vmem:[#allocation5 + $0x449] sm:$0xff] }
 0xdbe   :  { %9176 = vmatmul.mubr.bf16.gmra.mrb[44].mxu0 %v17343_v23 }
 0xdbf   :  { %9183 = vmatprep.mubr.bf16.mxu0 %v17171_v37  ;;  %v7371_v37 = vld [vmem:[#allocation5 + $0x3c8] sm:$0xff] }
 0xdc0   :  { %v17359_v16 = vpack.c.bf16 %v7372_v29, %v7371_v37 }
 0xdc6   :  { %9184 = vmatmul.mubr.bf16.gmra.mrb[48].mxu0 %v17347_v61 }
 0xdc7   :  { %9191 = vmatprep.mubr.bf16.mxu0 %v17175_v33  ;;  %v7373_v33 = vld [vmem:[#allocation5 + $0x3e8] sm:$0xff] }
 0xdc8   :  { %v17363_v26 = vpack.c.bf16 %v7374_v35, %v7373_v33  ;;  %v7379_v33 = vld [vmem:[#allocation5 + $0x448] sm:$0xff] }
 0xdce   :  { %9192 = vmatmul.mubr.bf16.gmra.mrb[52].mxu0 %v17351_v18 }
 0xdcf   :  { %9199 = vmatprep.mubr.bf16.mxu0 %v17179_v54  ;;  %v7375_v54 = vld [vmem:[#allocation5 + $0x408] sm:$0xff] }
 0xdd0   :  { %v17367_v39 = vpack.c.bf16 %v7376_v2, %v7375_v54  ;;  %v7510_v54 = vld [vmem:[#allocation5 + $0x47] sm:$0xff] }
 0xdd6   :  { %9200 = vmatmul.mubr.bf16.gmra.mrb[56].mxu0 %v17355_v42 }
 0xdd7   :  { %9207 = vmatprep.mubr.bf16.mxu0 %v17183_v34  ;;  %v7377_v34 = vld [vmem:[#allocation5 + $0x428] sm:$0xff] }
 0xdd8   :  { %v17371_v37 = vpack.c.bf16 %v7378_v27, %v7377_v34  ;;  %v7512_v34 = vld [vmem:[#allocation5 + $0x67] sm:$0xff]  ;;  %v7513_v27 = vld [vmem:[#allocation5 + $0x6f] sm:$0xff] }
 0xdde   :  { %9208 = vmatmul.mubr.bf16.gmra.mrb[60].mxu0 %v17359_v16 }
 0xddf   :  { %9215 = vmatprep.mubr.bf16.mxu0 %v17187_v13  ;;  %v7476_v13 = vld [vmem:[#allocation5 + $0x451] sm:$0xff] }
 0xde0   :  { %v7508_v29 = vpack.c.bf16 %v7476_v13, %v7475_v3  ;;  %v7575_v3 = vpack.c.bf16 %v7513_v27, %v7512_v34  ;;  %v7514_v13 = vld [vmem:[#allocation5 + $0x87] sm:$0xff] }
 0xde1   :  { %v7522_v27 = vld [vmem:[#allocation5 + $0x107] sm:$0xff] }
 0xde6   :  { %9216 = vmatmul.mubr.bf16.gmra.mrb[64].mxu0 %v17363_v26 }
 0xde7   :  { %9223 = vmatprep.mubr.bf16.mxu0 %v17191_v30  ;;  %v7380_v30 = vld [vmem:[#allocation5 + $0x450] sm:$0xff] }
 0xde8   :  { %v17374_v35 = vpack.c.bf16 %v7380_v30, %v7379_v33  ;;  %v7516_v30 = vld [vmem:[#allocation5 + $0xa7] sm:$0xff] }
 0xdee   :  { %9224 = vmatmul.mubr.bf16.gmra.mrb[68].mxu0 %v17367_v39 }
 0xdef   :  { %9231 = vmatprep.mubr.bf16.mxu0 %v17194_v9  ;;  %v7511_v9 = vld [vmem:[#allocation5 + $0x4f] sm:$0xff] }
 0xdf0   :  { %v7574_v2 = vpack.c.bf16 %v7511_v9, %v7510_v54  ;;  %v7518_v54 = vld [vmem:[#allocation5 + $0xc7] sm:$0xff] }
 0xdf6   :  { %9232 = vmatmul.mubr.bf16.gmra.mrb[72].mxu0 %v17371_v37 }
 0xdf7   :  { %9239 = vmatprep.mubr.bf16.mxu0 %v7508_v29  ;;  %v7515_v29 = vld [vmem:[#allocation5 + $0x8f] sm:$0xff] }
 0xdf8   :  { %v7576_v33 = vpack.c.bf16 %v7515_v29, %v7514_v13  ;;  %v7526_v29 = vld [vmem:[#allocation5 + $0x147] sm:$0xff] }
 0xdfe   :  { %9240 = vmatmul.mubr.bf16.gmra.mrb[76].mxu0 %v17374_v35 }
 0xdff   :  { %9280 = vmatprep.mubr.bf16.mxu0 %v17208_v7  ;;  %v7517_v7 = vld [vmem:[#allocation5 + $0xaf] sm:$0xff] }
 0xe00   :  { %v7577_v17 = vpack.c.bf16 %v7517_v7, %v7516_v30  ;;  %v7528_v30 = vld [vmem:[#allocation5 + $0x167] sm:$0xff] }
 0xe06   :  { %9281 = vmatmul.mubr.bf16.vlgmr.msra.gmra.mrb[208].mxu0 %v7574_v2  ;;  %v7520_v2 = vld [vmem:[#allocation5 + $0xe7] sm:$0xff] }
 0xe07   :  { %9288 = vmatprep.mubr.bf16.mxu0 %v17219_v4  ;;  %v7519_v4 = vld [vmem:[#allocation5 + $0xcf] sm:$0xff] }
 0xe08   :  { %v7578_v9 = vpack.c.bf16 %v7519_v4, %v7518_v54  ;;  %v7530_v54 = vld [vmem:[#allocation5 + $0x187] sm:$0xff] }
 0xe0e   :  { %9289 = vmatmul.mubr.bf16.gmra.mrb[212].mxu0 %v7575_v3 }
 0xe0f   :  { %9296 = vmatprep.mubr.bf16.mxu0 %v17230_v19  ;;  %v7521_v19 = vld [vmem:[#allocation5 + $0xef] sm:$0xff] }
 0xe10   :  { %v7579_v34 = vpack.c.bf16 %v7521_v19, %v7520_v2  ;;  %v7534_v19 = vld [vmem:[#allocation5 + $0x1c7] sm:$0xff] }
 0xe16   :  { %9297 = vmatmul.mubr.bf16.gmra.mrb[216].mxu0 %v7576_v33 }
 0xe17   :  { %9304 = vmatprep.mubr.bf16.mxu0 %v17239_v51  ;;  %v7523_v51 = vld [vmem:[#allocation5 + $0x10f] sm:$0xff] }
 0xe18   :  { %v7580_v3 = vpack.c.bf16 %v7523_v51, %v7522_v27  ;;  %v7536_v27 = vld [vmem:[#allocation5 + $0x1e7] sm:$0xff] }
 0xe1e   :  { %9305 = vmatmul.mubr.bf16.gmra.mrb[220].mxu0 %v7577_v17  ;;  %v7524_v17 = vld [vmem:[#allocation5 + $0x127] sm:$0xff] }
 0xe1f   :  { %9312 = vmatprep.mubr.bf16.mxu0 %v17248_v45  ;;  %v7525_v45 = vld [vmem:[#allocation5 + $0x12f] sm:$0xff] }
 0xe20   :  { %v7581_v13 = vpack.c.bf16 %v7525_v45, %v7524_v17  ;;  %v12350_v17 = vld [vmem:[#allocation3] sm:$0xff] }
 0xe21   :  { %v17392_v45 = vpack.c.bf16 %v12350_v17, %v12350_v17  ;;  %v7556_v17 = vld [vmem:[#allocation5 + $0x367] sm:$0xff] }
 0xe26   :  { %9313 = vmatmul.mubr.bf16.gmra.mrb[224].mxu0 %v7578_v9  ;;  %v7532_v9 = vld [vmem:[#allocation5 + $0x1a7] sm:$0xff] }
 0xe27   :  { %9320 = vmatprep.mubr.bf16.mxu0 %v17252_v47  ;;  %v7527_v47 = vld [vmem:[#allocation5 + $0x14f] sm:$0xff] }
 0xe28   :  { %v7582_v33 = vpack.c.bf16 %v7527_v47, %v7526_v29  ;;  %v7541_v29 = vld [vmem:[#allocation5 + $0x22f] sm:$0xff] }
 0xe2e   :  { %9321 = vmatmul.mubr.bf16.gmra.mrb[228].mxu0 %v7579_v34 }
 0xe2f   :  { %9328 = vmatprep.mubr.bf16.mxu0 %v17260_v10  ;;  %v7529_v10 = vld [vmem:[#allocation5 + $0x16f] sm:$0xff] }
 0xe30   :  { %v7583_v7 = vpack.c.bf16 %v7529_v10, %v7528_v30  ;;  %v7764_v30 = vld [vmem:[#allocation5 + $0x469] sm:$0xff]  ;;  %v7765_v10 = vld [vmem:[#allocation5 + $0x471] sm:$0xff] }
 0xe36   :  { %9329 = vmatmul.mubr.bf16.gmra.mrb[232].mxu0 %v7580_v3  ;;  %v7538_v3 = vld [vmem:[#allocation5 + $0x207] sm:$0xff] }
 0xe37   :  { %9336 = vmatprep.mubr.bf16.mxu0 %v17264_v8  ;;  %v7531_v8 = vld [vmem:[#allocation5 + $0x18f] sm:$0xff] }
 0xe38   :  { %v7584_v4 = vpack.c.bf16 %v7531_v8, %v7530_v54  ;;  %v7544_v54 = vld [vmem:[#allocation5 + $0x2a7] sm:$0xff]  ;;  %v7545_v8 = vld [vmem:[#allocation5 + $0x2af] sm:$0xff] }
 0xe3e   :  { %9337 = vmatmul.mubr.bf16.gmra.mrb[236].mxu0 %v7581_v13 }
 0xe3f   :  { %9344 = vmatprep.mubr.bf16.mxu0 %v17272_v52  ;;  %v7533_v52 = vld [vmem:[#allocation5 + $0x1af] sm:$0xff] }
 0xe40   :  { %v7585_v2 = vpack.c.bf16 %v7533_v52, %v7532_v9  ;;  %v7546_v9 = vld [vmem:[#allocation5 + $0x2c7] sm:$0xff]  ;;  %v7547_v52 = vld [vmem:[#allocation5 + $0x2cf] sm:$0xff] }
 0xe46   :  { %9345 = vmatmul.mubr.bf16.gmra.mrb[240].mxu0 %v7582_v33  ;;  %v7543_v33 = vld [vmem:[#allocation5 + $0x28f] sm:$0xff] }
 0xe47   :  { %9352 = vmatprep.mubr.bf16.mxu0 %v17276_v1  ;;  %v7535_v1 = vld [vmem:[#allocation5 + $0x1cf] sm:$0xff] }
 0xe48   :  { %v7586_v34 = vpack.c.bf16 %v7535_v1, %v7534_v19  ;;  %v7549_v19 = vld [vmem:[#allocation5 + $0x2ef] sm:$0xff] }
 0xe4e   :  { %9353 = vmatmul.mubr.bf16.gmra.mrb[244].mxu0 %v7583_v7  ;;  %v7797_v7 = vpack.c.bf16 %v7765_v10, %v7764_v30 }
 0xe4f   :  { %9360 = vmatprep.mubr.bf16.mxu0 %v17284_v0  ;;  %v7537_v0 = vld [vmem:[#allocation5 + $0x1ef] sm:$0xff] }
 0xe50   :  { %v7587_v51 = vpack.c.bf16 %v7537_v0, %v7536_v27  ;;  %11040 = vmatmul.mubr.bf16.gmra.mrb[44].mxu1 %v7797_v7  ;;  %v7552_v0 = vld [vmem:[#allocation5 + $0x327] sm:$0xff] }
 0xe56   :  { %9361 = vmatmul.mubr.bf16.gmra.mrb[248].mxu0 %v7584_v4  ;;  %v7591_v4 = vpack.c.bf16 %v7545_v8, %v7544_v54 }
 0xe57   :  { %9368 = vmatprep.mubr.bf16.mxu0 %v17288_v56  ;;  %v7539_v56 = vld [vmem:[#allocation5 + $0x20f] sm:$0xff] }
 0xe58   :  { %v7588_v13 = vpack.c.bf16 %v7539_v56, %v7538_v3  ;;  %v7554_v3 = vld [vmem:[#allocation5 + $0x347] sm:$0xff] }
 0xe5e   :  { %9369 = vmatmul.mubr.bf16.gmra.mrb[252].mxu0 %v7585_v2  ;;  %v7592_v2 = vpack.c.bf16 %v7547_v52, %v7546_v9 }
 0xe5f   :  { %9376 = vmatprep.mubr.bf16.mxu0 %v17296_v22  ;;  %v7540_v22 = vld [vmem:[#allocation5 + $0x227] sm:$0xff] }
 0xe60   :  { %v7589_v47 = vpack.c.bf16 %v7541_v29, %v7540_v22  ;;  %v7558_v22 = vld [vmem:[#allocation5 + $0x387] sm:$0xff] }
 0xe66   :  { %9377 = vmatmul.mubr.bf16.gmra.mrb[0].mxu0 %v7586_v34  ;;  %v7550_v34 = vld [vmem:[#allocation5 + $0x307] sm:$0xff] }
 0xe67   :  { %9384 = vmatprep.mubr.bf16.mxu0 %v17300_v48  ;;  %v7542_v48 = vld [vmem:[#allocation5 + $0x287] sm:$0xff] }
 0xe6e   :  { %9385 = vmatmul.mubr.bf16.gmra.mrb[4].mxu0 %v7587_v51 }
 0xe6f   :  { %9392 = vmatprep.mubr.bf16.mxu0 %v17307_v5  ;;  %v7590_v5 = vpack.c.bf16 %v7543_v33, %v7542_v48  ;;  %v7562_v33 = vld [vmem:[#allocation5 + $0x3c7] sm:$0xff] }
 0xe76   :  { %9393 = vmatmul.mubr.bf16.gmra.mrb[8].mxu0 %v7588_v13 }
 0xe77   :  { %9400 = vmatprep.mubr.bf16.mxu0 %v17392_v45 }
 0xe7e   :  { %9401 = vmatmul.mubr.bf16.gmra.mrb[12].mxu0 %v7589_v47  ;;  %v7560_v47 = vld [vmem:[#allocation5 + $0x3a7] sm:$0xff] }
 0xe7f   :  { %9408 = vmatprep.mubr.bf16.mxu0 %v17319_v14  ;;  %v7548_v14 = vld [vmem:[#allocation5 + $0x2e7] sm:$0xff] }
 0xe80   :  { %v7593_v1 = vpack.c.bf16 %v7549_v19, %v7548_v14  ;;  %v7566_v14 = vld [vmem:[#allocation5 + $0x407] sm:$0xff]  ;;  %v7567_v19 = vld [vmem:[#allocation5 + $0x40f] sm:$0xff] }
 0xe86   :  { %9409 = vmatmul.mubr.bf16.gmra.mrb[16].mxu0 %v7590_v5  ;;  %v7564_v5 = vld [vmem:[#allocation5 + $0x3e7] sm:$0xff] }
 0xe87   :  { %9416 = vmatprep.mubr.bf16.mxu0 %v17323_v44  ;;  %v7551_v44 = vld [vmem:[#allocation5 + $0x30f] sm:$0xff] }
 0xe88   :  { %v7594_v27 = vpack.c.bf16 %v7551_v44, %v7550_v34 }
 0xe8e   :  { %9417 = vmatmul.mubr.bf16.gmra.mrb[20].mxu0 %v7591_v4 }
 0xe8f   :  { %9424 = vmatprep.mubr.bf16.mxu0 %v17327_v43  ;;  %v7553_v43 = vld [vmem:[#allocation5 + $0x32f] sm:$0xff] }
 0xe90   :  { %v7595_v51 = vpack.c.bf16 %v7553_v43, %v7552_v0  ;;  %v7602_v43 = vpack.c.bf16 %v7567_v19, %v7566_v14 }
 0xe96   :  { %9425 = vmatmul.mubr.bf16.gmra.mrb[24].mxu0 %v7592_v2 }
 0xe97   :  { %9432 = vmatprep.mubr.bf16.mxu0 %v17331_v55  ;;  %v7555_v55 = vld [vmem:[#allocation5 + $0x34f] sm:$0xff] }
 0xe98   :  { %v7596_v56 = vpack.c.bf16 %v7555_v55, %v7554_v3  ;;  %v7568_v3 = vld [vmem:[#allocation5 + $0x427] sm:$0xff]  ;;  %v7569_v55 = vld [vmem:[#allocation5 + $0x42f] sm:$0xff] }
 0xe9e   :  { %9433 = vmatmul.mubr.bf16.gmra.mrb[28].mxu0 %v7593_v1 }
 0xe9f   :  { %9440 = vmatprep.mubr.bf16.mxu0 %v17335_v11  ;;  %v7557_v11 = vld [vmem:[#allocation5 + $0x36f] sm:$0xff] }
 0xea0   :  { %v7597_v13 = vpack.c.bf16 %v7557_v11, %v7556_v17 }
 0xea6   :  { %9441 = vmatmul.mubr.bf16.gmra.mrb[32].mxu0 %v7594_v27 }
 0xea7   :  { %9448 = vmatprep.mubr.bf16.mxu0 %v17339_v32  ;;  %v7559_v32 = vld [vmem:[#allocation5 + $0x38f] sm:$0xff] }
 0xea8   :  { %v7598_v29 = vpack.c.bf16 %v7559_v32, %v7558_v22  ;;  %v7603_v22 = vpack.c.bf16 %v7569_v55, %v7568_v3 }
 0xeae   :  { %9449 = vmatmul.mubr.bf16.gmra.mrb[36].mxu0 %v7595_v51 }
 0xeaf   :  { %9456 = vmatprep.mubr.bf16.mxu0 %v17343_v23  ;;  %v7561_v23 = vld [vmem:[#allocation5 + $0x3af] sm:$0xff] }
 0xeb0   :  { %v7599_v48 = vpack.c.bf16 %v7561_v23, %v7560_v47  ;;  %v7570_v23 = vld [vmem:[#allocation5 + $0x447] sm:$0xff] }
 0xeb6   :  { %9457 = vmatmul.mubr.bf16.gmra.mrb[40].mxu0 %v7596_v56 }
 0xeb7   :  { %9464 = vmatprep.mubr.bf16.mxu0 %v17347_v61  ;;  %v7563_v61 = vld [vmem:[#allocation5 + $0x3cf] sm:$0xff] }
 0xeb8   :  { %v7600_v30 = vpack.c.bf16 %v7563_v61, %v7562_v33 }
 0xebe   :  { %9465 = vmatmul.mubr.bf16.gmra.mrb[44].mxu0 %v7597_v13 }
 0xebf   :  { %9472 = vmatprep.mubr.bf16.mxu0 %v17351_v18  ;;  %v17410_v18 = vld [vmem:[%s17760_s16] ss:$0 sm:$0xff] }
 0xec6   :  { %9473 = vmatmul.mubr.bf16.gmra.mrb[48].mxu0 %v7598_v29 }
 0xec7   :  { %9480 = vmatprep.mubr.bf16.mxu0 %v17355_v42  ;;  %v7565_v42 = vld [vmem:[#allocation5 + $0x3ef] sm:$0xff] }
 0xec8   :  { %v7601_v52 = vpack.c.bf16 %v7565_v42, %v7564_v5 }
 0xece   :  { %9481 = vmatmul.mubr.bf16.gmra.mrb[52].mxu0 %v7599_v48  ;;  %v7571_v48 = vld [vmem:[#allocation5 + $0x44f] sm:$0xff] }
 0xecf   :  { %9488 = vmatprep.mubr.bf16.mxu0 %v17359_v16  ;;  %v7604_v5 = vpack.c.bf16 %v7571_v48, %v7570_v23 }
 0xed6   :  { %9489 = vmatmul.mubr.bf16.gmra.mrb[56].mxu0 %v7600_v30 }
 0xed7   :  { %9496 = vmatprep.mubr.bf16.mxu0 %v17363_v26 }
 0xed9   :  { %v9282_v10 = vpop.f32.mrb[208].mxu0 }
 0xeda   :  { %v11163_v7 = vadd.f32 %v17410_v18, %v9282_v10  ;;  %v9284_v54 = vpop.f32.mrb[209].mxu0 }
 0xedb   :  { %v9285_v8 = vpop.f32.mrb[210].mxu0  ;;  %v7573_v54 = vld [vmem:[#allocation5 + $0x46f] sm:$0xff] }
 0xedc   :  { %v9572_v16 = vadd.f32 %v11163_v7, %v16889_v60  ;;  %v11164_v4 = vadd.f32 %v17410_v18, %v9285_v8  ;;  %v9287_v9 = vpop.f32.mrb[211].mxu0  ;;  %v7572_v7 = vld [vmem:[#allocation5 + $0x467] sm:$0xff] }
 0xede   :  { %12219 = vtanh.f32 %v9572_v16  ;;  %v9575_v26 = vadd.f32 %v11164_v4, %v16893_v20  ;;  %9497 = vmatmul.mubr.bf16.gmra.mrb[60].mxu0 %v7601_v52  ;;  %v7605_v52 = vpack.c.bf16 %v7573_v54, %v7572_v7 }
 0xedf   :  { %9504 = vmatprep.mubr.bf16.mxu0 %v17367_v39 }
 0xee0   :  { %12221 = vtanh.f32 %v9575_v26 }
 0xee1   :  { %v9290_v2 = vpop.f32.mrb[212].mxu0 }
 0xee2   :  { %v11165_v1 = vadd.f32 %v17410_v18, %v9290_v2  ;;  %v9292_v34 = vpop.f32.mrb[213].mxu0 }
 0xee3   :  { %v9293_v44 = vpop.f32.mrb[214].mxu0 }
 0xee4   :  { %v9580_v60 = vadd.f32 %v11165_v1, %v16887_v15  ;;  %v11166_v27 = vadd.f32 %v17410_v18, %v9293_v44  ;;  %v9295_v0 = vpop.f32.mrb[215].mxu0 }
 0xee6   :  { %12223 = vtanh.f32 %v9580_v60  ;;  %v9583_v20 = vadd.f32 %v11166_v27, %v16891_v21  ;;  %9505 = vmatmul.mubr.bf16.gmra.mrb[64].mxu0 %v7602_v43 }
 0xee7   :  { %9512 = vmatprep.mubr.bf16.mxu0 %v17371_v37 }
 0xee8   :  { %v12220_v39 = vpop.eup %12219  ;;  %12225 = vtanh.f32 %v9583_v20 }
 0xee9   :  { %9890 = vst [vmem:[%s17761_s17] sm:$0xff] %v12220_v39  ;;  %v9298_v51 = vpop.f32.mrb[216].mxu0 }
 0xeea   :  { %v12222_v15 = vpop.eup %12221  ;;  %v11167_v56 = vadd.f32 %v17410_v18, %v9298_v51  ;;  %v9300_v17 = vpop.f32.mrb[217].mxu0 }
 0xeeb   :  { %9891 = vst [vmem:[%s17761_s17 + $0x8] sm:$0xff] %v12222_v15  ;;  %v9301_v21 = vpop.f32.mrb[218].mxu0 }
 0xeec   :  { %v9588_v37 = vadd.f32 %v11167_v56, %v16900_v36  ;;  %v11168_v11 = vadd.f32 %v17410_v18, %v9301_v21  ;;  %v9303_v13 = vpop.f32.mrb[219].mxu0 }
 0xeee   :  { %12227 = vtanh.f32 %v9588_v37  ;;  %v9591_v32 = vadd.f32 %v11168_v11, %v16904_v31  ;;  %9513 = vmatmul.mubr.bf16.gmra.mrb[68].mxu0 %v7603_v22 }
 0xeef   :  { %9520 = vmatprep.mubr.bf16.mxu0 %v17374_v35 }
 0xef0   :  { %v12224_v29 = vpop.eup %12223  ;;  %12229 = vtanh.f32 %v9591_v32 }
 0xef1   :  { %9892 = vst [vmem:[%s17761_s17 + $0x10] sm:$0xff] %v12224_v29  ;;  %v9306_v47 = vpop.f32.mrb[220].mxu0 }
 0xef2   :  { %v12226_v36 = vpop.eup %12225  ;;  %v11169_v33 = vadd.f32 %v17410_v18, %v9306_v47  ;;  %v9308_v61 = vpop.f32.mrb[221].mxu0 }
 0xef3   :  { %9893 = vst [vmem:[%s17761_s17 + $0x18] sm:$0xff] %v12226_v36  ;;  %v9309_v31 = vpop.f32.mrb[222].mxu0 }
 0xef4   :  { %v9596_v35 = vadd.f32 %v11169_v33, %v16898_v24  ;;  %v11170_v30 = vadd.f32 %v17410_v18, %v9309_v31  ;;  %v9311_v10 = vpop.f32.mrb[223].mxu0 }
 0xef6   :  { %12231 = vtanh.f32 %v9596_v35  ;;  %v9599_v42 = vadd.f32 %v11170_v30, %v16902_v59  ;;  %9521 = vmatmul.mubr.bf16.gmra.mrb[72].mxu0 %v7604_v5 }
 0xef7   :  { %9528 = vmatprep.mubr.bf16.mxu0 %v17392_v45 }
 0xef8   :  { %v12228_v8 = vpop.eup %12227  ;;  %12233 = vtanh.f32 %v9599_v42 }
 0xef9   :  { %9894 = vst [vmem:[%s17761_s17 + $0x20] sm:$0xff] %v12228_v8  ;;  %v9314_v16 = vpop.f32.mrb[224].mxu0 }
 0xefa   :  { %v12230_v24 = vpop.eup %12229  ;;  %v11171_v4 = vadd.f32 %v17410_v18, %v9314_v16  ;;  %v9316_v9 = vpop.f32.mrb[225].mxu0 }
 0xefb   :  { %9895 = vst [vmem:[%s17761_s17 + $0x28] sm:$0xff] %v12230_v24  ;;  %v9317_v59 = vpop.f32.mrb[226].mxu0 }
 0xefc   :  { %v9604_v45 = vadd.f32 %v11171_v4, %v16911_v25  ;;  %v11172_v26 = vadd.f32 %v17410_v18, %v9317_v59  ;;  %v9319_v2 = vpop.f32.mrb[227].mxu0 }
 0xefe   :  { %12235 = vtanh.f32 %v9604_v45  ;;  %v9607_v14 = vadd.f32 %v11172_v26, %v16915_v12  ;;  %9529 = vmatmul.mubr.bf16.gmra.mrb[76].mxu0 %v7605_v52 }
 0xf00   :  { %v12232_v19 = vpop.eup %12231  ;;  %12237 = vtanh.f32 %v9607_v14 }
 0xf01   :  { %9896 = vst [vmem:[%s17761_s17 + $0x30] sm:$0xff] %v12232_v19  ;;  %v9322_v1 = vpop.f32.mrb[228].mxu0 }
 0xf02   :  { %v12234_v34 = vpop.eup %12233  ;;  %v11173_v44 = vadd.f32 %v17410_v18, %v9322_v1  ;;  %v9324_v60 = vpop.f32.mrb[229].mxu0 }
 0xf03   :  { %9897 = vst [vmem:[%s17761_s17 + $0x38] sm:$0xff] %v12234_v34  ;;  %v9325_v25 = vpop.f32.mrb[230].mxu0 }
 0xf04   :  { %v9612_v27 = vadd.f32 %v11173_v44, %v16909_v40  ;;  %v11174_v12 = vadd.f32 %v17410_v18, %v9325_v25  ;;  %v9327_v0 = vpop.f32.mrb[231].mxu0 }
 0xf06   :  { %12239 = vtanh.f32 %v9612_v27  ;;  %v9615_v43 = vadd.f32 %v11174_v12, %v16913_v41  ;;  %v18276_v12 = vld [vmem:[#allocation17_spill] sm:$0xff] }
 0xf08   :  { %v12236_v20 = vpop.eup %12235  ;;  %12241 = vtanh.f32 %v9615_v43 }
 0xf09   :  { %9898 = vst [vmem:[%s17761_s17 + $0x40] sm:$0xff] %v12236_v20  ;;  %v9330_v39 = vpop.f32.mrb[232].mxu0 }
 0xf0a   :  { %v12238_v51 = vpop.eup %12237  ;;  %v11175_v3 = vadd.f32 %v17410_v18, %v9330_v39  ;;  %v9332_v55 = vpop.f32.mrb[233].mxu0 }
 0xf0b   :  { %9899 = vst [vmem:[%s17761_s17 + $0x48] sm:$0xff] %v12238_v51  ;;  %v9333_v40 = vpop.f32.mrb[234].mxu0  ;;  %v18277_v55 = vld [vmem:[#allocation19_spill] sm:$0xff] }
 0xf0c   :  { %v9620_v15 = vadd.f32 %v11175_v3, %v16922_v57  ;;  %v11176_v41 = vadd.f32 %v17410_v18, %v9333_v40  ;;  %v9335_v56 = vpop.f32.mrb[235].mxu0 }
 0xf0d   :  { %v18278_v56 = vld [vmem:[#allocation36_spill] sm:$0xff] }
 0xf0e   :  { %12243 = vtanh.f32 %v9620_v15  ;;  %v9623_v17 = vadd.f32 %v11176_v41, %v16926_v58 }
 0xf10   :  { %v12240_v21 = vpop.eup %12239  ;;  %12245 = vtanh.f32 %v9623_v17 }
 0xf11   :  { %9900 = vst [vmem:[%s17761_s17 + $0x50] sm:$0xff] %v12240_v21  ;;  %v9338_v37 = vpop.f32.mrb[236].mxu0 }
 0xf12   :  { %v12242_v11 = vpop.eup %12241  ;;  %v11177_v13 = vadd.f32 %v17410_v18, %v9338_v37  ;;  %v9340_v22 = vpop.f32.mrb[237].mxu0 }
 0xf13   :  { %9901 = vst [vmem:[%s17761_s17 + $0x58] sm:$0xff] %v12242_v11  ;;  %v9341_v57 = vpop.f32.mrb[238].mxu0 }
 0xf14   :  { %v9628_v32 = vadd.f32 %v11177_v13, %v16920_v50  ;;  %v11178_v58 = vadd.f32 %v17410_v18, %v9341_v57  ;;  %v9343_v29 = vpop.f32.mrb[239].mxu0 }
 0xf16   :  { %12247 = vtanh.f32 %v9628_v32  ;;  %v9631_v47 = vadd.f32 %v11178_v58, %v16924_v63  ;;  %v18279_v32 = vld [vmem:[#allocation22_spill] sm:$0xff] }
 0xf18   :  { %v12244_v23 = vpop.eup %12243  ;;  %12249 = vtanh.f32 %v9631_v47 }
 0xf19   :  { %9902 = vst [vmem:[%s17761_s17 + $0x60] sm:$0xff] %v12244_v23  ;;  %v9346_v48 = vpop.f32.mrb[240].mxu0  ;;  %v18280_v23 = vld [vmem:[#allocation37_spill] sm:$0xff] }
 0xf1a   :  { %v12246_v36 = vpop.eup %12245  ;;  %v11179_v33 = vadd.f32 %v17410_v18, %v9346_v48  ;;  %v9348_v61 = vpop.f32.mrb[241].mxu0 }
 0xf1b   :  { %9903 = vst [vmem:[%s17761_s17 + $0x68] sm:$0xff] %v12246_v36  ;;  %v9349_v50 = vpop.f32.mrb[242].mxu0 }
 0xf1c   :  { %v9636_v31 = vadd.f32 %v11179_v33, %v16934_v38  ;;  %v11180_v63 = vadd.f32 %v17410_v18, %v9349_v50  ;;  %v9351_v35 = vpop.f32.mrb[243].mxu0 }
 0xf1d   :  { %v18281_v35 = vld [vmem:[#allocation29_spill] sm:$0xff] }
 0xf1e   :  { %12251 = vtanh.f32 %v9636_v31  ;;  %v9639_v30 = vadd.f32 %v11180_v63, %v16941_v28 }
 0xf20   :  { %v12248_v10 = vpop.eup %12247  ;;  %12253 = vtanh.f32 %v9639_v30 }
 0xf21   :  { %9904 = vst [vmem:[%s17761_s17 + $0x70] sm:$0xff] %v12248_v10  ;;  %v9354_v5 = vpop.f32.mrb[244].mxu0 }
 0xf22   :  { %v12250_v42 = vpop.eup %12249  ;;  %v11181_v7 = vadd.f32 %v17410_v18, %v9354_v5  ;;  %v9356_v54 = vpop.f32.mrb[245].mxu0 }
 0xf23   :  { %9905 = vst [vmem:[%s17761_s17 + $0x78] sm:$0xff] %v12250_v42  ;;  %v9357_v38 = vpop.f32.mrb[246].mxu0  ;;  %v18282_v42 = vld [vmem:[#allocation43_spill] sm:$0xff] }
 0xf24   :  { %v9644_v8 = vadd.f32 %v11181_v7, %v16932_v53  ;;  %v11182_v28 = vadd.f32 %v17410_v18, %v9357_v38  ;;  %v9359_v16 = vpop.f32.mrb[247].mxu0 }
 0xf26   :  { %12255 = vtanh.f32 %v9644_v8  ;;  %v9647_v24 = vadd.f32 %v11182_v28, %v16936_v62 }
 0xf28   :  { %v12252_v4 = vpop.eup %12251  ;;  %12257 = vtanh.f32 %v9647_v24 }
 0xf29   :  { %9906 = vst [vmem:[%s17761_s17 + $0x80] sm:$0xff] %v12252_v4  ;;  %v9362_v9 = vpop.f32.mrb[248].mxu0  ;;  %v18283_v4 = vld [vmem:[#allocation24_spill] sm:$0xff] }
 0xf2a   :  { %v12254_v52 = vpop.eup %12253  ;;  %v11183_v59 = vadd.f32 %v17410_v18, %v9362_v9  ;;  %v9364_v45 = vpop.f32.mrb[249].mxu0 }
 0xf2b   :  { %9907 = vst [vmem:[%s17761_s17 + $0x88] sm:$0xff] %v12254_v52  ;;  %v9365_v53 = vpop.f32.mrb[250].mxu0  ;;  %v18284_v45 = vld [vmem:[#allocation45_spill] sm:$0xff] }
 0xf2c   :  { %v9652_v26 = vadd.f32 %v11183_v59, %v16950_v6  ;;  %v11184_v62 = vadd.f32 %v17410_v18, %v9365_v53  ;;  %v9367_v2 = vpop.f32.mrb[251].mxu0 }
 0xf2d   :  { %v17567_v2 = vpop.f32.mrb[44].mxu1 }
 0xf2e   :  { %12259 = vtanh.f32 %v9652_v26  ;;  %v9655_v14 = vadd.f32 %v11184_v62, %v16957_v49 }
 0xf30   :  { %v12256_v19 = vpop.eup %12255  ;;  %12261 = vtanh.f32 %v9655_v14 }
 0xf31   :  { %9908 = vst [vmem:[%s17761_s17 + $0x90] sm:$0xff] %v12256_v19  ;;  %v9370_v1 = vpop.f32.mrb[252].mxu0 }
 0xf32   :  { %v12258_v34 = vpop.eup %12257  ;;  %v11185_v44 = vadd.f32 %v17410_v18, %v9370_v1  ;;  %v9372_v60 = vpop.f32.mrb[253].mxu0 }
 0xf33   :  { %9909 = vst [vmem:[%s17761_s17 + $0x98] sm:$0xff] %v12258_v34  ;;  %v9373_v6 = vpop.f32.mrb[254].mxu0  ;;  %v17570_v34 = vpop.f32.mrb[45].mxu1 }
 0xf34   :  { %v9660_v25 = vadd.f32 %v11185_v44, %v16948_v46  ;;  %v11186_v49 = vadd.f32 %v17410_v18, %v9373_v6  ;;  %v9375_v27 = vpop.f32.mrb[255].mxu0  ;;  %v17575_v60 = vpop.f32.mrb[46].mxu1  ;;  %v18285_v6 = vld [vmem:[#allocation33_spill] sm:$0xff] }
 0xf36   :  { %12263 = vtanh.f32 %v9660_v25  ;;  %v9663_v0 = vadd.f32 %v11186_v49, %v18276_v12  ;;  %v17579_v12 = vpop.f32.mrb[47].mxu1 }
 0xf38   :  { %v12260_v43 = vpop.eup %12259  ;;  %12265 = vtanh.f32 %v9663_v0  ;;  %v18286_v0 = vld [vmem:[#allocation49_spill] sm:$0xff] }
 0xf39   :  { %9910 = vst [vmem:[%s17761_s17 + $0xa0] sm:$0xff] %v12260_v43  ;;  %v9378_v20 = vpop.f32.mrb[0].mxu0 }
 0xf3a   :  { %v12262_v39 = vpop.eup %12261  ;;  %v11187_v51 = vadd.f32 %v17410_v18, %v9378_v20  ;;  %v9380_v3 = vpop.f32.mrb[1].mxu0 }
 0xf3b   :  { %9911 = vst [vmem:[%s17761_s17 + $0xa8] sm:$0xff] %v12262_v39  ;;  %v9381_v46 = vpop.f32.mrb[2].mxu0 }
 0xf3c   :  { %v9668_v40 = vadd.f32 %v11187_v51, %v18277_v55  ;;  %v11188_v15 = vadd.f32 %v17410_v18, %v9381_v46  ;;  %v9383_v41 = vpop.f32.mrb[3].mxu0 }
 0xf3e   :  { %12267 = vtanh.f32 %v9668_v40  ;;  %v9671_v17 = vadd.f32 %v11188_v15, %v18278_v56  ;;  %v18287_v40 = vld [vmem:[#allocation44_spill] sm:$0xff] }
 0xf40   :  { %v12264_v21 = vpop.eup %12263  ;;  %12269 = vtanh.f32 %v9671_v17  ;;  %v18288_v17 = vld [vmem:[#allocation30_spill] sm:$0xff] }
 0xf41   :  { %9912 = vst [vmem:[%s17761_s17 + $0xb0] sm:$0xff] %v12264_v21  ;;  %v9386_v37 = vpop.f32.mrb[4].mxu0 }
 0xf42   :  { %v12266_v11 = vpop.eup %12265  ;;  %v11189_v13 = vadd.f32 %v17410_v18, %v9386_v37  ;;  %v9388_v22 = vpop.f32.mrb[5].mxu0 }
 0xf43   :  { %9913 = vst [vmem:[%s17761_s17 + $0xb8] sm:$0xff] %v12266_v11  ;;  %v9389_v57 = vpop.f32.mrb[6].mxu0 }
 0xf44   :  { %v9676_v58 = vadd.f32 %v11189_v13, %v18279_v32  ;;  %v11190_v29 = vadd.f32 %v17410_v18, %v9389_v57  ;;  %v9391_v47 = vpop.f32.mrb[7].mxu0 }
 0xf46   :  { %12271 = vtanh.f32 %v9676_v58  ;;  %v9679_v48 = vadd.f32 %v11190_v29, %v18280_v23  ;;  %v18289_v58 = vld [vmem:[#allocation42_spill] sm:$0xff] }
 0xf48   :  { %v12268_v36 = vpop.eup %12267  ;;  %12273 = vtanh.f32 %v9679_v48  ;;  %v18290_v48 = vld [vmem:[#allocation48_spill] sm:$0xff] }
 0xf49   :  { %9914 = vst [vmem:[%s17761_s17 + $0xc0] sm:$0xff] %v12268_v36  ;;  %v9394_v33 = vpop.f32.mrb[8].mxu0 }
 0xf4a   :  { %v12270_v61 = vpop.eup %12269  ;;  %v11191_v50 = vadd.f32 %v17410_v18, %v9394_v33  ;;  %v9396_v31 = vpop.f32.mrb[9].mxu0 }
 0xf4b   :  { %9915 = vst [vmem:[%s17761_s17 + $0xc8] sm:$0xff] %v12270_v61  ;;  %v9397_v63 = vpop.f32.mrb[10].mxu0 }
 0xf4c   :  { %v9684_v30 = vadd.f32 %v11191_v50, %v18281_v35  ;;  %v11192_v10 = vadd.f32 %v17410_v18, %v9397_v63  ;;  %v9399_v5 = vpop.f32.mrb[11].mxu0 }
 0xf4e   :  { %12275 = vtanh.f32 %v9684_v30  ;;  %v9687_v7 = vadd.f32 %v11192_v10, %v18282_v42  ;;  %v18291_v30 = vld [vmem:[#allocation32_spill] sm:$0xff] }
 0xf50   :  { %v12272_v54 = vpop.eup %12271  ;;  %12277 = vtanh.f32 %v9687_v7  ;;  %v18292_v7 = vld [vmem:[#allocation47_spill] sm:$0xff] }
 0xf51   :  { %9916 = vst [vmem:[%s17761_s17 + $0xd0] sm:$0xff] %v12272_v54  ;;  %v9402_v38 = vpop.f32.mrb[12].mxu0 }
 0xf52   :  { %v12274_v8 = vpop.eup %12273  ;;  %v11193_v28 = vadd.f32 %v17410_v18, %v9402_v38  ;;  %v9404_v16 = vpop.f32.mrb[13].mxu0 }
 0xf53   :  { %9917 = vst [vmem:[%s17761_s17 + $0xd8] sm:$0xff] %v12274_v8  ;;  %v9405_v24 = vpop.f32.mrb[14].mxu0 }
 0xf54   :  { %v9692_v9 = vadd.f32 %v11193_v28, %v18283_v4  ;;  %v11194_v52 = vadd.f32 %v17410_v18, %v9405_v24  ;;  %v9407_v59 = vpop.f32.mrb[15].mxu0 }
 0xf56   :  { %12279 = vtanh.f32 %v9692_v9  ;;  %v9695_v53 = vadd.f32 %v11194_v52, %v18284_v45  ;;  %v18293_v9 = vld [vmem:[#allocation50_spill] sm:$0xff] }
 0xf58   :  { %v12276_v26 = vpop.eup %12275  ;;  %12281 = vtanh.f32 %v9695_v53  ;;  %v18294_v53 = vld [vmem:[#allocation7_spill] sm:$0xff] }
 0xf59   :  { %9918 = vst [vmem:[%s17761_s17 + $0xe0] sm:$0xff] %v12276_v26  ;;  %v9410_v62 = vpop.f32.mrb[16].mxu0 }
 0xf5a   :  { %v12278_v14 = vpop.eup %12277  ;;  %v11195_v19 = vadd.f32 %v17410_v18, %v9410_v62  ;;  %v9412_v1 = vpop.f32.mrb[17].mxu0 }
 0xf5b   :  { %9919 = vst [vmem:[%s17761_s17 + $0xe8] sm:$0xff] %v12278_v14  ;;  %v9413_v44 = vpop.f32.mrb[18].mxu0 }
 0xf5c   :  { %v9700_v25 = vadd.f32 %v11195_v19, %v18285_v6  ;;  %v11196_v49 = vadd.f32 %v17410_v18, %v9413_v44  ;;  %v9415_v27 = vpop.f32.mrb[19].mxu0 }
 0xf5e   :  { %12283 = vtanh.f32 %v9700_v25  ;;  %v9703_v43 = vadd.f32 %v11196_v49, %v18286_v0  ;;  %v18295_v25 = vld [vmem:[#allocation51_spill] sm:$0xff] }
 0xf60   :  { %v12280_v20 = vpop.eup %12279  ;;  %12285 = vtanh.f32 %v9703_v43  ;;  %v18296_v43 = vld [vmem:[#allocation6_spill] sm:$0xff] }
 0xf61   :  { %9920 = vst [vmem:[%s17761_s17 + $0xf0] sm:$0xff] %v12280_v20  ;;  %v9418_v39 = vpop.f32.mrb[20].mxu0 }
 0xf62   :  { %v12282_v51 = vpop.eup %12281  ;;  %v11197_v3 = vadd.f32 %v17410_v18, %v9418_v39  ;;  %v9420_v46 = vpop.f32.mrb[21].mxu0 }
 0xf63   :  { %9921 = vst [vmem:[%s17761_s17 + $0xf8] sm:$0xff] %v12282_v51  ;;  %v9421_v55 = vpop.f32.mrb[22].mxu0 }
 0xf64   :  { %v9708_v15 = vadd.f32 %v11197_v3, %v18287_v40  ;;  %v11198_v41 = vadd.f32 %v17410_v18, %v9421_v55  ;;  %v9423_v56 = vpop.f32.mrb[23].mxu0 }
 0xf66   :  { %12287 = vtanh.f32 %v9708_v15  ;;  %v9711_v21 = vadd.f32 %v11198_v41, %v18288_v17  ;;  %v18297_v15 = vld [vmem:[#allocation53_spill] sm:$0xff] }
 0xf68   :  { %v12284_v37 = vpop.eup %12283  ;;  %12289 = vtanh.f32 %v9711_v21  ;;  %v18298_v21 = vld [vmem:[#allocation10_spill] sm:$0xff] }
 0xf69   :  { %9922 = vst [vmem:[%s17761_s17 + $0x100] sm:$0xff] %v12284_v37  ;;  %v9426_v11 = vpop.f32.mrb[24].mxu0 }
 0xf6a   :  { %v12286_v13 = vpop.eup %12285  ;;  %v11199_v22 = vadd.f32 %v17410_v18, %v9426_v11  ;;  %v9428_v57 = vpop.f32.mrb[25].mxu0 }
 0xf6b   :  { %9923 = vst [vmem:[%s17761_s17 + $0x108] sm:$0xff] %v12286_v13  ;;  %v9429_v32 = vpop.f32.mrb[26].mxu0 }
 0xf6c   :  { %v9716_v29 = vadd.f32 %v11199_v22, %v18289_v58  ;;  %v11200_v47 = vadd.f32 %v17410_v18, %v9429_v32  ;;  %v9431_v23 = vpop.f32.mrb[27].mxu0 }
 0xf6e   :  { %12291 = vtanh.f32 %v9716_v29  ;;  %v9719_v36 = vadd.f32 %v11200_v47, %v18290_v48  ;;  %v18299_v29 = vld [vmem:[#allocation8_spill] sm:$0xff] }
 0xf70   :  { %v12288_v33 = vpop.eup %12287  ;;  %12293 = vtanh.f32 %v9719_v36  ;;  %v18300_v36 = vld [vmem:[#allocation9_spill] sm:$0xff] }
 0xf71   :  { %9924 = vst [vmem:[%s17761_s17 + $0x110] sm:$0xff] %v12288_v33  ;;  %v9434_v61 = vpop.f32.mrb[28].mxu0 }
 0xf72   :  { %v12290_v50 = vpop.eup %12289  ;;  %v11201_v31 = vadd.f32 %v17410_v18, %v9434_v61  ;;  %v9436_v63 = vpop.f32.mrb[29].mxu0 }
 0xf73   :  { %9925 = vst [vmem:[%s17761_s17 + $0x118] sm:$0xff] %v12290_v50  ;;  %v9437_v35 = vpop.f32.mrb[30].mxu0 }
 0xf74   :  { %v9724_v10 = vadd.f32 %v11201_v31, %v18291_v30  ;;  %v11202_v5 = vadd.f32 %v17410_v18, %v9437_v35  ;;  %v9439_v42 = vpop.f32.mrb[31].mxu0 }
 0xf76   :  { %12295 = vtanh.f32 %v9724_v10  ;;  %v9727_v54 = vadd.f32 %v11202_v5, %v18292_v7  ;;  %v18301_v10 = vld [vmem:[#allocation12_spill] sm:$0xff] }
 0xf78   :  { %v12292_v38 = vpop.eup %12291  ;;  %12297 = vtanh.f32 %v9727_v54  ;;  %v18302_v54 = vld [vmem:[#allocation13_spill] sm:$0xff] }
 0xf79   :  { %9926 = vst [vmem:[%s17761_s17 + $0x120] sm:$0xff] %v12292_v38  ;;  %v9442_v8 = vpop.f32.mrb[32].mxu0 }
 0xf7a   :  { %v12294_v28 = vpop.eup %12293  ;;  %v11203_v16 = vadd.f32 %v17410_v18, %v9442_v8  ;;  %v9444_v24 = vpop.f32.mrb[33].mxu0 }
 0xf7b   :  { %9927 = vst [vmem:[%s17761_s17 + $0x128] sm:$0xff] %v12294_v28  ;;  %v9445_v4 = vpop.f32.mrb[34].mxu0 }
 0xf7c   :  { %v9732_v52 = vadd.f32 %v11203_v16, %v18293_v9  ;;  %v11204_v59 = vadd.f32 %v17410_v18, %v9445_v4  ;;  %v9447_v45 = vpop.f32.mrb[35].mxu0 }
 0xf7e   :  { %12299 = vtanh.f32 %v9732_v52  ;;  %v9735_v26 = vadd.f32 %v11204_v59, %v18294_v53  ;;  %v18303_v52 = vld [vmem:[#allocation11_spill] sm:$0xff] }
 0xf80   :  { %v12296_v62 = vpop.eup %12295  ;;  %12301 = vtanh.f32 %v9735_v26  ;;  %v18304_v26 = vld [vmem:[#allocation55_spill] sm:$0xff] }
 0xf81   :  { %9928 = vst [vmem:[%s17761_s17 + $0x130] sm:$0xff] %v12296_v62  ;;  %v9450_v14 = vpop.f32.mrb[36].mxu0 }
 0xf82   :  { %v12298_v19 = vpop.eup %12297  ;;  %v11205_v1 = vadd.f32 %v17410_v18, %v9450_v14  ;;  %v9452_v44 = vpop.f32.mrb[37].mxu0 }
 0xf83   :  { %9929 = vst [vmem:[%s17761_s17 + $0x138] sm:$0xff] %v12298_v19  ;;  %v9453_v6 = vpop.f32.mrb[38].mxu0 }
 0xf84   :  { %v9740_v49 = vadd.f32 %v11205_v1, %v18295_v25  ;;  %v11206_v27 = vadd.f32 %v17410_v18, %v9453_v6  ;;  %v9455_v0 = vpop.f32.mrb[39].mxu0 }
 0xf86   :  { %12303 = vtanh.f32 %v9740_v49  ;;  %v9743_v20 = vadd.f32 %v11206_v27, %v18296_v43  ;;  %v18305_v49 = vld [vmem:[#allocation15_spill] sm:$0xff] }
 0xf88   :  { %v12300_v39 = vpop.eup %12299  ;;  %12305 = vtanh.f32 %v9743_v20  ;;  %v18306_v20 = vld [vmem:[#allocation16_spill] sm:$0xff] }
 0xf89   :  { %9930 = vst [vmem:[%s17761_s17 + $0x140] sm:$0xff] %v12300_v39  ;;  %v9458_v51 = vpop.f32.mrb[40].mxu0 }
 0xf8a   :  { %v12302_v3 = vpop.eup %12301  ;;  %v11207_v46 = vadd.f32 %v17410_v18, %v9458_v51  ;;  %v9460_v55 = vpop.f32.mrb[41].mxu0 }
 0xf8b   :  { %9931 = vst [vmem:[%s17761_s17 + $0x148] sm:$0xff] %v12302_v3  ;;  %v9461_v40 = vpop.f32.mrb[42].mxu0 }
 0xf8c   :  { %v9748_v41 = vadd.f32 %v11207_v46, %v18297_v15  ;;  %v11208_v56 = vadd.f32 %v17410_v18, %v9461_v40  ;;  %v9463_v17 = vpop.f32.mrb[43].mxu0 }
 0xf8e   :  { %12307 = vtanh.f32 %v9748_v41  ;;  %v9751_v37 = vadd.f32 %v11208_v56, %v18298_v21  ;;  %v18307_v41 = vld [vmem:[#allocation56_spill] sm:$0xff] }
 0xf90   :  { %v12304_v11 = vpop.eup %12303  ;;  %12309 = vtanh.f32 %v9751_v37  ;;  %v18308_v37 = vld [vmem:[#allocation14_spill] sm:$0xff] }
 0xf91   :  { %9932 = vst [vmem:[%s17761_s17 + $0x150] sm:$0xff] %v12304_v11  ;;  %v9466_v13 = vpop.f32.mrb[44].mxu0 }
 0xf92   :  { %v12306_v22 = vpop.eup %12305  ;;  %v11209_v57 = vadd.f32 %v17410_v18, %v9466_v13  ;;  %v9468_v32 = vpop.f32.mrb[45].mxu0 }
 0xf93   :  { %9933 = vst [vmem:[%s17761_s17 + $0x158] sm:$0xff] %v12306_v22  ;;  %v9469_v58 = vpop.f32.mrb[46].mxu0 }
 0xf94   :  { %v9756_v47 = vadd.f32 %v11209_v57, %v18299_v29  ;;  %v11210_v23 = vadd.f32 %v17410_v18, %v9469_v58  ;;  %v9471_v48 = vpop.f32.mrb[47].mxu0 }
 0xf96   :  { %12311 = vtanh.f32 %v9756_v47  ;;  %v9759_v33 = vadd.f32 %v11210_v23, %v18300_v36  ;;  %v18309_v47 = vld [vmem:[#allocation18_spill] sm:$0xff] }
 0xf98   :  { %v12308_v61 = vpop.eup %12307  ;;  %12313 = vtanh.f32 %v9759_v33  ;;  %v18310_v33 = vld [vmem:[#allocation25_spill] sm:$0xff] }
 0xf99   :  { %9934 = vst [vmem:[%s17761_s17 + $0x160] sm:$0xff] %v12308_v61  ;;  %v9474_v50 = vpop.f32.mrb[48].mxu0 }
 0xf9a   :  { %v12310_v31 = vpop.eup %12309  ;;  %v11211_v63 = vadd.f32 %v17410_v18, %v9474_v50  ;;  %v9476_v35 = vpop.f32.mrb[49].mxu0 }
 0xf9b   :  { %9935 = vst [vmem:[%s17761_s17 + $0x168] sm:$0xff] %v12310_v31  ;;  %v9477_v30 = vpop.f32.mrb[50].mxu0 }
 0xf9c   :  { %v9764_v5 = vadd.f32 %v11211_v63, %v18301_v10  ;;  %v11212_v42 = vadd.f32 %v17410_v18, %v9477_v30  ;;  %v9479_v7 = vpop.f32.mrb[51].mxu0 }
 0xf9e   :  { %12315 = vtanh.f32 %v9764_v5  ;;  %v9767_v38 = vadd.f32 %v11212_v42, %v18302_v54  ;;  %v18311_v5 = vld [vmem:[#allocation21_spill] sm:$0xff] }
 0xfa0   :  { %v12312_v8 = vpop.eup %12311  ;;  %12317 = vtanh.f32 %v9767_v38  ;;  %v18312_v38 = vld [vmem:[#allocation20_spill] sm:$0xff] }
 0xfa1   :  { %9936 = vst [vmem:[%s17761_s17 + $0x170] sm:$0xff] %v12312_v8  ;;  %v9482_v28 = vpop.f32.mrb[52].mxu0 }
 0xfa2   :  { %v12314_v16 = vpop.eup %12313  ;;  %v11213_v24 = vadd.f32 %v17410_v18, %v9482_v28  ;;  %v9484_v4 = vpop.f32.mrb[53].mxu0 }
 0xfa3   :  { %9937 = vst [vmem:[%s17761_s17 + $0x178] sm:$0xff] %v12314_v16  ;;  %v9485_v9 = vpop.f32.mrb[54].mxu0 }
 0xfa4   :  { %v9772_v59 = vadd.f32 %v11213_v24, %v18303_v52  ;;  %v11214_v45 = vadd.f32 %v17410_v18, %v9485_v9  ;;  %v9487_v53 = vpop.f32.mrb[55].mxu0 }
 0xfa6   :  { %12319 = vtanh.f32 %v9772_v59  ;;  %v9775_v62 = vadd.f32 %v11214_v45, %v18304_v26 }
 0xfa8   :  { %v12316_v14 = vpop.eup %12315  ;;  %12321 = vtanh.f32 %v9775_v62 }
 0xfa9   :  { %9938 = vst [vmem:[%s17761_s17 + $0x180] sm:$0xff] %v12316_v14  ;;  %v9490_v19 = vpop.f32.mrb[56].mxu0 }
 0xfaa   :  { %v12318_v1 = vpop.eup %12317  ;;  %v11215_v44 = vadd.f32 %v17410_v18, %v9490_v19  ;;  %v9492_v6 = vpop.f32.mrb[57].mxu0 }
 0xfab   :  { %9939 = vst [vmem:[%s17761_s17 + $0x188] sm:$0xff] %v12318_v1  ;;  %v9493_v25 = vpop.f32.mrb[58].mxu0 }
 0xfac   :  { %v9780_v27 = vadd.f32 %v11215_v44, %v18305_v49  ;;  %v11216_v0 = vadd.f32 %v17410_v18, %v9493_v25  ;;  %v9495_v43 = vpop.f32.mrb[59].mxu0 }
 0xfae   :  { %12323 = vtanh.f32 %v9780_v27  ;;  %v9783_v39 = vadd.f32 %v11216_v0, %v18306_v20 }
 0xfb0   :  { %v12320_v51 = vpop.eup %12319  ;;  %12325 = vtanh.f32 %v9783_v39 }
 0xfb1   :  { %9940 = vst [vmem:[%s17761_s17 + $0x190] sm:$0xff] %v12320_v51  ;;  %v9498_v3 = vpop.f32.mrb[60].mxu0 }
 0xfb2   :  { %v12322_v46 = vpop.eup %12321  ;;  %v11217_v55 = vadd.f32 %v17410_v18, %v9498_v3  ;;  %v9500_v40 = vpop.f32.mrb[61].mxu0 }
 0xfb3   :  { %9941 = vst [vmem:[%s17761_s17 + $0x198] sm:$0xff] %v12322_v46  ;;  %v9501_v15 = vpop.f32.mrb[62].mxu0 }
 0xfb4   :  { %v9788_v56 = vadd.f32 %v11217_v55, %v18307_v41  ;;  %v11218_v17 = vadd.f32 %v17410_v18, %v9501_v15  ;;  %v9503_v21 = vpop.f32.mrb[63].mxu0 }
 0xfb6   :  { %12327 = vtanh.f32 %v9788_v56  ;;  %v9791_v11 = vadd.f32 %v11218_v17, %v18308_v37 }
 0xfb8   :  { %v12324_v13 = vpop.eup %12323  ;;  %12329 = vtanh.f32 %v9791_v11 }
 0xfb9   :  { %9942 = vst [vmem:[%s17761_s17 + $0x1a0] sm:$0xff] %v12324_v13  ;;  %v9506_v22 = vpop.f32.mrb[64].mxu0 }
 0xfba   :  { %v12326_v57 = vpop.eup %12325  ;;  %v11219_v32 = vadd.f32 %v17410_v18, %v9506_v22  ;;  %v9508_v58 = vpop.f32.mrb[65].mxu0 }
 0xfbb   :  { %9943 = vst [vmem:[%s17761_s17 + $0x1a8] sm:$0xff] %v12326_v57  ;;  %v9509_v29 = vpop.f32.mrb[66].mxu0 }
 0xfbc   :  { %v9796_v23 = vadd.f32 %v11219_v32, %v18309_v47  ;;  %v11220_v48 = vadd.f32 %v17410_v18, %v9509_v29  ;;  %v9511_v36 = vpop.f32.mrb[67].mxu0 }
 0xfbe   :  { %12331 = vtanh.f32 %v9796_v23  ;;  %v9799_v61 = vadd.f32 %v11220_v48, %v18310_v33 }
 0xfc0   :  { %v12328_v50 = vpop.eup %12327  ;;  %12333 = vtanh.f32 %v9799_v61 }
 0xfc1   :  { %9944 = vst [vmem:[%s17761_s17 + $0x1b0] sm:$0xff] %v12328_v50  ;;  %v9514_v31 = vpop.f32.mrb[68].mxu0 }
 0xfc2   :  { %v12330_v63 = vpop.eup %12329  ;;  %v11221_v35 = vadd.f32 %v17410_v18, %v9514_v31  ;;  %v9516_v30 = vpop.f32.mrb[69].mxu0 }
 0xfc3   :  { %9945 = vst [vmem:[%s17761_s17 + $0x1b8] sm:$0xff] %v12330_v63  ;;  %v9517_v10 = vpop.f32.mrb[70].mxu0 }
 0xfc4   :  { %v9804_v42 = vadd.f32 %v11221_v35, %v18311_v5  ;;  %v11222_v7 = vadd.f32 %v17410_v18, %v9517_v10  ;;  %v9519_v54 = vpop.f32.mrb[71].mxu0 }
 0xfc6   :  { %12335 = vtanh.f32 %v9804_v42  ;;  %v9807_v8 = vadd.f32 %v11222_v7, %v18312_v38 }
 0xfc8   :  { %v12332_v28 = vpop.eup %12331  ;;  %12337 = vtanh.f32 %v9807_v8 }
 0xfc9   :  { %9946 = vst [vmem:[%s17761_s17 + $0x1c0] sm:$0xff] %v12332_v28  ;;  %v9522_v16 = vpop.f32.mrb[72].mxu0 }
 0xfca   :  { %v12334_v24 = vpop.eup %12333  ;;  %v11223_v4 = vadd.f32 %v17410_v18, %v9522_v16  ;;  %v9524_v9 = vpop.f32.mrb[73].mxu0 }
 0xfcb   :  { %9947 = vst [vmem:[%s17761_s17 + $0x1c8] sm:$0xff] %v12334_v24  ;;  %v9525_v52 = vpop.f32.mrb[74].mxu0 }
 0xfcc   :  { %v11224_v59 = vadd.f32 %v17410_v18, %v9525_v52  ;;  %v9812_v45 = vadd.f32 %v11223_v4, %v17570_v34  ;;  %v9527_v53 = vpop.f32.mrb[75].mxu0 }
 0xfce   :  { %12339 = vtanh.f32 %v9812_v45  ;;  %v9815_v26 = vadd.f32 %v11224_v59, %v17579_v12 }
 0xfd0   :  { %v12336_v62 = vpop.eup %12335  ;;  %12341 = vtanh.f32 %v9815_v26 }
 0xfd1   :  { %9948 = vst [vmem:[%s17761_s17 + $0x1d0] sm:$0xff] %v12336_v62  ;;  %v9530_v14 = vpop.f32.mrb[76].mxu0 }
 0xfd2   :  { %v12338_v19 = vpop.eup %12337  ;;  %v11225_v1 = vadd.f32 %v17410_v18, %v9530_v14  ;;  %v9532_v44 = vpop.f32.mrb[77].mxu0 }
 0xfd3   :  { %9949 = vst [vmem:[%s17761_s17 + $0x1d8] sm:$0xff] %v12338_v19  ;;  %v9533_v34 = vpop.f32.mrb[78].mxu0 }
 0xfd4   :  { %v9820_v6 = vadd.f32 %v11225_v1, %v17567_v2  ;;  %v11226_v12 = vadd.f32 %v17410_v18, %v9533_v34  ;;  %v9535_v25 = vpop.f32.mrb[79].mxu0 }
 0xfd6   :  { %12343 = vtanh.f32 %v9820_v6  ;;  %v9823_v49 = vadd.f32 %v11226_v12, %v17575_v60 }
 0xfd8   :  { %v12340_v27 = vpop.eup %12339  ;;  %12345 = vtanh.f32 %v9823_v49 }
 0xfd9   :  { %9950 = vst [vmem:[%s17761_s17 + $0x1e0] sm:$0xff] %v12340_v27 }
 0xfda   :  { %v12342_v0 = vpop.eup %12341 }
 0xfdb   :  { %9951 = vst [vmem:[%s17761_s17 + $0x1e8] sm:$0xff] %v12342_v0 }
 0xfe0   :  { %v12344_v43 = vpop.eup %12343 }
 0xfe1   :  { %9952 = vst [vmem:[%s17761_s17 + $0x1f0] sm:$0xff] %v12344_v43 }
 0xfe2   :  { %v12346_v18 = vpop.eup %12345 }
 0xfe3   :  { %9953 = vst [vmem:[%s17761_s17 + $0x1f8] sm:$0xff] %v12346_v18 }

</bundles_post_ra>
